<compile_context>
chip_gen: v7x
topology: tpu7x:2x2x1
jax: 0.10.0
libtpu: 0.0.40
codegen_flags: <defaults>
</compile_context>

<pallas_src>
import math
from functools import partial

import jax
import jax.numpy as jnp
from jax.experimental import pallas as pl
from jax.experimental.pallas import tpu as pltpu

_NEG_INF = -1e30  # large finite mask value (NaN-safe vs. -inf)


def _flash_attn_kernel(q_ref, k_ref, v_ref, o_ref,
                       qs_sc, m_sc, l_sc, acc_sc,
                       *, scale, causal, hg, head_dim, tq, tk, exp_bf16):
    """Grid = (B, H//hg, S//tq, S//tk); the kv axis (last) is the reduction axis.

    Blocks: q/o (1, tq, hg*D), k/v (1, tk, hg*D), sliced straight out of the
    packed (B, S, 3*H*D) tensor.  Scratches hold per-q-tile online-softmax state
    and stay resident across the kv axis.
    """
    D = head_dim
    qi = pl.program_id(2)
    ki = pl.program_id(3)
    mm_dtype = jnp.bfloat16

    @pl.when(ki == 0)
    def _init():
        # Scale q once per q tile (full-width, lane-dense op).
        qs_sc[...] = (q_ref[0].astype(jnp.float32) * scale).astype(mm_dtype)
        m_sc[...] = jnp.full(m_sc.shape, _NEG_INF, m_sc.dtype)
        l_sc[...] = jnp.zeros(l_sc.shape, l_sc.dtype)
        acc_sc[...] = jnp.zeros(acc_sc.shape, acc_sc.dtype)

    def _tile_update(apply_mask):
        if apply_mask:
            row = qi * tq + jax.lax.broadcasted_iota(jnp.int32, (tq, tk), 0)
            col = ki * tk + jax.lax.broadcasted_iota(jnp.int32, (tq, tk), 1)
            unmasked = row >= col
        for h in range(hg):
            sl = slice(h * D, (h + 1) * D)
            q_h = qs_sc[:, sl]                                   # (tq, D) bf16, pre-scaled
            k_h = k_ref[0, :, sl].astype(mm_dtype)               # (tk, D)
            # bf16 x bf16 MXU matmul with f32 accumulation (contraction over D).
            s = jax.lax.dot_general(q_h, k_h, (((1,), (1,)), ((), ())),
                                    preferred_element_type=jnp.float32)   # (tq, tk)
            if apply_mask:
                s = jnp.where(unmasked, s, _NEG_INF)

            m_prev = m_sc[h]                                     # (tq, 1) f32
            m_new = jnp.maximum(m_prev, s.max(-1, keepdims=True))
            alpha = jnp.exp(m_prev - m_new)                      # (tq, 1) f32
            if exp_bf16:
                # bf16 EUP path (v6e/v7x): p comes out in bf16, ready for the PV
                # matmul; the softmax denominator is still accumulated in f32.
                p = jnp.exp((s - m_new).astype(mm_dtype))        # (tq, tk) bf16
                l_cur = jnp.sum(p, axis=-1, keepdims=True, dtype=jnp.float32)
            else:
                p_f32 = jnp.exp(s - m_new)                       # (tq, tk) f32
                l_cur = p_f32.sum(-1, keepdims=True)
                p = p_f32.astype(mm_dtype)
            l_sc[h] = alpha * l_sc[h] + l_cur
            m_sc[h] = m_new

            v_h = v_ref[0, :, sl].astype(mm_dtype)               # (tk, D)
            pv = jax.lax.dot_general(p, v_h, (((1,), (0,)), ((), ())),
                                     preferred_element_type=jnp.float32)  # (tq, D)
            acc_sc[:, sl] = acc_sc[:, sl] * alpha + pv

    if causal:
        # Tile classification: rows [qi*tq, qi*tq+tq) x cols [ki*tk, ki*tk+tk).
        not_above = ki * tk <= qi * tq + (tq - 1)   # at least one visible column
        on_diag = ki * tk + (tk - 1) > qi * tq      # at least one masked column

        @pl.when(not_above & on_diag)
        def _():                                    # diagonal tile: apply mask
            _tile_update(True)

        @pl.when(not_above & jnp.logical_not(on_diag))
        def _():                                    # interior tile: unmasked fast path
            _tile_update(False)
        # Fully-above-diagonal tiles: compute skipped here AND their K/V DMA is
        # skipped by the clamped index maps in the wrapper.
    else:
        _tile_update(False)

    @pl.when(ki == pl.num_programs(3) - 1)
    def _finalize():
        outs = []
        for h in range(hg):
            inv_l = 1.0 / l_sc[h]                                # exact; once per q tile
            outs.append(acc_sc[:, h * D:(h + 1) * D] * inv_l)
        o = outs[0] if hg == 1 else jnp.concatenate(outs, axis=-1)
        o_ref[0] = o.astype(o_ref.dtype)                         # lane-dense store


def _tpu_kind():
    try:
        return jax.devices()[0].device_kind.lower()
    except Exception:
        return ""


def flash_self_attention(qkv, *, softmax_scale=None, causal=False, tq=None, tk=None):
    """Forward of FlashSelfAttention (padded path: cu_seqlens=None).

    qkv: (B, S, 3, H, D) bf16/f16.  Returns (B, S, H, D), same dtype.
    """
    assert qkv.dtype in (jnp.bfloat16, jnp.float16), "flash-attn requires fp16/bf16"
    B, S, three, H, D = qkv.shape
    assert three == 3
    scale = float(softmax_scale) if softmax_scale is not None else 1.0 / math.sqrt(D)

    # Heads per block so the lane (last) dim of every block is a multiple of 128
    # (lane-dense DMA/stores, valid (8,128) tiling, full MXU width).
    hg = 128 // math.gcd(D, 128)
    assert H % hg == 0, (
        f"head grouping hg={hg} (for head_dim={D}) must divide num_heads={H}")
    G = H // hg
    blk_lanes = hg * D

    kind = _tpu_kind()
    is_v5 = "v5" in kind
    is_v6 = "v6" in kind
    is_v7 = "v7" in kind
    # bf16 EUP/VPU path exists on v6e/v7x; v5e (and unknown gens) stay in f32.
    exp_bf16 = is_v6 or is_v7

    # Per-generation tile defaults (square: minimal masked waste when causal; a
    # bigger tq on v6e halves K/V HBM re-streaming on the memory-bound side).
    if is_v6 or is_v7:
        tq_d = tk_d = 512
    else:                       # v5e (16 MiB scoped VMEM, MXU-bound at D>=64) / unknown
        tq_d = tk_d = 256
    tq = tq_d if tq is None else int(tq)
    tk = tk_d if tk is None else int(tk)

    def _fit(t):
        t = max(8, min(t, S))
        while S % t != 0 and t > 8:
            t //= 2
        return t

    tq = _fit(tq)
    tk = _fit(tk)
    assert S % tq == 0 and S % tk == 0, f"S={S} must be divisible by tq={tq}, tk={tk}"

    # v7x: keep >= 2 parallel work units so both TensorCores get fed.
    if is_v7 and B * G * (S // tq) < 2 and tq >= 16 and S % (tq // 2) == 0:
        tq //= 2

    def _vmem_bytes(tq_, tk_):
        bpe = 2
        blocks = (2 * tq_ * blk_lanes * bpe          # q block, double-buffered
                  + 2 * 2 * tk_ * blk_lanes * bpe    # k + v blocks, double-buffered
                  + 2 * tq_ * blk_lanes * bpe)       # out block, double-buffered
        scratch = (tq_ * blk_lanes * bpe             # scaled q (bf16, lane-dense)
                   + tq_ * blk_lanes * 4             # accumulator (f32, lane-dense)
                   + 2 * hg * tq_ * 128 * 4)         # m, l (lane-padded)
        # Mosaic-materialized (tq,tk) score/probability intermediates (the head
        # loop is unrolled -> count all hg heads) + causal iota/compare masks.
        inter = hg * tq_ * tk_ * (4 + (2 if exp_bf16 else 4))
        if causal:
            inter += 2 * tq_ * tk_ * 4
        return blocks + scratch + inter

    budget = (12 if is_v5 else 24) * 1024 * 1024
    while _vmem_bytes(tq, tk) > budget and tk > 128 and S % (tk // 2) == 0:
        tk //= 2
    while _vmem_bytes(tq, tk) > budget and tq > 128 and S % (tq // 2) == 0:
        tq //= 2

    if is_v6:
        vmem_limit = 64 * 1024 * 1024     # 128 MiB physical; plenty of headroom
    elif is_v7:
        vmem_limit = 32 * 1024 * 1024     # 64 MiB physical; stay at the scoped default
    elif is_v5:
        vmem_limit = 16 * 1024 * 1024
    else:
        vmem_limit = None

    # Free reshape (last three dims contiguous): q/k/v blocks are sliced straight
    # out of the packed tensor by the index maps; no wrapper-side HBM passes.
    qkv_flat = qkv.reshape(B, S, 3 * H * D)

    if causal:
        # Clamp the kv block index to the last block this q tile actually needs:
        # above-diagonal grid steps re-use the resident k/v block -> no DMA.
        def k_map(b, g, qi, ki):
            return (b, jnp.minimum(ki, (qi * tq + tq - 1) // tk), G + g)

        def v_map(b, g, qi, ki):
            return (b, jnp.minimum(ki, (qi * tq + tq - 1) // tk), 2 * G + g)
    else:
        def k_map(b, g, qi, ki):
            return (b, ki, G + g)

        def v_map(b, g, qi, ki):
            return (b, ki, 2 * G + g)

    kernel = partial(_flash_attn_kernel, scale=scale, causal=causal, hg=hg,
                     head_dim=D, tq=tq, tk=tk, exp_bf16=exp_bf16)

    out = pl.pallas_call(
        kernel,
        out_shape=jax.ShapeDtypeStruct((B, S, H * D), qkv.dtype),
        grid_spec=pltpu.PrefetchScalarGridSpec(
            num_scalar_prefetch=0,
            grid=(B, G, S // tq, S // tk),
            in_specs=[
                pl.BlockSpec((1, tq, blk_lanes), lambda b, g, qi, ki: (b, qi, g)),
                pl.BlockSpec((1, tk, blk_lanes), k_map),
                pl.BlockSpec((1, tk, blk_lanes), v_map),
            ],
            out_specs=pl.BlockSpec((1, tq, blk_lanes), lambda b, g, qi, ki: (b, qi, g)),
            scratch_shapes=[
                pltpu.VMEM((tq, blk_lanes), jnp.bfloat16),   # pre-scaled q (lane-dense)
                pltpu.VMEM((hg, tq, 1), jnp.float32),        # running max m
                pltpu.VMEM((hg, tq, 1), jnp.float32),        # running denom l
                pltpu.VMEM((tq, blk_lanes), jnp.float32),    # running numerator acc
            ],
        ),
        compiler_params=pltpu.CompilerParams(
            dimension_semantics=("parallel", "parallel", "parallel", "arbitrary"),
            vmem_limit_bytes=vmem_limit),
    )(qkv_flat, qkv_flat, qkv_flat)

    # Free reshape back to the module's return layout.
    return out.reshape(B, S, H, D)


def _reference(qkv, softmax_scale=None, causal=False):
    B, S, _, H, D = qkv.shape
    scale = softmax_scale if softmax_scale is not None else 1.0 / math.sqrt(D)
    q = qkv[:, :, 0].astype(jnp.float32)
    k = qkv[:, :, 1].astype(jnp.float32)
    v = qkv[:, :, 2].astype(jnp.float32)
    s = jnp.einsum("bqhd,bkhd->bhqk", q, k) * scale
    if causal:
        mask = jnp.tril(jnp.ones((S, S), dtype=bool))
        s = jnp.where(mask[None, None], s, -jnp.inf)
    p = jax.nn.softmax(s, axis=-1)
    return jnp.einsum("bhqk,bkhd->bqhd", p, v)


def _check(name, out, ref, max_tol=1e-1, mean_tol=4e-3):
    out32 = out.astype(jnp.float32)
    err = jnp.abs(out32 - ref)
    max_err = float(jnp.max(err))
    mean_err = float(jnp.mean(err))
    rel = max_err / (float(jnp.max(jnp.abs(ref))) + 1e-6)
    assert max_err < max_tol and mean_err < mean_tol, (
        f"{name}: max_abs={max_err:.3e} mean_abs={mean_err:.3e} rel={rel:.3e}")


if __name__ == "__main__":
    # Small shapes consistent with the module's (B, S, 3, H, D) packed input.
    B, S, H, D = 2, 256, 4, 64          # hg = 2 -> 128-lane blocks, G = 2 head groups
    key = jax.random.PRNGKey(0)
    qkv = jax.random.normal(key, (B, S, 3, H, D), dtype=jnp.float32)
    qkv = qkv.astype(jnp.bfloat16)      # module asserts fp16/bf16

    # 1) Non-causal, per-generation default tiles.
    out = jax.block_until_ready(flash_self_attention(qkv, causal=False))
    assert out.shape == (B, S, H, D) and out.dtype == jnp.bfloat16
    _check("non-causal/default", out, _reference(qkv, causal=False))

    # 2) Non-causal, small tiles: online-softmax accumulation across several kv tiles.
    out2 = jax.block_until_ready(flash_self_attention(qkv, causal=False, tq=64, tk=128))
    _check("non-causal/tiled", out2, _reference(qkv, causal=False))

    # 3) Causal, small tiles: diagonal masking, unmasked interior fast path,
    #    above-diagonal compute skip and the clamped (DMA-skipping) k/v index maps.
    out3 = jax.block_until_ready(flash_self_attention(qkv, causal=True, tq=64, tk=64))
    _check("causal/tiled", out3, _reference(qkv, causal=True))

    # 4) Causal, default (square) tiles.
    out4 = jax.block_until_ready(flash_self_attention(qkv, causal=True))
    _check("causal/default", out4, _reference(qkv, causal=True))

    print("KERNEL_OK")
</pallas_src>

<mosaic_0001>
module attributes {stable_mosaic.version = 11 : i64} {
  func.func @_flash_attn_kernel(%arg0: i32, %arg1: i32, %arg2: i32, %arg3: i32, %arg4: memref<1x256x128xbf16, #tpu.memory_space<vmem>>, %arg5: memref<1x256x128xbf16, #tpu.memory_space<vmem>>, %arg6: memref<1x256x128xbf16, #tpu.memory_space<vmem>>, %arg7: memref<1x256x128xbf16, #tpu.memory_space<vmem>>, %arg8: memref<256x128xbf16, #tpu.memory_space<vmem>>, %arg9: memref<2x256x1xf32, #tpu.memory_space<vmem>>, %arg10: memref<2x256x1xf32, #tpu.memory_space<vmem>>, %arg11: memref<256x128xf32, #tpu.memory_space<vmem>>) attributes {dimension_semantics = [#tpu.dimension_semantics<parallel>, #tpu.dimension_semantics<parallel>, #tpu.dimension_semantics<parallel>, #tpu.dimension_semantics<arbitrary>], iteration_bounds = array<i64: 2, 2, 1, 1>, scalar_prefetch = 0 : i64, scratch_operands = 4 : i64, tpu.core_type = #tpu.core_type<tc>, window_params = [{transform_indices = @transform_0, window_bounds = array<i64: 1, 256, 128>}, {transform_indices = @transform_1, window_bounds = array<i64: 1, 256, 128>}, {transform_indices = @transform_2, window_bounds = array<i64: 1, 256, 128>}, {transform_indices = @transform_3, window_bounds = array<i64: 1, 256, 128>}]} {
    %c0_i32 = arith.constant 0 : i32
    %0 = arith.cmpi eq, %arg3, %c0_i32 : i32
    %1 = arith.extui %0 : i1 to i32
    %c0_i32_0 = arith.constant 0 : i32
    %2 = arith.cmpi ne, %1, %c0_i32_0 : i32
    scf.if %2 {
      %c0_55 = arith.constant 0 : index
      %c0_56 = arith.constant 0 : index
      %c0_57 = arith.constant 0 : index
      %76 = vector.load %arg4[%c0_55, %c0_56, %c0_57] : memref<1x256x128xbf16, #tpu.memory_space<vmem>>, vector<1x256x128xbf16>
      %77 = vector.shape_cast %76 : vector<1x256x128xbf16> to vector<256x128xbf16>
      %78 = arith.extf %77 : vector<256x128xbf16> to vector<256x128xf32>
      %cst_58 = arith.constant 1.250000e-01 : f32
      %79 = vector.broadcast %cst_58 : f32 to vector<256x128xf32>
      %80 = arith.mulf %78, %79 : vector<256x128xf32>
      %81 = arith.truncf %80 : vector<256x128xf32> to vector<256x128xbf16>
      %c0_59 = arith.constant 0 : index
      %c0_60 = arith.constant 0 : index
      %82 = vector.load %arg8[%c0_59, %c0_60] : memref<256x128xbf16, #tpu.memory_space<vmem>>, vector<256x128xbf16>
      tpu.vector_store %arg8[%c0_59, %c0_60], %81 {strides = array<i32>} : memref<256x128xbf16, #tpu.memory_space<vmem>>, vector<256x128xbf16>,
      %cst_61 = arith.constant -1.000000e+30 : f32
      %83 = vector.broadcast %cst_61 : f32 to vector<2x256x1xf32>
      %c0_62 = arith.constant 0 : index
      %c0_63 = arith.constant 0 : index
      %c0_64 = arith.constant 0 : index
      %84 = vector.load %arg9[%c0_62, %c0_63, %c0_64] : memref<2x256x1xf32, #tpu.memory_space<vmem>>, vector<2x256x1xf32>
      tpu.vector_store %arg9[%c0_62, %c0_63, %c0_64], %83 {strides = array<i32>} : memref<2x256x1xf32, #tpu.memory_space<vmem>>, vector<2x256x1xf32>,
      %cst_65 = arith.constant 0.000000e+00 : f32
      %85 = vector.broadcast %cst_65 : f32 to vector<2x256x1xf32>
      %c0_66 = arith.constant 0 : index
      %c0_67 = arith.constant 0 : index
      %c0_68 = arith.constant 0 : index
      %86 = vector.load %arg10[%c0_66, %c0_67, %c0_68] : memref<2x256x1xf32, #tpu.memory_space<vmem>>, vector<2x256x1xf32>
      tpu.vector_store %arg10[%c0_66, %c0_67, %c0_68], %85 {strides = array<i32>} : memref<2x256x1xf32, #tpu.memory_space<vmem>>, vector<2x256x1xf32>,
      %cst_69 = arith.constant 0.000000e+00 : f32
      %87 = vector.broadcast %cst_69 : f32 to vector<256x128xf32>
      %c0_70 = arith.constant 0 : index
      %c0_71 = arith.constant 0 : index
      %88 = vector.load %arg11[%c0_70, %c0_71] : memref<256x128xf32, #tpu.memory_space<vmem>>, vector<256x128xf32>
      tpu.vector_store %arg11[%c0_70, %c0_71], %87 {strides = array<i32>} : memref<256x128xf32, #tpu.memory_space<vmem>>, vector<256x128xf32>,
    } else {
    }
    %c0 = arith.constant 0 : index
    %c0_1 = arith.constant 0 : index
    %3 = vector.load %arg8[%c0, %c0_1] : memref<256x128xbf16, #tpu.memory_space<vmem>>, vector<256x64xbf16>
    %c0_2 = arith.constant 0 : index
    %c0_3 = arith.constant 0 : index
    %c0_4 = arith.constant 0 : index
    %4 = vector.load %arg5[%c0_2, %c0_3, %c0_4] : memref<1x256x128xbf16, #tpu.memory_space<vmem>>, vector<1x256x64xbf16>
    %5 = vector.shape_cast %4 : vector<1x256x64xbf16> to vector<256x64xbf16>
    %cst = arith.constant dense<0.000000e+00> : vector<256x256xf32>
    %6 = tpu.matmul %3, %5, %cst {dimension_numbers = #tpu.dot_dimension_numbers<[1], [1], [0], [0], [0, 0, 1, 0], [], []>} : vector<256x64xbf16>, vector<256x64xbf16>, vector<256x256xf32> -> vector<256x256xf32>
    %c0_5 = arith.constant 0 : index
    %c0_6 = arith.constant 0 : index
    %c0_7 = arith.constant 0 : index
    %7 = vector.load %arg9[%c0_5, %c0_6, %c0_7] : memref<2x256x1xf32, #tpu.memory_space<vmem>>, vector<1x256x1xf32>
    %8 = vector.shape_cast %7 : vector<1x256x1xf32> to vector<256x1xf32>
    %cst_8 = arith.constant dense<0xFF800000> : vector<256xf32>
    %9 = vector.multi_reduction <maximumf>, %6, %cst_8 [1] : vector<256x256xf32> to vector<256xf32>
    %10 = vector.shape_cast %9 : vector<256xf32> to vector<256x1xf32>
    %11 = arith.maximumf %8, %10 : vector<256x1xf32>
    %12 = arith.subf %8, %11 : vector<256x1xf32>
    %13 = math.exp %12 : vector<256x1xf32>
    %14 = vector.broadcast %11 : vector<256x1xf32> to vector<256x256xf32>
    %15 = arith.subf %6, %14 : vector<256x256xf32>
    %16 = math.exp %15 : vector<256x256xf32>
    %cst_9 = arith.constant dense<0.000000e+00> : vector<256xf32>
    %17 = vector.multi_reduction <add>, %16, %cst_9 [1] : vector<256x256xf32> to vector<256xf32>
    %18 = vector.shape_cast %17 : vector<256xf32> to vector<256x1xf32>
    %19 = arith.truncf %16 : vector<256x256xf32> to vector<256x256xbf16>
    %c0_10 = arith.constant 0 : index
    %c0_11 = arith.constant 0 : index
    %c0_12 = arith.constant 0 : index
    %20 = vector.load %arg10[%c0_10, %c0_11, %c0_12] : memref<2x256x1xf32, #tpu.memory_space<vmem>>, vector<1x256x1xf32>
    %21 = vector.shape_cast %20 : vector<1x256x1xf32> to vector<256x1xf32>
    %22 = arith.mulf %13, %21 : vector<256x1xf32>
    %23 = arith.addf %22, %18 : vector<256x1xf32>
    %c0_13 = arith.constant 0 : index
    %c0_14 = arith.constant 0 : index
    %c0_15 = arith.constant 0 : index
    %24 = vector.load %arg10[%c0_13, %c0_14, %c0_15] : memref<2x256x1xf32, #tpu.memory_space<vmem>>, vector<1x256x1xf32>
    %25 = vector.shape_cast %24 : vector<1x256x1xf32> to vector<256x1xf32>
    %26 = vector.shape_cast %23 : vector<256x1xf32> to vector<1x256x1xf32>
    tpu.vector_store %arg10[%c0_13, %c0_14, %c0_15], %26 {strides = array<i32>} : memref<2x256x1xf32, #tpu.memory_space<vmem>>, vector<1x256x1xf32>,
    %c0_16 = arith.constant 0 : index
    %c0_17 = arith.constant 0 : index
    %c0_18 = arith.constant 0 : index
    %27 = vector.load %arg9[%c0_16, %c0_17, %c0_18] : memref<2x256x1xf32, #tpu.memory_space<vmem>>, vector<1x256x1xf32>
    %28 = vector.shape_cast %27 : vector<1x256x1xf32> to vector<256x1xf32>
    %29 = vector.shape_cast %11 : vector<256x1xf32> to vector<1x256x1xf32>
    tpu.vector_store %arg9[%c0_16, %c0_17, %c0_18], %29 {strides = array<i32>} : memref<2x256x1xf32, #tpu.memory_space<vmem>>, vector<1x256x1xf32>,
    %c0_19 = arith.constant 0 : index
    %c0_20 = arith.constant 0 : index
    %c0_21 = arith.constant 0 : index
    %30 = vector.load %arg6[%c0_19, %c0_20, %c0_21] : memref<1x256x128xbf16, #tpu.memory_space<vmem>>, vector<1x256x64xbf16>
    %31 = vector.shape_cast %30 : vector<1x256x64xbf16> to vector<256x64xbf16>
    %cst_22 = arith.constant dense<0.000000e+00> : vector<256x64xf32>
    %32 = tpu.matmul %19, %31, %cst_22 {dimension_numbers = #tpu.dot_dimension_numbers<[1], [0], [0], [1], [0, 0, 1, 1], [], []>} : vector<256x256xbf16>, vector<256x64xbf16>, vector<256x64xf32> -> vector<256x64xf32>
    %c0_23 = arith.constant 0 : index
    %c0_24 = arith.constant 0 : index
    %33 = vector.load %arg11[%c0_23, %c0_24] : memref<256x128xf32, #tpu.memory_space<vmem>>, vector<256x64xf32>
    %34 = vector.broadcast %13 : vector<256x1xf32> to vector<256x64xf32>
    %35 = arith.mulf %33, %34 : vector<256x64xf32>
    %36 = arith.addf %35, %32 : vector<256x64xf32>
    %c0_25 = arith.constant 0 : index
    %c0_26 = arith.constant 0 : index
    %37 = vector.load %arg11[%c0_25, %c0_26] : memref<256x128xf32, #tpu.memory_space<vmem>>, vector<256x64xf32>
    tpu.vector_store %arg11[%c0_25, %c0_26], %36 {strides = array<i32>} : memref<256x128xf32, #tpu.memory_space<vmem>>, vector<256x64xf32>,
    %c0_27 = arith.constant 0 : index
    %c64 = arith.constant 64 : index
    %38 = vector.load %arg8[%c0_27, %c64] : memref<256x128xbf16, #tpu.memory_space<vmem>>, vector<256x64xbf16>
    %c0_28 = arith.constant 0 : index
    %c0_29 = arith.constant 0 : index
    %c64_30 = arith.constant 64 : index
    %39 = vector.load %arg5[%c0_28, %c0_29, %c64_30] : memref<1x256x128xbf16, #tpu.memory_space<vmem>>, vector<1x256x64xbf16>
    %40 = vector.shape_cast %39 : vector<1x256x64xbf16> to vector<256x64xbf16>
    %cst_31 = arith.constant dense<0.000000e+00> : vector<256x256xf32>
    %41 = tpu.matmul %38, %40, %cst_31 {dimension_numbers = #tpu.dot_dimension_numbers<[1], [1], [0], [0], [0, 0, 1, 0], [], []>} : vector<256x64xbf16>, vector<256x64xbf16>, vector<256x256xf32> -> vector<256x256xf32>
    %c1 = arith.constant 1 : index
    %c0_32 = arith.constant 0 : index
    %c0_33 = arith.constant 0 : index
    %42 = vector.load %arg9[%c1, %c0_32, %c0_33] : memref<2x256x1xf32, #tpu.memory_space<vmem>>, vector<1x256x1xf32>
    %43 = vector.shape_cast %42 : vector<1x256x1xf32> to vector<256x1xf32>
    %cst_34 = arith.constant dense<0xFF800000> : vector<256xf32>
    %44 = vector.multi_reduction <maximumf>, %41, %cst_34 [1] : vector<256x256xf32> to vector<256xf32>
    %45 = vector.shape_cast %44 : vector<256xf32> to vector<256x1xf32>
    %46 = arith.maximumf %43, %45 : vector<256x1xf32>
    %47 = arith.subf %43, %46 : vector<256x1xf32>
    %48 = math.exp %47 : vector<256x1xf32>
    %49 = vector.broadcast %46 : vector<256x1xf32> to vector<256x256xf32>
    %50 = arith.subf %41, %49 : vector<256x256xf32>
    %51 = math.exp %50 : vector<256x256xf32>
    %cst_35 = arith.constant dense<0.000000e+00> : vector<256xf32>
    %52 = vector.multi_reduction <add>, %51, %cst_35 [1] : vector<256x256xf32> to vector<256xf32>
    %53 = vector.shape_cast %52 : vector<256xf32> to vector<256x1xf32>
    %54 = arith.truncf %51 : vector<256x256xf32> to vector<256x256xbf16>
    %c1_36 = arith.constant 1 : index
    %c0_37 = arith.constant 0 : index
    %c0_38 = arith.constant 0 : index
    %55 = vector.load %arg10[%c1_36, %c0_37, %c0_38] : memref<2x256x1xf32, #tpu.memory_space<vmem>>, vector<1x256x1xf32>
    %56 = vector.shape_cast %55 : vector<1x256x1xf32> to vector<256x1xf32>
    %57 = arith.mulf %48, %56 : vector<256x1xf32>
    %58 = arith.addf %57, %53 : vector<256x1xf32>
    %c1_39 = arith.constant 1 : index
    %c0_40 = arith.constant 0 : index
    %c0_41 = arith.constant 0 : index
    %59 = vector.load %arg10[%c1_39, %c0_40, %c0_41] : memref<2x256x1xf32, #tpu.memory_space<vmem>>, vector<1x256x1xf32>
    %60 = vector.shape_cast %59 : vector<1x256x1xf32> to vector<256x1xf32>
    %61 = vector.shape_cast %58 : vector<256x1xf32> to vector<1x256x1xf32>
    tpu.vector_store %arg10[%c1_39, %c0_40, %c0_41], %61 {strides = array<i32>} : memref<2x256x1xf32, #tpu.memory_space<vmem>>, vector<1x256x1xf32>,
    %c1_42 = arith.constant 1 : index
    %c0_43 = arith.constant 0 : index
    %c0_44 = arith.constant 0 : index
    %62 = vector.load %arg9[%c1_42, %c0_43, %c0_44] : memref<2x256x1xf32, #tpu.memory_space<vmem>>, vector<1x256x1xf32>
    %63 = vector.shape_cast %62 : vector<1x256x1xf32> to vector<256x1xf32>
    %64 = vector.shape_cast %46 : vector<256x1xf32> to vector<1x256x1xf32>
    tpu.vector_store %arg9[%c1_42, %c0_43, %c0_44], %64 {strides = array<i32>} : memref<2x256x1xf32, #tpu.memory_space<vmem>>, vector<1x256x1xf32>,
    %c0_45 = arith.constant 0 : index
    %c0_46 = arith.constant 0 : index
    %c64_47 = arith.constant 64 : index
    %65 = vector.load %arg6[%c0_45, %c0_46, %c64_47] : memref<1x256x128xbf16, #tpu.memory_space<vmem>>, vector<1x256x64xbf16>
    %66 = vector.shape_cast %65 : vector<1x256x64xbf16> to vector<256x64xbf16>
    %cst_48 = arith.constant dense<0.000000e+00> : vector<256x64xf32>
    %67 = tpu.matmul %54, %66, %cst_48 {dimension_numbers = #tpu.dot_dimension_numbers<[1], [0], [0], [1], [0, 0, 1, 1], [], []>} : vector<256x256xbf16>, vector<256x64xbf16>, vector<256x64xf32> -> vector<256x64xf32>
    %c0_49 = arith.constant 0 : index
    %c64_50 = arith.constant 64 : index
    %68 = vector.load %arg11[%c0_49, %c64_50] : memref<256x128xf32, #tpu.memory_space<vmem>>, vector<256x64xf32>
    %69 = vector.broadcast %48 : vector<256x1xf32> to vector<256x64xf32>
    %70 = arith.mulf %68, %69 : vector<256x64xf32>
    %71 = arith.addf %70, %67 : vector<256x64xf32>
    %c0_51 = arith.constant 0 : index
    %c64_52 = arith.constant 64 : index
    %72 = vector.load %arg11[%c0_51, %c64_52] : memref<256x128xf32, #tpu.memory_space<vmem>>, vector<256x64xf32>
    tpu.vector_store %arg11[%c0_51, %c64_52], %71 {strides = array<i32>} : memref<256x128xf32, #tpu.memory_space<vmem>>, vector<256x64xf32>,
    %c0_i32_53 = arith.constant 0 : i32
    %73 = arith.cmpi eq, %arg3, %c0_i32_53 : i32
    %74 = arith.extui %73 : i1 to i32
    %c0_i32_54 = arith.constant 0 : i32
    %75 = arith.cmpi ne, %74, %c0_i32_54 : i32
    scf.if %75 {
      %c0_55 = arith.constant 0 : index
      %c0_56 = arith.constant 0 : index
      %c0_57 = arith.constant 0 : index
      %76 = vector.load %arg10[%c0_55, %c0_56, %c0_57] : memref<2x256x1xf32, #tpu.memory_space<vmem>>, vector<1x256x1xf32>
      %77 = vector.shape_cast %76 : vector<1x256x1xf32> to vector<256x1xf32>
      %cst_58 = arith.constant 1.000000e+00 : f32
      %78 = vector.broadcast %cst_58 : f32 to vector<256x1xf32>
      %79 = arith.divf %78, %77 : vector<256x1xf32>
      %c0_59 = arith.constant 0 : index
      %c0_60 = arith.constant 0 : index
      %80 = vector.load %arg11[%c0_59, %c0_60] : memref<256x128xf32, #tpu.memory_space<vmem>>, vector<256x64xf32>
      %81 = vector.broadcast %79 : vector<256x1xf32> to vector<256x64xf32>
      %82 = arith.mulf %80, %81 : vector<256x64xf32>
      %c1_61 = arith.constant 1 : index
      %c0_62 = arith.constant 0 : index
      %c0_63 = arith.constant 0 : index
      %83 = vector.load %arg10[%c1_61, %c0_62, %c0_63] : memref<2x256x1xf32, #tpu.memory_space<vmem>>, vector<1x256x1xf32>
      %84 = vector.shape_cast %83 : vector<1x256x1xf32> to vector<256x1xf32>
      %cst_64 = arith.constant 1.000000e+00 : f32
      %85 = vector.broadcast %cst_64 : f32 to vector<256x1xf32>
      %86 = arith.divf %85, %84 : vector<256x1xf32>
      %c0_65 = arith.constant 0 : index
      %c64_66 = arith.constant 64 : index
      %87 = vector.load %arg11[%c0_65, %c64_66] : memref<256x128xf32, #tpu.memory_space<vmem>>, vector<256x64xf32>
      %88 = vector.broadcast %86 : vector<256x1xf32> to vector<256x64xf32>
      %89 = arith.mulf %87, %88 : vector<256x64xf32>
      %90 = tpu.concatenate %82, %89 in 1 : vector<256x64xf32>, vector<256x64xf32> -> vector<256x128xf32>
      %91 = arith.truncf %90 : vector<256x128xf32> to vector<256x128xbf16>
      %c0_67 = arith.constant 0 : index
      %c0_68 = arith.constant 0 : index
      %c0_69 = arith.constant 0 : index
      %92 = vector.load %arg7[%c0_67, %c0_68, %c0_69] : memref<1x256x128xbf16, #tpu.memory_space<vmem>>, vector<1x256x128xbf16>
      %93 = vector.shape_cast %92 : vector<1x256x128xbf16> to vector<256x128xbf16>
      %94 = vector.shape_cast %91 : vector<256x128xbf16> to vector<1x256x128xbf16>
      tpu.vector_store %arg7[%c0_67, %c0_68, %c0_69], %94 {strides = array<i32>} : memref<1x256x128xbf16, #tpu.memory_space<vmem>>, vector<1x256x128xbf16>,
    } else {
    }
    return
  }
  func.func @transform_0(%arg0: i32, %arg1: i32, %arg2: i32, %arg3: i32) -> (i32, i32, i32) {
    %c0_i32 = arith.constant 0 : i32
    return %arg0, %arg2, %arg1 : i32, i32, i32
  }
  func.func @transform_1(%arg0: i32, %arg1: i32, %arg2: i32, %arg3: i32) -> (i32, i32, i32) {
    %c2_i32 = arith.constant 2 : i32
    %0 = arith.addi %c2_i32, %arg1 : i32
    %c0_i32 = arith.constant 0 : i32
    return %arg0, %arg3, %0 : i32, i32, i32
  }
  func.func @transform_2(%arg0: i32, %arg1: i32, %arg2: i32, %arg3: i32) -> (i32, i32, i32) {
    %c4_i32 = arith.constant 4 : i32
    %0 = arith.addi %c4_i32, %arg1 : i32
    %c0_i32 = arith.constant 0 : i32
    return %arg0, %arg3, %0 : i32, i32, i32
  }
  func.func @transform_3(%arg0: i32, %arg1: i32, %arg2: i32, %arg3: i32) -> (i32, i32, i32) {
    %c0_i32 = arith.constant 0 : i32
    return %arg0, %arg2, %arg1 : i32, i32, i32
  }
}

</mosaic_0001>

<bundles_post_ra>
// kernel: tpu_custom_call.1
= control target key start
LH: loop header
LB: loop body
LE: loop exit
PB: predicated region body
PF: predicated region fallthrough
CT: control target
= control target key end

     0   :  { %s10249_s0 = inlined_call_operand.hbm [shape: bf16[2,256,768], index: 0, kind: input, shape index: {}]   ;;  %s10250_s1 = inlined_call_operand.hbm [shape: bf16[2,256,768], index: 1, kind: input, shape index: {}]   ;;  %s10251_s2 = inlined_call_operand.hbm [shape: bf16[2,256,768], index: 2, kind: input, shape index: {}]   ;;  %s10252_s3 = inlined_call_operand.hbm [shape: bf16[2,256,256], index: 3, kind: output, shape index: {}]  }
   0x1   :  { %10401 = sst [smem:[#allocation97_spill]] %s10249_s0 }
   0x2   :  { %10402 = sst [smem:[#allocation98_spill]] %s10250_s1 }
   0x3   :  { %10403 = sst [smem:[#allocation99_spill]] %s10252_s3 }
   0x4   :  { %8 = vsyncpa [#allocation7], 0 }
   0x5   :  { %10 = vsyncpa [#allocation7 + $0x1], 0 }
   0x6   :  { %11 = vsyncpa [#allocation10], 0 }
   0x7   :  { %13 = vsyncpa [#allocation10 + $0x1], 0 }
   0x8   :  { %14 = vsyncpa [#allocation8], 0 }
   0x9   :  { %16 = vsyncpa [#allocation8 + $0x1], 0  ;;  %s7335_s12 = smov 0   ;;  %s7337_s13 = smov 0  }
   0xa   :  { %s7339_s14 = smov 0   ;;  %s7341_s15 = smov 0  }
   0xb   :  { %s7343_s16 = smov 0   ;;  %s7345_s17 = smov 0  }
   0xc   :  { %s7347_s18 = smov 0   ;;  %s7349_s19 = smov 0  }
   0xd   :  { %s7351_s20 = smov 0   ;;  %s7353_s21 = smov 0  }
   0xe   :  { %s7355_s22 = smov 0   ;;  %s7357_s23 = smov 0  }
   0xf   :  { %s7359_s24 = smov 0   ;;  %s7361_s25 = smov 0  }
  0x10 LB: > { %10404 = sst [smem:[#allocation17_spill]] %s7264_s16  ;;  %s7406_s26 = sadd.s32 4294967295, %s7300_s25   ;;  %s7300_s25 = sphi %s7361_s25, %s22_s25   ;;  %s7296_s24 = sphi %s7359_s24, %s10802_s24   ;;  %s7292_s23 = sphi %s7357_s23, %s10801_s23   ;;  %s7288_s22 = sphi %s7355_s22, %s10800_s22   ;;  %s7284_s21 = sphi %s7353_s21, %s10799_s21   ;;  %s7280_s20 = sphi %s7351_s20, %s10798_s20   ;;  %s7276_s19 = sphi %s7349_s19, %s10809_s19   ;;  %s7272_s18 = sphi %s7347_s18, %s10808_s18   ;;  %s7268_s17 = sphi %s7345_s17, %s10807_s17   ;;  %s7264_s16 = sphi %s7343_s16, %s10806_s16   ;;  %s7260_s15 = sphi %s7341_s15, %s10796_s15   ;;  %s7256_s14 = sphi %s7339_s14, %s10805_s14   ;;  %s7252_s13 = sphi %s7337_s13, %s10804_s13   ;;  %s7248_s12 = sphi %s7335_s12, %s10803_s12  }
  0x11   : > { %10405 = sst [smem:[#allocation18_spill]] %s7280_s20  ;;  %s44_s27 = sadd.s32 1, %s7292_s23 }
  0x12   : > { %10406 = sst [smem:[#allocation19_spill]] %s7284_s21  ;;  %p46_p0 = scmp.ge.s32.totalorder %s44_s27, 2 }
  0x13   : > { %10407 = sst [smem:[#allocation20_spill]] %s7288_s22  ;;  %s48_s28 = sadd.s32 1, %s7296_s24 }
  0x14   : > { %10408 = sst [smem:[#allocation21_spill]] %s7292_s23  ;;  %p10260_p1 = scmp.eq.s32.totalorder %s7300_s25, 0 }
  0x15   : > { %10409 = sst [smem:[#allocation22_spill]] %s7296_s24  ;;  %p10259_p2 = scmp.eq.s32.totalorder %s7406_s26, 0 }
  0x16   : > { %s10811_s27 = smov (%p46_p0, %s44_s27), 0  ;;  %s10813_s28 = smov (!%p46_p0, %s48_s28), %s7296_s24 }
  0x17   : > { %10410 = sst [smem:[#allocation23_spill]] %s10811_s27  ;;  %s82_s29 = sadd.s32 2, %s7292_s23 }
  0x18   : > { %s83_s30 = sadd.s32 2, %s10811_s27  ;;  %p50_p3 = scmp.ge.s32.totalorder %s10813_s28, 2 }
  0x19   : > { %s87_s4 = ssub.s32 %s82_s29, %s83_s30  ;;  %s91_s5 = sadd.s32 1, %s7268_s17 }
  0x1a   : > { %p98_p4 = scmp.ne.s32.totalorder %s7268_s17, %s7264_s16  ;;  %s10815_s28 = smov (%p50_p3, %s10813_s28), 0 }
  0x1b   : > { %10411 = sst [smem:[#allocation24_spill]] %s10815_s28  ;;  %p104_p6 = scmp.ne.s32.totalorder %s7264_s16, %s7260_s15 }
  0x1c   : > { %p7424_p5 = por %p98_p4, %p10260_p1  ;;  %s7432_s7 = ssub.s32 %s7296_s24, %s10815_s28 }
  0x1d   : > { %s114_s8 = sadd.s32 4, %s7292_s23  ;;  %s88_s9 = sor.u32 %s87_s4, %s7432_s7 }
  0x1e   : > { %p7438_p7 = por %p104_p6, %p10259_p2  ;;  %p89_p8 = scmp.eq.s32.totalorder %s88_s9, 0 }
  0x1f   : > { %s115_s11 = sadd.s32 4, %s10811_s27  ;;  %p10258_p9 = scmp.lt.s32.totalorder %s7300_s25, 4 }
  0x20   : > { %s10413_s10 = scalar_select %p7438_p7, 1, 0 }
  0x21   : > { %s119_s29 = ssub.s32 %s114_s8, %s115_s11  ;;  %s6329_s4 = smul.u32 192, %s7296_s24 }
  0x22   : > { %10414 = sst [smem:[#allocation25_spill]] %s10413_s10  ;;  %s120_s15 = sor.u32 %s119_s29, %s7432_s7 }
  0x23   : > { %s7444_s30 = scalar_select %p89_p8, %s7268_s17, %s91_s5  }
  0x24   : > { %p7448_p10 = scmp.eq.s32.totalorder %s120_s15, 0  ;;  %s202_s3 = sadd.s32 %s7292_s23, %s6329_s4 }
  0x25   : > { %s7454_s21 = sshll.u32 %s202_s3, 6  ;;  %s215_s9 = sand.u32 1, %s7300_s25  }
  0x26   : > { %s217_s22 = sand.u32 1, %s7268_s17   ;;  %s10416_s1 = sld [smem:[#allocation98_spill]] }
  0x27   : > { %s5629_s10 = sshll.u32 %s217_s22, 7  ;;  %p7468_p11 = pnand %p10258_p9, %p7424_p5 }
  0x28   : > { %s219_s29 = scalar_lea.vmem [#allocation9], %s5629_s10  ;;  %s7476_s16 = scalar_lea.sflag [#allocation10], %s215_s9 }
  0x29   : > { %s231_s15 = sshll.u32 %s219_s29, 4  ;;  %p7056_p3 = pneg %p7468_p11  ;;  %s7472_s15 = int_to_ptr.vmem [resolvable:$true] %s231_s15 }
  0x2c   : > { %s5519_s5 = scalar_lea.hbm %s10416_s1, %s7454_s21  ;;  %s7059_s4 = scalar_lea.hbm %s10416_s1, 24576 }
  0x2d   : > { %s7462_s11 = scalar_lea.hbm %s5519_s5, 128  ;;  %s7084_s22 = scalar_lea.hbm %s5519_s5, 2176 }
  0x2e   : > { %p7055_p0 = scmp.ne.s32.totalorder %s7462_s11, %s7084_s22  ;;  %p7060_p5 = scmp.lt.u32.totalorder %s7462_s11, %s10416_s1 }
  0x2f   : > { %p7061_p8 = scmp.lt.u32.totalorder %s7059_s4, %s7084_s22  ;;  %p7063_p2 = scmp.lt.u32.totalorder %s7084_s22, %s7462_s11 }
  0x30   : > { %p7057_p4 = pnand %p7056_p3, %p7055_p0 }
  0x31   : > { %p7062_p9 = por %p7061_p8, %p7060_p5 }
  0x32   : > { %p7058_p6 = pneg %p7057_p4 }
  0x33   : > { %p7064_p1 = por %p7063_p2, %p7062_p9 }
  0x35   : > { %p7065_p12 = pnand %p7064_p1, %p7058_p6 }
  0x37   : > { %7068 = shalt.err (!%p7065_p12)
}
  0x38   : > { %s7069_s9 = scalar_lea.vmem %s7472_s15, 2048  ;;  %s7302_s5 = smov [#allocation9]  }
  0x39   : > { %p7070_p0 = scmp.ne.s32.totalorder %s7472_s15, %s7069_s9  ;;  %s7074_s6 = sshll.u32 %s7302_s5, 4  ;;  %s7075_s6 = int_to_ptr.vmem [resolvable:$false] %s7074_s6 }
  0x3a   : > { %s7076_s10 = scalar_lea.vmem %s7075_s6, 4096  ;;  %p7077_p7 = scmp.lt.s32.totalorder %s7472_s15, %s7075_s6 }
  0x3b   : > { %p7072_p4 = pnand %p7070_p0, %p7056_p3  ;;  %p7078_p5 = scmp.lt.s32.totalorder %s7076_s10, %s7069_s9 }
  0x3d   : > { %p7073_p13 = pneg %p7072_p4  ;;  %p7079_p8 = por %p7078_p5, %p7077_p7 }
  0x3f   : > { %p7080_p2 = pnand %p7079_p8, %p7073_p13 }
  0x41   : > { %7083 = shalt.err (!%p7080_p2)
}
  0x42   : > { %s10262_s22 = smov 384   ;;  %s10264_s4 = smov 64  }
  0x43   : > { %s10266_s8 = smov 4   ;;  %p10418_p1 = scmp.lt.s32.totalorder %s7300_s25, 5 }
  0x44   : > { %6344 = dma.hbm_to_vmem [thread:$0]  (!%p7468_p11), %s7462_s11, 2048, %s7472_s15, %s7476_s16, %s10262_s22, %s10264_s4, %s10266_s8  }
  0x45   : > { %p10419_p7 = scmp.ge.s32.totalorder %s7300_s25, 1  ;;  %s5624_s9 = sadd.s32 4294967294, %s7300_s25  }
  0x46   : > { %s55_s5 = ssub.s32 %s7292_s23, %s10811_s27  ;;  %s59_s6 = sadd.s32 1, %s7280_s20 }
  0x47   : > { %p7510_p9 = pnand %p10419_p7, %p10418_p1  ;;  %s56_s10 = sor.u32 %s55_s5, %s7432_s7 }
  0x48   : > { %p66_p12 = scmp.ne.s32.totalorder %s7280_s20, %s7276_s19  ;;  %p57_p13 = scmp.eq.s32.totalorder %s56_s10, 0 }
  0x49   : > { %s10420_s29 = scalar_select %p7510_p9, 1, 0 }
  0x4a   : > { %p72_p3 = scmp.ne.s32.totalorder %s7276_s19, %s7272_s18  ;;  %p10421_p6 = scmp.eq.s32.totalorder %s7300_s25, 0 }
  0x4b   : > { %p164_p11 = scmp.eq.s32.totalorder %s7406_s26, 3  ;;  %p10424_p4 = scmp.eq.s32.totalorder %s7406_s26, 0 }
  0x4c   : > { %p7525_p0 = por %p10421_p6, %p66_p12  ;;  %p170_p2 = scmp.eq.s32.totalorder %s5624_s9, 3 }
  0x4d   : > { %s7531_s11 = scalar_select %p57_p13, %s7280_s20, %s59_s6  }
  0x4e   : > { %p7535_p5 = por %p10424_p4, %p72_p3  ;;  %p7539_p8 = por %p164_p11, %p66_p12 }
  0x4f   : > { %10423 = sst [smem:[#allocation26_spill]] %s7531_s11  ;;  %s190_s5 = sand.u32 1, %s7280_s20  }
  0x50   : > { %s10425_s15 = scalar_select %p7535_p5, 1, 0 }
  0x51   : > { %s10426_s7 = scalar_select %p7539_p8, 1, 0 }
  0x52   : > { %s5627_s10 = sshll.u32 %s190_s5, 7  ;;  %p7544_p1 = por %p170_p2, %p72_p3 }
  0x53   : > { %s10428_s0 = sld [smem:[#allocation97_spill]]  ;;  %s194_s1 = scalar_lea.vmem [#allocation6], %s5627_s10 }
  0x54   : > { %s10427_s22 = scalar_select %p7544_p1, 1, 0 }
  0x55   : > { %s205_s27 = sshll.u32 %s194_s1, 4  ;;  %p10429_p7 = scmp.lt.s32.totalorder %s7300_s25, 4  ;;  %s7554_s27 = int_to_ptr.vmem [resolvable:$true] %s205_s27 }
  0x56   : > { %s7564_s24 = scalar_lea.sflag [#allocation7], %s190_s5 }
  0x57   : > { %p7560_p12 = pnand %p10429_p7, %p7525_p0 }
  0x59   : > { %s7552_s6 = scalar_lea.hbm %s10428_s0, %s7454_s21  ;;  %p7087_p3 = pneg %p7560_p12 }
  0x5a   : > { %s7085_s4 = scalar_lea.hbm %s7552_s6, 2048  ;;  %s7090_s3 = scalar_lea.hbm %s10428_s0, 24576 }
  0x5b   : > { %p7086_p13 = scmp.ne.s32.totalorder %s7552_s6, %s7085_s4  ;;  %p7091_p0 = scmp.lt.u32.totalorder %s7552_s6, %s10428_s0 }
  0x5c   : > { %p7092_p4 = scmp.lt.u32.totalorder %s7090_s3, %s7085_s4  ;;  %p7094_p7 = scmp.lt.u32.totalorder %s7085_s4, %s7552_s6 }
  0x5d   : > { %p7088_p6 = pnand %p7087_p3, %p7086_p13 }
  0x5e   : > { %p7093_p2 = por %p7092_p4, %p7091_p0 }
  0x5f   : > { %p7089_p11 = pneg %p7088_p6 }
  0x60   : > { %p7095_p1 = por %p7094_p7, %p7093_p2 }
  0x62   : > { %p7096_p8 = pnand %p7095_p1, %p7089_p11 }
  0x64   : > { %7099 = shalt.err (!%p7096_p8)
}
  0x65   : > { %s7100_s5 = scalar_lea.vmem %s7554_s27, 2048  ;;  %s7306_s1 = smov [#allocation6]  }
  0x66   : > { %p7101_p13 = scmp.ne.s32.totalorder %s7554_s27, %s7100_s5  ;;  %s7105_s8 = sshll.u32 %s7306_s1, 4  ;;  %s7106_s8 = int_to_ptr.vmem [resolvable:$false] %s7105_s8 }
  0x67   : > { %s7107_s23 = scalar_lea.vmem %s7106_s8, 4096  ;;  %p7108_p9 = scmp.lt.s32.totalorder %s7554_s27, %s7106_s8 }
  0x68   : > { %p7103_p6 = pnand %p7101_p13, %p7087_p3  ;;  %p7109_p0 = scmp.lt.s32.totalorder %s7107_s23, %s7100_s5 }
  0x6a   : > { %p7104_p5 = pneg %p7103_p6  ;;  %p7110_p4 = por %p7109_p0, %p7108_p9 }
  0x6c   : > { %p7111_p2 = pnand %p7110_p4, %p7104_p5 }
  0x6e   : > { %7114 = shalt.err (!%p7111_p2)
}
  0x6f   : > { %s10431_s4 = smov 4   ;;  %s10432_s3 = smov 64  }
  0x70   : > { %s10433_s10 = smov 384   ;;  %s123_s9 = sadd.s32 1, %s7256_s14 }
  0x71   : > { %6341 = dma.hbm_to_vmem [thread:$0]  (!%p7560_p12), %s7552_s6, 2048, %s7554_s27, %s7564_s24, %s10433_s10, %s10432_s3, %s10431_s4  }
  0x72   : > { %s7599_s5 = scalar_select %p7448_p10, %s7256_s14, %s123_s9  }
  0x73   : > { %p130_p9 = scmp.ne.s32.totalorder %s7256_s14, %s7252_s13  ;;  %p136_p5 = scmp.ne.s32.totalorder %s7252_s13, %s7248_s12 }
  0x74   : > { %s243_s1 = sand.u32 1, %s7256_s14   ;;  %s5529_s0 = scalar_lea.hbm %s10251_s2, %s7454_s21 }
  0x75   : > { %p10434_p8 = scmp.eq.s32.totalorder %s7300_s25, 0  ;;  %p10435_p3 = scmp.eq.s32.totalorder %s7406_s26, 0 }
  0x76   : > { %s5631_s20 = sshll.u32 %s243_s1, 7  ;;  %s7618_s24 = scalar_lea.hbm %s5529_s0, 256 }
  0x77   : > { %p132_p1 = por %p130_p9, %p10434_p8  ;;  %p7614_p11 = por %p136_p5, %p10435_p3 }
  0x78   : > { %p10437_p12 = scmp.lt.s32.totalorder %s7300_s25, 4  ;;  %s245_s21 = scalar_lea.vmem [#allocation11], %s5631_s20 }
  0x79   : > { %s257_s27 = sshll.u32 %s245_s21, 4  ;;  %s7145_s28 = scalar_lea.hbm %s5529_s0, 2304  ;;  %s7626_s27 = int_to_ptr.vmem [resolvable:$true] %s257_s27 }
  0x7a   : > { %p7622_p10 = pnand %p10437_p12, %p132_p1  ;;  %p7116_p7 = scmp.ne.s32.totalorder %s7618_s24, %s7145_s28 }
  0x7b   : > { %s7120_s1 = scalar_lea.hbm %s10251_s2, 24576  ;;  %p7121_p4 = scmp.lt.u32.totalorder %s7618_s24, %s10251_s2 }
  0x7c   : > { %p7117_p13 = pneg %p7622_p10  ;;  %p7122_p2 = scmp.lt.u32.totalorder %s7120_s1, %s7145_s28 }
  0x7d   : > { %p7124_p5 = scmp.lt.u32.totalorder %s7145_s28, %s7618_s24 }
  0x7e   : > { %p7118_p6 = pnand %p7117_p13, %p7116_p7  ;;  %p7123_p9 = por %p7122_p2, %p7121_p4 }
  0x80   : > { %p7119_p0 = pneg %p7118_p6  ;;  %p7125_p8 = por %p7124_p5, %p7123_p9 }
  0x82   : > { %p7126_p1 = pnand %p7125_p8, %p7119_p0 }
  0x84   : > { %7129 = shalt.err (!%p7126_p1)
}
  0x85   : > { %s7130_s0 = scalar_lea.vmem %s7626_s27, 2048  ;;  %s7307_s20 = smov [#allocation11]  }
  0x86   : > { %p7131_p3 = scmp.ne.s32.totalorder %s7626_s27, %s7130_s0  ;;  %s7135_s21 = sshll.u32 %s7307_s20, 4  ;;  %s7136_s21 = int_to_ptr.vmem [resolvable:$false] %s7135_s21 }
  0x87   : > { %s7137_s6 = scalar_lea.vmem %s7136_s21, 4096  ;;  %p7138_p6 = scmp.lt.s32.totalorder %s7626_s27, %s7136_s21 }
  0x88   : > { %p7133_p12 = pnand %p7131_p3, %p7117_p13  ;;  %p7139_p4 = scmp.lt.s32.totalorder %s7137_s6, %s7130_s0 }
  0x8a   : > { %p7134_p7 = pneg %p7133_p12  ;;  %p7140_p2 = por %p7139_p4, %p7138_p6 }
  0x8c   : > { %p7141_p9 = pnand %p7140_p2, %p7134_p7 }
  0x8e   : > { %7144 = shalt.err (!%p7141_p9)
}
  0x8f   : > { %6347 = dma.hbm_to_vmem [thread:$0]  (!%p7622_p10), %s7618_s24, 2048, %s7626_s27, %s7476_s16, %s10433_s10, %s10432_s3, %s10431_s4  }
  0x90   : > { %p10439_p13 = scmp.ne.s32.totalorder %s10420_s29, 0 }
  0x92   : > { %269 = sbr.rel (%p10439_p13) target bundleno = 1921 (0x781), region = 32 }
  0x99   : > { %s7659_s28 = sand.u32 1, %s7276_s19   ;;  %p10440_p0 = scmp.ne.s32.totalorder %s10425_s15, 0 }
  0x9a   : > { %s5634_s9 = sshll.u32 %s7659_s28, 7  ;;  %s272_s1 = scalar_lea.sflag [#allocation7], %s7659_s28 }
  0x9b   : > { %s7665_s12 = scalar_lea.vmem [#allocation6], %s5634_s9 }
  0x9c   : > { %7231 = dma.done.wait (%p10440_p0), %s272_s1, 2048  }
  0x9d   : > { %7233 = vsyncadd (%p10440_p0), %s272_s1, 4294965248  ;;  %s10441_s16 = sld [smem:[#allocation17_spill]]  ;;  %s10442_s29 = sld [smem:[#allocation25_spill]] }
  0x9e   : > { %s280_s4 = sand.u32 1, %s7406_s26  }
  0x9f   : > { %s281_s24 = scalar_lea.sflag [#allocation10], %s280_s4 }
  0xa3   : > { %s282_s3 = sand.u32 1, %s10441_s16   ;;  %p10443_p10 = scmp.ne.s32.totalorder %s10442_s29, 0 }
  0xa4   : > { %s5635_s10 = sshll.u32 %s282_s3, 7 }
  0xa5   : > { %s7673_s27 = scalar_lea.vmem [#allocation9], %s5635_s10 }
  0xa6   : > { %7235 = dma.done.wait (%p10443_p10), %s281_s24, 2048  }
  0xa7   : > { %7237 = vsyncadd (%p10443_p10), %s281_s24, 4294965248  ;;  %s291_s8 = sand.u32 1, %s7252_s13  }
  0xa8   : > { %s5636_s23 = sshll.u32 %s291_s8, 7 }
  0xa9   : > { %s7680_s15 = scalar_lea.vmem [#allocation11], %s5636_s23 }
  0xaa   : > { %7239 = dma.done.wait (%p7614_p11), %s281_s24, 2048  }
  0xab   : > { %7241 = vsyncadd (%p7614_p11), %s281_s24, 4294965248  ;;  %vm754_vm0 = vcmask 523264   ;;  %v6477_v0 = vld [vmem:[%s7673_s27 + $0x40] sm:$0xff]   ;;  %v6479_v2 = vld [vmem:[%s7673_s27 + $0x48] sm:$0xff]   ;;  %vm465_vm1 = vcmask 7168   ;;  %s7311_s26 = smov 64  }
  0xac   : > { %v6478_v1 = vld [vmem:[%s7673_s27] sm:$0xff]   ;;  %6313 = vmatprep.subr.msk.bf16.mxu0 %vm754_vm0, %v6477_v0  ;;  %v6480_v4 = vld [vmem:[%s7673_s27 + $0x8] sm:$0xff]   ;;  %v6481_v6 = vld [vmem:[%s7673_s27 + $0x50] sm:$0xff]   ;;  %vm4618_vm2 = vcmask 1048064   ;;  %s9980_s11 = scalar_lea.vmem [#allocation12], %s5634_s9  ;;  %s10784_s0 = sld [smem:[#allocation20_spill]] }
  0xad   : > { %v804_v3 = vsel %vm754_vm0, %v6478_v1, 0  ;;  %v807_v5 = vsel %vm754_vm0, %v6480_v4, 0  ;;  %v6482_v7 = vld [vmem:[%s7673_s27 + $0x10] sm:$0xff]   ;;  %v5804_v8 = vld [vmem:[%s7665_s12] sm:$0xff]   ;;  %v6483_v10 = vld [vmem:[%s7673_s27 + $0x58] sm:$0xff]   ;;  %s10787_s20 = sld [smem:[#allocation19_spill]] }
  0xae   : > { %5978 = vmatpush3.bf16.xpose.msra.mxu0 %v804_v3  ;;  %v810_v9 = vsel %vm754_vm0, %v6482_v7, 0  ;;  %v5805_v11 = vunpack.c.l.bf16 %v5804_v8  ;;  %v5806_v12 = vunpack.c.h.bf16 %v5804_v8  ;;  %v6484_v15 = vld [vmem:[%s7673_s27 + $0x18] sm:$0xff]   ;;  %v6485_v18 = vld [vmem:[%s7673_s27 + $0x60] sm:$0xff]   ;;  %v6487_v20 = vld [vmem:[%s7673_s27 + $0x68] sm:$0xff]   ;;  %s5472_s1 = sshll.u32 %s9980_s11, 4  ;;  %s10792_s29 = sld [smem:[#allocation99_spill]]  ;;  %s10169_s1 = int_to_ptr.vmem [resolvable:$true] %s5472_s1 }
  0xaf   : > { %6314 = vmatprep.subr.msk.bf16.mxu0 %vm754_vm0, %v6479_v2  ;;  %v813_v17 = vsel %vm754_vm0, %v6484_v15, 0  ;;  %v6486_v19 = vld [vmem:[%s7673_s27 + $0x20] sm:$0xff]   ;;  %v6488_v22 = vld [vmem:[%s7673_s27 + $0x28] sm:$0xff]   ;;  %v6489_v24 = vld [vmem:[%s7673_s27 + $0x70] sm:$0xff]   ;;  %s5455_s3 = scalar_lea.sflag [#allocation8], %s7659_s28  ;;  %s7146_s10 = scalar_lea.vmem %s10169_s1, 2048 }
  0xb0   : > { %v401_v13 = vmul.f32 0.125, %v5805_v11  ;;  %v402_v14 = vmul.f32 0.125, %v5806_v12  ;;  %v816_v21 = vsel %vm754_vm0, %v6486_v19, 0  ;;  %v819_v23 = vsel %vm754_vm0, %v6488_v22, 0  ;;  %v6490_v25 = vld [vmem:[%s7673_s27 + $0x30] sm:$0xff]   ;;  %v6491_v27 = vld [vmem:[%s7673_s27 + $0x78] sm:$0xff]   ;;  %p7147_p11 = scmp.ne.s32.totalorder %s10169_s1, %s7146_s10 }
  0xb1   : > { %v822_v26 = vsel %vm754_vm0, %v6490_v25, 0  ;;  %v6492_v28 = vld [vmem:[%s7673_s27 + $0x38] sm:$0xff]   ;;  %v5947_v29 = vld [vmem:[%s7665_s12 + $0x8] sm:$0xff]   ;;  %v5948_v35 = vld [vmem:[%s7665_s12 + $0x10] sm:$0xff]   ;;  %p10793_p5 = scmp.ne.s32.totalorder %s10426_s7, 0  ;;  %s7312_s24 = smov [#allocation12]  }
  0xb2   : > { %v7702_v16 = vpack.c.bf16 %v402_v14, %v401_v13  ;;  %v825_v30 = vsel %vm754_vm0, %v6492_v28, 0  ;;  %v5809_v31 = vunpack.c.l.bf16 %v5947_v29  ;;  %v5810_v32 = vunpack.c.h.bf16 %v5947_v29  ;;  %v5949_v41 = vld [vmem:[%s7665_s12 + $0x18] sm:$0xff]   ;;  %v5950_v47 = vld [vmem:[%s7665_s12 + $0x20] sm:$0xff]   ;;  %v5951_v53 = vld [vmem:[%s7665_s12 + $0x28] sm:$0xff]   ;;  %s5767_s21 = sshll.u32 %s10784_s0, 6 }
  0xb3   : > { %v5813_v37 = vunpack.c.l.bf16 %v5948_v35  ;;  %v5814_v38 = vunpack.c.h.bf16 %v5948_v35  ;;  %v5817_v43 = vunpack.c.l.bf16 %v5949_v41  ;;  %v5818_v44 = vunpack.c.h.bf16 %v5949_v41  ;;  %v5952_v59 = vld [vmem:[%s7665_s12 + $0x30] sm:$0xff]   ;;  %v5953_v1 = vld [vmem:[%s7665_s12 + $0x38] sm:$0xff]   ;;  %v5954_v7 = vld [vmem:[%s7665_s12 + $0x40] sm:$0xff]   ;;  %s5469_s6 = sadd.s32 %s10787_s20, %s5767_s21  ;;  %p7148_p8 = pnand %p7147_p11, %p10793_p5 }
  0xb4   : > { %5993 = vmatprep.mubr.msk.bf16.mxu0 %vm754_vm0, %v7702_v16  ;;  %v403_v33 = vmul.f32 0.125, %v5809_v31  ;;  %v404_v34 = vmul.f32 0.125, %v5810_v32  ;;  %v5821_v49 = vunpack.c.l.bf16 %v5950_v47  ;;  %v5822_v50 = vunpack.c.h.bf16 %v5950_v47  ;;  %v5955_v13 = vld [vmem:[%s7665_s12 + $0x48] sm:$0xff]   ;;  %v5958_v32 = vld [vmem:[%s7665_s12 + $0x60] sm:$0xff]   ;;  %s5768_s9 = sshll.u32 %s5469_s6, 6 }
  0xb5   : > { %v405_v39 = vmul.f32 0.125, %v5813_v37  ;;  %v406_v40 = vmul.f32 0.125, %v5814_v38  ;;  %v407_v45 = vmul.f32 0.125, %v5817_v43  ;;  %v408_v46 = vmul.f32 0.125, %v5818_v44  ;;  %s10167_s4 = scalar_lea.hbm %s10792_s29, %s5768_s9  ;;  %p7149_p1 = pneg %p7148_p8 }
  0xb6   : > { %5980 = vmatpush3.bf16.xpose.msra.mxu0 %v807_v5  ;;  %v7725_v36 = vpack.c.bf16 %v404_v34, %v403_v33  ;;  %v409_v51 = vmul.f32 0.125, %v5821_v49  ;;  %v410_v52 = vmul.f32 0.125, %v5822_v50  ;;  %v5825_v55 = vunpack.c.l.bf16 %v5951_v53 }
  0xb7   : > { %6315 = vmatprep.subr.msk.bf16.mxu0 %vm754_vm0, %v6481_v6  ;;  %v7732_v42 = vpack.c.bf16 %v406_v40, %v405_v39  ;;  %v7739_v48 = vpack.c.bf16 %v408_v46, %v407_v45  ;;  %v5826_v56 = vunpack.c.h.bf16 %v5951_v53  ;;  %v5829_v61 = vunpack.c.l.bf16 %v5952_v59  ;;  %v5959_v39 = vld [vmem:[%s7665_s12 + $0x68] sm:$0xff]   ;;  %v5960_v46 = vld [vmem:[%s7665_s12 + $0x70] sm:$0xff]   ;;  %v5961_v53 = vld [vmem:[%s7665_s12 + $0x78] sm:$0xff]  }
  0xb8   : > { %v7746_v54 = vpack.c.bf16 %v410_v52, %v409_v51  ;;  %v411_v57 = vmul.f32 0.125, %v5825_v55  ;;  %v5830_v62 = vunpack.c.h.bf16 %v5952_v59  ;;  %v5833_v3 = vunpack.c.l.bf16 %v5953_v1 }
  0xb9   : > { %v412_v58 = vmul.f32 0.125, %v5826_v56  ;;  %v413_v63 = vmul.f32 0.125, %v5829_v61  ;;  %v5834_v4 = vunpack.c.h.bf16 %v5953_v1  ;;  %v5841_v15 = vunpack.c.l.bf16 %v5955_v13 }
  0xba   : > { %v414_v0 = vmul.f32 0.125, %v5830_v62  ;;  %v415_v5 = vmul.f32 0.125, %v5833_v3  ;;  %v5853_v34 = vunpack.c.l.bf16 %v5958_v32  ;;  %v5854_v35 = vunpack.c.h.bf16 %v5958_v32 }
  0xbb   : > { %v7753_v60 = vpack.c.bf16 %v412_v58, %v411_v57  ;;  %v416_v6 = vmul.f32 0.125, %v5834_v4  ;;  %v5857_v41 = vunpack.c.l.bf16 %v5959_v39  ;;  %v5858_v43 = vunpack.c.h.bf16 %v5959_v39 }
  0xbc   : > { %v7760_v2 = vpack.c.bf16 %v414_v0, %v413_v63  ;;  %v425_v37 = vmul.f32 0.125, %v5853_v34  ;;  %v426_v38 = vmul.f32 0.125, %v5854_v35  ;;  %v5861_v49 = vunpack.c.l.bf16 %v5960_v46 }
  0xbd   : > { %v7767_v8 = vpack.c.bf16 %v416_v6, %v415_v5  ;;  %v427_v44 = vmul.f32 0.125, %v5857_v41  ;;  %v428_v45 = vmul.f32 0.125, %v5858_v43  ;;  %v5862_v50 = vunpack.c.h.bf16 %v5960_v46 }
  0xbe   : > { %5982 = vmatpush3.bf16.xpose.msra.mxu0 %v810_v9  ;;  %v5837_v9 = vunpack.c.l.bf16 %v5954_v7  ;;  %v7802_v40 = vpack.c.bf16 %v426_v38, %v425_v37  ;;  %v429_v51 = vmul.f32 0.125, %v5861_v49  ;;  %v5865_v56 = vunpack.c.l.bf16 %v5961_v53 }
  0xbf   : > { %6316 = vmatprep.subr.msk.bf16.mxu0 %vm754_vm0, %v6483_v10  ;;  %v5838_v10 = vunpack.c.h.bf16 %v5954_v7  ;;  %v7809_v47 = vpack.c.bf16 %v428_v45, %v427_v44  ;;  %v430_v52 = vmul.f32 0.125, %v5862_v50  ;;  %v5866_v57 = vunpack.c.h.bf16 %v5961_v53 }
  0xc0   : > { %v417_v11 = vmul.f32 0.125, %v5837_v9  ;;  %10444 = vst [vmem:[#allocation27_spill] sm:$0xff] %v7802_v40  ;;  %v431_v58 = vmul.f32 0.125, %v5865_v56 }
  0xc1   : > { %v418_v12 = vmul.f32 0.125, %v5838_v10  ;;  %v7816_v55 = vpack.c.bf16 %v430_v52, %v429_v51  ;;  %v432_v59 = vmul.f32 0.125, %v5866_v57  ;;  %v7308_v10 = vmov -1e+30  }
  0xc2   : > { %466 = vst.msk [vmem:[#allocation3] sm:$0xff] %vm465_vm1, %v7308_v10  ;;  %467 = vst.msk [vmem:[#allocation3 + $0x8] sm:$0xff] %vm465_vm1, %v7308_v10 }
  0xc3   : > { %v7774_v14 = vpack.c.bf16 %v418_v12, %v417_v11  ;;  %10445 = vst [vmem:[#allocation28_spill] sm:$0xff] %v7816_v55  ;;  %v7822_v61 = vpack.c.bf16 %v432_v59, %v431_v58  ;;  %468 = vst.msk [vmem:[#allocation3 + $0x10] sm:$0xff] %vm465_vm1, %v7308_v10 }
  0xc4   : > { %469 = vst.msk [vmem:[#allocation3 + $0x18] sm:$0xff] %vm465_vm1, %v7308_v10  ;;  %470 = vst.msk [vmem:[#allocation3 + $0x20] sm:$0xff] %vm465_vm1, %v7308_v10 }
  0xc5   : > { %471 = vst.msk [vmem:[#allocation3 + $0x28] sm:$0xff] %vm465_vm1, %v7308_v10  ;;  %472 = vst.msk [vmem:[#allocation3 + $0x30] sm:$0xff] %vm465_vm1, %v7308_v10 }
  0xc6   : > { %5984 = vmatpush3.bf16.xpose.msra.mxu0 %v813_v17  ;;  %v5842_v17 = vunpack.c.h.bf16 %v5955_v13  ;;  %473 = vst.msk [vmem:[#allocation3 + $0x38] sm:$0xff] %vm465_vm1, %v7308_v10  ;;  %474 = vst.msk [vmem:[#allocation3 + $0x40] sm:$0xff] %vm465_vm1, %v7308_v10 }
  0xc7   : > { %6317 = vmatprep.subr.msk.bf16.mxu0 %vm754_vm0, %v6485_v18  ;;  %v419_v18 = vmul.f32 0.125, %v5841_v15  ;;  %475 = vst.msk [vmem:[#allocation3 + $0x48] sm:$0xff] %vm465_vm1, %v7308_v10  ;;  %476 = vst.msk [vmem:[#allocation3 + $0x50] sm:$0xff] %vm465_vm1, %v7308_v10 }
  0xc8   : > { %v420_v19 = vmul.f32 0.125, %v5842_v17  ;;  %477 = vst.msk [vmem:[#allocation3 + $0x58] sm:$0xff] %vm465_vm1, %v7308_v10  ;;  %478 = vst.msk [vmem:[#allocation3 + $0x60] sm:$0xff] %vm465_vm1, %v7308_v10 }
  0xc9   : > { %479 = vst.msk [vmem:[#allocation3 + $0x68] sm:$0xff] %vm465_vm1, %v7308_v10  ;;  %480 = vst.msk [vmem:[#allocation3 + $0x70] sm:$0xff] %vm465_vm1, %v7308_v10 }
  0xca   : > { %481 = vst.msk [vmem:[#allocation3 + $0x78] sm:$0xff] %vm465_vm1, %v7308_v10  ;;  %482 = vst.msk [vmem:[#allocation3 + $0x80] sm:$0xff] %vm465_vm1, %v7308_v10 }
  0xcb   : > { %483 = vst.msk [vmem:[#allocation3 + $0x88] sm:$0xff] %vm465_vm1, %v7308_v10  ;;  %484 = vst.msk [vmem:[#allocation3 + $0x90] sm:$0xff] %vm465_vm1, %v7308_v10 }
  0xcc   : > { %485 = vst.msk [vmem:[#allocation3 + $0x98] sm:$0xff] %vm465_vm1, %v7308_v10  ;;  %486 = vst.msk [vmem:[#allocation3 + $0xa0] sm:$0xff] %vm465_vm1, %v7308_v10 }
  0xcd   : > { %487 = vst.msk [vmem:[#allocation3 + $0xa8] sm:$0xff] %vm465_vm1, %v7308_v10  ;;  %488 = vst.msk [vmem:[#allocation3 + $0xb0] sm:$0xff] %vm465_vm1, %v7308_v10 }
  0xce   : > { %5986 = vmatpush3.bf16.xpose.msra.mxu0 %v816_v21  ;;  %v7781_v21 = vpack.c.bf16 %v420_v19, %v419_v18  ;;  %489 = vst.msk [vmem:[#allocation3 + $0xb8] sm:$0xff] %vm465_vm1, %v7308_v10  ;;  %490 = vst.msk [vmem:[#allocation3 + $0xc0] sm:$0xff] %vm465_vm1, %v7308_v10 }
  0xcf   : > { %6318 = vmatprep.subr.msk.bf16.mxu0 %vm754_vm0, %v6487_v20  ;;  %v5956_v20 = vld [vmem:[%s7665_s12 + $0x50] sm:$0xff]   ;;  %491 = vst.msk [vmem:[#allocation3 + $0xc8] sm:$0xff] %vm465_vm1, %v7308_v10  ;;  %492 = vst.msk [vmem:[#allocation3 + $0xd0] sm:$0xff] %vm465_vm1, %v7308_v10 }
  0xd0   : > { %v5845_v22 = vunpack.c.l.bf16 %v5956_v20  ;;  %493 = vst.msk [vmem:[#allocation3 + $0xd8] sm:$0xff] %vm465_vm1, %v7308_v10  ;;  %494 = vst.msk [vmem:[#allocation3 + $0xe0] sm:$0xff] %vm465_vm1, %v7308_v10 }
  0xd1   : > { %495 = vst.msk [vmem:[#allocation3 + $0xe8] sm:$0xff] %vm465_vm1, %v7308_v10  ;;  %496 = vst.msk [vmem:[#allocation3 + $0xf0] sm:$0xff] %vm465_vm1, %v7308_v10 }
  0xd2   : > { %497 = vst.msk [vmem:[#allocation3 + $0xf8] sm:$0xff] %vm465_vm1, %v7308_v10  ;;  %498 = vst.msk [vmem:[#allocation3 + $0x100] sm:$0xff] %vm465_vm1, %v7308_v10 }
  0xd3   : > { %499 = vst.msk [vmem:[#allocation3 + $0x108] sm:$0xff] %vm465_vm1, %v7308_v10  ;;  %500 = vst.msk [vmem:[#allocation3 + $0x110] sm:$0xff] %vm465_vm1, %v7308_v10 }
  0xd4   : > { %501 = vst.msk [vmem:[#allocation3 + $0x118] sm:$0xff] %vm465_vm1, %v7308_v10  ;;  %502 = vst.msk [vmem:[#allocation3 + $0x120] sm:$0xff] %vm465_vm1, %v7308_v10 }
  0xd5   : > { %503 = vst.msk [vmem:[#allocation3 + $0x128] sm:$0xff] %vm465_vm1, %v7308_v10  ;;  %504 = vst.msk [vmem:[#allocation3 + $0x130] sm:$0xff] %vm465_vm1, %v7308_v10 }
  0xd6   : > { %5988 = vmatpush3.bf16.xpose.msra.mxu0 %v819_v23  ;;  %v5846_v23 = vunpack.c.h.bf16 %v5956_v20  ;;  %505 = vst.msk [vmem:[#allocation3 + $0x138] sm:$0xff] %vm465_vm1, %v7308_v10  ;;  %506 = vst.msk [vmem:[#allocation3 + $0x140] sm:$0xff] %vm465_vm1, %v7308_v10  ;;  %v7309_v20 = vmov 0  }
  0xd7   : > { %6319 = vmatprep.subr.msk.bf16.mxu0 %vm754_vm0, %v6489_v24  ;;  %v421_v24 = vmul.f32 0.125, %v5845_v22  ;;  %507 = vst.msk [vmem:[#allocation3 + $0x148] sm:$0xff] %vm465_vm1, %v7308_v10  ;;  %508 = vst.msk [vmem:[#allocation3 + $0x150] sm:$0xff] %vm465_vm1, %v7308_v10  ;;  %6475 = vset.pattern.permute.xlu0 %v7309_v20 }
  0xd8   : > { %v422_v25 = vmul.f32 0.125, %v5846_v23  ;;  %509 = vst.msk [vmem:[#allocation3 + $0x158] sm:$0xff] %vm465_vm1, %v7308_v10  ;;  %510 = vst.msk [vmem:[#allocation3 + $0x160] sm:$0xff] %vm465_vm1, %v7308_v10  ;;  %6476 = vset.pattern.permute.xlu1 %v7309_v20 }
  0xd9   : > { %511 = vst.msk [vmem:[#allocation3 + $0x168] sm:$0xff] %vm465_vm1, %v7308_v10  ;;  %512 = vst.msk [vmem:[#allocation3 + $0x170] sm:$0xff] %vm465_vm1, %v7308_v10 }
  0xda   : > { %513 = vst.msk [vmem:[#allocation3 + $0x178] sm:$0xff] %vm465_vm1, %v7308_v10  ;;  %514 = vst.msk [vmem:[#allocation3 + $0x180] sm:$0xff] %vm465_vm1, %v7308_v10 }
  0xdb   : > { %515 = vst.msk [vmem:[#allocation3 + $0x188] sm:$0xff] %vm465_vm1, %v7308_v10  ;;  %516 = vst.msk [vmem:[#allocation3 + $0x190] sm:$0xff] %vm465_vm1, %v7308_v10 }
  0xdc   : > { %517 = vst.msk [vmem:[#allocation3 + $0x198] sm:$0xff] %vm465_vm1, %v7308_v10  ;;  %518 = vst.msk [vmem:[#allocation3 + $0x1a0] sm:$0xff] %vm465_vm1, %v7308_v10 }
  0xdd   : > { %519 = vst.msk [vmem:[#allocation3 + $0x1a8] sm:$0xff] %vm465_vm1, %v7308_v10  ;;  %520 = vst.msk [vmem:[#allocation3 + $0x1b0] sm:$0xff] %vm465_vm1, %v7308_v10 }
  0xde   : > { %5990 = vmatpush3.bf16.xpose.msra.mxu0 %v822_v26  ;;  %v5957_v26 = vld [vmem:[%s7665_s12 + $0x58] sm:$0xff]   ;;  %521 = vst.msk [vmem:[#allocation3 + $0x1b8] sm:$0xff] %vm465_vm1, %v7308_v10  ;;  %522 = vst.msk [vmem:[#allocation3 + $0x1c0] sm:$0xff] %vm465_vm1, %v7308_v10 }
  0xdf   : > { %6320 = vmatprep.subr.msk.bf16.mxu0 %vm754_vm0, %v6491_v27  ;;  %v7788_v27 = vpack.c.bf16 %v422_v25, %v421_v24  ;;  %v5849_v28 = vunpack.c.l.bf16 %v5957_v26  ;;  %v5850_v29 = vunpack.c.h.bf16 %v5957_v26  ;;  %523 = vst.msk [vmem:[#allocation3 + $0x1c8] sm:$0xff] %vm465_vm1, %v7308_v10  ;;  %524 = vst.msk [vmem:[#allocation3 + $0x1d0] sm:$0xff] %vm465_vm1, %v7308_v10 }
  0xe0   : > { %525 = vst.msk [vmem:[#allocation3 + $0x1d8] sm:$0xff] %vm465_vm1, %v7308_v10  ;;  %526 = vst.msk [vmem:[#allocation3 + $0x1e0] sm:$0xff] %vm465_vm1, %v7308_v10 }
  0xe1   : > { %v424_v31 = vmul.f32 0.125, %v5850_v29  ;;  %527 = vst.msk [vmem:[#allocation3 + $0x1e8] sm:$0xff] %vm465_vm1, %v7308_v10  ;;  %528 = vst.msk [vmem:[#allocation3 + $0x1f0] sm:$0xff] %vm465_vm1, %v7308_v10 }
  0xe2   : > { %529 = vst.msk [vmem:[#allocation3 + $0x1f8] sm:$0xff] %vm465_vm1, %v7308_v10 }
  0xe6   : > { %5992 = vmatpush3.bf16.xpose.msra.mxu0 %v825_v30  ;;  %v423_v30 = vmul.f32 0.125, %v5849_v28 }
  0xe8   : > { %v7795_v33 = vpack.c.bf16 %v424_v31, %v423_v30  ;;  %v7310_v30 = vmov 0.0  }
  0xe9   : > { %594 = vst [vmem:[#allocation5] sm:$0xff] %v7310_v30  ;;  %530 = vst.msk [vmem:[#allocation4] sm:$0xff] %vm465_vm1, %v7310_v30 }
  0xea   : > { %531 = vst.msk [vmem:[#allocation4 + $0x8] sm:$0xff] %vm465_vm1, %v7310_v30  ;;  %532 = vst.msk [vmem:[#allocation4 + $0x10] sm:$0xff] %vm465_vm1, %v7310_v30 }
  0xeb   : > { %533 = vst.msk [vmem:[#allocation4 + $0x18] sm:$0xff] %vm465_vm1, %v7310_v30  ;;  %534 = vst.msk [vmem:[#allocation4 + $0x20] sm:$0xff] %vm465_vm1, %v7310_v30 }
  0xec   : > { %535 = vst.msk [vmem:[#allocation4 + $0x28] sm:$0xff] %vm465_vm1, %v7310_v30  ;;  %536 = vst.msk [vmem:[#allocation4 + $0x30] sm:$0xff] %vm465_vm1, %v7310_v30 }
  0xed   : > { %5994 = vmatmul.mubr.msk.bf16.vlgmr.msra.gmra.mrb[0].mxu0 %vm754_vm0, %v7702_v16  ;;  %537 = vst.msk [vmem:[#allocation4 + $0x38] sm:$0xff] %vm465_vm1, %v7310_v30  ;;  %538 = vst.msk [vmem:[#allocation4 + $0x40] sm:$0xff] %vm465_vm1, %v7310_v30 }
  0xee   : > { %5995 = vmatprep.mubr.msk.bf16.mxu0 %vm754_vm0, %v7725_v36  ;;  %539 = vst.msk [vmem:[#allocation4 + $0x48] sm:$0xff] %vm465_vm1, %v7310_v30  ;;  %540 = vst.msk [vmem:[#allocation4 + $0x50] sm:$0xff] %vm465_vm1, %v7310_v30 }
  0xef   : > { %541 = vst.msk [vmem:[#allocation4 + $0x58] sm:$0xff] %vm465_vm1, %v7310_v30  ;;  %542 = vst.msk [vmem:[#allocation4 + $0x60] sm:$0xff] %vm465_vm1, %v7310_v30 }
  0xf0   : > { %543 = vst.msk [vmem:[#allocation4 + $0x68] sm:$0xff] %vm465_vm1, %v7310_v30  ;;  %544 = vst.msk [vmem:[#allocation4 + $0x70] sm:$0xff] %vm465_vm1, %v7310_v30 }
  0xf1   : > { %545 = vst.msk [vmem:[#allocation4 + $0x78] sm:$0xff] %vm465_vm1, %v7310_v30  ;;  %546 = vst.msk [vmem:[#allocation4 + $0x80] sm:$0xff] %vm465_vm1, %v7310_v30 }
  0xf2   : > { %547 = vst.msk [vmem:[#allocation4 + $0x88] sm:$0xff] %vm465_vm1, %v7310_v30  ;;  %548 = vst.msk [vmem:[#allocation4 + $0x90] sm:$0xff] %vm465_vm1, %v7310_v30 }
  0xf3   : > { %549 = vst.msk [vmem:[#allocation4 + $0x98] sm:$0xff] %vm465_vm1, %v7310_v30  ;;  %550 = vst.msk [vmem:[#allocation4 + $0xa0] sm:$0xff] %vm465_vm1, %v7310_v30 }
  0xf4   : > { %551 = vst.msk [vmem:[#allocation4 + $0xa8] sm:$0xff] %vm465_vm1, %v7310_v30  ;;  %552 = vst.msk [vmem:[#allocation4 + $0xb0] sm:$0xff] %vm465_vm1, %v7310_v30 }
  0xf5   : > { %5996 = vmatmul.mubr.msk.bf16.gmra.mrb[4].mxu0 %vm754_vm0, %v7725_v36  ;;  %553 = vst.msk [vmem:[#allocation4 + $0xb8] sm:$0xff] %vm465_vm1, %v7310_v30  ;;  %554 = vst.msk [vmem:[#allocation4 + $0xc0] sm:$0xff] %vm465_vm1, %v7310_v30 }
  0xf6   : > { %5997 = vmatprep.mubr.msk.bf16.mxu0 %vm754_vm0, %v7732_v42  ;;  %555 = vst.msk [vmem:[#allocation4 + $0xc8] sm:$0xff] %vm465_vm1, %v7310_v30  ;;  %556 = vst.msk [vmem:[#allocation4 + $0xd0] sm:$0xff] %vm465_vm1, %v7310_v30 }
  0xf7   : > { %557 = vst.msk [vmem:[#allocation4 + $0xd8] sm:$0xff] %vm465_vm1, %v7310_v30  ;;  %558 = vst.msk [vmem:[#allocation4 + $0xe0] sm:$0xff] %vm465_vm1, %v7310_v30 }
  0xf8   : > { %559 = vst.msk [vmem:[#allocation4 + $0xe8] sm:$0xff] %vm465_vm1, %v7310_v30  ;;  %560 = vst.msk [vmem:[#allocation4 + $0xf0] sm:$0xff] %vm465_vm1, %v7310_v30 }
  0xf9   : > { %561 = vst.msk [vmem:[#allocation4 + $0xf8] sm:$0xff] %vm465_vm1, %v7310_v30  ;;  %562 = vst.msk [vmem:[#allocation4 + $0x100] sm:$0xff] %vm465_vm1, %v7310_v30 }
  0xfa   : > { %563 = vst.msk [vmem:[#allocation4 + $0x108] sm:$0xff] %vm465_vm1, %v7310_v30  ;;  %564 = vst.msk [vmem:[#allocation4 + $0x110] sm:$0xff] %vm465_vm1, %v7310_v30 }
  0xfb   : > { %565 = vst.msk [vmem:[#allocation4 + $0x118] sm:$0xff] %vm465_vm1, %v7310_v30  ;;  %566 = vst.msk [vmem:[#allocation4 + $0x120] sm:$0xff] %vm465_vm1, %v7310_v30 }
  0xfc   : > { %567 = vst.msk [vmem:[#allocation4 + $0x128] sm:$0xff] %vm465_vm1, %v7310_v30  ;;  %568 = vst.msk [vmem:[#allocation4 + $0x130] sm:$0xff] %vm465_vm1, %v7310_v30 }
  0xfd   : > { %5998 = vmatmul.mubr.msk.bf16.gmra.mrb[8].mxu0 %vm754_vm0, %v7732_v42  ;;  %569 = vst.msk [vmem:[#allocation4 + $0x138] sm:$0xff] %vm465_vm1, %v7310_v30  ;;  %570 = vst.msk [vmem:[#allocation4 + $0x140] sm:$0xff] %vm465_vm1, %v7310_v30 }
  0xfe   : > { %5999 = vmatprep.mubr.msk.bf16.mxu0 %vm754_vm0, %v7739_v48  ;;  %571 = vst.msk [vmem:[#allocation4 + $0x148] sm:$0xff] %vm465_vm1, %v7310_v30  ;;  %572 = vst.msk [vmem:[#allocation4 + $0x150] sm:$0xff] %vm465_vm1, %v7310_v30 }
  0xff   : > { %573 = vst.msk [vmem:[#allocation4 + $0x158] sm:$0xff] %vm465_vm1, %v7310_v30  ;;  %574 = vst.msk [vmem:[#allocation4 + $0x160] sm:$0xff] %vm465_vm1, %v7310_v30 }
 0x100   : > { %575 = vst.msk [vmem:[#allocation4 + $0x168] sm:$0xff] %vm465_vm1, %v7310_v30  ;;  %576 = vst.msk [vmem:[#allocation4 + $0x170] sm:$0xff] %vm465_vm1, %v7310_v30 }
 0x101   : > { %577 = vst.msk [vmem:[#allocation4 + $0x178] sm:$0xff] %vm465_vm1, %v7310_v30  ;;  %578 = vst.msk [vmem:[#allocation4 + $0x180] sm:$0xff] %vm465_vm1, %v7310_v30 }
 0x102   : > { %579 = vst.msk [vmem:[#allocation4 + $0x188] sm:$0xff] %vm465_vm1, %v7310_v30  ;;  %580 = vst.msk [vmem:[#allocation4 + $0x190] sm:$0xff] %vm465_vm1, %v7310_v30 }
 0x103   : > { %581 = vst.msk [vmem:[#allocation4 + $0x198] sm:$0xff] %vm465_vm1, %v7310_v30  ;;  %582 = vst.msk [vmem:[#allocation4 + $0x1a0] sm:$0xff] %vm465_vm1, %v7310_v30 }
 0x104   : > { %583 = vst.msk [vmem:[#allocation4 + $0x1a8] sm:$0xff] %vm465_vm1, %v7310_v30  ;;  %584 = vst.msk [vmem:[#allocation4 + $0x1b0] sm:$0xff] %vm465_vm1, %v7310_v30 }
 0x105   : > { %6000 = vmatmul.mubr.msk.bf16.gmra.mrb[12].mxu0 %vm754_vm0, %v7739_v48  ;;  %585 = vst.msk [vmem:[#allocation4 + $0x1b8] sm:$0xff] %vm465_vm1, %v7310_v30  ;;  %586 = vst.msk [vmem:[#allocation4 + $0x1c0] sm:$0xff] %vm465_vm1, %v7310_v30 }
 0x106   : > { %6001 = vmatprep.mubr.msk.bf16.mxu0 %vm754_vm0, %v7746_v54  ;;  %587 = vst.msk [vmem:[#allocation4 + $0x1c8] sm:$0xff] %vm465_vm1, %v7310_v30  ;;  %588 = vst.msk [vmem:[#allocation4 + $0x1d0] sm:$0xff] %vm465_vm1, %v7310_v30 }
 0x107   : > { %589 = vst.msk [vmem:[#allocation4 + $0x1d8] sm:$0xff] %vm465_vm1, %v7310_v30  ;;  %590 = vst.msk [vmem:[#allocation4 + $0x1e0] sm:$0xff] %vm465_vm1, %v7310_v30 }
 0x108   : > { %591 = vst.msk [vmem:[#allocation4 + $0x1e8] sm:$0xff] %vm465_vm1, %v7310_v30  ;;  %592 = vst.msk [vmem:[#allocation4 + $0x1f0] sm:$0xff] %vm465_vm1, %v7310_v30 }
 0x109   : > { %593 = vst.msk [vmem:[#allocation4 + $0x1f8] sm:$0xff] %vm465_vm1, %v7310_v30  ;;  %595 = vst [vmem:[#allocation5 + $0x8] sm:$0xff] %v7310_v30 }
 0x10a   : > { %596 = vst [vmem:[#allocation5 + $0x10] sm:$0xff] %v7310_v30  ;;  %597 = vst [vmem:[#allocation5 + $0x18] sm:$0xff] %v7310_v30 }
 0x10b   : > { %598 = vst [vmem:[#allocation5 + $0x20] sm:$0xff] %v7310_v30  ;;  %599 = vst [vmem:[#allocation5 + $0x28] sm:$0xff] %v7310_v30 }
 0x10c   : > { %600 = vst [vmem:[#allocation5 + $0x30] sm:$0xff] %v7310_v30  ;;  %601 = vst [vmem:[#allocation5 + $0x38] sm:$0xff] %v7310_v30 }
 0x10d   : > { %6002 = vmatmul.mubr.msk.bf16.gmra.mrb[16].mxu0 %vm754_vm0, %v7746_v54  ;;  %602 = vst [vmem:[#allocation5 + $0x40] sm:$0xff] %v7310_v30  ;;  %603 = vst [vmem:[#allocation5 + $0x48] sm:$0xff] %v7310_v30 }
 0x10e   : > { %6003 = vmatprep.mubr.msk.bf16.mxu0 %vm754_vm0, %v7753_v60  ;;  %604 = vst [vmem:[#allocation5 + $0x50] sm:$0xff] %v7310_v30  ;;  %605 = vst [vmem:[#allocation5 + $0x58] sm:$0xff] %v7310_v30 }
 0x10f   : > { %606 = vst [vmem:[#allocation5 + $0x60] sm:$0xff] %v7310_v30  ;;  %607 = vst [vmem:[#allocation5 + $0x68] sm:$0xff] %v7310_v30 }
 0x110   : > { %608 = vst [vmem:[#allocation5 + $0x70] sm:$0xff] %v7310_v30  ;;  %609 = vst [vmem:[#allocation5 + $0x78] sm:$0xff] %v7310_v30 }
 0x111   : > { %610 = vst [vmem:[#allocation5 + $0x80] sm:$0xff] %v7310_v30  ;;  %611 = vst [vmem:[#allocation5 + $0x88] sm:$0xff] %v7310_v30 }
 0x112   : > { %612 = vst [vmem:[#allocation5 + $0x90] sm:$0xff] %v7310_v30  ;;  %613 = vst [vmem:[#allocation5 + $0x98] sm:$0xff] %v7310_v30 }
 0x113   : > { %614 = vst [vmem:[#allocation5 + $0xa0] sm:$0xff] %v7310_v30  ;;  %615 = vst [vmem:[#allocation5 + $0xa8] sm:$0xff] %v7310_v30 }
 0x114   : > { %616 = vst [vmem:[#allocation5 + $0xb0] sm:$0xff] %v7310_v30  ;;  %617 = vst [vmem:[#allocation5 + $0xb8] sm:$0xff] %v7310_v30 }
 0x115   : > { %6004 = vmatmul.mubr.msk.bf16.gmra.mrb[20].mxu0 %vm754_vm0, %v7753_v60  ;;  %618 = vst [vmem:[#allocation5 + $0xc0] sm:$0xff] %v7310_v30  ;;  %619 = vst [vmem:[#allocation5 + $0xc8] sm:$0xff] %v7310_v30 }
 0x116   : > { %6005 = vmatprep.mubr.msk.bf16.mxu0 %vm754_vm0, %v7760_v2  ;;  %620 = vst [vmem:[#allocation5 + $0xd0] sm:$0xff] %v7310_v30  ;;  %621 = vst [vmem:[#allocation5 + $0xd8] sm:$0xff] %v7310_v30 }
 0x117   : > { %622 = vst [vmem:[#allocation5 + $0xe0] sm:$0xff] %v7310_v30  ;;  %623 = vst [vmem:[#allocation5 + $0xe8] sm:$0xff] %v7310_v30 }
 0x118   : > { %624 = vst [vmem:[#allocation5 + $0xf0] sm:$0xff] %v7310_v30  ;;  %625 = vst [vmem:[#allocation5 + $0xf8] sm:$0xff] %v7310_v30 }
 0x11d   : > { %6006 = vmatmul.mubr.msk.bf16.gmra.mrb[24].mxu0 %vm754_vm0, %v7760_v2 }
 0x11e   : > { %6007 = vmatprep.mubr.msk.bf16.mxu0 %vm754_vm0, %v7767_v8 }
 0x125   : > { %6008 = vmatmul.mubr.msk.bf16.gmra.mrb[28].mxu0 %vm754_vm0, %v7767_v8 }
 0x126   : > { %6009 = vmatprep.mubr.msk.bf16.mxu0 %vm754_vm0, %v7774_v14 }
 0x12d   : > { %6010 = vmatmul.mubr.msk.bf16.gmra.mrb[32].mxu0 %vm754_vm0, %v7774_v14 }
 0x12e   : > { %6011 = vmatprep.mubr.msk.bf16.mxu0 %vm754_vm0, %v7781_v21 }
 0x135   : > { %6012 = vmatmul.mubr.msk.bf16.gmra.mrb[36].mxu0 %vm754_vm0, %v7781_v21 }
 0x136   : > { %6013 = vmatprep.mubr.msk.bf16.mxu0 %vm754_vm0, %v7788_v27 }
 0x13d   : > { %6014 = vmatmul.mubr.msk.bf16.gmra.mrb[40].mxu0 %vm754_vm0, %v7788_v27 }
 0x13e   : > { %6015 = vmatprep.mubr.msk.bf16.mxu0 %vm754_vm0, %v7795_v33 }
 0x145   : > { %6016 = vmatmul.mubr.msk.bf16.gmra.mrb[44].mxu0 %vm754_vm0, %v7795_v33 }
 0x146   : > { %6017 = vmatprep.mubr.msk.bf16.mxu0 %vm754_vm0, %v7802_v40 }
 0x14d   : > { %6018 = vmatmul.mubr.msk.bf16.gmra.mrb[48].mxu0 %vm754_vm0, %v7802_v40 }
 0x14e   : > { %6019 = vmatprep.mubr.msk.bf16.mxu0 %vm754_vm0, %v7809_v47 }
 0x155   : > { %6020 = vmatmul.mubr.msk.bf16.gmra.mrb[52].mxu0 %vm754_vm0, %v7809_v47 }
 0x156   : > { %6021 = vmatprep.mubr.msk.bf16.mxu0 %vm754_vm0, %v7816_v55 }
 0x15d   : > { %6022 = vmatmul.mubr.msk.bf16.gmra.mrb[56].mxu0 %vm754_vm0, %v7816_v55 }
 0x15e   : > { %6023 = vmatprep.mubr.msk.bf16.mxu0 %vm754_vm0, %v7822_v61 }
 0x165   : > { %6024 = vmatmul.mubr.msk.bf16.gmra.mrb[60].mxu0 %vm754_vm0, %v7822_v61 }
 0x1c0   : > { %v7830_v62 = vpop.f32.mrb[0].mxu0 }
 0x1c1   : > { %v7832_v63 = vpop.f32.mrb[1].mxu0 }
 0x1c2   : > { %v7834_v0 = vpop.f32.mrb[2].mxu0  ;;  %v1076_v1 = vmax.f32 %v7830_v62, %v7832_v63 }
 0x1c3   : > { %v7838_v3 = vpop.f32.mrb[3].mxu0 }
 0x1c4   : > { %1077 = vmax.xlane.f32.xlu0 %v1076_v1  ;;  %v1079_v4 = vmax.f32 %v7834_v0, %v7838_v3 }
 0x1c8   : > { %1080 = vmax.xlane.f32.xlu0 %v1079_v4  ;;  %v7842_v5 = vpop.f32.mrb[4].mxu0 }
 0x1c9   : > { %v7844_v6 = vpop.f32.mrb[5].mxu0 }
 0x1ca   : > { %v7846_v7 = vpop.f32.mrb[6].mxu0  ;;  %v1082_v9 = vmax.f32 %v7842_v5, %v7844_v6 }
 0x1cb   : > { %v7978_v11 = vpop.f32.mrb[7].mxu0 }
 0x1cc   : > { %1083 = vmax.xlane.f32.xlu1 %v1082_v9  ;;  %v1085_v12 = vmax.f32 %v7846_v7, %v7978_v11 }
 0x1d0   : > { %1086 = vmax.xlane.f32.xlu1 %v1085_v12  ;;  %v7985_v13 = vpop.f32.mrb[8].mxu0 }
 0x1d1   : > { %v7987_v15 = vpop.f32.mrb[9].mxu0 }
 0x1d2   : > { %v7989_v17 = vpop.f32.mrb[10].mxu0  ;;  %v1088_v18 = vmax.f32 %v7985_v13, %v7987_v15 }
 0x1d3   : > { %v7993_v19 = vpop.f32.mrb[11].mxu0 }
 0x1d4   : > { %1089 = vmax.xlane.f32.xlu0 %v1088_v18  ;;  %v1091_v22 = vmax.f32 %v7989_v17, %v7993_v19 }
 0x1d6   : > { %1092 = vmax.xlane.f32.xlu1 %v1091_v22 }
 0x1d8   : > { %v7997_v23 = vpop.f32.mrb[12].mxu0 }
 0x1d9   : > { %v7999_v24 = vpop.f32.mrb[13].mxu0 }
 0x1da   : > { %v8001_v25 = vpop.f32.mrb[14].mxu0  ;;  %v1094_v26 = vmax.f32 %v7997_v23, %v7999_v24 }
 0x1db   : > { %v8005_v28 = vpop.f32.mrb[15].mxu0 }
 0x1dc   : > { %1095 = vmax.xlane.f32.xlu0 %v1094_v26  ;;  %v1097_v29 = vmax.f32 %v8001_v25, %v8005_v28 }
 0x1de   : > { %1098 = vmax.xlane.f32.xlu1 %v1097_v29 }
 0x1e0   : > { %v8172_v31 = vpop.f32.mrb[16].mxu0 }
 0x1e1   : > { %v8174_v32 = vpop.f32.mrb[17].mxu0 }
 0x1e2   : > { %v8176_v34 = vpop.f32.mrb[18].mxu0  ;;  %v1100_v35 = vmax.f32 %v8172_v31, %v8174_v32 }
 0x1e3   : > { %v8180_v37 = vpop.f32.mrb[19].mxu0 }
 0x1e4   : > { %1101 = vmax.xlane.f32.xlu0 %v1100_v35  ;;  %v1103_v38 = vmax.f32 %v8176_v34, %v8180_v37 }
 0x1e6   : > { %1104 = vmax.xlane.f32.xlu1 %v1103_v38 }
 0x1e8   : > { %v8184_v39 = vpop.f32.mrb[20].mxu0 }
 0x1e9   : > { %v8186_v41 = vpop.f32.mrb[21].mxu0 }
 0x1ea   : > { %v8188_v43 = vpop.f32.mrb[22].mxu0  ;;  %v1106_v44 = vmax.f32 %v8184_v39, %v8186_v41 }
 0x1eb   : > { %v8192_v45 = vpop.f32.mrb[23].mxu0 }
 0x1ec   : > { %1107 = vmax.xlane.f32.xlu0 %v1106_v44  ;;  %v1109_v46 = vmax.f32 %v8188_v43, %v8192_v45 }
 0x1ee   : > { %1110 = vmax.xlane.f32.xlu1 %v1109_v46 }
 0x1f0   : > { %v8196_v49 = vpop.f32.mrb[24].mxu0 }
 0x1f1   : > { %v8198_v50 = vpop.f32.mrb[25].mxu0 }
 0x1f2   : > { %v8200_v51 = vpop.f32.mrb[26].mxu0  ;;  %v1112_v52 = vmax.f32 %v8196_v49, %v8198_v50 }
 0x1f3   : > { %v8204_v53 = vpop.f32.mrb[27].mxu0 }
 0x1f4   : > { %1113 = vmax.xlane.f32.xlu0 %v1112_v52  ;;  %v1115_v56 = vmax.f32 %v8200_v51, %v8204_v53 }
 0x1f6   : > { %1116 = vmax.xlane.f32.xlu1 %v1115_v56 }
 0x1f8   : > { %v8208_v57 = vpop.f32.mrb[28].mxu0 }
 0x1f9   : > { %10446 = vst [vmem:[#allocation29_spill] sm:$0xff] %v8208_v57  ;;  %v8210_v58 = vpop.f32.mrb[29].mxu0 }
 0x1fa   : > { %10447 = vst [vmem:[#allocation30_spill] sm:$0xff] %v8210_v58  ;;  %v8212_v59 = vpop.f32.mrb[30].mxu0  ;;  %v1118_v1 = vmax.f32 %v8208_v57, %v8210_v58 }
 0x1fb   : > { %10448 = vst [vmem:[#allocation31_spill] sm:$0xff] %v8212_v59  ;;  %v8216_v4 = vpop.f32.mrb[31].mxu0 }
 0x1fc   : > { %10449 = vst [vmem:[#allocation32_spill] sm:$0xff] %v8216_v4  ;;  %1119 = vmax.xlane.f32.xlu0 %v1118_v1  ;;  %v1121_v9 = vmax.f32 %v8212_v59, %v8216_v4  ;;  %v8496_v59 = vld [vmem:[#allocation3 + $0xf0] sm:$0xff] }
 0x1fd   : > { %10505 = vst [vmem:[#allocation88_spill] sm:$0xff] %v8496_v59 }
 0x1fe   : > { %1122 = vmax.xlane.f32.xlu1 %v1121_v9 }
 0x200   : > { %v8220_v10 = vpop.f32.mrb[32].mxu0 }
 0x201   : > { %10450 = vst [vmem:[#allocation33_spill] sm:$0xff] %v8220_v10  ;;  %v8222_v12 = vpop.f32.mrb[33].mxu0 }
 0x202   : > { %10451 = vst [vmem:[#allocation34_spill] sm:$0xff] %v8222_v12  ;;  %v8224_v18 = vpop.f32.mrb[34].mxu0  ;;  %v1124_v20 = vmax.f32 %v8220_v10, %v8222_v12 }
 0x203   : > { %10452 = vst [vmem:[#allocation35_spill] sm:$0xff] %v8224_v18  ;;  %v8228_v22 = vpop.f32.mrb[35].mxu0 }
 0x204   : > { %10453 = vst [vmem:[#allocation36_spill] sm:$0xff] %v8228_v22  ;;  %1125 = vmax.xlane.f32.xlu0 %v1124_v20  ;;  %v1127_v26 = vmax.f32 %v8224_v18, %v8228_v22 }
 0x206   : > { %1128 = vmax.xlane.f32.xlu1 %v1127_v26 }
 0x208   : > { %v8232_v29 = vpop.f32.mrb[36].mxu0 }
 0x209   : > { %10454 = vst [vmem:[#allocation37_spill] sm:$0xff] %v8232_v29  ;;  %v8234_v30 = vpop.f32.mrb[37].mxu0 }
 0x20a   : > { %10455 = vst [vmem:[#allocation38_spill] sm:$0xff] %v8234_v30  ;;  %v8236_v35 = vpop.f32.mrb[38].mxu0  ;;  %v1130_v38 = vmax.f32 %v8232_v29, %v8234_v30 }
 0x20b   : > { %10456 = vst [vmem:[#allocation39_spill] sm:$0xff] %v8236_v35  ;;  %v8240_v44 = vpop.f32.mrb[39].mxu0 }
 0x20c   : > { %10457 = vst [vmem:[#allocation40_spill] sm:$0xff] %v8240_v44  ;;  %1131 = vmax.xlane.f32.xlu0 %v1130_v38  ;;  %v1133_v46 = vmax.f32 %v8236_v35, %v8240_v44  ;;  %v6501_v35 = vld [vmem:[%s7680_s15 + $0x50] sm:$0xff]  }
 0x20e   : > { %1134 = vmax.xlane.f32.xlu1 %v1133_v46 }
 0x210   : > { %v8244_v52 = vpop.f32.mrb[40].mxu0 }
 0x211   : > { %10458 = vst [vmem:[#allocation41_spill] sm:$0xff] %v8244_v52  ;;  %v8246_v56 = vpop.f32.mrb[41].mxu0 }
 0x212   : > { %10459 = vst [vmem:[#allocation42_spill] sm:$0xff] %v8246_v56  ;;  %v8248_v1 = vpop.f32.mrb[42].mxu0  ;;  %v1136_v9 = vmax.f32 %v8244_v52, %v8246_v56 }
 0x213   : > { %10460 = vst [vmem:[#allocation43_spill] sm:$0xff] %v8248_v1  ;;  %v8252_v20 = vpop.f32.mrb[43].mxu0 }
 0x214   : > { %10461 = vst [vmem:[#allocation44_spill] sm:$0xff] %v8252_v20  ;;  %1137 = vmax.xlane.f32.xlu0 %v1136_v9  ;;  %v1139_v26 = vmax.f32 %v8248_v1, %v8252_v20 }
 0x216   : > { %1140 = vmax.xlane.f32.xlu1 %v1139_v26 }
 0x218   : > { %v8256_v38 = vpop.f32.mrb[44].mxu0 }
 0x219   : > { %10462 = vst [vmem:[#allocation45_spill] sm:$0xff] %v8256_v38  ;;  %v8258_v30 = vpop.f32.mrb[45].mxu0 }
 0x21a   : > { %10463 = vst [vmem:[#allocation46_spill] sm:$0xff] %v8258_v30  ;;  %v8260_v46 = vpop.f32.mrb[46].mxu0  ;;  %v1142_v29 = vmax.f32 %v8256_v38, %v8258_v30 }
 0x21b   : > { %10464 = vst [vmem:[#allocation47_spill] sm:$0xff] %v8260_v46  ;;  %v8264_v44 = vpop.f32.mrb[47].mxu0 }
 0x21c   : > { %10465 = vst [vmem:[#allocation48_spill] sm:$0xff] %v8264_v44  ;;  %1143 = vmax.xlane.f32.xlu0 %v1142_v29  ;;  %v1145_v56 = vmax.f32 %v8260_v46, %v8264_v44 }
 0x21e   : > { %1146 = vmax.xlane.f32.xlu1 %v1145_v56 }
 0x220   : > { %v8268_v9 = vpop.f32.mrb[48].mxu0 }
 0x221   : > { %10466 = vst [vmem:[#allocation49_spill] sm:$0xff] %v8268_v9  ;;  %v8270_v52 = vpop.f32.mrb[49].mxu0 }
 0x222   : > { %10467 = vst [vmem:[#allocation50_spill] sm:$0xff] %v8270_v52  ;;  %v8272_v26 = vpop.f32.mrb[50].mxu0  ;;  %v1148_v20 = vmax.f32 %v8268_v9, %v8270_v52 }
 0x223   : > { %10468 = vst [vmem:[#allocation51_spill] sm:$0xff] %v8272_v26  ;;  %v8276_v1 = vpop.f32.mrb[51].mxu0 }
 0x224   : > { %10469 = vst [vmem:[#allocation52_spill] sm:$0xff] %v8276_v1  ;;  %1149 = vmax.xlane.f32.xlu0 %v1148_v20  ;;  %v1151_v29 = vmax.f32 %v8272_v26, %v8276_v1  ;;  %v6497_v1 = vld [vmem:[%s7680_s15] sm:$0xff]  }
 0x226   : > { %1152 = vmax.xlane.f32.xlu1 %v1151_v29  ;;  %v6496_v29 = vld [vmem:[%s7680_s15 + $0x40] sm:$0xff]  }
 0x227   : > { %6025 = vmatprep.subr.bf16.mxu1 %v6496_v29 }
 0x228   : > { %v8280_v30 = vpop.f32.mrb[52].mxu0  ;;  %6026 = vmatpush3.bf16.msra.mxu1 %v6497_v1 }
 0x229   : > { %10470 = vst [vmem:[#allocation53_spill] sm:$0xff] %v8280_v30  ;;  %v8282_v56 = vpop.f32.mrb[53].mxu0 }
 0x22a   : > { %10471 = vst [vmem:[#allocation54_spill] sm:$0xff] %v8282_v56  ;;  %v8284_v38 = vpop.f32.mrb[54].mxu0  ;;  %v1154_v44 = vmax.f32 %v8280_v30, %v8282_v56 }
 0x22b   : > { %10472 = vst [vmem:[#allocation55_spill] sm:$0xff] %v8284_v38  ;;  %v8288_v46 = vpop.f32.mrb[55].mxu0 }
 0x22c   : > { %10473 = vst [vmem:[#allocation56_spill] sm:$0xff] %v8288_v46  ;;  %1155 = vmax.xlane.f32.xlu0 %v1154_v44  ;;  %v1157_v20 = vmax.f32 %v8284_v38, %v8288_v46  ;;  %v6500_v46 = vld [vmem:[%s7680_s15 + $0x8] sm:$0xff]  }
 0x22e   : > { %1158 = vmax.xlane.f32.xlu1 %v1157_v20  ;;  %v6499_v20 = vld [vmem:[%s7680_s15 + $0x48] sm:$0xff]  }
 0x22f   : > { %6027 = vmatprep.subr.bf16.mxu1 %v6499_v20  ;;  %v6505_v20 = vld [vmem:[%s7680_s15 + $0x18] sm:$0xff]  }
 0x230   : > { %v8292_v52 = vpop.f32.mrb[56].mxu0  ;;  %6028 = vmatpush3.bf16.msra.mxu1 %v6500_v46 }
 0x231   : > { %10474 = vst [vmem:[#allocation57_spill] sm:$0xff] %v8292_v52  ;;  %v8295_v9 = vpop.f32.mrb[57].mxu0  ;;  %6029 = vmatprep.subr.bf16.mxu1 %v6501_v35  ;;  %v6509_v35 = vld [vmem:[%s7680_s15 + $0x68] sm:$0xff]  }
 0x232   : > { %10475 = vst [vmem:[#allocation58_spill] sm:$0xff] %v8295_v9  ;;  %v8298_v26 = vpop.f32.mrb[58].mxu0  ;;  %v1160_v56 = vmax.f32 %v8292_v52, %v8295_v9  ;;  %v6502_v9 = vld [vmem:[%s7680_s15 + $0x10] sm:$0xff]  }
 0x233   : > { %10476 = vst [vmem:[#allocation59_spill] sm:$0xff] %v8298_v26  ;;  %v8302_v30 = vpop.f32.mrb[59].mxu0 }
 0x234   : > { %10477 = vst [vmem:[#allocation60_spill] sm:$0xff] %v8302_v30  ;;  %1161 = vmax.xlane.f32.xlu0 %v1160_v56  ;;  %v1163_v44 = vmax.f32 %v8298_v26, %v8302_v30  ;;  %6030 = vmatpush3.bf16.msra.mxu1 %v6502_v9  ;;  %v6510_v9 = vld [vmem:[%s7680_s15 + $0x28] sm:$0xff]   ;;  %v6512_v30 = vld [vmem:[%s7680_s15 + $0x30] sm:$0xff]  }
 0x236   : > { %1164 = vmax.xlane.f32.xlu1 %v1163_v44  ;;  %v6504_v44 = vld [vmem:[%s7680_s15 + $0x58] sm:$0xff]  }
 0x237   : > { %6031 = vmatprep.subr.bf16.mxu1 %v6504_v44  ;;  %v1044_v44 = vld [vmem:[#allocation3] sm:$0xff] }
 0x238   : > { %v8308_v38 = vpop.f32.mrb[60].mxu0  ;;  %6032 = vmatpush3.bf16.msra.mxu1 %v6505_v20 }
 0x239   : > { %10478 = vst [vmem:[#allocation61_spill] sm:$0xff] %v8308_v38  ;;  %v8311_v29 = vpop.f32.mrb[61].mxu0 }
 0x23a   : > { %10479 = vst [vmem:[#allocation62_spill] sm:$0xff] %v8311_v29  ;;  %v8314_v1 = vpop.f32.mrb[62].mxu0  ;;  %v1166_v56 = vmax.f32 %v8308_v38, %v8311_v29  ;;  %v6506_v29 = vld [vmem:[%s7680_s15 + $0x60] sm:$0xff]  }
 0x23b   : > { %10480 = vst [vmem:[#allocation63_spill] sm:$0xff] %v8314_v1  ;;  %v8318_v52 = vpop.f32.mrb[63].mxu0  ;;  %v6507_v38 = vld [vmem:[%s7680_s15 + $0x20] sm:$0xff]   ;;  %6033 = vmatprep.subr.bf16.mxu1 %v6506_v29  ;;  %v6494_v29 = vld [vmem:[%s7673_s27 + $0x8] sm:$0xff]  }
 0x23c   : > { %10481 = vst [vmem:[#allocation64_spill] sm:$0xff] %v8318_v52  ;;  %1167 = vmax.xlane.f32.xlu0 %v1166_v56  ;;  %v1169_v46 = vmax.f32 %v8314_v1, %v8318_v52  ;;  %6034 = vmatpush3.bf16.msra.mxu1 %v6507_v38  ;;  %v6511_v56 = vld [vmem:[%s7680_s15 + $0x70] sm:$0xff]   ;;  %v6493_v52 = vld [vmem:[%s7673_s27 + $0x40] sm:$0xff]   ;;  %v6516_v1 = vld [vmem:[%s7680_s15 + $0x38] sm:$0xff]  }
 0x23d   : > { %6035 = vmatprep.subr.bf16.mxu1 %v6509_v35  ;;  %v1045_v35 = vld [vmem:[#allocation3 + $0x8] sm:$0xff] }
 0x23e   : > { %1170 = vmax.xlane.f32.xlu1 %v1169_v46  ;;  %v6515_v46 = vld [vmem:[%s7680_s15 + $0x78] sm:$0xff]  }
 0x240   : > { %6036 = vmatpush3.bf16.msra.mxu1 %v6510_v9 }
 0x241   : > { %6037 = vmatprep.subr.bf16.mxu1 %v6511_v56 }
 0x244   : > { %6038 = vmatpush3.bf16.msra.mxu1 %v6512_v30  ;;  %v6495_v30 = vld [vmem:[%s7673_s27] sm:$0xff]  }
 0x245   : > { %6039 = vmatprep.subr.bf16.mxu1 %v6515_v46  ;;  %v1046_v46 = vld [vmem:[#allocation3 + $0x10] sm:$0xff] }
 0x248   : > { %6040 = vmatpush3.bf16.msra.mxu1 %v6516_v1 }
 0x24f   : > { %2710 = vrot.lane.b32.xlu1 %v6493_v52, %s7311_s26 }
 0x251   : > { %v1078_v38 = vpop.xlane.xlu0 %1077 }
 0x252   : > { %v1172_v20 = vmax.f32 %v1044_v44, %v1078_v38  ;;  %v1047_v38 = vld [vmem:[#allocation3 + $0x18] sm:$0xff] }
 0x253   : > { %2696 = vrot.lane.b32.xlu1 %v6494_v29, %s7311_s26 }
 0x254   : > { %v1204_v9 = vsub.f32 %v1044_v44, %v1172_v20  ;;  %1909 = vst.msk [vmem:[#allocation3] sm:$0xff] %vm465_vm1, %v1172_v20  ;;  %1302 = vperm.xlu0 %6475, %v1172_v20  }
 0x255   : > { %v1081_v56 = vpop.xlane.xlu0 %1080 }
 0x256   : > { %v1236_v26 = vmul.f32 1.442695, %v1204_v9  ;;  %v1173_v12 = vmax.f32 %v1045_v35, %v1081_v56  ;;  %v1048_v56 = vld [vmem:[#allocation3 + $0x20] sm:$0xff] }
 0x258   : > { %6541 = vpow2.f32 %v1236_v26  ;;  %v1205_v10 = vsub.f32 %v1045_v35, %v1173_v12  ;;  %1910 = vst.msk [vmem:[#allocation3 + $0x8] sm:$0xff] %vm465_vm1, %v1173_v12  ;;  %1307 = vperm.xlu1 %6476, %v1173_v12   ;;  %2694 = vrot.lane.b32.xlu0 %v6495_v30, %s7311_s26  ;;  %v1049_v35 = vld [vmem:[#allocation3 + $0x28] sm:$0xff] }
 0x259   : > { %v1084_v52 = vpop.xlane.xlu1 %1083 }
 0x25a   : > { %v1238_v1 = vmul.f32 1.442695, %v1205_v10  ;;  %v1174_v29 = vmax.f32 %v1046_v46, %v1084_v52 }
 0x25c   : > { %6543 = vpow2.f32 %v1238_v1  ;;  %1911 = vst.msk [vmem:[#allocation3 + $0x10] sm:$0xff] %vm465_vm1, %v1174_v29  ;;  %1312 = vperm.xlu1 %6476, %v1174_v29   ;;  %v1206_v44 = vsub.f32 %v1046_v46, %v1174_v29 }
 0x25d   : > { %v1087_v20 = vpop.xlane.xlu1 %1086 }
 0x25e   : > { %v1175_v9 = vmax.f32 %v1047_v38, %v1087_v20  ;;  %v1240_v26 = vmul.f32 1.442695, %v1206_v44 }
 0x260   : > { %v1207_v22 = vsub.f32 %v1047_v38, %v1175_v9  ;;  %1912 = vst.msk [vmem:[#allocation3 + $0x18] sm:$0xff] %vm465_vm1, %v1175_v9  ;;  %1317 = vperm.xlu1 %6476, %v1175_v9   ;;  %v1050_v38 = vld [vmem:[#allocation3 + $0x30] sm:$0xff]  ;;  %v1051_v9 = vld [vmem:[#allocation3 + $0x38] sm:$0xff] }
 0x261   : > { %v1090_v12 = vpop.xlane.xlu0 %1089 }
 0x262   : > { %v8342_v30 = vpop.eup %6541  ;;  %v1242_v10 = vmul.f32 1.442695, %v1207_v22  ;;  %v1176_v52 = vmax.f32 %v1048_v56, %v1090_v12 }
 0x263   : > { %10482 = vst [vmem:[#allocation65_spill] sm:$0xff] %v8342_v30  ;;  %v1093_v18 = vpop.xlane.xlu1 %1092  ;;  %2264 = vperm.xlu0 %6475, %v8342_v30  }
 0x264   : > { %6545 = vpow2.f32 %v1242_v10  ;;  %1913 = vst.msk [vmem:[#allocation3 + $0x20] sm:$0xff] %vm465_vm1, %v1176_v52  ;;  %v1177_v46 = vmax.f32 %v1049_v35, %v1093_v18  ;;  %1322 = vperm.xlu1 %6476, %v1176_v52   ;;  %v1208_v22 = vsub.f32 %v1048_v56, %v1176_v52  ;;  %v1052_v56 = vld [vmem:[#allocation3 + $0x40] sm:$0xff] }
 0x265   : > { %6547 = vpow2.f32 %v1240_v26 }
 0x266   : > { %v8346_v1 = vpop.eup %6543  ;;  %v1209_v29 = vsub.f32 %v1049_v35, %v1177_v46  ;;  %1914 = vst.msk [vmem:[#allocation3 + $0x28] sm:$0xff] %vm465_vm1, %v1177_v46  ;;  %v1244_v26 = vmul.f32 1.442695, %v1208_v22 }
 0x267   : > { %10483 = vst [vmem:[#allocation66_spill] sm:$0xff] %v8346_v1 }
 0x268   : > { %v1246_v44 = vmul.f32 1.442695, %v1209_v29  ;;  %2269 = vperm.xlu1 %6476, %v8346_v1  }
 0x269   : > { %v1096_v20 = vpop.xlane.xlu0 %1095 }
 0x26a   : > { %6549 = vpow2.f32 %v1246_v44  ;;  %v1178_v12 = vmax.f32 %v1050_v38, %v1096_v20  ;;  %v1053_v20 = vld [vmem:[#allocation3 + $0x48] sm:$0xff] }
 0x26b   : > { %v1099_v10 = vpop.xlane.xlu1 %1098  ;;  %6551 = vpow2.f32 %v1244_v26 }
 0x26c   : > { %1915 = vst.msk [vmem:[#allocation3 + $0x30] sm:$0xff] %vm465_vm1, %v1178_v12  ;;  %v1179_v18 = vmax.f32 %v1051_v9, %v1099_v10  ;;  %1327 = vperm.xlu1 %6476, %v1177_v46   ;;  %v1210_v29 = vsub.f32 %v1050_v38, %v1178_v12 }
 0x26e   : > { %v8351_v30 = vpop.eup %6545  ;;  %v1211_v35 = vsub.f32 %v1051_v9, %v1179_v18  ;;  %1916 = vst.msk [vmem:[#allocation3 + $0x38] sm:$0xff] %vm465_vm1, %v1179_v18  ;;  %v1248_v1 = vmul.f32 1.442695, %v1210_v29 }
 0x26f   : > { %10484 = vst [vmem:[#allocation67_spill] sm:$0xff] %v8351_v30  ;;  %v8354_v58 = vpop.eup %6547  ;;  %2279 = vperm.xlu0 %6475, %v8351_v30  }
 0x270   : > { %10485 = vst [vmem:[#allocation68_spill] sm:$0xff] %v8354_v58  ;;  %v1250_v52 = vmul.f32 1.442695, %v1211_v35  ;;  %2274 = vperm.xlu1 %6476, %v8354_v58   ;;  %v1054_v35 = vld [vmem:[#allocation3 + $0x50] sm:$0xff] }
 0x271   : > { %v1102_v44 = vpop.xlane.xlu0 %1101 }
 0x272   : > { %6553 = vpow2.f32 %v1250_v52  ;;  %v1180_v46 = vmax.f32 %v1052_v56, %v1102_v44  ;;  %v1055_v44 = vld [vmem:[#allocation3 + $0x58] sm:$0xff] }
 0x273   : > { %v1105_v22 = vpop.xlane.xlu1 %1104  ;;  %6555 = vpow2.f32 %v1248_v1  ;;  %v1056_v1 = vld [vmem:[#allocation3 + $0x60] sm:$0xff] }
 0x274   : > { %v8358_v10 = vpop.eup %6549  ;;  %1917 = vst.msk [vmem:[#allocation3 + $0x40] sm:$0xff] %vm465_vm1, %v1180_v46  ;;  %v1181_v9 = vmax.f32 %v1053_v20, %v1105_v22  ;;  %1332 = vperm.xlu1 %6476, %v1178_v12   ;;  %v1212_v38 = vsub.f32 %v1052_v56, %v1180_v46 }
 0x275   : > { %10486 = vst [vmem:[#allocation69_spill] sm:$0xff] %v8358_v10  ;;  %2289 = vperm.xlu0 %6475, %v8358_v10   ;;  %v8363_v57 = vpop.eup %6551 }
 0x276   : > { %v1213_v30 = vsub.f32 %v1053_v20, %v1181_v9  ;;  %1918 = vst.msk [vmem:[#allocation3 + $0x48] sm:$0xff] %vm465_vm1, %v1181_v9  ;;  %10487 = vst [vmem:[#allocation70_spill] sm:$0xff] %v8363_v57  ;;  %v1252_v20 = vmul.f32 1.442695, %v1212_v38 }
 0x278   : > { %v1254_v26 = vmul.f32 1.442695, %v1213_v30  ;;  %1337 = vperm.xlu1 %6476, %v1179_v18  }
 0x279   : > { %v1108_v52 = vpop.xlane.xlu0 %1107  ;;  %1347 = vperm.xlu0 %6475, %v1181_v9  }
 0x27a   : > { %6557 = vpow2.f32 %v1254_v26  ;;  %v1182_v58 = vmax.f32 %v1054_v35, %v1108_v52  ;;  %v1057_v26 = vld [vmem:[#allocation3 + $0x68] sm:$0xff] }
 0x27b   : > { %v1111_v22 = vpop.xlane.xlu1 %1110  ;;  %6559 = vpow2.f32 %v1252_v20 }
 0x27c   : > { %v8365_v12 = vpop.eup %6553  ;;  %1919 = vst.msk [vmem:[#allocation3 + $0x50] sm:$0xff] %vm465_vm1, %v1182_v58  ;;  %v1183_v29 = vmax.f32 %v1055_v44, %v1111_v22  ;;  %2284 = vperm.xlu1 %6476, %v8363_v57   ;;  %v1214_v56 = vsub.f32 %v1054_v35, %v1182_v58  ;;  %v1058_v35 = vld [vmem:[#allocation3 + $0x70] sm:$0xff] }
 0x27d   : > { %10488 = vst [vmem:[#allocation71_spill] sm:$0xff] %v8365_v12  ;;  %2299 = vperm.xlu0 %6475, %v8365_v12   ;;  %v8371_v10 = vpop.eup %6555 }
 0x27e   : > { %v1215_v30 = vsub.f32 %v1055_v44, %v1183_v29  ;;  %1920 = vst.msk [vmem:[#allocation3 + $0x58] sm:$0xff] %vm465_vm1, %v1183_v29  ;;  %10489 = vst [vmem:[#allocation72_spill] sm:$0xff] %v8371_v10  ;;  %v1256_v44 = vmul.f32 1.442695, %v1214_v56 }
 0x280   : > { %v1258_v18 = vmul.f32 1.442695, %v1215_v30  ;;  %1342 = vperm.xlu1 %6476, %v1180_v46  }
 0x281   : > { %v1114_v9 = vpop.xlane.xlu0 %1113  ;;  %1357 = vperm.xlu0 %6475, %v1183_v29  }
 0x282   : > { %6561 = vpow2.f32 %v1258_v18  ;;  %v1184_v52 = vmax.f32 %v1056_v1, %v1114_v9  ;;  %v1059_v18 = vld [vmem:[#allocation3 + $0x78] sm:$0xff] }
 0x283   : > { %v1117_v22 = vpop.xlane.xlu1 %1116  ;;  %6563 = vpow2.f32 %v1256_v44 }
 0x284   : > { %v8373_v57 = vpop.eup %6557  ;;  %1921 = vst.msk [vmem:[#allocation3 + $0x60] sm:$0xff] %vm465_vm1, %v1184_v52  ;;  %v1185_v38 = vmax.f32 %v1057_v26, %v1117_v22  ;;  %2294 = vperm.xlu1 %6476, %v8371_v10   ;;  %v1216_v20 = vsub.f32 %v1056_v1, %v1184_v52  ;;  %v1060_v1 = vld [vmem:[#allocation3 + $0x80] sm:$0xff] }
 0x285   : > { %10490 = vst [vmem:[#allocation73_spill] sm:$0xff] %v8373_v57  ;;  %2309 = vperm.xlu0 %6475, %v8373_v57   ;;  %v8379_v12 = vpop.eup %6559 }
 0x286   : > { %v1217_v46 = vsub.f32 %v1057_v26, %v1185_v38  ;;  %1922 = vst.msk [vmem:[#allocation3 + $0x68] sm:$0xff] %vm465_vm1, %v1185_v38  ;;  %10491 = vst [vmem:[#allocation74_spill] sm:$0xff] %v8379_v12  ;;  %v1260_v26 = vmul.f32 1.442695, %v1216_v20 }
 0x288   : > { %v1262_v29 = vmul.f32 1.442695, %v1217_v46  ;;  %1352 = vperm.xlu1 %6476, %v1182_v58  }
 0x289   : > { %v1120_v30 = vpop.xlane.xlu0 %1119  ;;  %1367 = vperm.xlu0 %6475, %v1185_v38  }
 0x28a   : > { %6565 = vpow2.f32 %v1262_v29  ;;  %v1186_v9 = vmax.f32 %v1058_v35, %v1120_v30  ;;  %v1061_v29 = vld [vmem:[#allocation3 + $0x88] sm:$0xff] }
 0x28b   : > { %v1123_v22 = vpop.xlane.xlu1 %1122  ;;  %6567 = vpow2.f32 %v1260_v26 }
 0x28c   : > { %v8381_v10 = vpop.eup %6561  ;;  %1923 = vst.msk [vmem:[#allocation3 + $0x70] sm:$0xff] %vm465_vm1, %v1186_v9  ;;  %v1187_v56 = vmax.f32 %v1059_v18, %v1123_v22  ;;  %2304 = vperm.xlu1 %6476, %v8379_v12   ;;  %v1218_v44 = vsub.f32 %v1058_v35, %v1186_v9  ;;  %v1062_v35 = vld [vmem:[#allocation3 + $0x90] sm:$0xff] }
 0x28d   : > { %10492 = vst [vmem:[#allocation75_spill] sm:$0xff] %v8381_v10  ;;  %2319 = vperm.xlu0 %6475, %v8381_v10   ;;  %v8387_v57 = vpop.eup %6563 }
 0x28e   : > { %v1219_v58 = vsub.f32 %v1059_v18, %v1187_v56  ;;  %1924 = vst.msk [vmem:[#allocation3 + $0x78] sm:$0xff] %vm465_vm1, %v1187_v56  ;;  %10493 = vst [vmem:[#allocation76_spill] sm:$0xff] %v8387_v57  ;;  %v1264_v18 = vmul.f32 1.442695, %v1218_v44 }
 0x290   : > { %v1266_v38 = vmul.f32 1.442695, %v1219_v58  ;;  %1362 = vperm.xlu1 %6476, %v1184_v52  }
 0x291   : > { %v1126_v46 = vpop.xlane.xlu0 %1125  ;;  %1377 = vperm.xlu0 %6475, %v1187_v56  }
 0x292   : > { %6569 = vpow2.f32 %v1266_v38  ;;  %v1188_v30 = vmax.f32 %v1060_v1, %v1126_v46  ;;  %v1063_v38 = vld [vmem:[#allocation3 + $0x98] sm:$0xff] }
 0x293   : > { %v1129_v22 = vpop.xlane.xlu1 %1128  ;;  %6571 = vpow2.f32 %v1264_v18 }
 0x294   : > { %v8389_v12 = vpop.eup %6565  ;;  %1925 = vst.msk [vmem:[#allocation3 + $0x80] sm:$0xff] %vm465_vm1, %v1188_v30  ;;  %v1189_v20 = vmax.f32 %v1061_v29, %v1129_v22  ;;  %2314 = vperm.xlu1 %6476, %v8387_v57   ;;  %v1220_v26 = vsub.f32 %v1060_v1, %v1188_v30  ;;  %v1064_v1 = vld [vmem:[#allocation3 + $0xa0] sm:$0xff] }
 0x295   : > { %10494 = vst [vmem:[#allocation77_spill] sm:$0xff] %v8389_v12  ;;  %2329 = vperm.xlu0 %6475, %v8389_v12   ;;  %v8395_v10 = vpop.eup %6567 }
 0x296   : > { %v1221_v52 = vsub.f32 %v1061_v29, %v1189_v20  ;;  %1926 = vst.msk [vmem:[#allocation3 + $0x88] sm:$0xff] %vm465_vm1, %v1189_v20  ;;  %10495 = vst [vmem:[#allocation78_spill] sm:$0xff] %v8395_v10  ;;  %v1268_v29 = vmul.f32 1.442695, %v1220_v26 }
 0x298   : > { %v1270_v56 = vmul.f32 1.442695, %v1221_v52  ;;  %1372 = vperm.xlu1 %6476, %v1186_v9  }
 0x299   : > { %v1132_v58 = vpop.xlane.xlu0 %1131  ;;  %1387 = vperm.xlu0 %6475, %v1189_v20  }
 0x29a   : > { %6573 = vpow2.f32 %v1270_v56  ;;  %v1190_v46 = vmax.f32 %v1062_v35, %v1132_v58  ;;  %v1065_v56 = vld [vmem:[#allocation3 + $0xa8] sm:$0xff] }
 0x29b   : > { %v1135_v22 = vpop.xlane.xlu1 %1134  ;;  %6575 = vpow2.f32 %v1268_v29  ;;  %v8413_v29 = vld [vmem:[#allocation3 + $0xb8] sm:$0xff] }
 0x29c   : > { %v8397_v57 = vpop.eup %6569  ;;  %1927 = vst.msk [vmem:[#allocation3 + $0x90] sm:$0xff] %vm465_vm1, %v1190_v46  ;;  %v1191_v44 = vmax.f32 %v1063_v38, %v1135_v22  ;;  %2324 = vperm.xlu1 %6476, %v8395_v10   ;;  %v1222_v18 = vsub.f32 %v1062_v35, %v1190_v46 }
 0x29d   : > { %10496 = vst [vmem:[#allocation79_spill] sm:$0xff] %v8397_v57  ;;  %2339 = vperm.xlu0 %6475, %v8397_v57   ;;  %v8403_v12 = vpop.eup %6571 }
 0x29e   : > { %v1223_v9 = vsub.f32 %v1063_v38, %v1191_v44  ;;  %1928 = vst.msk [vmem:[#allocation3 + $0x98] sm:$0xff] %vm465_vm1, %v1191_v44  ;;  %10497 = vst [vmem:[#allocation80_spill] sm:$0xff] %v8403_v12  ;;  %v1272_v38 = vmul.f32 1.442695, %v1222_v18 }
 0x2a0   : > { %v1274_v20 = vmul.f32 1.442695, %v1223_v9  ;;  %1382 = vperm.xlu1 %6476, %v1188_v30   ;;  %v8411_v30 = vld [vmem:[#allocation3 + $0xb0] sm:$0xff] }
 0x2a1   : > { %v1138_v52 = vpop.xlane.xlu0 %1137  ;;  %1397 = vperm.xlu0 %6475, %v1191_v44  }
 0x2a2   : > { %6577 = vpow2.f32 %v1274_v20  ;;  %v1192_v58 = vmax.f32 %v1064_v1, %v1138_v52 }
 0x2a3   : > { %v1141_v22 = vpop.xlane.xlu1 %1140  ;;  %6579 = vpow2.f32 %v1272_v38 }
 0x2a4   : > { %v8405_v10 = vpop.eup %6573  ;;  %1929 = vst.msk [vmem:[#allocation3 + $0xa0] sm:$0xff] %vm465_vm1, %v1192_v58  ;;  %v1193_v26 = vmax.f32 %v1065_v56, %v1141_v22  ;;  %2334 = vperm.xlu1 %6476, %v8403_v12   ;;  %v1224_v35 = vsub.f32 %v1064_v1, %v1192_v58  ;;  %v8428_v1 = vld [vmem:[#allocation3 + $0xc0] sm:$0xff] }
 0x2a5   : > { %10498 = vst [vmem:[#allocation81_spill] sm:$0xff] %v8405_v10  ;;  %2349 = vperm.xlu0 %6475, %v8405_v10   ;;  %v8416_v20 = vpop.eup %6575  ;;  %v6498_v10 = vld [vmem:[%s7673_s27 + $0x48] sm:$0xff]  }
 0x2a6   : > { %1930 = vst.msk [vmem:[#allocation3 + $0xa8] sm:$0xff] %vm465_vm1, %v1193_v26  ;;  %10499 = vst [vmem:[#allocation82_spill] sm:$0xff] %v8416_v20 }
 0x2a8   : > { %1392 = vperm.xlu1 %6476, %v1190_v46   ;;  %v1276_v46 = vmul.f32 1.442695, %v1224_v35 }
 0x2a9   : > { %v1144_v44 = vpop.xlane.xlu0 %1143  ;;  %1407 = vperm.xlu0 %6475, %v1193_v26  }
 0x2aa   : > { %v1194_v9 = vmax.f32 %v8411_v30, %v1144_v44  ;;  %6581 = vpow2.f32 %v1276_v46  ;;  %v8431_v44 = vld [vmem:[#allocation3 + $0xc8] sm:$0xff] }
 0x2ab   : > { %v1147_v52 = vpop.xlane.xlu1 %1146 }
 0x2ac   : > { %v8418_v18 = vpop.eup %6577  ;;  %1931 = vst.msk [vmem:[#allocation3 + $0xb0] sm:$0xff] %vm465_vm1, %v1194_v9  ;;  %v8422_v22 = vmax.f32 %v8413_v29, %v1147_v52  ;;  %2344 = vperm.xlu1 %6476, %v8416_v20   ;;  %v1225_v52 = vsub.f32 %v1065_v56, %v1193_v26  ;;  %v8448_v56 = vld [vmem:[#allocation3 + $0xd0] sm:$0xff]  ;;  %v1226_v12 = vsub.f32 %v8411_v30, %v1194_v9 }
 0x2ad   : > { %10500 = vst [vmem:[#allocation83_spill] sm:$0xff] %v8418_v18  ;;  %2359 = vperm.xlu0 %6475, %v8418_v18   ;;  %v8437_v35 = vpop.eup %6579  ;;  %v6503_v20 = vld [vmem:[%s7673_s27 + $0x10] sm:$0xff]  }
 0x2ae   : > { %1932 = vst.msk [vmem:[#allocation3 + $0xb8] sm:$0xff] %vm465_vm1, %v8422_v22  ;;  %10501 = vst [vmem:[#allocation84_spill] sm:$0xff] %v8437_v35  ;;  %v1278_v46 = vmul.f32 1.442695, %v1225_v52 }
 0x2b0   : > { %1402 = vperm.xlu1 %6476, %v1192_v58   ;;  %6583 = vpow2.f32 %v1278_v46  ;;  %v8468_v46 = vld [vmem:[#allocation3 + $0xe0] sm:$0xff] }
 0x2b1   : > { %v1150_v38 = vpop.xlane.xlu0 %1149  ;;  %1417 = vperm.xlu0 %6475, %v8422_v22   ;;  %10503 = vst [vmem:[#allocation86_spill] sm:$0xff] %v8468_v46 }
 0x2b2   : > { %v8435_v57 = vmax.f32 %v8428_v1, %v1150_v38  ;;  %v8451_v38 = vld [vmem:[#allocation3 + $0xd8] sm:$0xff] }
 0x2b3   : > { %v1153_v18 = vpop.xlane.xlu1 %1152 }
 0x2b4   : > { %1933 = vst.msk [vmem:[#allocation3 + $0xc0] sm:$0xff] %vm465_vm1, %v8435_v57  ;;  %v8442_v58 = vmax.f32 %v8431_v44, %v1153_v18  ;;  %2354 = vperm.xlu1 %6476, %v8437_v35   ;;  %v8457_v35 = vpop.eup %6581 }
 0x2b5   : > { %2712 = vrot.lane.b32.xlu0 %v6498_v10, %s7311_s26  ;;  %10502 = vst [vmem:[#allocation85_spill] sm:$0xff] %v8457_v35 }
 0x2b6   : > { %1934 = vst.msk [vmem:[#allocation3 + $0xc8] sm:$0xff] %vm465_vm1, %v8442_v58 }
 0x2b8   : > { %1412 = vperm.xlu1 %6476, %v1194_v9   ;;  %v1280_v9 = vmul.f32 1.442695, %v1226_v12 }
 0x2b9   : > { %v1156_v26 = vpop.xlane.xlu0 %1155  ;;  %1427 = vperm.xlu0 %6475, %v8442_v58  }
 0x2ba   : > { %v8455_v18 = vmax.f32 %v8448_v56, %v1156_v26  ;;  %v6508_v26 = vld [vmem:[%s7673_s27 + $0x50] sm:$0xff]   ;;  %v8479_v4 = vpop.eup %6583  ;;  %6585 = vpow2.f32 %v1280_v9 }
 0x2bb   : > { %v1159_v10 = vpop.xlane.xlu1 %1158  ;;  %10504 = vst [vmem:[#allocation87_spill] sm:$0xff] %v8479_v4 }
 0x2bc   : > { %1935 = vst.msk [vmem:[#allocation3 + $0xd0] sm:$0xff] %vm465_vm1, %v8455_v18  ;;  %v8462_v52 = vmax.f32 %v8451_v38, %v1159_v10  ;;  %2364 = vperm.xlu1 %6476, %v8457_v35   ;;  %v8474_v10 = vld [vmem:[#allocation3 + $0xe8] sm:$0xff] }
 0x2bd   : > { %2698 = vrot.lane.b32.xlu0 %v6503_v20, %s7311_s26 }
 0x2be   : > { %1936 = vst.msk [vmem:[#allocation3 + $0xd8] sm:$0xff] %vm465_vm1, %v8462_v52 }
 0x2c0   : > { %1422 = vperm.xlu1 %6476, %v8435_v57  }
 0x2c1   : > { %v1162_v55 = vpop.xlane.xlu0 %1161  ;;  %1437 = vperm.xlu0 %6475, %v8462_v52  }
 0x2c2   : > { %v8477_v35 = vmax.f32 %v8468_v46, %v1162_v55  ;;  %v1227_v55 = vsub.f32 %v8413_v29, %v8422_v22 }
 0x2c3   : > { %v1165_v20 = vpop.xlane.xlu1 %1164 }
 0x2c4   : > { %1937 = vst.msk [vmem:[#allocation3 + $0xe0] sm:$0xff] %vm465_vm1, %v8477_v35  ;;  %v8486_v30 = vmax.f32 %v8474_v10, %v1165_v20  ;;  %2714 = vrot.lane.b32.xlu1 %v6508_v26, %s7311_s26  ;;  %v6513_v20 = vld [vmem:[%s7673_s27 + $0x18] sm:$0xff]   ;;  %v1282_v46 = vmul.f32 1.442695, %v1227_v55 }
 0x2c5   : > { %2369 = vperm.xlu0 %6475, %v8479_v4   ;;  %v8501_v26 = vld [vmem:[#allocation3 + $0xf8] sm:$0xff] }
 0x2c6   : > { %1938 = vst.msk [vmem:[#allocation3 + $0xe8] sm:$0xff] %vm465_vm1, %v8486_v30  ;;  %10506 = vst [vmem:[#allocation89_spill] sm:$0xff] %v8501_v26  ;;  %v6514_v4 = vld [vmem:[%s7673_s27 + $0x58] sm:$0xff]   ;;  %6587 = vpow2.f32 %v1282_v46  ;;  %v8528_v46 = vpop.eup %6585 }
 0x2c7   : > { %10508 = vst [vmem:[#allocation91_spill] sm:$0xff] %v8528_v46 }
 0x2c8   : > { %1432 = vperm.xlu1 %6476, %v8455_v18  }
 0x2c9   : > { %1447 = vperm.xlu0 %6475, %v8486_v30   ;;  %v1168_v12 = vpop.xlane.xlu0 %1167 }
 0x2ca   : > { %v8505_v29 = vmax.f32 %v8496_v59, %v1168_v12  ;;  %v1228_v12 = vsub.f32 %v8428_v1, %v8435_v57 }
 0x2cb   : > { %v1171_v22 = vpop.xlane.xlu1 %1170 }
 0x2cc   : > { %1939 = vst.msk [vmem:[#allocation3 + $0xf0] sm:$0xff] %vm465_vm1, %v8505_v29  ;;  %v8512_v9 = vmax.f32 %v8501_v26, %v1171_v22  ;;  %2700 = vrot.lane.b32.xlu1 %v6513_v20, %s7311_s26  ;;  %v6517_v20 = vld [vmem:[%s7673_s27 + $0x20] sm:$0xff]   ;;  %v1284_v22 = vmul.f32 1.442695, %v1228_v12 }
 0x2cd   : > { %2716 = vrot.lane.b32.xlu0 %v6514_v4, %s7311_s26  ;;  %v1229_v4 = vsub.f32 %v8431_v44, %v8442_v58 }
 0x2ce   : > { %10507 = vst [vmem:[#allocation90_spill] sm:$0xff] %v8512_v9  ;;  %1940 = vst.msk [vmem:[#allocation3 + $0xf8] sm:$0xff] %vm465_vm1, %v8512_v9  ;;  %6589 = vpow2.f32 %v1284_v22  ;;  %v1230_v22 = vsub.f32 %v8448_v56, %v8455_v18 }
 0x2cf   : > { %v2711_v40 = vpop.permute.xlu1 %2710 }
 0x2d0   : > { %1442 = vperm.xlu1 %6476, %v8477_v35   ;;  %6321 = vmatprep.subr.msk.bf16.mxu1 %vm754_vm0, %v2711_v40  ;;  %v1286_v40 = vmul.f32 1.442695, %v1229_v4  ;;  %v8536_v58 = vpop.eup %6587 }
 0x2d1   : > { %1457 = vperm.xlu0 %6475, %v8512_v9   ;;  %10509 = vst [vmem:[#allocation92_spill] sm:$0xff] %v8536_v58 }
 0x2d3   : > { %v1303_v55 = vpop.permute.xlu0 %1302  ;;  %v8530_v26 = vpop.permute.xlu1 %2696 }
 0x2d4   : > { %v1460_v57 = vsub.f32 %v7830_v62, %v1303_v55  ;;  %v1461_v1 = vsub.f32 %v7832_v63, %v1303_v55  ;;  %2374 = vperm.xlu1 %6476, %v8528_v46   ;;  %v6518_v63 = vld [vmem:[%s7673_s27 + $0x60] sm:$0xff]   ;;  %v6519_v55 = vld [vmem:[%s7673_s27 + $0x68] sm:$0xff]  }
 0x2d5   : > { %2702 = vrot.lane.b32.xlu0 %v6517_v20, %s7311_s26 }
 0x2d6   : > { %v1524_v9 = vmul.f32 1.442695, %v1460_v57  ;;  %v1526_v59 = vmul.f32 1.442695, %v1461_v1  ;;  %v6520_v57 = vld [vmem:[%s7673_s27 + $0x28] sm:$0xff]  }
 0x2d7   : > { %v1308_v44 = vpop.permute.xlu1 %1307 }
 0x2d8   : > { %6591 = vpow2.f32 %v1524_v9  ;;  %v1462_v12 = vsub.f32 %v7834_v0, %v1308_v44  ;;  %v1463_v62 = vsub.f32 %v7838_v3, %v1308_v44  ;;  %1452 = vperm.xlu1 %6476, %v8505_v29   ;;  %v1288_v44 = vmul.f32 1.442695, %v1230_v22  ;;  %v6522_v22 = vld [vmem:[%s7673_s27 + $0x70] sm:$0xff]  }
 0x2d9   : > { %6593 = vpow2.f32 %v1526_v59  ;;  %2379 = vperm.xlu0 %6475, %v8536_v58   ;;  %v6521_v59 = vld [vmem:[%s7673_s27 + $0x30] sm:$0xff]  }
 0x2da   : > { %6595 = vpow2.f32 %v1286_v40  ;;  %v1528_v20 = vmul.f32 1.442695, %v1462_v12  ;;  %v1530_v4 = vmul.f32 1.442695, %v1463_v62  ;;  %v1231_v12 = vsub.f32 %v8451_v38, %v8462_v52 }
 0x2db   : > { %v1313_v9 = vpop.permute.xlu1 %1312 }
 0x2dc   : > { %6597 = vpow2.f32 %v1528_v20  ;;  %v1464_v0 = vsub.f32 %v7842_v5, %v1313_v9  ;;  %v1465_v3 = vsub.f32 %v7844_v6, %v1313_v9  ;;  %2718 = vrot.lane.b32.xlu1 %v6518_v63, %s7311_s26  ;;  %v8557_v6 = vpop.eup %6589  ;;  %v1290_v38 = vmul.f32 1.442695, %v1231_v12  ;;  %v6524_v12 = vld [vmem:[%s7673_s27 + $0x38] sm:$0xff]  }
 0x2dd   : > { %6599 = vpow2.f32 %v1530_v4  ;;  %2720 = vrot.lane.b32.xlu0 %v6519_v55, %s7311_s26  ;;  %10510 = vst [vmem:[#allocation93_spill] sm:$0xff] %v8557_v6 }
 0x2de   : > { %v1532_v1 = vmul.f32 1.442695, %v1464_v0  ;;  %v1534_v40 = vmul.f32 1.442695, %v1465_v3  ;;  %v6523_v0 = vld [vmem:[%s7673_s27 + $0x78] sm:$0xff]   ;;  %s7150_s27 = sshll.u32 %s7312_s24, 4  ;;  %s7151_s27 = int_to_ptr.vmem [resolvable:$false] %s7150_s27 }
 0x2df   : > { %v1318_v56 = vpop.permute.xlu1 %1317  ;;  %s7152_s8 = scalar_lea.vmem %s7151_s27, 4096  ;;  %p7153_p3 = scmp.lt.s32.totalorder %s10169_s1, %s7151_s27 }
 0x2e0   : > { %6601 = vpow2.f32 %v1532_v1  ;;  %v1466_v18 = vsub.f32 %v7846_v7, %v1318_v56  ;;  %v1467_v5 = vsub.f32 %v7978_v11, %v1318_v56  ;;  %2704 = vrot.lane.b32.xlu1 %v6520_v57, %s7311_s26  ;;  %v2695_v57 = vpop.permute.xlu0 %2694  ;;  %p7154_p12 = scmp.lt.s32.totalorder %s7152_s8, %s7146_s10 }
 0x2e1   : > { %6603 = vpow2.f32 %v1534_v40  ;;  %2706 = vrot.lane.b32.xlu0 %v6521_v59, %s7311_s26 }
 0x2e2   : > { %v6592_v62 = vpop.eup %6591  ;;  %v1536_v63 = vmul.f32 1.442695, %v1466_v18  ;;  %v1538_v55 = vmul.f32 1.442695, %v1467_v5  ;;  %6605 = vpow2.f32 %v1288_v44  ;;  %p7155_p7 = por %p7154_p12, %p7153_p3 }
 0x2e3   : > { %v6594_v20 = vpop.eup %6593  ;;  %v1323_v52 = vpop.permute.xlu1 %1322 }
 0x2e4   : > { %v8560_v4 = vpop.eup %6595  ;;  %6607 = vpow2.f32 %v1536_v63  ;;  %v1468_v7 = vsub.f32 %v7985_v13, %v1323_v52  ;;  %v1469_v11 = vsub.f32 %v7987_v15, %v1323_v52  ;;  %2384 = vperm.xlu1 %6476, %v8557_v6   ;;  %v8566_v9 = vadd.f32 %v6594_v20, %v6592_v62  ;;  %p7156_p6 = pnand %p7155_p7, %p7149_p1 }
 0x2e5   : > { %10511 = vst [vmem:[#allocation94_spill] sm:$0xff] %v8560_v4  ;;  %6609 = vpow2.f32 %v1538_v55  ;;  %2389 = vperm.xlu0 %6475, %v8560_v4   ;;  %v2775_v63 = vsel %vm754_vm0, %v2695_v57, 0 }
 0x2e6   : > { %v6598_v3 = vpop.eup %6597  ;;  %v1540_v59 = vmul.f32 1.442695, %v1468_v7  ;;  %v1542_v1 = vmul.f32 1.442695, %v1469_v11  ;;  %6611 = vpow2.f32 %v1290_v38  ;;  %v8578_v38 = vpop.permute.xlu0 %2264 }
 0x2e7   : > { %v6600_v40 = vpop.eup %6599  ;;  %v8570_v44 = vpop.permute.xlu1 %2269  ;;  %v1748_v13 = vpack.c.bf16 %v6598_v3, %v6592_v62 }
 0x2e8   : > { %6613 = vpow2.f32 %v1540_v59  ;;  %2722 = vrot.lane.b32.xlu1 %v6522_v22, %s7311_s26  ;;  %v1749_v15 = vpack.c.bf16 %v6600_v40, %v6594_v20  ;;  %v8574_v56 = vadd.f32 %v6600_v40, %v6598_v3 }
 0x2e9   : > { %6615 = vpow2.f32 %v1542_v1  ;;  %2724 = vrot.lane.b32.xlu0 %v6523_v0, %s7311_s26 }
 0x2ea   : > { %v6602_v18 = vpop.eup %6601  ;;  %2101 = vmatprep.mubr.bf16.mxu1 %v1749_v15 }
 0x2eb   : > { %v6604_v5 = vpop.eup %6603  ;;  %2102 = vmatmul.mubr.bf16.vlgmr.msra.gmra.mrb[0].mxu1 %v1748_v13  ;;  %v1328_v55 = vpop.permute.xlu1 %1327 }
 0x2ec   : > { %6138 = vmatpush3.bf16.xpose.msra.mxu1 %v2775_v63  ;;  %v1470_v62 = vsub.f32 %v7989_v17, %v1328_v55  ;;  %v1471_v20 = vsub.f32 %v7993_v19, %v1328_v55  ;;  %2708 = vrot.lane.b32.xlu1 %v6524_v12, %s7311_s26  ;;  %v8583_v52 = vadd.f32 %v6604_v5, %v6602_v18  ;;  %v8585_v7 = vpop.eup %6605 }
 0x2ed   : > { %10512 = vst [vmem:[#allocation95_spill] sm:$0xff] %v8585_v7  ;;  %2582 = vrot.lane.b32.xlu0 %v7702_v16, %s7311_s26 }
 0x2ee   : > { %v6608_v11 = vpop.eup %6607  ;;  %v1544_v22 = vmul.f32 1.442695, %v1470_v62  ;;  %v1546_v0 = vmul.f32 1.442695, %v1471_v20  ;;  %v8591_v17 = vpop.permute.xlu0 %2279 }
 0x2ef   : > { %v6610_v3 = vpop.eup %6609  ;;  %v8589_v57 = vpop.permute.xlu1 %2274  ;;  %v1750_v59 = vpack.c.bf16 %v6608_v11, %v6602_v18 }
 0x2f0   : > { %6617 = vpow2.f32 %v1544_v22  ;;  %2394 = vperm.xlu1 %6476, %v8585_v7   ;;  %v1751_v19 = vpack.c.bf16 %v6610_v3, %v6604_v5  ;;  %v8594_v1 = vadd.f32 %v6610_v3, %v6608_v11  ;;  %v8596_v40 = vpop.eup %6611 }
 0x2f1   : > { %10513 = vst [vmem:[#allocation96_spill] sm:$0xff] %v8596_v40  ;;  %6619 = vpow2.f32 %v1546_v0  ;;  %2588 = vrot.lane.b32.xlu0 %v7739_v48, %s7311_s26 }
 0x2f2   : > { %v6614_v16 = vpop.eup %6613  ;;  %2109 = vmatprep.mubr.bf16.mxu1 %v1751_v19 }
 0x2f3   : > { %v6616_v13 = vpop.eup %6615  ;;  %2110 = vmatmul.mubr.bf16.gmra.mrb[4].mxu1 %v1750_v59  ;;  %v1333_v15 = vpop.permute.xlu1 %1332 }
 0x2f4   : > { %v1472_v12 = vsub.f32 %v7997_v23, %v1333_v15  ;;  %v1473_v18 = vsub.f32 %v7999_v24, %v1333_v15  ;;  %v8602_v63 = vpop.permute.xlu0 %2289  ;;  %2399 = vperm.xlu1 %6476, %v8596_v40   ;;  %v8605_v5 = vadd.f32 %v6616_v13, %v6614_v16 }
 0x2f5   : > { %2592 = vrot.lane.b32.xlu0 %v7753_v60, %s7311_s26 }
 0x2f6   : > { %v1548_v55 = vmul.f32 1.442695, %v1472_v12  ;;  %v1550_v48 = vmul.f32 1.442695, %v1473_v18 }
 0x2f7   : > { %v1338_v62 = vpop.permute.xlu1 %1337 }
 0x2f8   : > { %6621 = vpow2.f32 %v1548_v55  ;;  %v1474_v20 = vsub.f32 %v8001_v25, %v1338_v62  ;;  %v1475_v11 = vsub.f32 %v8005_v28, %v1338_v62  ;;  %v1348_v23 = vpop.permute.xlu0 %1347  ;;  %2584 = vrot.lane.b32.xlu1 %v7725_v36, %s7311_s26 }
 0x2f9   : > { %6623 = vpow2.f32 %v1550_v48  ;;  %v1478_v24 = vsub.f32 %v8176_v34, %v1348_v23  ;;  %v1479_v22 = vsub.f32 %v8180_v37, %v1348_v23  ;;  %2596 = vrot.lane.b32.xlu0 %v7767_v8, %s7311_s26 }
 0x2fa   : > { %v6618_v60 = vpop.eup %6617  ;;  %v1552_v0 = vmul.f32 1.442695, %v1474_v20  ;;  %v1554_v3 = vmul.f32 1.442695, %v1475_v11 }
 0x2fb   : > { %v6620_v59 = vpop.eup %6619  ;;  %v1560_v19 = vmul.f32 1.442695, %v1478_v24  ;;  %v1562_v25 = vmul.f32 1.442695, %v1479_v22  ;;  %v8617_v15 = vpop.permute.xlu1 %2284  ;;  %v1752_v28 = vpack.c.bf16 %v6618_v60, %v6614_v16 }
 0x2fc   : > { %6625 = vpow2.f32 %v1552_v0  ;;  %v8619_v12 = vpop.permute.xlu0 %2299  ;;  %2586 = vrot.lane.b32.xlu1 %v7732_v42, %s7311_s26  ;;  %v1753_v36 = vpack.c.bf16 %v6620_v59, %v6616_v13  ;;  %v8623_v34 = vadd.f32 %v6620_v59, %v6618_v60 }
 0x2fd   : > { %6627 = vpow2.f32 %v1554_v3  ;;  %2600 = vrot.lane.b32.xlu0 %v7781_v21, %s7311_s26 }
 0x2fe   : > { %6629 = vpow2.f32 %v1560_v19  ;;  %2117 = vmatprep.mubr.bf16.mxu1 %v1753_v36 }
 0x2ff   : > { %6631 = vpow2.f32 %v1562_v25  ;;  %2118 = vmatmul.mubr.bf16.gmra.mrb[8].mxu1 %v1752_v28  ;;  %v1343_v8 = vpop.permute.xlu1 %1342  ;;  %v6525_v25 = vld [vmem:[%s7680_s15] sm:$0xff]  }
 0x300   : > { %v1476_v37 = vsub.f32 %v8172_v31, %v1343_v8  ;;  %v1477_v16 = vsub.f32 %v8174_v32, %v1343_v8  ;;  %v1358_v18 = vpop.permute.xlu0 %1357  ;;  %2590 = vrot.lane.b32.xlu1 %v7746_v54, %s7311_s26 }
 0x301   : > { %v1482_v42 = vsub.f32 %v8188_v43, %v1358_v18  ;;  %v1483_v13 = vsub.f32 %v8192_v45, %v1358_v18  ;;  %2604 = vrot.lane.b32.xlu0 %v7795_v33, %s7311_s26 }
 0x302   : > { %v6622_v21 = vpop.eup %6621  ;;  %v1556_v55 = vmul.f32 1.442695, %v1476_v37  ;;  %v1558_v48 = vmul.f32 1.442695, %v1477_v16 }
 0x303   : > { %v6624_v62 = vpop.eup %6623  ;;  %v1568_v20 = vmul.f32 1.442695, %v1482_v42  ;;  %v1570_v11 = vmul.f32 1.442695, %v1483_v13  ;;  %v8635_v31 = vpop.permute.xlu1 %2294 }
 0x304   : > { %6633 = vpow2.f32 %v1556_v55  ;;  %v8637_v32 = vpop.permute.xlu0 %2309  ;;  %2594 = vrot.lane.b32.xlu1 %v7760_v2, %s7311_s26  ;;  %v8641_v54 = vadd.f32 %v6624_v62, %v6622_v21 }
 0x305   : > { %6635 = vpow2.f32 %v1558_v48  ;;  %2608 = vrot.lane.b32.xlu0 %v7809_v47, %s7311_s26  ;;  %v10514_v48 = vld [vmem:[#allocation27_spill] sm:$0xff] }
 0x306   : > { %v6626_v33 = vpop.eup %6625  ;;  %6637 = vpow2.f32 %v1568_v20 }
 0x307   : > { %v6628_v43 = vpop.eup %6627  ;;  %6639 = vpow2.f32 %v1570_v11  ;;  %v1353_v45 = vpop.permute.xlu1 %1352  ;;  %v1754_v23 = vpack.c.bf16 %v6626_v33, %v6622_v21  ;;  %v10515_v11 = vld [vmem:[#allocation31_spill] sm:$0xff] }
 0x308   : > { %v6630_v24 = vpop.eup %6629  ;;  %v1480_v22 = vsub.f32 %v8184_v39, %v1353_v45  ;;  %v1481_v60 = vsub.f32 %v8186_v41, %v1353_v45  ;;  %v1368_v0 = vpop.permute.xlu0 %1367  ;;  %2598 = vrot.lane.b32.xlu1 %v7774_v14, %s7311_s26  ;;  %v1755_v2 = vpack.c.bf16 %v6628_v43, %v6624_v62  ;;  %v8649_v3 = vadd.f32 %v6628_v43, %v6626_v33  ;;  %v10516_v43 = vld [vmem:[#allocation32_spill] sm:$0xff] }
 0x309   : > { %v6632_v47 = vpop.eup %6631  ;;  %v1486_v59 = vsub.f32 %v8200_v51, %v1368_v0  ;;  %v1487_v19 = vsub.f32 %v8204_v53, %v1368_v0  ;;  %2612 = vrot.lane.b32.xlu0 %v7822_v61, %s7311_s26  ;;  %v6526_v61 = vld [vmem:[%s7680_s15 + $0x8] sm:$0xff]  }
 0x30a   : > { %v1564_v39 = vmul.f32 1.442695, %v1480_v22  ;;  %v1566_v28 = vmul.f32 1.442695, %v1481_v60  ;;  %2125 = vmatprep.mubr.bf16.mxu1 %v1755_v2  ;;  %v8656_v41 = vadd.f32 %v6632_v47, %v6630_v24 }
 0x30b   : > { %v1576_v36 = vmul.f32 1.442695, %v1486_v59  ;;  %v1578_v14 = vmul.f32 1.442695, %v1487_v19  ;;  %2126 = vmatmul.mubr.bf16.gmra.mrb[12].mxu1 %v1754_v23  ;;  %v8658_v8 = vpop.permute.xlu1 %2304  ;;  %v6527_v23 = vld [vmem:[%s7680_s15 + $0x10] sm:$0xff]   ;;  %v6528_v59 = vld [vmem:[%s7680_s15 + $0x40] sm:$0xff]  }
 0x30c   : > { %6641 = vpow2.f32 %v1564_v39  ;;  %v8660_v37 = vpop.permute.xlu0 %2319  ;;  %2602 = vrot.lane.b32.xlu1 %v7788_v27, %s7311_s26  ;;  %v6529_v19 = vld [vmem:[%s7680_s15 + $0x18] sm:$0xff]  }
 0x30d   : > { %6643 = vpow2.f32 %v1566_v28  ;;  %4025 = vrot.lane.b32.xlu0 %v6525_v25, %s7311_s26 }
 0x30e   : > { %v6634_v51 = vpop.eup %6633  ;;  %6645 = vpow2.f32 %v1576_v36 }
 0x30f   : > { %v6636_v53 = vpop.eup %6635  ;;  %6647 = vpow2.f32 %v1578_v14  ;;  %v1363_v16 = vpop.permute.xlu1 %1362  ;;  %v1756_v18 = vpack.c.bf16 %v6630_v24, %v6634_v51 }
 0x310   : > { %v6638_v42 = vpop.eup %6637  ;;  %v1484_v13 = vsub.f32 %v8196_v49, %v1363_v16  ;;  %v1485_v21 = vsub.f32 %v8198_v50, %v1363_v16  ;;  %v1378_v55 = vpop.permute.xlu0 %1377  ;;  %2606 = vrot.lane.b32.xlu1 %v10514_v48, %s7311_s26  ;;  %v1757_v27 = vpack.c.bf16 %v6632_v47, %v6636_v53  ;;  %v8670_v62 = vadd.f32 %v6636_v53, %v6634_v51  ;;  %v10517_v47 = vld [vmem:[#allocation28_spill] sm:$0xff]  ;;  %v10519_v53 = vld [vmem:[#allocation30_spill] sm:$0xff] }
 0x311   : > { %v6640_v20 = vpop.eup %6639  ;;  %v1490_v33 = vsub.f32 %v10515_v11, %v1378_v55  ;;  %v1491_v45 = vsub.f32 %v10516_v43, %v1378_v55  ;;  %4027 = vrot.lane.b32.xlu0 %v6526_v61, %s7311_s26  ;;  %v10518_v61 = vld [vmem:[#allocation29_spill] sm:$0xff] }
 0x312   : > { %v1572_v49 = vmul.f32 1.442695, %v1484_v13  ;;  %v1574_v24 = vmul.f32 1.442695, %v1485_v21  ;;  %2133 = vmatprep.mubr.bf16.mxu1 %v1757_v27  ;;  %v8676_v50 = vadd.f32 %v6640_v20, %v6638_v42  ;;  %v6530_v21 = vld [vmem:[%s7680_s15 + $0x48] sm:$0xff]   ;;  %v10520_v27 = vld [vmem:[#allocation35_spill] sm:$0xff] }
 0x313   : > { %v1584_v22 = vmul.f32 1.442695, %v1490_v33  ;;  %v1586_v60 = vmul.f32 1.442695, %v1491_v45  ;;  %2134 = vmatmul.mubr.bf16.gmra.mrb[16].mxu1 %v1756_v18  ;;  %v8678_v0 = vpop.permute.xlu1 %2314  ;;  %v10521_v33 = vld [vmem:[#allocation36_spill] sm:$0xff] }
 0x314   : > { %6649 = vpow2.f32 %v1572_v49  ;;  %v8680_v2 = vpop.permute.xlu0 %2329  ;;  %2610 = vrot.lane.b32.xlu1 %v10517_v47, %s7311_s26  ;;  %v6532_v47 = vld [vmem:[%s7680_s15 + $0x50] sm:$0xff]  }
 0x315   : > { %6651 = vpow2.f32 %v1574_v24  ;;  %4029 = vrot.lane.b32.xlu0 %v6527_v23, %s7311_s26 }
 0x316   : > { %v6642_v25 = vpop.eup %6641  ;;  %6653 = vpow2.f32 %v1584_v22 }
 0x317   : > { %v6644_v39 = vpop.eup %6643  ;;  %6655 = vpow2.f32 %v1586_v60  ;;  %v1373_v28 = vpop.permute.xlu1 %1372  ;;  %v1758_v36 = vpack.c.bf16 %v6638_v42, %v6642_v25  ;;  %v6531_v42 = vld [vmem:[%s7680_s15 + $0x20] sm:$0xff]  }
 0x318   : > { %v6646_v14 = vpop.eup %6645  ;;  %v1488_v51 = vsub.f32 %v10518_v61, %v1373_v28  ;;  %v1489_v16 = vsub.f32 %v10519_v53, %v1373_v28  ;;  %v1388_v18 = vpop.permute.xlu0 %1387  ;;  %4041 = vrot.lane.b32.xlu1 %v6528_v59, %s7311_s26  ;;  %v1759_v13 = vpack.c.bf16 %v6640_v20, %v6644_v39  ;;  %v8691_v55 = vadd.f32 %v6644_v39, %v6642_v25  ;;  %v6533_v59 = vld [vmem:[%s7680_s15 + $0x28] sm:$0xff]   ;;  %v10522_v25 = vld [vmem:[#allocation86_spill] sm:$0xff] }
 0x319   : > { %v6648_v48 = vpop.eup %6647  ;;  %v1494_v11 = vsub.f32 %v10520_v27, %v1388_v18  ;;  %v1495_v43 = vsub.f32 %v10521_v33, %v1388_v18  ;;  %4031 = vrot.lane.b32.xlu0 %v6529_v19, %s7311_s26  ;;  %v10523_v39 = vsub.f32 %v10522_v25, %v8477_v35  ;;  %v10524_v61 = vsub.f32 %v8474_v10, %v8486_v30  ;;  %v10526_v27 = vld [vmem:[#allocation34_spill] sm:$0xff]  ;;  %v10528_v30 = vld [vmem:[#allocation40_spill] sm:$0xff] }
 0x31a   : > { %v1580_v45 = vmul.f32 1.442695, %v1488_v51  ;;  %v1582_v23 = vmul.f32 1.442695, %v1489_v16  ;;  %2141 = vmatprep.mubr.bf16.mxu1 %v1759_v13  ;;  %v8697_v49 = vadd.f32 %v6648_v48, %v6646_v14  ;;  %v10525_v13 = vld [vmem:[#allocation33_spill] sm:$0xff] }
 0x31b   : > { %v1592_v24 = vmul.f32 1.442695, %v1494_v11  ;;  %v1594_v20 = vmul.f32 1.442695, %v1495_v43  ;;  %2142 = vmatmul.mubr.bf16.gmra.mrb[20].mxu1 %v1758_v36  ;;  %v8699_v22 = vpop.permute.xlu1 %2324  ;;  %v1292_v28 = vmul.f32 1.442695, %v10523_v39 }
 0x31c   : > { %6657 = vpow2.f32 %v1580_v45  ;;  %v8701_v60 = vpop.permute.xlu0 %2339  ;;  %4043 = vrot.lane.b32.xlu1 %v6530_v21, %s7311_s26  ;;  %v1294_v51 = vmul.f32 1.442695, %v10524_v61  ;;  %v6534_v43 = vld [vmem:[%s7680_s15 + $0x58] sm:$0xff]  }
 0x31d   : > { %6659 = vpow2.f32 %v1582_v23  ;;  %4033 = vrot.lane.b32.xlu0 %v6531_v42, %s7311_s26  ;;  %v10527_v23 = vld [vmem:[#allocation39_spill] sm:$0xff] }
 0x31e   : > { %v6650_v19 = vpop.eup %6649  ;;  %6661 = vpow2.f32 %v1592_v24 }
 0x31f   : > { %v6652_v36 = vpop.eup %6651  ;;  %6663 = vpow2.f32 %v1594_v20  ;;  %v1383_v53 = vpop.permute.xlu1 %1382  ;;  %v1760_v16 = vpack.c.bf16 %v6646_v14, %v6650_v19  ;;  %v6535_v14 = vld [vmem:[%s7680_s15 + $0x30] sm:$0xff]  }
 0x320   : > { %v6654_v18 = vpop.eup %6653  ;;  %v1492_v21 = vsub.f32 %v10525_v13, %v1383_v53  ;;  %v1493_v11 = vsub.f32 %v10526_v27, %v1383_v53  ;;  %v1398_v33 = vpop.permute.xlu0 %1397  ;;  %4045 = vrot.lane.b32.xlu1 %v6532_v47, %s7311_s26  ;;  %v1761_v35 = vpack.c.bf16 %v6648_v48, %v6652_v36  ;;  %v8717_v42 = vadd.f32 %v6652_v36, %v6650_v19  ;;  %v10530_v53 = vld [vmem:[#allocation88_spill] sm:$0xff]  ;;  %v10533_v27 = vld [vmem:[#allocation90_spill] sm:$0xff] }
 0x321   : > { %v6656_v45 = vpop.eup %6655  ;;  %v1498_v10 = vsub.f32 %v10527_v23, %v1398_v33  ;;  %v1499_v24 = vsub.f32 %v10528_v30, %v1398_v33  ;;  %4035 = vrot.lane.b32.xlu0 %v6533_v59, %s7311_s26  ;;  %6665 = vpow2.f32 %v1292_v28  ;;  %v6536_v59 = vld [vmem:[%s7680_s15 + $0x60] sm:$0xff]   ;;  %v6537_v28 = vld [vmem:[%s7680_s15 + $0x38] sm:$0xff]  }
 0x322   : > { %v1588_v20 = vmul.f32 1.442695, %v1492_v21  ;;  %v1590_v25 = vmul.f32 1.442695, %v1493_v11  ;;  %2149 = vmatprep.mubr.bf16.mxu1 %v1761_v35  ;;  %v8723_v39 = vadd.f32 %v6656_v45, %v6654_v18  ;;  %6667 = vpow2.f32 %v1294_v51  ;;  %v10532_v21 = vld [vmem:[#allocation89_spill] sm:$0xff] }
 0x323   : > { %v1600_v48 = vmul.f32 1.442695, %v1498_v10  ;;  %v1602_v47 = vmul.f32 1.442695, %v1499_v24  ;;  %2150 = vmatmul.mubr.bf16.gmra.mrb[24].mxu1 %v1760_v16  ;;  %v8725_v19 = vpop.permute.xlu1 %2334  ;;  %v10531_v51 = vsub.f32 %v10530_v53, %v8505_v29  ;;  %v10534_v11 = vsub.f32 %v10532_v21, %v10533_v27  ;;  %v10535_v10 = vld [vmem:[#allocation37_spill] sm:$0xff]  ;;  %v10536_v24 = vld [vmem:[#allocation38_spill] sm:$0xff] }
 0x324   : > { %6669 = vpow2.f32 %v1588_v20  ;;  %v8727_v36 = vpop.permute.xlu0 %2349  ;;  %4047 = vrot.lane.b32.xlu1 %v6534_v43, %s7311_s26  ;;  %v6538_v29 = vld [vmem:[%s7680_s15 + $0x68] sm:$0xff]  }
 0x325   : > { %10529 = vst [vmem:[#allocation27_spill] sm:$0xff] %v8727_v36  ;;  %6671 = vpow2.f32 %v1590_v25  ;;  %4037 = vrot.lane.b32.xlu0 %v6535_v14, %s7311_s26  ;;  %v1296_v13 = vmul.f32 1.442695, %v10531_v51  ;;  %v1298_v33 = vmul.f32 1.442695, %v10534_v11  ;;  %v10537_v51 = vld [vmem:[#allocation43_spill] sm:$0xff] }
 0x326   : > { %v6658_v61 = vpop.eup %6657  ;;  %6673 = vpow2.f32 %v1600_v48  ;;  %v10538_v21 = vld [vmem:[#allocation44_spill] sm:$0xff] }
 0x327   : > { %v6660_v16 = vpop.eup %6659  ;;  %6675 = vpow2.f32 %v1602_v47  ;;  %v1393_v35 = vpop.permute.xlu1 %1392  ;;  %v1762_v43 = vpack.c.bf16 %v6654_v18, %v6658_v61 }
 0x328   : > { %v6662_v23 = vpop.eup %6661  ;;  %v1496_v30 = vsub.f32 %v10535_v10, %v1393_v35  ;;  %v1497_v14 = vsub.f32 %v10536_v24, %v1393_v35  ;;  %v1408_v20 = vpop.permute.xlu0 %1407  ;;  %4049 = vrot.lane.b32.xlu1 %v6536_v59, %s7311_s26  ;;  %v1763_v25 = vpack.c.bf16 %v6656_v45, %v6660_v16  ;;  %v8743_v53 = vadd.f32 %v6660_v16, %v6658_v61  ;;  %v10543_v24 = vld [vmem:[#allocation41_spill] sm:$0xff] }
 0x329   : > { %v6664_v48 = vpop.eup %6663  ;;  %v1502_v40 = vsub.f32 %v10537_v51, %v1408_v20  ;;  %v1503_v27 = vsub.f32 %v10538_v21, %v1408_v20  ;;  %4039 = vrot.lane.b32.xlu0 %v6537_v28, %s7311_s26  ;;  %6677 = vpow2.f32 %v1296_v13  ;;  %v6539_v28 = vld [vmem:[%s7680_s15 + $0x70] sm:$0xff]   ;;  %v10544_v20 = vld [vmem:[#allocation42_spill] sm:$0xff] }
 0x32a   : > { %v1596_v18 = vmul.f32 1.442695, %v1496_v30  ;;  %v1598_v47 = vmul.f32 1.442695, %v1497_v14  ;;  %2157 = vmatprep.mubr.bf16.mxu1 %v1763_v25  ;;  %v8748_v11 = vadd.f32 %v6664_v48, %v6662_v23  ;;  %6679 = vpow2.f32 %v1298_v33  ;;  %v6540_v21 = vld [vmem:[%s7680_s15 + $0x78] sm:$0xff]  }
 0x32b   : > { %v1608_v59 = vmul.f32 1.442695, %v1502_v40  ;;  %v1610_v45 = vmul.f32 1.442695, %v1503_v27  ;;  %2158 = vmatmul.mubr.bf16.gmra.mrb[28].mxu1 %v1762_v43  ;;  %v8750_v61 = vpop.permute.xlu1 %2344  ;;  %v8752_v16 = vpop.eup %6665 }
 0x32c   : > { %10539 = vst [vmem:[#allocation31_spill] sm:$0xff] %v8750_v61  ;;  %10540 = vst [vmem:[#allocation32_spill] sm:$0xff] %v8752_v16  ;;  %6681 = vpow2.f32 %v1596_v18  ;;  %v8754_v35 = vpop.permute.xlu0 %2359  ;;  %4051 = vrot.lane.b32.xlu1 %v6538_v29, %s7311_s26  ;;  %v8758_v13 = vpop.eup %6667 }
 0x32d   : > { %10541 = vst [vmem:[#allocation28_spill] sm:$0xff] %v8754_v35  ;;  %10542 = vst [vmem:[#allocation29_spill] sm:$0xff] %v8758_v13  ;;  %6683 = vpow2.f32 %v1598_v47  ;;  %2404 = vperm.xlu0 %6475, %v8752_v16   ;;  %v10545_v47 = vld [vmem:[#allocation47_spill] sm:$0xff]  ;;  %v10558_v35 = vld [vmem:[#allocation56_spill] sm:$0xff] }
 0x32e   : > { %v6670_v33 = vpop.eup %6669  ;;  %6685 = vpow2.f32 %v1608_v59  ;;  %v10546_v59 = vld [vmem:[#allocation48_spill] sm:$0xff] }
 0x32f   : > { %v6672_v40 = vpop.eup %6671  ;;  %6687 = vpow2.f32 %v1610_v45  ;;  %v1403_v43 = vpop.permute.xlu1 %1402  ;;  %v1764_v10 = vpack.c.bf16 %v6662_v23, %v6670_v33 }
 0x330   : > { %v6674_v30 = vpop.eup %6673  ;;  %v1500_v14 = vsub.f32 %v10543_v24, %v1403_v43  ;;  %v1501_v25 = vsub.f32 %v10544_v20, %v1403_v43  ;;  %v1418_v51 = vpop.permute.xlu0 %1417  ;;  %4053 = vrot.lane.b32.xlu1 %v6539_v28, %s7311_s26  ;;  %v1765_v29 = vpack.c.bf16 %v6664_v48, %v6672_v40  ;;  %v8765_v27 = vadd.f32 %v6672_v40, %v6670_v33 }
 0x331   : > { %v6676_v18 = vpop.eup %6675  ;;  %v1506_v4 = vsub.f32 %v10545_v47, %v1418_v51  ;;  %v1507_v16 = vsub.f32 %v10546_v59, %v1418_v51  ;;  %2409 = vperm.xlu0 %6475, %v8758_v13   ;;  %v10551_v47 = vld [vmem:[#allocation46_spill] sm:$0xff] }
 0x332   : > { %v1604_v23 = vmul.f32 1.442695, %v1500_v14  ;;  %v1606_v45 = vmul.f32 1.442695, %v1501_v25  ;;  %2165 = vmatprep.mubr.bf16.mxu1 %v1765_v29  ;;  %v8770_v24 = vadd.f32 %v6676_v18, %v6674_v30  ;;  %v2778_v14 = vsel %vm754_vm0, %v8530_v26, 0  ;;  %v10550_v29 = vld [vmem:[#allocation45_spill] sm:$0xff] }
 0x333   : > { %v1616_v43 = vmul.f32 1.442695, %v1506_v4  ;;  %v1618_v20 = vmul.f32 1.442695, %v1507_v16  ;;  %2166 = vmatmul.mubr.bf16.gmra.mrb[32].mxu1 %v1764_v10  ;;  %v8772_v28 = vpop.permute.xlu1 %2354  ;;  %v8774_v48 = vpop.eup %6677 }
 0x334   : > { %10547 = vst [vmem:[#allocation30_spill] sm:$0xff] %v8772_v28  ;;  %10548 = vst [vmem:[#allocation35_spill] sm:$0xff] %v8774_v48  ;;  %6689 = vpow2.f32 %v1604_v23  ;;  %v2713_v33 = vpop.permute.xlu0 %2712  ;;  %4055 = vrot.lane.b32.xlu1 %v6540_v21, %s7311_s26  ;;  %v8777_v40 = vpop.eup %6679 }
 0x335   : > { %10549 = vst [vmem:[#allocation36_spill] sm:$0xff] %v8777_v40  ;;  %6691 = vpow2.f32 %v1606_v45  ;;  %2414 = vperm.xlu0 %6475, %v8774_v48   ;;  %6322 = vmatprep.subr.msk.bf16.mxu1 %vm754_vm0, %v2713_v33  ;;  %v10552_v33 = vld [vmem:[#allocation51_spill] sm:$0xff] }
 0x336   : > { %v6682_v4 = vpop.eup %6681  ;;  %6693 = vpow2.f32 %v1616_v43  ;;  %6140 = vmatpush3.bf16.xpose.msra.mxu1 %v2778_v14  ;;  %v10553_v43 = vld [vmem:[#allocation52_spill] sm:$0xff] }
 0x337   : > { %v6684_v16 = vpop.eup %6683  ;;  %6695 = vpow2.f32 %v1618_v20  ;;  %v1413_v10 = vpop.permute.xlu1 %1412  ;;  %v1766_v25 = vpack.c.bf16 %v6674_v30, %v6682_v4 }
 0x338   : > { %v6686_v51 = vpop.eup %6685  ;;  %v1504_v21 = vsub.f32 %v10550_v29, %v1413_v10  ;;  %v1505_v59 = vsub.f32 %v10551_v47, %v1413_v10  ;;  %v1428_v23 = vpop.permute.xlu0 %1427  ;;  %2419 = vperm.xlu1 %6476, %v8777_v40   ;;  %v1767_v26 = vpack.c.bf16 %v6676_v18, %v6684_v16  ;;  %v8786_v45 = vadd.f32 %v6684_v16, %v6682_v4 }
 0x339   : > { %v6688_v13 = vpop.eup %6687  ;;  %v1510_v48 = vsub.f32 %v10552_v33, %v1428_v23  ;;  %v1511_v14 = vsub.f32 %v10553_v43, %v1428_v23 }
 0x33a   : > { %v1612_v58 = vmul.f32 1.442695, %v1504_v21  ;;  %v1614_v20 = vmul.f32 1.442695, %v1505_v59  ;;  %2173 = vmatprep.mubr.bf16.mxu1 %v1767_v26  ;;  %v8790_v30 = vadd.f32 %v6688_v13, %v6686_v51  ;;  %v10555_v21 = vld [vmem:[#allocation49_spill] sm:$0xff]  ;;  %v10556_v26 = vld [vmem:[#allocation50_spill] sm:$0xff] }
 0x33b   : > { %v1624_v7 = vmul.f32 1.442695, %v1510_v48  ;;  %v1626_v29 = vmul.f32 1.442695, %v1511_v14  ;;  %2174 = vmatmul.mubr.bf16.gmra.mrb[36].mxu1 %v1766_v25  ;;  %v8792_v10 = vpop.permute.xlu1 %2364 }
 0x33c   : > { %10554 = vst [vmem:[#allocation86_spill] sm:$0xff] %v8792_v10  ;;  %6697 = vpow2.f32 %v1612_v58  ;;  %v2699_v47 = vpop.permute.xlu0 %2698  ;;  %v10557_v10 = vld [vmem:[#allocation55_spill] sm:$0xff] }
 0x33d   : > { %6699 = vpow2.f32 %v1614_v20 }
 0x33e   : > { %v6690_v18 = vpop.eup %6689  ;;  %6701 = vpow2.f32 %v1624_v7 }
 0x33f   : > { %v6692_v4 = vpop.eup %6691  ;;  %6703 = vpow2.f32 %v1626_v29  ;;  %v1423_v16 = vpop.permute.xlu1 %1422  ;;  %v1768_v33 = vpack.c.bf16 %v6686_v51, %v6690_v18 }
 0x340   : > { %v6694_v23 = vpop.eup %6693  ;;  %v1508_v59 = vsub.f32 %v10555_v21, %v1423_v16  ;;  %v1509_v43 = vsub.f32 %v10556_v26, %v1423_v16  ;;  %v1438_v40 = vpop.permute.xlu0 %1437  ;;  %v1769_v48 = vpack.c.bf16 %v6688_v13, %v6692_v4  ;;  %v8796_v14 = vadd.f32 %v6692_v4, %v6690_v18 }
 0x341   : > { %v6696_v25 = vpop.eup %6695  ;;  %v1514_v58 = vsub.f32 %v10557_v10, %v1438_v40  ;;  %v1515_v20 = vsub.f32 %v10558_v35, %v1438_v40  ;;  %v2781_v16 = vsel %vm754_vm0, %v2699_v47, 0 }
 0x342   : > { %v1620_v6 = vmul.f32 1.442695, %v1508_v59  ;;  %v1622_v7 = vmul.f32 1.442695, %v1509_v43  ;;  %2181 = vmatprep.mubr.bf16.mxu1 %v1769_v48  ;;  %v8800_v29 = vadd.f32 %v6696_v25, %v6694_v23  ;;  %v10560_v59 = vld [vmem:[#allocation53_spill] sm:$0xff] }
 0x343   : > { %v1632_v51 = vmul.f32 1.442695, %v1514_v58  ;;  %v1634_v28 = vmul.f32 1.442695, %v1515_v20  ;;  %2182 = vmatmul.mubr.bf16.gmra.mrb[40].mxu1 %v1768_v33  ;;  %v2715_v21 = vpop.permute.xlu1 %2714  ;;  %v10561_v33 = vld [vmem:[#allocation54_spill] sm:$0xff]  ;;  %v10562_v20 = vld [vmem:[#allocation59_spill] sm:$0xff] }
 0x344   : > { %6705 = vpow2.f32 %v1620_v6  ;;  %v8803_v13 = vpop.permute.xlu0 %2369  ;;  %6323 = vmatprep.subr.msk.bf16.mxu1 %vm754_vm0, %v2715_v21 }
 0x345   : > { %10559 = vst [vmem:[#allocation33_spill] sm:$0xff] %v8803_v13  ;;  %6707 = vpow2.f32 %v1622_v7  ;;  %6142 = vmatpush3.bf16.xpose.msra.mxu1 %v2781_v16  ;;  %v10563_v7 = vld [vmem:[#allocation60_spill] sm:$0xff] }
 0x346   : > { %v6698_v10 = vpop.eup %6697  ;;  %6709 = vpow2.f32 %v1632_v51 }
 0x347   : > { %v6700_v35 = vpop.eup %6699  ;;  %6711 = vpow2.f32 %v1634_v28  ;;  %v1433_v40 = vpop.permute.xlu1 %1432  ;;  %v1770_v18 = vpack.c.bf16 %v6694_v23, %v6698_v10 }
 0x348   : > { %v6702_v4 = vpop.eup %6701  ;;  %v1512_v26 = vsub.f32 %v10560_v59, %v1433_v40  ;;  %v1513_v43 = vsub.f32 %v10561_v33, %v1433_v40  ;;  %v1448_v48 = vpop.permute.xlu0 %1447  ;;  %v1771_v47 = vpack.c.bf16 %v6696_v25, %v6700_v35  ;;  %v8808_v6 = vadd.f32 %v6700_v35, %v6698_v10 }
 0x349   : > { %v6704_v58 = vpop.eup %6703  ;;  %v1518_v21 = vsub.f32 %v10562_v20, %v1448_v48  ;;  %v1519_v16 = vsub.f32 %v10563_v7, %v1448_v48  ;;  %v10564_v48 = vld [vmem:[#allocation57_spill] sm:$0xff]  ;;  %v10565_v20 = vld [vmem:[#allocation58_spill] sm:$0xff] }
 0x34a   : > { %v1628_v13 = vmul.f32 1.442695, %v1512_v26  ;;  %v1630_v51 = vmul.f32 1.442695, %v1513_v43  ;;  %2189 = vmatprep.mubr.bf16.mxu1 %v1771_v47  ;;  %v8812_v28 = vadd.f32 %v6704_v58, %v6702_v4 }
 0x34b   : > { %v1640_v23 = vmul.f32 1.442695, %v1518_v21  ;;  %v1642_v46 = vmul.f32 1.442695, %v1519_v16  ;;  %2190 = vmatmul.mubr.bf16.gmra.mrb[44].mxu1 %v1770_v18  ;;  %v2701_v59 = vpop.permute.xlu1 %2700 }
 0x34c   : > { %6713 = vpow2.f32 %v1628_v13  ;;  %v2784_v40 = vsel %vm754_vm0, %v2701_v59, 0  ;;  %v2717_v25 = vpop.permute.xlu0 %2716 }
 0x34d   : > { %6715 = vpow2.f32 %v1630_v51  ;;  %6324 = vmatprep.subr.msk.bf16.mxu1 %vm754_vm0, %v2717_v25  ;;  %v10566_v51 = vld [vmem:[#allocation63_spill] sm:$0xff]  ;;  %v10567_v25 = vld [vmem:[#allocation64_spill] sm:$0xff] }
 0x34e   : > { %v6706_v10 = vpop.eup %6705  ;;  %6717 = vpow2.f32 %v1640_v23  ;;  %6144 = vmatpush3.bf16.xpose.msra.mxu1 %v2784_v40 }
 0x34f   : > { %v6708_v35 = vpop.eup %6707  ;;  %6719 = vpow2.f32 %v1642_v46  ;;  %v1443_v26 = vpop.permute.xlu1 %1442  ;;  %v1772_v33 = vpack.c.bf16 %v6702_v4, %v6706_v10 }
 0x350   : > { %v6710_v43 = vpop.eup %6709  ;;  %v1516_v47 = vsub.f32 %v10564_v48, %v1443_v26  ;;  %v1517_v18 = vsub.f32 %v10565_v20, %v1443_v26  ;;  %v1458_v21 = vpop.permute.xlu0 %1457  ;;  %v1773_v13 = vpack.c.bf16 %v6704_v58, %v6708_v35  ;;  %v8818_v7 = vadd.f32 %v6708_v35, %v6706_v10 }
 0x351   : > { %v6712_v16 = vpop.eup %6711  ;;  %v1522_v59 = vsub.f32 %v10566_v51, %v1458_v21  ;;  %v1523_v36 = vsub.f32 %v10567_v25, %v1458_v21 }
 0x352   : > { %v1636_v23 = vmul.f32 1.442695, %v1516_v47  ;;  %v1638_v40 = vmul.f32 1.442695, %v1517_v18  ;;  %2197 = vmatprep.mubr.bf16.mxu1 %v1773_v13  ;;  %v8822_v46 = vadd.f32 %v6712_v16, %v6710_v43  ;;  %v10568_v18 = vld [vmem:[#allocation61_spill] sm:$0xff]  ;;  %v10569_v13 = vld [vmem:[#allocation62_spill] sm:$0xff] }
 0x353   : > { %v1648_v4 = vmul.f32 1.442695, %v1522_v59  ;;  %v1650_v61 = vmul.f32 1.442695, %v1523_v36  ;;  %2198 = vmatmul.mubr.bf16.gmra.mrb[48].mxu1 %v1772_v33  ;;  %v8824_v48 = vpop.permute.xlu1 %2374 }
 0x354   : > { %6721 = vpow2.f32 %v1636_v23  ;;  %v2703_v26 = vpop.permute.xlu0 %2702  ;;  %1656 = vadd.xlane.f32.xlu0 %v8574_v56 }
 0x355   : > { %6723 = vpow2.f32 %v1638_v40 }
 0x356   : > { %v6714_v58 = vpop.eup %6713  ;;  %6725 = vpow2.f32 %v1648_v4  ;;  %v2787_v4 = vsel %vm754_vm0, %v2703_v26, 0 }
 0x357   : > { %v6716_v10 = vpop.eup %6715  ;;  %6727 = vpow2.f32 %v1650_v61  ;;  %v1453_v35 = vpop.permute.xlu1 %1452  ;;  %v1774_v47 = vpack.c.bf16 %v6710_v43, %v6714_v58 }
 0x358   : > { %v6718_v20 = vpop.eup %6717  ;;  %v1520_v21 = vsub.f32 %v10568_v18, %v1453_v35  ;;  %v1521_v51 = vsub.f32 %v10569_v13, %v1453_v35  ;;  %v8829_v36 = vpop.permute.xlu0 %2379  ;;  %1659 = vadd.xlane.f32.xlu0 %v8583_v52  ;;  %v1775_v33 = vpack.c.bf16 %v6712_v16, %v6716_v10  ;;  %v8832_v59 = vadd.f32 %v6716_v10, %v6714_v58 }
 0x359   : > { %v6720_v56 = vpop.eup %6719 }
 0x35a   : > { %v1644_v25 = vmul.f32 1.442695, %v1520_v21  ;;  %v1646_v23 = vmul.f32 1.442695, %v1521_v51  ;;  %2205 = vmatprep.mubr.bf16.mxu1 %v1775_v33  ;;  %v8834_v40 = vadd.f32 %v6720_v56, %v6718_v20 }
 0x35b   : > { %2206 = vmatmul.mubr.bf16.gmra.mrb[52].mxu1 %v1774_v47  ;;  %v2719_v61 = vpop.permute.xlu1 %2718 }
 0x35c   : > { %6729 = vpow2.f32 %v1644_v25  ;;  %v2721_v43 = vpop.permute.xlu0 %2720  ;;  %1665 = vadd.xlane.f32.xlu0 %v8605_v5  ;;  %1653 = vadd.xlane.f32.xlu1 %v8566_v9 }
 0x35d   : > { %6731 = vpow2.f32 %v1646_v23  ;;  %6325 = vmatprep.subr.msk.bf16.mxu1 %vm754_vm0, %v2719_v61 }
 0x35e   : > { %v6722_v52 = vpop.eup %6721  ;;  %6146 = vmatpush3.bf16.xpose.msra.mxu1 %v2787_v4 }
 0x35f   : > { %v6724_v16 = vpop.eup %6723  ;;  %v2705_v58 = vpop.permute.xlu1 %2704  ;;  %v1776_v10 = vpack.c.bf16 %v6718_v20, %v6722_v52  ;;  %6326 = vmatprep.subr.msk.bf16.mxu1 %vm754_vm0, %v2721_v43 }
 0x360   : > { %v6726_v35 = vpop.eup %6725  ;;  %v2707_v47 = vpop.permute.xlu0 %2706  ;;  %1671 = vadd.xlane.f32.xlu0 %v8641_v54  ;;  %1662 = vadd.xlane.f32.xlu1 %v8594_v1  ;;  %v1777_v5 = vpack.c.bf16 %v6720_v56, %v6724_v16  ;;  %v8843_v9 = vadd.f32 %v6724_v16, %v6722_v52  ;;  %v2790_v54 = vsel %vm754_vm0, %v2705_v58, 0 }
 0x361   : > { %v6728_v26 = vpop.eup %6727  ;;  %v2793_v61 = vsel %vm754_vm0, %v2707_v47, 0 }
 0x362   : > { %2213 = vmatprep.mubr.bf16.mxu1 %v1777_v5  ;;  %v8845_v18 = vadd.f32 %v6728_v26, %v6726_v35 }
 0x363   : > { %2214 = vmatmul.mubr.bf16.gmra.mrb[56].mxu1 %v1776_v10  ;;  %v8847_v21 = vpop.permute.xlu1 %2384 }
 0x364   : > { %v8849_v13 = vpop.permute.xlu0 %2389  ;;  %1677 = vadd.xlane.f32.xlu0 %v8670_v62  ;;  %1668 = vadd.xlane.f32.xlu1 %v8623_v34 }
 0x366   : > { %v6730_v20 = vpop.eup %6729  ;;  %6148 = vmatpush3.bf16.xpose.msra.mxu1 %v2790_v54 }
 0x367   : > { %v6732_v1 = vpop.eup %6731  ;;  %v2723_v51 = vpop.permute.xlu1 %2722  ;;  %v1778_v33 = vpack.c.bf16 %v6726_v35, %v6730_v20 }
 0x368   : > { %v2725_v56 = vpop.permute.xlu0 %2724  ;;  %1674 = vadd.xlane.f32.xlu1 %v8649_v3  ;;  %1683 = vadd.xlane.f32.xlu0 %v8691_v55  ;;  %v1779_v25 = vpack.c.bf16 %v6728_v26, %v6732_v1  ;;  %v1742_v23 = vadd.f32 %v6732_v1, %v6730_v20 }
 0x369   : > { %6327 = vmatprep.subr.msk.bf16.mxu1 %vm754_vm0, %v2723_v51  ;;  %v8931_v51 = vld [vmem:[#allocation5] sm:$0xff] }
 0x36a   : > { %2221 = vmatprep.mubr.bf16.mxu1 %v1779_v25 }
 0x36b   : > { %2222 = vmatmul.mubr.bf16.gmra.mrb[60].mxu1 %v1778_v33  ;;  %v2709_v62 = vpop.permute.xlu1 %2708  ;;  %v2422_v33 = vmul.f32 %v8931_v51, %v8578_v38 }
 0x36c   : > { %v2583_v34 = vpop.permute.xlu0 %2582  ;;  %1680 = vadd.xlane.f32.xlu1 %v8656_v41  ;;  %1689 = vadd.xlane.f32.xlu0 %v8717_v42  ;;  %v2796_v41 = vsel %vm754_vm0, %v2709_v62, 0  ;;  %v2423_v62 = vmul.f32 %v8931_v51, %v8570_v44 }
 0x36d   : > { %6153 = vmatprep.mubr.msk.bf16.mxu1 %vm754_vm0, %v2583_v34 }
 0x36e   : > { %6150 = vmatpush3.bf16.xpose.msra.mxu1 %v2793_v61 }
 0x36f   : > { %v8861_v3 = vpop.permute.xlu1 %2394  ;;  %6328 = vmatprep.subr.msk.bf16.mxu1 %vm754_vm0, %v2725_v56 }
 0x370   : > { %v2589_v55 = vpop.permute.xlu0 %2588  ;;  %1686 = vadd.xlane.f32.xlu1 %v8676_v50  ;;  %1695 = vadd.xlane.f32.xlu0 %v8743_v53 }
 0x373   : > { %v8866_v43 = vpop.permute.xlu1 %2399 }
 0x374   : > { %v8868_v4 = vpop.permute.xlu0 %2592  ;;  %1692 = vadd.xlane.f32.xlu1 %v8697_v49  ;;  %1701 = vadd.xlane.f32.xlu0 %v8765_v27 }
 0x376   : > { %6152 = vmatpush3.bf16.xpose.msra.mxu1 %v2796_v41  ;;  %v2424_v41 = vmul.f32 %v8931_v51, %v8589_v57 }
 0x377   : > { %v2585_v42 = vpop.permute.xlu1 %2584 }
 0x378   : > { %v8873_v52 = vpop.permute.xlu0 %2596  ;;  %1698 = vadd.xlane.f32.xlu1 %v8723_v39  ;;  %1707 = vadd.xlane.f32.xlu0 %v8786_v45 }
 0x37b   : > { %v2587_v50 = vpop.permute.xlu1 %2586 }
 0x37c   : > { %v8877_v53 = vpop.permute.xlu0 %2600  ;;  %1704 = vadd.xlane.f32.xlu1 %v8748_v11  ;;  %1713 = vadd.xlane.f32.xlu0 %v8796_v14 }
 0x37d   : > { %6154 = vmatmul.mubr.msk.bf16.vlgmr.msra.gmra.mrb[64].mxu1 %vm754_vm0, %v2583_v34 }
 0x37e   : > { %6155 = vmatprep.mubr.msk.bf16.mxu1 %vm754_vm0, %v2585_v42 }
 0x37f   : > { %v2591_v49 = vpop.permute.xlu1 %2590 }
 0x380   : > { %v8883_v27 = vpop.permute.xlu0 %2604  ;;  %1710 = vadd.xlane.f32.xlu1 %v8770_v24  ;;  %1719 = vadd.xlane.f32.xlu0 %v8808_v6 }
 0x383   : > { %v2595_v39 = vpop.permute.xlu1 %2594 }
 0x384   : > { %v8887_v45 = vpop.permute.xlu0 %2608  ;;  %1716 = vadd.xlane.f32.xlu1 %v8790_v30  ;;  %1725 = vadd.xlane.f32.xlu0 %v8818_v7 }
 0x385   : > { %6156 = vmatmul.mubr.msk.bf16.gmra.mrb[68].mxu1 %vm754_vm0, %v2585_v42 }
 0x386   : > { %6157 = vmatprep.mubr.msk.bf16.mxu1 %vm754_vm0, %v2587_v50 }
 0x387   : > { %v8893_v11 = vpop.permute.xlu1 %2598 }
 0x388   : > { %v8895_v14 = vpop.permute.xlu0 %2612  ;;  %1722 = vadd.xlane.f32.xlu1 %v8800_v29  ;;  %1731 = vadd.xlane.f32.xlu0 %v8832_v59 }
 0x38b   : > { %v8899_v24 = vpop.permute.xlu1 %2602 }
 0x38c   : > { %v4026_v6 = vpop.permute.xlu0 %4025  ;;  %1728 = vadd.xlane.f32.xlu1 %v8812_v28  ;;  %1737 = vadd.xlane.f32.xlu0 %v8843_v9 }
 0x38d   : > { %6158 = vmatmul.mubr.msk.bf16.gmra.mrb[72].mxu1 %vm754_vm0, %v2587_v50  ;;  %v2425_v50 = vmul.f32 %v8931_v51, %v8591_v17  ;;  %v2426_v17 = vmul.f32 %v8931_v51, %v8617_v15 }
 0x38e   : > { %6159 = vmatprep.mubr.msk.bf16.mxu1 %vm754_vm0, %v2589_v55 }
 0x38f   : > { %v8905_v30 = vpop.permute.xlu1 %2606 }
 0x390   : > { %v4028_v7 = vpop.permute.xlu0 %4027  ;;  %1734 = vadd.xlane.f32.xlu1 %v8822_v46  ;;  %1743 = vadd.xlane.f32.xlu0 %v1742_v23 }
 0x393   : > { %v8908_v29 = vpop.permute.xlu1 %2610 }
 0x394   : > { %1740 = vadd.xlane.f32.xlu1 %v8834_v40  ;;  %v4030_v59 = vpop.permute.xlu0 %4029 }
 0x395   : > { %6160 = vmatmul.mubr.msk.bf16.gmra.mrb[76].mxu1 %vm754_vm0, %v2589_v55 }
 0x396   : > { %6161 = vmatprep.mubr.msk.bf16.mxu1 %vm754_vm0, %v2591_v49 }
 0x397   : > { %v4042_v28 = vpop.permute.xlu1 %4041 }
 0x398   : > { %1746 = vadd.xlane.f32.xlu1 %v8845_v18  ;;  %6185 = vmatprep.subr.bf16.mxu0 %v4042_v28  ;;  %v4032_v58 = vpop.permute.xlu0 %4031 }
 0x399   : > { %6297 = vmatprep.subr.bf16.mxu1 %v4042_v28  ;;  %6186 = vmatpush3.bf16.msra.mxu0 %v4026_v6 }
 0x39a   : > { %6305 = vmatpush3.bf16.msra.mxu1 %v4026_v6 }
 0x39b   : > { %v4044_v16 = vpop.permute.xlu1 %4043 }
 0x39c   : > { %6187 = vmatprep.subr.bf16.mxu0 %v4044_v16  ;;  %6298 = vmatprep.subr.bf16.mxu1 %v4044_v16  ;;  %v4034_v40 = vpop.permute.xlu0 %4033 }
 0x39d   : > { %6162 = vmatmul.mubr.msk.bf16.gmra.mrb[80].mxu1 %vm754_vm0, %v2591_v49  ;;  %6188 = vmatpush3.bf16.msra.mxu0 %v4028_v7 }
 0x39e   : > { %6163 = vmatprep.mubr.msk.bf16.mxu1 %vm754_vm0, %v8868_v4  ;;  %6306 = vmatpush3.bf16.msra.mxu1 %v4028_v7 }
 0x39f   : > { %v4046_v46 = vpop.permute.xlu1 %4045 }
 0x3a0   : > { %6189 = vmatprep.subr.bf16.mxu0 %v4046_v46  ;;  %6299 = vmatprep.subr.bf16.mxu1 %v4046_v46  ;;  %v4036_v47 = vpop.permute.xlu0 %4035 }
 0x3a1   : > { %6190 = vmatpush3.bf16.msra.mxu0 %v4030_v59 }
 0x3a2   : > { %6307 = vmatpush3.bf16.msra.mxu1 %v4030_v59 }
 0x3a3   : > { %v4048_v10 = vpop.permute.xlu1 %4047 }
 0x3a4   : > { %6191 = vmatprep.subr.bf16.mxu0 %v4048_v10  ;;  %6300 = vmatprep.subr.bf16.mxu1 %v4048_v10  ;;  %v4038_v9 = vpop.permute.xlu0 %4037 }
 0x3a5   : > { %6164 = vmatmul.mubr.msk.bf16.gmra.mrb[84].mxu1 %vm754_vm0, %v8868_v4  ;;  %6192 = vmatpush3.bf16.msra.mxu0 %v4032_v58 }
 0x3a6   : > { %6165 = vmatprep.mubr.msk.bf16.mxu1 %vm754_vm0, %v2595_v39  ;;  %6308 = vmatpush3.bf16.msra.mxu1 %v4032_v58 }
 0x3a7   : > { %v4050_v35 = vpop.permute.xlu1 %4049 }
 0x3a8   : > { %6193 = vmatprep.subr.bf16.mxu0 %v4050_v35  ;;  %6301 = vmatprep.subr.bf16.mxu1 %v4050_v35  ;;  %v4040_v54 = vpop.permute.xlu0 %4039  ;;  %v2428_v35 = vmul.f32 %v8931_v51, %v8635_v31 }
 0x3a9   : > { %6194 = vmatpush3.bf16.msra.mxu0 %v4034_v40 }
 0x3aa   : > { %6309 = vmatpush3.bf16.msra.mxu1 %v4034_v40 }
 0x3ab   : > { %v4052_v5 = vpop.permute.xlu1 %4051 }
 0x3ac   : > { %6195 = vmatprep.subr.bf16.mxu0 %v4052_v5  ;;  %6302 = vmatprep.subr.bf16.mxu1 %v4052_v5  ;;  %v8953_v57 = vpop.permute.xlu0 %2404 }
 0x3ad   : > { %6166 = vmatmul.mubr.msk.bf16.gmra.mrb[88].mxu1 %vm754_vm0, %v2595_v39  ;;  %6196 = vmatpush3.bf16.msra.mxu0 %v4036_v47 }
 0x3ae   : > { %6167 = vmatprep.mubr.msk.bf16.mxu1 %vm754_vm0, %v8873_v52  ;;  %6310 = vmatpush3.bf16.msra.mxu1 %v4036_v47 }
 0x3af   : > { %v4054_v26 = vpop.permute.xlu1 %4053 }
 0x3b0   : > { %6197 = vmatprep.subr.bf16.mxu0 %v4054_v26  ;;  %6303 = vmatprep.subr.bf16.mxu1 %v4054_v26  ;;  %v8963_v46 = vpop.permute.xlu0 %2409 }
 0x3b1   : > { %6198 = vmatpush3.bf16.msra.mxu0 %v4038_v9 }
 0x3b2   : > { %6311 = vmatpush3.bf16.msra.mxu1 %v4038_v9  ;;  %v10570_v9 = vld [vmem:[#allocation66_spill] sm:$0xff] }
 0x3b3   : > { %v4056_v18 = vpop.permute.xlu1 %4055 }
 0x3b4   : > { %6199 = vmatprep.subr.bf16.mxu0 %v4056_v18  ;;  %6304 = vmatprep.subr.bf16.mxu1 %v4056_v18  ;;  %v8967_v15 = vpop.permute.xlu0 %2414 }
 0x3b5   : > { %6168 = vmatmul.mubr.msk.bf16.gmra.mrb[92].mxu1 %vm754_vm0, %v8873_v52  ;;  %6200 = vmatpush3.bf16.msra.mxu0 %v4040_v54 }
 0x3b6   : > { %6169 = vmatprep.mubr.msk.bf16.mxu1 %vm754_vm0, %v8893_v11  ;;  %6312 = vmatpush3.bf16.msra.mxu1 %v4040_v54 }
 0x3bd   : > { %6170 = vmatmul.mubr.msk.bf16.gmra.mrb[96].mxu1 %vm754_vm0, %v8893_v11 }
 0x3be   : > { %v6041_v20 = vpop.f32.mrb[0].mxu1  ;;  %6171 = vmatprep.mubr.msk.bf16.mxu1 %vm754_vm0, %v8877_v53 }
 0x3bf   : > { %v6042_v1 = vpop.f32.mrb[1].mxu1 }
 0x3c0   : > { %v6043_v56 = vadd.f32 %v6042_v1, %v6041_v20  ;;  %v6044_v25 = vpop.f32.mrb[2].mxu1  ;;  %v1782_v20 = vld [vmem:[#allocation4 + $0x10] sm:$0xff]  ;;  %v2429_v1 = vmul.f32 %v8931_v51, %v8619_v12 }
 0x3c1   : > { %v6045_v23 = vpop.f32.mrb[3].mxu1 }
 0x3c2   : > { %v2454_v34 = vadd.f32 %v6043_v56, %v2422_v33  ;;  %v6046_v61 = vadd.f32 %v6045_v23, %v6044_v25  ;;  %v10571_v23 = vld [vmem:[#allocation68_spill] sm:$0xff] }
 0x3c3   : > { %v1814_v31 = vmul.f32 %v10571_v23, %v1782_v20  ;;  %v2432_v20 = vmul.f32 %v8931_v51, %v8678_v0  ;;  %v10577_v23 = vld [vmem:[#allocation69_spill] sm:$0xff] }
 0x3c4   : > { %2486 = vst.msk [vmem:[#allocation5] sm:$0xff] %vm754_vm0, %v2454_v34  ;;  %v2455_v55 = vadd.f32 %v6046_v61, %v2423_v62  ;;  %v1784_v34 = vld [vmem:[#allocation4 + $0x20] sm:$0xff]  ;;  %v8983_v61 = vpop.permute.xlu1 %2419 }
 0x3c5   : > { %6172 = vmatmul.mubr.msk.bf16.gmra.mrb[100].mxu1 %vm754_vm0, %v8877_v53 }
 0x3c6   : > { %2487 = vst.msk [vmem:[#allocation5 + $0x8] sm:$0xff] %vm754_vm0, %v2455_v55  ;;  %v6047_v4 = vpop.f32.mrb[4].mxu1  ;;  %6173 = vmatprep.mubr.msk.bf16.mxu1 %vm754_vm0, %v8899_v24 }
 0x3c7   : > { %v6048_v38 = vpop.f32.mrb[5].mxu1 }
 0x3c8   : > { %v6049_v42 = vadd.f32 %v6048_v38, %v6047_v4  ;;  %v6050_v44 = vpop.f32.mrb[6].mxu1  ;;  %v1780_v4 = vld [vmem:[#allocation4] sm:$0xff] }
 0x3c9   : > { %v6051_v52 = vpop.f32.mrb[7].mxu1 }
 0x3ca   : > { %v2456_v49 = vadd.f32 %v6049_v42, %v2424_v41  ;;  %v6052_v39 = vadd.f32 %v6051_v52, %v6050_v44  ;;  %v2430_v41 = vmul.f32 %v8931_v51, %v8658_v8  ;;  %v10572_v44 = vld [vmem:[#allocation70_spill] sm:$0xff] }
 0x3cb   : > { %v1816_v52 = vmul.f32 %v10572_v44, %v1784_v34  ;;  %v2433_v34 = vmul.f32 %v8931_v51, %v8660_v37  ;;  %v10578_v44 = vld [vmem:[#allocation76_spill] sm:$0xff] }
 0x3cc   : > { %2488 = vst.msk [vmem:[#allocation5 + $0x10] sm:$0xff] %vm754_vm0, %v2456_v49  ;;  %v2457_v53 = vadd.f32 %v6052_v39, %v2425_v50  ;;  %v10573_v39 = vld [vmem:[#allocation65_spill] sm:$0xff] }
 0x3cd   : > { %6174 = vmatmul.mubr.msk.bf16.gmra.mrb[104].mxu1 %vm754_vm0, %v8899_v24  ;;  %v2427_v24 = vmul.f32 %v8931_v51, %v8602_v63 }
 0x3ce   : > { %2489 = vst.msk [vmem:[#allocation5 + $0x18] sm:$0xff] %vm754_vm0, %v2457_v53  ;;  %6175 = vmatprep.mubr.msk.bf16.mxu1 %vm754_vm0, %v8883_v27  ;;  %v1812_v53 = vmul.f32 %v10573_v39, %v1780_v4  ;;  %v1792_v39 = vld [vmem:[#allocation4 + $0x60] sm:$0xff] }
 0x3d2   : > { %v6053_v11 = vpop.f32.mrb[8].mxu1 }
 0x3d3   : > { %v6054_v6 = vpop.f32.mrb[9].mxu1 }
 0x3d4   : > { %v6055_v7 = vadd.f32 %v6054_v6, %v6053_v11  ;;  %v6056_v59 = vpop.f32.mrb[10].mxu1  ;;  %v1786_v11 = vld [vmem:[#allocation4 + $0x30] sm:$0xff]  ;;  %v2431_v6 = vmul.f32 %v8931_v51, %v8637_v32 }
 0x3d5   : > { %v6057_v28 = vpop.f32.mrb[11].mxu1  ;;  %6176 = vmatmul.mubr.msk.bf16.gmra.mrb[108].mxu1 %vm754_vm0, %v8883_v27  ;;  %v1781_v27 = vld [vmem:[#allocation4 + $0x8] sm:$0xff] }
 0x3d6   : > { %v2458_v16 = vadd.f32 %v6055_v7, %v2426_v17  ;;  %v6058_v58 = vadd.f32 %v6057_v28, %v6056_v59  ;;  %6177 = vmatprep.mubr.msk.bf16.mxu1 %vm754_vm0, %v8905_v30  ;;  %v1813_v26 = vmul.f32 %v10570_v9, %v1781_v27 }
 0x3d8   : > { %2490 = vst.msk [vmem:[#allocation5 + $0x20] sm:$0xff] %vm754_vm0, %v2458_v16  ;;  %v2459_v40 = vadd.f32 %v6058_v58, %v2427_v24  ;;  %v1783_v24 = vld [vmem:[#allocation4 + $0x18] sm:$0xff] }
 0x3da   : > { %2491 = vst.msk [vmem:[#allocation5 + $0x28] sm:$0xff] %vm754_vm0, %v2459_v40  ;;  %v10574_v40 = vld [vmem:[#allocation72_spill] sm:$0xff] }
 0x3db   : > { %v1818_v27 = vmul.f32 %v10574_v40, %v1786_v11 }
 0x3dd   : > { %6178 = vmatmul.mubr.msk.bf16.gmra.mrb[112].mxu1 %vm754_vm0, %v8905_v30 }
 0x3de   : > { %v6059_v10 = vpop.f32.mrb[12].mxu1  ;;  %6179 = vmatprep.mubr.msk.bf16.mxu1 %vm754_vm0, %v8887_v45 }
 0x3df   : > { %v6060_v63 = vpop.f32.mrb[13].mxu1 }
 0x3e0   : > { %v6061_v47 = vadd.f32 %v6060_v63, %v6059_v10  ;;  %v6062_v5 = vpop.f32.mrb[14].mxu1  ;;  %v10575_v10 = vld [vmem:[#allocation67_spill] sm:$0xff] }
 0x3e1   : > { %v6063_v18 = vpop.f32.mrb[15].mxu1  ;;  %v1657_v54 = vpop.xlane.xlu0 %1656  ;;  %v1815_v63 = vmul.f32 %v10575_v10, %v1783_v24  ;;  %v2434_v24 = vmul.f32 %v8931_v51, %v8699_v22 }
 0x3e2   : > { %v2460_v30 = vadd.f32 %v6061_v47, %v2428_v35  ;;  %v6064_v33 = vadd.f32 %v6063_v18, %v6062_v5  ;;  %v1845_v56 = vadd.f32 %v1813_v26, %v1657_v54  ;;  %v1788_v35 = vld [vmem:[#allocation4 + $0x40] sm:$0xff]  ;;  %v1785_v26 = vld [vmem:[#allocation4 + $0x28] sm:$0xff] }
 0x3e4   : > { %2492 = vst.msk [vmem:[#allocation5 + $0x30] sm:$0xff] %vm754_vm0, %v2460_v30  ;;  %v2461_v25 = vadd.f32 %v6064_v33, %v2429_v1  ;;  %v10576_v30 = vld [vmem:[#allocation74_spill] sm:$0xff] }
 0x3e5   : > { %1878 = vst.msk [vmem:[#allocation4 + $0x8] sm:$0xff] %vm465_vm1, %v1845_v56  ;;  %6180 = vmatmul.mubr.msk.bf16.gmra.mrb[116].mxu1 %vm754_vm0, %v8887_v45  ;;  %v1660_v62 = vpop.xlane.xlu0 %1659  ;;  %v1820_v33 = vmul.f32 %v10576_v30, %v1788_v35  ;;  %v2435_v35 = vmul.f32 %v8931_v51, %v8680_v2  ;;  %v10583_v30 = vld [vmem:[#allocation75_spill] sm:$0xff] }
 0x3e6   : > { %2493 = vst.msk [vmem:[#allocation5 + $0x38] sm:$0xff] %vm754_vm0, %v2461_v25  ;;  %v1846_v12 = vadd.f32 %v1814_v31, %v1660_v62  ;;  %v6065_v55 = vpop.f32.mrb[16].mxu1  ;;  %6181 = vmatprep.mubr.msk.bf16.mxu1 %vm754_vm0, %v8908_v29  ;;  %v1817_v31 = vmul.f32 %v10577_v23, %v1785_v26  ;;  %v1790_v62 = vld [vmem:[#allocation4 + $0x50] sm:$0xff]  ;;  %v1791_v26 = vld [vmem:[#allocation4 + $0x58] sm:$0xff] }
 0x3e7   : > { %v6066_v38 = vpop.f32.mrb[17].mxu1 }
 0x3e8   : > { %1879 = vst.msk [vmem:[#allocation4 + $0x10] sm:$0xff] %vm465_vm1, %v1846_v12  ;;  %v6067_v42 = vadd.f32 %v6066_v38, %v6065_v55  ;;  %v6068_v45 = vpop.f32.mrb[18].mxu1  ;;  %v1787_v38 = vld [vmem:[#allocation4 + $0x38] sm:$0xff] }
 0x3e9   : > { %v6069_v50 = vpop.f32.mrb[19].mxu1  ;;  %v1666_v49 = vpop.xlane.xlu0 %1665 }
 0x3ea   : > { %v2462_v17 = vadd.f32 %v6067_v42, %v2430_v41  ;;  %v6070_v7 = vadd.f32 %v6069_v50, %v6068_v45  ;;  %v1848_v59 = vadd.f32 %v1816_v52, %v1666_v49  ;;  %v1654_v28 = vpop.xlane.xlu1 %1653  ;;  %v1822_v52 = vmul.f32 %v10578_v44, %v1790_v62  ;;  %v10579_v50 = vld [vmem:[#allocation71_spill] sm:$0xff]  ;;  %v10585_v44 = vld [vmem:[#allocation77_spill] sm:$0xff] }
 0x3eb   : > { %v1844_v16 = vadd.f32 %v1812_v53, %v1654_v28  ;;  %v1819_v49 = vmul.f32 %v10579_v50, %v1787_v38  ;;  %v10584_v38 = vld [vmem:[#allocation82_spill] sm:$0xff]  ;;  %v2437_v50 = vmul.f32 %v8931_v51, %v8701_v60 }
 0x3ec   : > { %v4655_v8 = vld [vmem:[#allocation4 + $0x8] sm:$0xff]  ;;  %2494 = vst.msk [vmem:[#allocation5 + $0x40] sm:$0xff] %vm754_vm0, %v2462_v17  ;;  %v2463_v58 = vadd.f32 %v6070_v7, %v2431_v6 }
 0x3ed   : > { %6733 = vrcp.f32 %v4655_v8  ;;  %1881 = vst.msk [vmem:[#allocation4 + $0x20] sm:$0xff] %vm465_vm1, %v1848_v59  ;;  %1877 = vst.msk [vmem:[#allocation4] sm:$0xff] %vm465_vm1, %v1844_v16  ;;  %6182 = vmatmul.mubr.msk.bf16.gmra.mrb[120].mxu1 %vm754_vm0, %v8908_v29  ;;  %v1672_v32 = vpop.xlane.xlu0 %1671  ;;  %v1789_v7 = vld [vmem:[#allocation4 + $0x48] sm:$0xff]  ;;  %v10580_v16 = vld [vmem:[#allocation78_spill] sm:$0xff] }
 0x3ee   : > { %2495 = vst.msk [vmem:[#allocation5 + $0x48] sm:$0xff] %vm754_vm0, %v2463_v58  ;;  %v1850_v47 = vadd.f32 %v1818_v27, %v1672_v32  ;;  %v6071_v5 = vpop.f32.mrb[20].mxu1  ;;  %6183 = vmatprep.mubr.msk.bf16.mxu1 %vm754_vm0, %v8895_v14  ;;  %v1663_v9 = vpop.xlane.xlu1 %1662  ;;  %v1824_v58 = vmul.f32 %v10580_v16, %v1792_v39  ;;  %v10581_v32 = vld [vmem:[#allocation73_spill] sm:$0xff] }
 0x3ef   : > { %v1847_v18 = vadd.f32 %v1815_v63, %v1663_v9  ;;  %v6072_v54 = vpop.f32.mrb[21].mxu1  ;;  %v1821_v10 = vmul.f32 %v10581_v32, %v1789_v7  ;;  %v1794_v63 = vld [vmem:[#allocation4 + $0x70] sm:$0xff]  ;;  %v10586_v7 = vld [vmem:[#allocation84_spill] sm:$0xff] }
 0x3f0   : > { %1883 = vst.msk [vmem:[#allocation4 + $0x30] sm:$0xff] %vm465_vm1, %v1850_v47  ;;  %v6073_v29 = vadd.f32 %v6072_v54, %v6071_v5  ;;  %v6074_v1 = vpop.f32.mrb[22].mxu1 }
 0x3f1   : > { %1880 = vst.msk [vmem:[#allocation4 + $0x18] sm:$0xff] %vm465_vm1, %v1847_v18  ;;  %v6075_v56 = vpop.f32.mrb[23].mxu1  ;;  %v1678_v25 = vpop.xlane.xlu0 %1677 }
 0x3f2   : > { %v2464_v12 = vadd.f32 %v6073_v29, %v2432_v20  ;;  %v6076_v55 = vadd.f32 %v6075_v56, %v6074_v1  ;;  %v1852_v4 = vadd.f32 %v1820_v33, %v1678_v25  ;;  %v1669_v0 = vpop.xlane.xlu1 %1668  ;;  %v10582_v20 = vld [vmem:[#allocation80_spill] sm:$0xff]  ;;  %v1823_v33 = vmul.f32 %v10583_v30, %v1791_v26  ;;  %v1796_v56 = vld [vmem:[#allocation4 + $0x80] sm:$0xff] }
 0x3f3   : > { %v1849_v41 = vadd.f32 %v1817_v31, %v1669_v0  ;;  %v1826_v29 = vmul.f32 %v10582_v20, %v1794_v63  ;;  %v1793_v31 = vld [vmem:[#allocation4 + $0x68] sm:$0xff]  ;;  %v1802_v20 = vld [vmem:[#allocation4 + $0xb0] sm:$0xff] }
 0x3f4   : > { %v4654_v42 = vld [vmem:[#allocation4] sm:$0xff]  ;;  %2496 = vst.msk [vmem:[#allocation5 + $0x50] sm:$0xff] %vm754_vm0, %v2464_v12  ;;  %v2465_v45 = vadd.f32 %v6076_v55, %v2433_v34  ;;  %v2436_v55 = vmul.f32 %v8931_v51, %v8725_v19 }
 0x3f5   : > { %1885 = vst.msk [vmem:[#allocation4 + $0x40] sm:$0xff] %vm465_vm1, %v1852_v4  ;;  %6735 = vrcp.f32 %v4654_v42  ;;  %1882 = vst.msk [vmem:[#allocation4 + $0x28] sm:$0xff] %vm465_vm1, %v1849_v41  ;;  %6184 = vmatmul.mubr.msk.bf16.gmra.mrb[124].mxu1 %vm754_vm0, %v8895_v14  ;;  %v1684_v37 = vpop.xlane.xlu0 %1683  ;;  %v1828_v41 = vmul.f32 %v10584_v38, %v1796_v56 }
 0x3f6   : > { %2497 = vst.msk [vmem:[#allocation5 + $0x58] sm:$0xff] %vm754_vm0, %v2465_v45  ;;  %v1854_v11 = vadd.f32 %v1822_v52, %v1684_v37  ;;  %v6077_v6 = vpop.f32.mrb[24].mxu1  ;;  %v1675_v17 = vpop.xlane.xlu1 %1674  ;;  %v1825_v52 = vmul.f32 %v10585_v44, %v1793_v31  ;;  %v1798_v37 = vld [vmem:[#allocation4 + $0x90] sm:$0xff] }
 0x3f7   : > { %v6734_v53 = vpop.eup %6733  ;;  %v1851_v59 = vadd.f32 %v1819_v49, %v1675_v17  ;;  %v6078_v28 = vpop.f32.mrb[25].mxu1 }
 0x3f8   : > { %4789 = vperm.xlu0 %6475, %v6734_v53   ;;  %1887 = vst.msk [vmem:[#allocation4 + $0x50] sm:$0xff] %vm465_vm1, %v1854_v11  ;;  %v6079_v14 = vadd.f32 %v6078_v28, %v6077_v6  ;;  %v6080_v8 = vpop.f32.mrb[26].mxu1  ;;  %v1795_v11 = vld [vmem:[#allocation4 + $0x78] sm:$0xff] }
 0x3f9   : > { %1884 = vst.msk [vmem:[#allocation4 + $0x38] sm:$0xff] %vm465_vm1, %v1851_v59  ;;  %v6081_v40 = vpop.f32.mrb[27].mxu1  ;;  %v1690_v27 = vpop.xlane.xlu0 %1689  ;;  %v1830_v59 = vmul.f32 %v10586_v7, %v1798_v37  ;;  %v10594_v37 = vld [vmem:[#allocation30_spill] sm:$0xff] }
 0x3fa   : > { %v2466_v47 = vadd.f32 %v6079_v14, %v2434_v24  ;;  %v6082_v5 = vadd.f32 %v6081_v40, %v6080_v8  ;;  %v1856_v9 = vadd.f32 %v1824_v58, %v1690_v27  ;;  %v1681_v22 = vpop.xlane.xlu1 %1680  ;;  %v10587_v24 = vld [vmem:[#allocation79_spill] sm:$0xff]  ;;  %v1797_v40 = vld [vmem:[#allocation4 + $0x88] sm:$0xff] }
 0x3fb   : > { %v1853_v18 = vadd.f32 %v1821_v10, %v1681_v22  ;;  %v1827_v14 = vmul.f32 %v10587_v24, %v1795_v11  ;;  %v1800_v8 = vld [vmem:[#allocation4 + $0xa0] sm:$0xff] }
 0x3fc   : > { %2498 = vst.msk [vmem:[#allocation5 + $0x60] sm:$0xff] %vm754_vm0, %v2466_v47  ;;  %v2467_v54 = vadd.f32 %v6082_v5, %v2435_v35  ;;  %v10588_v10 = vld [vmem:[#allocation31_spill] sm:$0xff]  ;;  %v10589_v5 = vld [vmem:[#allocation85_spill] sm:$0xff] }
 0x3fd   : > { %1889 = vst.msk [vmem:[#allocation4 + $0x60] sm:$0xff] %vm465_vm1, %v1856_v9  ;;  %1886 = vst.msk [vmem:[#allocation4 + $0x48] sm:$0xff] %vm465_vm1, %v1853_v18  ;;  %v1696_v1 = vpop.xlane.xlu0 %1695  ;;  %v2438_v63 = vmul.f32 %v8931_v51, %v10588_v10  ;;  %v1832_v9 = vmul.f32 %v10589_v5, %v1800_v8  ;;  %v10590_v18 = vld [vmem:[#allocation81_spill] sm:$0xff]  ;;  %v1808_v5 = vld [vmem:[#allocation4 + $0xe0] sm:$0xff] }
 0x3fe   : > { %2499 = vst.msk [vmem:[#allocation5 + $0x68] sm:$0xff] %vm754_vm0, %v2467_v54  ;;  %v6083_v2 = vpop.f32.mrb[28].mxu1  ;;  %v1858_v25 = vadd.f32 %v1826_v29, %v1696_v1  ;;  %v1687_v23 = vpop.xlane.xlu1 %1686  ;;  %v1829_v54 = vmul.f32 %v10590_v18, %v1797_v40  ;;  %v10591_v29 = vld [vmem:[#allocation27_spill] sm:$0xff]  ;;  %v1805_v18 = vld [vmem:[#allocation4 + $0xc8] sm:$0xff] }
 0x3ff   : > { %v6736_v62 = vpop.eup %6735  ;;  %v1855_v34 = vadd.f32 %v1823_v33, %v1687_v23  ;;  %v6084_v12 = vpop.f32.mrb[29].mxu1  ;;  %v2439_v1 = vmul.f32 %v8931_v51, %v10591_v29  ;;  %v10600_v29 = vld [vmem:[#allocation86_spill] sm:$0xff] }
 0x400   : > { %1891 = vst.msk [vmem:[#allocation4 + $0x70] sm:$0xff] %vm465_vm1, %v1858_v25  ;;  %v6085_v4 = vadd.f32 %v6084_v12, %v6083_v2  ;;  %v6086_v0 = vpop.f32.mrb[30].mxu1  ;;  %4784 = vperm.xlu1 %6476, %v6736_v62   ;;  %v1799_v25 = vld [vmem:[#allocation4 + $0x98] sm:$0xff]  ;;  %v10592_v62 = vld [vmem:[#allocation91_spill] sm:$0xff] }
 0x401   : > { %1888 = vst.msk [vmem:[#allocation4 + $0x58] sm:$0xff] %vm465_vm1, %v1855_v34  ;;  %v6087_v42 = vpop.f32.mrb[31].mxu1  ;;  %v1702_v45 = vpop.xlane.xlu0 %1701  ;;  %v1834_v34 = vmul.f32 %v10592_v62, %v1802_v20 }
 0x402   : > { %v2468_v49 = vadd.f32 %v6085_v4, %v2436_v55  ;;  %v6088_v39 = vadd.f32 %v6087_v42, %v6086_v0  ;;  %v1860_v19 = vadd.f32 %v1828_v41, %v1702_v45  ;;  %v1693_v53 = vpop.xlane.xlu1 %1692  ;;  %v10593_v55 = vld [vmem:[#allocation83_spill] sm:$0xff]  ;;  %v1801_v45 = vld [vmem:[#allocation4 + $0xa8] sm:$0xff] }
 0x403   : > { %v1857_v6 = vadd.f32 %v1825_v52, %v1693_v53  ;;  %v1831_v4 = vmul.f32 %v10593_v55, %v1799_v25  ;;  %v1804_v0 = vld [vmem:[#allocation4 + $0xc0] sm:$0xff] }
 0x404   : > { %2500 = vst.msk [vmem:[#allocation5 + $0x70] sm:$0xff] %vm754_vm0, %v2468_v49  ;;  %v2469_v17 = vadd.f32 %v6088_v39, %v2437_v50  ;;  %v2440_v50 = vmul.f32 %v8931_v51, %v10594_v37 }
 0x405   : > { %1893 = vst.msk [vmem:[#allocation4 + $0x80] sm:$0xff] %vm465_vm1, %v1860_v19  ;;  %1890 = vst.msk [vmem:[#allocation4 + $0x68] sm:$0xff] %vm465_vm1, %v1857_v6  ;;  %v1708_v28 = vpop.xlane.xlu0 %1707  ;;  %v10595_v19 = vld [vmem:[#allocation93_spill] sm:$0xff] }
 0x406   : > { %2501 = vst.msk [vmem:[#allocation5 + $0x78] sm:$0xff] %vm754_vm0, %v2469_v17  ;;  %v6089_v60 = vpop.f32.mrb[32].mxu1  ;;  %v1862_v16 = vadd.f32 %v1830_v59, %v1708_v28  ;;  %v1699_v58 = vpop.xlane.xlu1 %1698  ;;  %v1836_v53 = vmul.f32 %v10595_v19, %v1804_v0  ;;  %v10596_v17 = vld [vmem:[#allocation87_spill] sm:$0xff]  ;;  %v1806_v59 = vld [vmem:[#allocation4 + $0xd0] sm:$0xff]  ;;  %v10597_v28 = vld [vmem:[#allocation28_spill] sm:$0xff] }
 0x407   : > { %v1859_v27 = vadd.f32 %v1827_v14, %v1699_v58  ;;  %v6090_v32 = vpop.f32.mrb[33].mxu1  ;;  %v1833_v7 = vmul.f32 %v10596_v17, %v1801_v45  ;;  %v2441_v24 = vmul.f32 %v8931_v51, %v10597_v28  ;;  %v1803_v58 = vld [vmem:[#allocation4 + $0xb8] sm:$0xff] }
 0x408   : > { %1895 = vst.msk [vmem:[#allocation4 + $0x90] sm:$0xff] %vm465_vm1, %v1862_v16  ;;  %v6091_v35 = vadd.f32 %v6090_v32, %v6089_v60  ;;  %v6092_v47 = vpop.f32.mrb[34].mxu1  ;;  %v10598_v32 = vld [vmem:[#allocation95_spill] sm:$0xff] }
 0x409   : > { %1892 = vst.msk [vmem:[#allocation4 + $0x78] sm:$0xff] %vm465_vm1, %v1859_v27  ;;  %v6093_v22 = vpop.f32.mrb[35].mxu1  ;;  %v1714_v26 = vpop.xlane.xlu0 %1713  ;;  %v1838_v10 = vmul.f32 %v10598_v32, %v1806_v59  ;;  %v2444_v59 = vmul.f32 %v8931_v51, %v8824_v48  ;;  %v1811_v32 = vld [vmem:[#allocation4 + $0xf8] sm:$0xff] }
 0x40a   : > { %v2470_v30 = vadd.f32 %v6091_v35, %v2438_v63  ;;  %v6094_v33 = vadd.f32 %v6093_v22, %v6092_v47  ;;  %v1864_v56 = vadd.f32 %v1832_v9, %v1714_v26  ;;  %v1705_v2 = vpop.xlane.xlu1 %1704  ;;  %v10599_v35 = vld [vmem:[#allocation92_spill] sm:$0xff] }
 0x40b   : > { %v1861_v23 = vadd.f32 %v1829_v54, %v1705_v2  ;;  %v1835_v47 = vmul.f32 %v10599_v35, %v1803_v58 }
 0x40c   : > { %2502 = vst.msk [vmem:[#allocation5 + $0x80] sm:$0xff] %vm754_vm0, %v2470_v30  ;;  %v2471_v31 = vadd.f32 %v6094_v33, %v2439_v1  ;;  %v2442_v1 = vmul.f32 %v8931_v51, %v10600_v29 }
 0x40d   : > { %1897 = vst.msk [vmem:[#allocation4 + $0xa0] sm:$0xff] %vm465_vm1, %v1864_v56  ;;  %1894 = vst.msk [vmem:[#allocation4 + $0x88] sm:$0xff] %vm465_vm1, %v1861_v23  ;;  %v1720_v12 = vpop.xlane.xlu0 %1719  ;;  %v10601_v56 = vld [vmem:[#allocation32_spill] sm:$0xff] }
 0x40e   : > { %2503 = vst.msk [vmem:[#allocation5 + $0x88] sm:$0xff] %vm754_vm0, %v2471_v31  ;;  %v6095_v38 = vpop.f32.mrb[36].mxu1  ;;  %v1866_v41 = vadd.f32 %v1834_v34, %v1720_v12  ;;  %v1711_v42 = vpop.xlane.xlu1 %1710  ;;  %v1840_v2 = vmul.f32 %v10601_v56, %v1808_v5  ;;  %v10602_v31 = vld [vmem:[#allocation94_spill] sm:$0xff]  ;;  %v1810_v34 = vld [vmem:[#allocation4 + $0xf0] sm:$0xff] }
 0x40f   : > { %v1863_v44 = vadd.f32 %v1831_v4, %v1711_v42  ;;  %v6096_v52 = vpop.f32.mrb[37].mxu1  ;;  %v1837_v62 = vmul.f32 %v10602_v31, %v1805_v18  ;;  %v10603_v12 = vld [vmem:[#allocation33_spill] sm:$0xff]  ;;  %v1807_v42 = vld [vmem:[#allocation4 + $0xd8] sm:$0xff]  ;;  %v2449_v31 = vmul.f32 %v8931_v51, %v8866_v43 }
 0x410   : > { %1899 = vst.msk [vmem:[#allocation4 + $0xb0] sm:$0xff] %vm465_vm1, %v1866_v41  ;;  %v6097_v49 = vadd.f32 %v6096_v52, %v6095_v38  ;;  %v6098_v39 = vpop.f32.mrb[38].mxu1  ;;  %v2443_v55 = vmul.f32 %v8931_v51, %v10603_v12  ;;  %v10604_v52 = vld [vmem:[#allocation35_spill] sm:$0xff] }
 0x411   : > { %1896 = vst.msk [vmem:[#allocation4 + $0x98] sm:$0xff] %vm465_vm1, %v1863_v44  ;;  %v6099_v11 = vpop.f32.mrb[39].mxu1  ;;  %v1726_v6 = vpop.xlane.xlu0 %1725  ;;  %v1842_v37 = vmul.f32 %v10604_v52, %v1810_v34 }
 0x412   : > { %v2472_v14 = vadd.f32 %v6097_v49, %v2440_v50  ;;  %v6100_v8 = vadd.f32 %v6099_v11, %v6098_v39  ;;  %v1868_v60 = vadd.f32 %v1836_v53, %v1726_v6  ;;  %v1717_v16 = vpop.xlane.xlu1 %1716  ;;  %v10605_v49 = vld [vmem:[#allocation96_spill] sm:$0xff] }
 0x413   : > { %v1865_v40 = vadd.f32 %v1833_v7, %v1717_v16  ;;  %v1839_v39 = vmul.f32 %v10605_v49, %v1807_v42  ;;  %v1809_v6 = vld [vmem:[#allocation4 + $0xe8] sm:$0xff]  ;;  %v2445_v16 = vmul.f32 %v8931_v51, %v8829_v36  ;;  %v2446_v36 = vmul.f32 %v8931_v51, %v8847_v21 }
 0x414   : > { %2504 = vst.msk [vmem:[#allocation5 + $0x90] sm:$0xff] %vm754_vm0, %v2472_v14  ;;  %v2473_v27 = vadd.f32 %v6100_v8, %v2441_v24  ;;  %v10606_v8 = vld [vmem:[#allocation29_spill] sm:$0xff]  ;;  %v2448_v21 = vmul.f32 %v8931_v51, %v8861_v3 }
 0x415   : > { %1901 = vst.msk [vmem:[#allocation4 + $0xc0] sm:$0xff] %vm465_vm1, %v1868_v60  ;;  %1898 = vst.msk [vmem:[#allocation4 + $0xa8] sm:$0xff] %vm465_vm1, %v1865_v40  ;;  %v1732_v63 = vpop.xlane.xlu0 %1731  ;;  %v1841_v60 = vmul.f32 %v10606_v8, %v1809_v6 }
 0x416   : > { %2505 = vst.msk [vmem:[#allocation5 + $0x98] sm:$0xff] %vm754_vm0, %v2473_v27  ;;  %v6101_v9 = vpop.f32.mrb[40].mxu1  ;;  %v1870_v22 = vadd.f32 %v1838_v10, %v1732_v63  ;;  %v1723_v26 = vpop.xlane.xlu1 %1722  ;;  %v10607_v63 = vld [vmem:[#allocation36_spill] sm:$0xff] }
 0x417   : > { %v1867_v54 = vadd.f32 %v1835_v47, %v1723_v26  ;;  %v6102_v20 = vpop.f32.mrb[41].mxu1  ;;  %v1843_v35 = vmul.f32 %v10607_v63, %v1811_v32 }
 0x418   : > { %1903 = vst.msk [vmem:[#allocation4 + $0xd0] sm:$0xff] %vm465_vm1, %v1870_v22  ;;  %v6103_v30 = vadd.f32 %v6102_v20, %v6101_v9  ;;  %v6104_v33 = vpop.f32.mrb[42].mxu1  ;;  %v2447_v20 = vmul.f32 %v8931_v51, %v8849_v13 }
 0x419   : > { %1900 = vst.msk [vmem:[#allocation4 + $0xb8] sm:$0xff] %vm465_vm1, %v1867_v54  ;;  %v6105_v25 = vpop.f32.mrb[43].mxu1  ;;  %v1738_v23 = vpop.xlane.xlu0 %1737 }
 0x41a   : > { %v2474_v4 = vadd.f32 %v6103_v30, %v2442_v1  ;;  %v6106_v0 = vadd.f32 %v6105_v25, %v6104_v33  ;;  %v1872_v38 = vadd.f32 %v1840_v2, %v1738_v23  ;;  %v1729_v41 = vpop.xlane.xlu1 %1728 }
 0x41b   : > { %v1869_v45 = vadd.f32 %v1837_v62, %v1729_v41  ;;  %v2451_v41 = vmul.f32 %v8931_v51, %v8963_v46 }
 0x41c   : > { %2506 = vst.msk [vmem:[#allocation5 + $0xa0] sm:$0xff] %vm754_vm0, %v2474_v4  ;;  %v2475_v44 = vadd.f32 %v6106_v0, %v2443_v55  ;;  %v2450_v4 = vmul.f32 %v8931_v51, %v8953_v57 }
 0x41d   : > { %1905 = vst.msk [vmem:[#allocation4 + $0xe0] sm:$0xff] %vm465_vm1, %v1872_v38  ;;  %1902 = vst.msk [vmem:[#allocation4 + $0xc8] sm:$0xff] %vm465_vm1, %v1869_v45  ;;  %v1744_v50 = vpop.xlane.xlu0 %1743 }
 0x41e   : > { %2507 = vst.msk [vmem:[#allocation5 + $0xa8] sm:$0xff] %vm754_vm0, %v2475_v44  ;;  %v6107_v19 = vpop.f32.mrb[44].mxu1  ;;  %v1874_v53 = vadd.f32 %v1842_v37, %v1744_v50  ;;  %v1735_v11 = vpop.xlane.xlu1 %1734  ;;  %v2452_v37 = vmul.f32 %v8931_v51, %v8967_v15 }
 0x41f   : > { %v1871_v17 = vadd.f32 %v1839_v39, %v1735_v11  ;;  %v6108_v7 = vpop.f32.mrb[45].mxu1  ;;  %v2453_v39 = vmul.f32 %v8931_v51, %v8983_v61 }
 0x420   : > { %1907 = vst.msk [vmem:[#allocation4 + $0xf0] sm:$0xff] %vm465_vm1, %v1874_v53  ;;  %v6109_v28 = vadd.f32 %v6108_v7, %v6107_v19  ;;  %v6110_v24 = vpop.f32.mrb[46].mxu1 }
 0x421   : > { %1904 = vst.msk [vmem:[#allocation4 + $0xd8] sm:$0xff] %vm465_vm1, %v1871_v17  ;;  %v6111_v14 = vpop.f32.mrb[47].mxu1 }
 0x422   : > { %v2476_v58 = vadd.f32 %v6109_v28, %v2444_v59  ;;  %v6112_v40 = vadd.f32 %v6111_v14, %v6110_v24  ;;  %v1741_v27 = vpop.xlane.xlu1 %1740 }
 0x423   : > { %v1873_v10 = vadd.f32 %v1841_v60, %v1741_v27 }
 0x424   : > { %2508 = vst.msk [vmem:[#allocation5 + $0xb0] sm:$0xff] %vm754_vm0, %v2476_v58  ;;  %v2477_v48 = vadd.f32 %v6112_v40, %v2445_v16 }
 0x425   : > { %1906 = vst.msk [vmem:[#allocation4 + $0xe8] sm:$0xff] %vm465_vm1, %v1873_v10 }
 0x426   : > { %2509 = vst.msk [vmem:[#allocation5 + $0xb8] sm:$0xff] %vm754_vm0, %v2477_v48  ;;  %v6113_v47 = vpop.f32.mrb[48].mxu1  ;;  %v1747_v5 = vpop.xlane.xlu1 %1746 }
 0x427   : > { %v1875_v9 = vadd.f32 %v1843_v35, %v1747_v5  ;;  %v6114_v22 = vpop.f32.mrb[49].mxu1 }
 0x428   : > { %v6115_v26 = vadd.f32 %v6114_v22, %v6113_v47  ;;  %v6116_v18 = vpop.f32.mrb[50].mxu1 }
 0x429   : > { %1908 = vst.msk [vmem:[#allocation4 + $0xf8] sm:$0xff] %vm465_vm1, %v1875_v9  ;;  %v6117_v54 = vpop.f32.mrb[51].mxu1 }
 0x42a   : > { %v2478_v29 = vadd.f32 %v6115_v26, %v2446_v36  ;;  %v6118_v1 = vadd.f32 %v6117_v54, %v6116_v18 }
 0x42c   : > { %2510 = vst.msk [vmem:[#allocation5 + $0xc0] sm:$0xff] %vm754_vm0, %v2478_v29  ;;  %v2479_v30 = vadd.f32 %v6118_v1, %v2447_v20 }
 0x42e   : > { %2511 = vst.msk [vmem:[#allocation5 + $0xc8] sm:$0xff] %vm754_vm0, %v2479_v30  ;;  %v6119_v33 = vpop.f32.mrb[52].mxu1 }
 0x42f   : > { %v6120_v56 = vpop.f32.mrb[53].mxu1 }
 0x430   : > { %v6121_v2 = vadd.f32 %v6120_v56, %v6119_v33  ;;  %v6122_v25 = vpop.f32.mrb[54].mxu1 }
 0x431   : > { %v6123_v23 = vpop.f32.mrb[55].mxu1 }
 0x432   : > { %v2480_v62 = vadd.f32 %v6121_v2, %v2448_v21  ;;  %v6124_v13 = vadd.f32 %v6123_v23, %v6122_v25 }
 0x434   : > { %2512 = vst.msk [vmem:[#allocation5 + $0xd0] sm:$0xff] %vm754_vm0, %v2480_v62  ;;  %v2481_v34 = vadd.f32 %v6124_v13, %v2449_v31 }
 0x436   : > { %2513 = vst.msk [vmem:[#allocation5 + $0xd8] sm:$0xff] %vm754_vm0, %v2481_v34  ;;  %v6125_v12 = vpop.f32.mrb[56].mxu1 }
 0x437   : > { %v6126_v55 = vpop.f32.mrb[57].mxu1 }
 0x438   : > { %v6127_v0 = vadd.f32 %v6126_v55, %v6125_v12  ;;  %v6128_v3 = vpop.f32.mrb[58].mxu1 }
 0x439   : > { %v6129_v38 = vpop.f32.mrb[59].mxu1 }
 0x43a   : > { %v2482_v42 = vadd.f32 %v6127_v0, %v2450_v4  ;;  %v6130_v43 = vadd.f32 %v6129_v38, %v6128_v3 }
 0x43c   : > { %2514 = vst.msk [vmem:[#allocation5 + $0xe0] sm:$0xff] %vm754_vm0, %v2482_v42  ;;  %v2483_v45 = vadd.f32 %v6130_v43, %v2451_v41 }
 0x43e   : > { %2515 = vst.msk [vmem:[#allocation5 + $0xe8] sm:$0xff] %vm754_vm0, %v2483_v45  ;;  %v6131_v44 = vpop.f32.mrb[60].mxu1 }
 0x43f   : > { %v6132_v52 = vpop.f32.mrb[61].mxu1 }
 0x440   : > { %v6133_v50 = vadd.f32 %v6132_v52, %v6131_v44  ;;  %v6134_v57 = vpop.f32.mrb[62].mxu1 }
 0x441   : > { %v6135_v49 = vpop.f32.mrb[63].mxu1 }
 0x442   : > { %v2484_v19 = vadd.f32 %v6133_v50, %v2452_v37  ;;  %v6136_v46 = vadd.f32 %v6135_v49, %v6134_v57 }
 0x444   : > { %2516 = vst.msk [vmem:[#allocation5 + $0xf0] sm:$0xff] %vm754_vm0, %v2484_v19  ;;  %v2485_v53 = vadd.f32 %v6136_v46, %v2453_v39 }
 0x446   : > { %2517 = vst.msk [vmem:[#allocation5 + $0xf8] sm:$0xff] %vm754_vm0, %v2485_v53 }
 0x450   : > { %v9127_v11 = vpop.f32.mrb[64].mxu1 }
 0x451   : > { %v9129_v6 = vpop.f32.mrb[65].mxu1 }
 0x452   : > { %v3048_v15 = vmax.f32 %v9127_v11, %v9129_v6  ;;  %v9133_v17 = vpop.f32.mrb[66].mxu1 }
 0x453   : > { %v9135_v7 = vpop.f32.mrb[67].mxu1 }
 0x454   : > { %v3051_v51 = vmax.f32 %v9133_v17, %v9135_v7  ;;  %3049 = vmax.xlane.f32.xlu1 %v3048_v15 }
 0x456   : > { %3052 = vmax.xlane.f32.xlu0 %v3051_v51 }
 0x458   : > { %v9139_v61 = vpop.f32.mrb[68].mxu1 }
 0x459   : > { %v9141_v59 = vpop.f32.mrb[69].mxu1 }
 0x45a   : > { %v3054_v28 = vmax.f32 %v9139_v61, %v9141_v59  ;;  %v9145_v24 = vpop.f32.mrb[70].mxu1 }
 0x45b   : > { %v9147_v14 = vpop.f32.mrb[71].mxu1 }
 0x45c   : > { %v3057_v8 = vmax.f32 %v9145_v24, %v9147_v14  ;;  %3055 = vmax.xlane.f32.xlu0 %v3054_v28 }
 0x45e   : > { %3058 = vmax.xlane.f32.xlu1 %v3057_v8 }
 0x460   : > { %v9151_v60 = vpop.f32.mrb[72].mxu1 }
 0x461   : > { %v9153_v16 = vpop.f32.mrb[73].mxu1 }
 0x462   : > { %v3060_v58 = vmax.f32 %v9151_v60, %v9153_v16  ;;  %v9157_v40 = vpop.f32.mrb[74].mxu1 }
 0x463   : > { %v9159_v27 = vpop.f32.mrb[75].mxu1 }
 0x464   : > { %v3063_v32 = vmax.f32 %v9157_v40, %v9159_v27  ;;  %3061 = vmax.xlane.f32.xlu0 %v3060_v58 }
 0x466   : > { %3064 = vmax.xlane.f32.xlu1 %v3063_v32 }
 0x468   : > { %v9163_v10 = vpop.f32.mrb[76].mxu1 }
 0x469   : > { %v9165_v48 = vpop.f32.mrb[77].mxu1 }
 0x46a   : > { %v3066_v63 = vmax.f32 %v9163_v10, %v9165_v48  ;;  %v9169_v35 = vpop.f32.mrb[78].mxu1 }
 0x46b   : > { %v9171_v47 = vpop.f32.mrb[79].mxu1 }
 0x46c   : > { %v3069_v5 = vmax.f32 %v9169_v35, %v9171_v47  ;;  %3067 = vmax.xlane.f32.xlu0 %v3066_v63 }
 0x46e   : > { %3070 = vmax.xlane.f32.xlu1 %v3069_v5 }
 0x470   : > { %v9175_v9 = vpop.f32.mrb[80].mxu1 }
 0x471   : > { %v9177_v22 = vpop.f32.mrb[81].mxu1 }
 0x472   : > { %v3072_v36 = vmax.f32 %v9175_v9, %v9177_v22  ;;  %v9181_v26 = vpop.f32.mrb[82].mxu1 }
 0x473   : > { %v9183_v18 = vpop.f32.mrb[83].mxu1 }
 0x474   : > { %v3075_v54 = vmax.f32 %v9181_v26, %v9183_v18  ;;  %3073 = vmax.xlane.f32.xlu0 %v3072_v36 }
 0x476   : > { %3076 = vmax.xlane.f32.xlu1 %v3075_v54 }
 0x478   : > { %v9187_v20 = vpop.f32.mrb[84].mxu1 }
 0x479   : > { %v9189_v29 = vpop.f32.mrb[85].mxu1 }
 0x47a   : > { %v3078_v1 = vmax.f32 %v9187_v20, %v9189_v29  ;;  %v9193_v30 = vpop.f32.mrb[86].mxu1 }
 0x47b   : > { %v9195_v33 = vpop.f32.mrb[87].mxu1 }
 0x47c   : > { %v3081_v56 = vmax.f32 %v9193_v30, %v9195_v33  ;;  %3079 = vmax.xlane.f32.xlu0 %v3078_v1 }
 0x47e   : > { %3082 = vmax.xlane.f32.xlu1 %v3081_v56 }
 0x480   : > { %v9199_v21 = vpop.f32.mrb[88].mxu1 }
 0x481   : > { %v9201_v2 = vpop.f32.mrb[89].mxu1 }
 0x482   : > { %v3084_v25 = vmax.f32 %v9199_v21, %v9201_v2  ;;  %v9205_v23 = vpop.f32.mrb[90].mxu1 }
 0x483   : > { %v9207_v31 = vpop.f32.mrb[91].mxu1 }
 0x484   : > { %v3087_v62 = vmax.f32 %v9205_v23, %v9207_v31  ;;  %3085 = vmax.xlane.f32.xlu0 %v3084_v25 }
 0x486   : > { %3088 = vmax.xlane.f32.xlu1 %v3087_v62 }
 0x488   : > { %v9211_v13 = vpop.f32.mrb[92].mxu1 }
 0x489   : > { %v9213_v34 = vpop.f32.mrb[93].mxu1 }
 0x48a   : > { %v3090_v12 = vmax.f32 %v9211_v13, %v9213_v34  ;;  %v9217_v55 = vpop.f32.mrb[94].mxu1 }
 0x48b   : > { %v9219_v4 = vpop.f32.mrb[95].mxu1 }
 0x48c   : > { %v3093_v0 = vmax.f32 %v9217_v55, %v9219_v4  ;;  %3091 = vmax.xlane.f32.xlu0 %v3090_v12 }
 0x48e   : > { %3094 = vmax.xlane.f32.xlu1 %v3093_v0 }
 0x490   : > { %v9223_v3 = vpop.f32.mrb[96].mxu1 }
 0x491   : > { %v9225_v38 = vpop.f32.mrb[97].mxu1 }
 0x492   : > { %v3096_v41 = vmax.f32 %v9223_v3, %v9225_v38  ;;  %v9229_v42 = vpop.f32.mrb[98].mxu1 }
 0x493   : > { %v9231_v43 = vpop.f32.mrb[99].mxu1 }
 0x494   : > { %v3099_v45 = vmax.f32 %v9229_v42, %v9231_v43  ;;  %3097 = vmax.xlane.f32.xlu0 %v3096_v41 }
 0x496   : > { %3100 = vmax.xlane.f32.xlu1 %v3099_v45 }
 0x498   : > { %v9235_v44 = vpop.f32.mrb[100].mxu1 }
 0x499   : > { %v9237_v52 = vpop.f32.mrb[101].mxu1 }
 0x49a   : > { %v3102_v37 = vmax.f32 %v9235_v44, %v9237_v52  ;;  %v9241_v50 = vpop.f32.mrb[102].mxu1 }
 0x49b   : > { %v9243_v57 = vpop.f32.mrb[103].mxu1 }
 0x49c   : > { %10608 = vst [vmem:[#allocation34_spill] sm:$0xff] %v9243_v57  ;;  %v3105_v49 = vmax.f32 %v9241_v50, %v9243_v57  ;;  %3103 = vmax.xlane.f32.xlu0 %v3102_v37 }
 0x49e   : > { %3106 = vmax.xlane.f32.xlu1 %v3105_v49 }
 0x4a0   : > { %v9247_v39 = vpop.f32.mrb[104].mxu1 }
 0x4a1   : > { %10609 = vst [vmem:[#allocation39_spill] sm:$0xff] %v9247_v39  ;;  %v9249_v19 = vpop.f32.mrb[105].mxu1 }
 0x4a2   : > { %10610 = vst [vmem:[#allocation40_spill] sm:$0xff] %v9249_v19  ;;  %v3108_v46 = vmax.f32 %v9247_v39, %v9249_v19  ;;  %v9253_v53 = vpop.f32.mrb[106].mxu1 }
 0x4a3   : > { %10611 = vst [vmem:[#allocation88_spill] sm:$0xff] %v9253_v53  ;;  %v9255_v15 = vpop.f32.mrb[107].mxu1 }
 0x4a4   : > { %10612 = vst [vmem:[#allocation89_spill] sm:$0xff] %v9255_v15  ;;  %v3111_v51 = vmax.f32 %v9253_v53, %v9255_v15  ;;  %3109 = vmax.xlane.f32.xlu0 %v3108_v46 }
 0x4a6   : > { %3112 = vmax.xlane.f32.xlu1 %v3111_v51 }
 0x4a8   : > { %v9259_v28 = vpop.f32.mrb[108].mxu1 }
 0x4a9   : > { %10613 = vst [vmem:[#allocation90_spill] sm:$0xff] %v9259_v28  ;;  %v9261_v8 = vpop.f32.mrb[109].mxu1 }
 0x4aa   : > { %10614 = vst [vmem:[#allocation37_spill] sm:$0xff] %v9261_v8  ;;  %v3114_v58 = vmax.f32 %v9259_v28, %v9261_v8  ;;  %v9265_v32 = vpop.f32.mrb[110].mxu1  ;;  %v4667_v8 = vld [vmem:[#allocation4 + $0x68] sm:$0xff] }
 0x4ab   : > { %10615 = vst [vmem:[#allocation38_spill] sm:$0xff] %v9265_v32  ;;  %v9267_v63 = vpop.f32.mrb[111].mxu1 }
 0x4ac   : > { %10616 = vst [vmem:[#allocation43_spill] sm:$0xff] %v9267_v63  ;;  %v3117_v5 = vmax.f32 %v9265_v32, %v9267_v63  ;;  %3115 = vmax.xlane.f32.xlu0 %v3114_v58  ;;  %v4664_v63 = vld [vmem:[#allocation4 + $0x50] sm:$0xff] }
 0x4ae   : > { %3118 = vmax.xlane.f32.xlu1 %v3117_v5 }
 0x4b0   : > { %v9271_v36 = vpop.f32.mrb[112].mxu1 }
 0x4b1   : > { %10617 = vst [vmem:[#allocation44_spill] sm:$0xff] %v9271_v36  ;;  %v9273_v54 = vpop.f32.mrb[113].mxu1 }
 0x4b2   : > { %10618 = vst [vmem:[#allocation41_spill] sm:$0xff] %v9273_v54  ;;  %v3120_v1 = vmax.f32 %v9271_v36, %v9273_v54  ;;  %v9277_v56 = vpop.f32.mrb[114].mxu1 }
 0x4b3   : > { %10619 = vst [vmem:[#allocation42_spill] sm:$0xff] %v9277_v56  ;;  %v9279_v25 = vpop.f32.mrb[115].mxu1 }
 0x4b4   : > { %10620 = vst [vmem:[#allocation47_spill] sm:$0xff] %v9279_v25  ;;  %v3123_v62 = vmax.f32 %v9277_v56, %v9279_v25  ;;  %3121 = vmax.xlane.f32.xlu0 %v3120_v1 }
 0x4b6   : > { %3124 = vmax.xlane.f32.xlu1 %v3123_v62 }
 0x4b8   : > { %v9283_v12 = vpop.f32.mrb[116].mxu1 }
 0x4b9   : > { %10621 = vst [vmem:[#allocation48_spill] sm:$0xff] %v9283_v12  ;;  %v9285_v0 = vpop.f32.mrb[117].mxu1 }
 0x4ba   : > { %10622 = vst [vmem:[#allocation45_spill] sm:$0xff] %v9285_v0  ;;  %v3126_v41 = vmax.f32 %v9283_v12, %v9285_v0  ;;  %v9289_v45 = vpop.f32.mrb[118].mxu1 }
 0x4bb   : > { %10623 = vst [vmem:[#allocation46_spill] sm:$0xff] %v9289_v45  ;;  %v9291_v37 = vpop.f32.mrb[119].mxu1 }
 0x4bc   : > { %10624 = vst [vmem:[#allocation51_spill] sm:$0xff] %v9291_v37  ;;  %v3129_v49 = vmax.f32 %v9289_v45, %v9291_v37  ;;  %3127 = vmax.xlane.f32.xlu0 %v3126_v41 }
 0x4be   : > { %3130 = vmax.xlane.f32.xlu1 %v3129_v49 }
 0x4c0   : > { %v9295_v46 = vpop.f32.mrb[120].mxu1 }
 0x4c1   : > { %10625 = vst [vmem:[#allocation52_spill] sm:$0xff] %v9295_v46  ;;  %v9297_v51 = vpop.f32.mrb[121].mxu1 }
 0x4c2   : > { %10626 = vst [vmem:[#allocation49_spill] sm:$0xff] %v9297_v51  ;;  %v3132_v58 = vmax.f32 %v9295_v46, %v9297_v51  ;;  %v9301_v5 = vpop.f32.mrb[122].mxu1  ;;  %v9319_v46 = vpop.permute.xlu1 %4784 }
 0x4c3   : > { %10627 = vst [vmem:[#allocation50_spill] sm:$0xff] %v9301_v5  ;;  %v9303_v1 = vpop.f32.mrb[123].mxu1  ;;  %10633 = vst [vmem:[#allocation60_spill] sm:$0xff] %v9319_v46 }
 0x4c4   : > { %10628 = vst [vmem:[#allocation55_spill] sm:$0xff] %v9303_v1  ;;  %v3135_v62 = vmax.f32 %v9301_v5, %v9303_v1  ;;  %3133 = vmax.xlane.f32.xlu0 %v3132_v58  ;;  %v9321_v58 = vpop.permute.xlu0 %4789  ;;  %v3017_v5 = vld [vmem:[#allocation3 + $0x108] sm:$0xff] }
 0x4c5   : > { %10634 = vst [vmem:[#allocation57_spill] sm:$0xff] %v9321_v58  ;;  %v3019_v58 = vld [vmem:[#allocation3 + $0x118] sm:$0xff] }
 0x4c6   : > { %3136 = vmax.xlane.f32.xlu1 %v3135_v62  ;;  %v3016_v62 = vld [vmem:[#allocation3 + $0x100] sm:$0xff] }
 0x4c8   : > { %v9307_v0 = vpop.f32.mrb[124].mxu1 }
 0x4c9   : > { %10629 = vst [vmem:[#allocation56_spill] sm:$0xff] %v9307_v0  ;;  %v9309_v41 = vpop.f32.mrb[125].mxu1 }
 0x4ca   : > { %10630 = vst [vmem:[#allocation53_spill] sm:$0xff] %v9309_v41  ;;  %v3138_v49 = vmax.f32 %v9307_v0, %v9309_v41  ;;  %v9313_v37 = vpop.f32.mrb[126].mxu1 }
 0x4cb   : > { %10631 = vst [vmem:[#allocation54_spill] sm:$0xff] %v9313_v37  ;;  %v9315_v45 = vpop.f32.mrb[127].mxu1 }
 0x4cc   : > { %10632 = vst [vmem:[#allocation59_spill] sm:$0xff] %v9315_v45  ;;  %v3141_v51 = vmax.f32 %v9313_v37, %v9315_v45  ;;  %3139 = vmax.xlane.f32.xlu0 %v3138_v49 }
 0x4ce   : > { %3142 = vmax.xlane.f32.xlu1 %v3141_v51  ;;  %v3018_v51 = vld [vmem:[#allocation3 + $0x110] sm:$0xff] }
 0x4e1   : > { %v3050_v1 = vpop.xlane.xlu1 %3049 }
 0x4e2   : > { %v3144_v12 = vmax.f32 %v3016_v62, %v3050_v1 }
 0x4e3   : > { %v3053_v25 = vpop.xlane.xlu0 %3052 }
 0x4e4   : > { %v3176_v56 = vsub.f32 %v3016_v62, %v3144_v12  ;;  %3881 = vst.msk [vmem:[#allocation3 + $0x100] sm:$0xff] %vm465_vm1, %v3144_v12  ;;  %v3145_v41 = vmax.f32 %v3017_v5, %v3053_v25  ;;  %3274 = vperm.xlu0 %6475, %v3144_v12  }
 0x4e6   : > { %v3208_v0 = vmul.f32 1.442695, %v3176_v56  ;;  %v3177_v54 = vsub.f32 %v3017_v5, %v3145_v41  ;;  %3882 = vst.msk [vmem:[#allocation3 + $0x108] sm:$0xff] %vm465_vm1, %v3145_v41  ;;  %3279 = vperm.xlu1 %6476, %v3145_v41   ;;  %v3020_v56 = vld [vmem:[#allocation3 + $0x120] sm:$0xff] }
 0x4e8   : > { %6737 = vpow2.f32 %v3208_v0  ;;  %v3210_v49 = vmul.f32 1.442695, %v3177_v54  ;;  %v3021_v54 = vld [vmem:[#allocation3 + $0x128] sm:$0xff] }
 0x4e9   : > { %v3056_v46 = vpop.xlane.xlu0 %3055 }
 0x4ea   : > { %6739 = vpow2.f32 %v3210_v49  ;;  %v3146_v45 = vmax.f32 %v3018_v51, %v3056_v46 }
 0x4eb   : > { %v3059_v37 = vpop.xlane.xlu1 %3058 }
 0x4ec   : > { %v3178_v1 = vsub.f32 %v3018_v51, %v3146_v45  ;;  %3883 = vst.msk [vmem:[#allocation3 + $0x110] sm:$0xff] %vm465_vm1, %v3146_v45  ;;  %v3147_v62 = vmax.f32 %v3019_v58, %v3059_v37  ;;  %3284 = vperm.xlu1 %6476, %v3146_v45  }
 0x4ee   : > { %v3212_v25 = vmul.f32 1.442695, %v3178_v1  ;;  %v3179_v12 = vsub.f32 %v3019_v58, %v3147_v62  ;;  %3884 = vst.msk [vmem:[#allocation3 + $0x118] sm:$0xff] %vm465_vm1, %v3147_v62  ;;  %3289 = vperm.xlu0 %6475, %v3147_v62   ;;  %v3022_v62 = vld [vmem:[#allocation3 + $0x130] sm:$0xff] }
 0x4f0   : > { %6741 = vpow2.f32 %v3212_v25  ;;  %v3214_v5 = vmul.f32 1.442695, %v3179_v12 }
 0x4f1   : > { %v3062_v0 = vpop.xlane.xlu0 %3061 }
 0x4f2   : > { %v9327_v41 = vpop.eup %6737  ;;  %6743 = vpow2.f32 %v3214_v5  ;;  %v3148_v46 = vmax.f32 %v3020_v56, %v3062_v0  ;;  %v3023_v5 = vld [vmem:[#allocation3 + $0x138] sm:$0xff] }
 0x4f3   : > { %10635 = vst [vmem:[#allocation58_spill] sm:$0xff] %v9327_v41  ;;  %4268 = vperm.xlu1 %6476, %v9327_v41   ;;  %v3065_v51 = vpop.xlane.xlu1 %3064 }
 0x4f4   : > { %v9330_v49 = vpop.eup %6739  ;;  %v3180_v45 = vsub.f32 %v3020_v56, %v3148_v46  ;;  %3885 = vst.msk [vmem:[#allocation3 + $0x120] sm:$0xff] %vm465_vm1, %v3148_v46  ;;  %v3149_v37 = vmax.f32 %v3021_v54, %v3065_v51 }
 0x4f5   : > { %10636 = vst [vmem:[#allocation63_spill] sm:$0xff] %v9330_v49  ;;  %4273 = vperm.xlu0 %6475, %v9330_v49  }
 0x4f6   : > { %v3216_v58 = vmul.f32 1.442695, %v3180_v45  ;;  %v3181_v1 = vsub.f32 %v3021_v54, %v3149_v37  ;;  %3886 = vst.msk [vmem:[#allocation3 + $0x128] sm:$0xff] %vm465_vm1, %v3149_v37 }
 0x4f7   : > { %3294 = vperm.xlu1 %6476, %v3148_v46  }
 0x4f8   : > { %6745 = vpow2.f32 %v3216_v58  ;;  %v3218_v25 = vmul.f32 1.442695, %v3181_v1 }
 0x4f9   : > { %v3068_v12 = vpop.xlane.xlu0 %3067  ;;  %3299 = vperm.xlu0 %6475, %v3149_v37   ;;  %v3024_v37 = vld [vmem:[#allocation3 + $0x140] sm:$0xff] }
 0x4fa   : > { %v9335_v0 = vpop.eup %6741  ;;  %6747 = vpow2.f32 %v3218_v25  ;;  %v3150_v56 = vmax.f32 %v3022_v62, %v3068_v12  ;;  %v3025_v12 = vld [vmem:[#allocation3 + $0x148] sm:$0xff] }
 0x4fb   : > { %10637 = vst [vmem:[#allocation64_spill] sm:$0xff] %v9335_v0  ;;  %4278 = vperm.xlu1 %6476, %v9335_v0   ;;  %v3071_v51 = vpop.xlane.xlu1 %3070 }
 0x4fc   : > { %v9338_v41 = vpop.eup %6743  ;;  %v3182_v45 = vsub.f32 %v3022_v62, %v3150_v56  ;;  %3887 = vst.msk [vmem:[#allocation3 + $0x130] sm:$0xff] %vm465_vm1, %v3150_v56  ;;  %v3151_v54 = vmax.f32 %v3023_v5, %v3071_v51 }
 0x4fd   : > { %10638 = vst [vmem:[#allocation61_spill] sm:$0xff] %v9338_v41  ;;  %4283 = vperm.xlu0 %6475, %v9338_v41  }
 0x4fe   : > { %v3220_v46 = vmul.f32 1.442695, %v3182_v45  ;;  %v3183_v58 = vsub.f32 %v3023_v5, %v3151_v54  ;;  %3888 = vst.msk [vmem:[#allocation3 + $0x138] sm:$0xff] %vm465_vm1, %v3151_v54 }
 0x4ff   : > { %3304 = vperm.xlu1 %6476, %v3150_v56  }
 0x500   : > { %6749 = vpow2.f32 %v3220_v46  ;;  %v3222_v1 = vmul.f32 1.442695, %v3183_v58 }
 0x501   : > { %v3074_v25 = vpop.xlane.xlu0 %3073  ;;  %3309 = vperm.xlu0 %6475, %v3151_v54   ;;  %v3026_v54 = vld [vmem:[#allocation3 + $0x150] sm:$0xff] }
 0x502   : > { %v9343_v0 = vpop.eup %6745  ;;  %6751 = vpow2.f32 %v3222_v1  ;;  %v3152_v62 = vmax.f32 %v3024_v37, %v3074_v25  ;;  %v3027_v25 = vld [vmem:[#allocation3 + $0x158] sm:$0xff] }
 0x503   : > { %10639 = vst [vmem:[#allocation62_spill] sm:$0xff] %v9343_v0  ;;  %4288 = vperm.xlu1 %6476, %v9343_v0   ;;  %v3077_v51 = vpop.xlane.xlu1 %3076 }
 0x504   : > { %v9346_v49 = vpop.eup %6747  ;;  %v3184_v45 = vsub.f32 %v3024_v37, %v3152_v62  ;;  %3889 = vst.msk [vmem:[#allocation3 + $0x140] sm:$0xff] %vm465_vm1, %v3152_v62  ;;  %v3153_v5 = vmax.f32 %v3025_v12, %v3077_v51 }
 0x505   : > { %10640 = vst [vmem:[#allocation66_spill] sm:$0xff] %v9346_v49  ;;  %4293 = vperm.xlu0 %6475, %v9346_v49  }
 0x506   : > { %v3224_v56 = vmul.f32 1.442695, %v3184_v45  ;;  %v3185_v46 = vsub.f32 %v3025_v12, %v3153_v5  ;;  %3890 = vst.msk [vmem:[#allocation3 + $0x148] sm:$0xff] %vm465_vm1, %v3153_v5 }
 0x507   : > { %3314 = vperm.xlu1 %6476, %v3152_v62  }
 0x508   : > { %6753 = vpow2.f32 %v3224_v56  ;;  %v3226_v58 = vmul.f32 1.442695, %v3185_v46 }
 0x509   : > { %v3080_v1 = vpop.xlane.xlu0 %3079  ;;  %3319 = vperm.xlu0 %6475, %v3153_v5   ;;  %v3028_v5 = vld [vmem:[#allocation3 + $0x160] sm:$0xff] }
 0x50a   : > { %v9351_v0 = vpop.eup %6749  ;;  %6755 = vpow2.f32 %v3226_v58  ;;  %v3154_v37 = vmax.f32 %v3026_v54, %v3080_v1  ;;  %v3029_v1 = vld [vmem:[#allocation3 + $0x168] sm:$0xff] }
 0x50b   : > { %10641 = vst [vmem:[#allocation68_spill] sm:$0xff] %v9351_v0  ;;  %4298 = vperm.xlu1 %6476, %v9351_v0   ;;  %v3083_v51 = vpop.xlane.xlu1 %3082 }
 0x50c   : > { %v9354_v41 = vpop.eup %6751  ;;  %v3186_v45 = vsub.f32 %v3026_v54, %v3154_v37  ;;  %3891 = vst.msk [vmem:[#allocation3 + $0x150] sm:$0xff] %vm465_vm1, %v3154_v37  ;;  %v3155_v12 = vmax.f32 %v3027_v25, %v3083_v51 }
 0x50d   : > { %10642 = vst [vmem:[#allocation70_spill] sm:$0xff] %v9354_v41  ;;  %4303 = vperm.xlu0 %6475, %v9354_v41  }
 0x50e   : > { %v3228_v62 = vmul.f32 1.442695, %v3186_v45  ;;  %v3187_v56 = vsub.f32 %v3027_v25, %v3155_v12  ;;  %3892 = vst.msk [vmem:[#allocation3 + $0x158] sm:$0xff] %vm465_vm1, %v3155_v12 }
 0x50f   : > { %3324 = vperm.xlu1 %6476, %v3154_v37  }
 0x510   : > { %6757 = vpow2.f32 %v3228_v62  ;;  %v3230_v46 = vmul.f32 1.442695, %v3187_v56 }
 0x511   : > { %v3086_v58 = vpop.xlane.xlu0 %3085  ;;  %3329 = vperm.xlu0 %6475, %v3155_v12   ;;  %v3030_v12 = vld [vmem:[#allocation3 + $0x170] sm:$0xff] }
 0x512   : > { %v9359_v0 = vpop.eup %6753  ;;  %6759 = vpow2.f32 %v3230_v46  ;;  %v3156_v54 = vmax.f32 %v3028_v5, %v3086_v58  ;;  %v3031_v58 = vld [vmem:[#allocation3 + $0x178] sm:$0xff] }
 0x513   : > { %10643 = vst [vmem:[#allocation65_spill] sm:$0xff] %v9359_v0  ;;  %4308 = vperm.xlu1 %6476, %v9359_v0   ;;  %v3089_v51 = vpop.xlane.xlu1 %3088 }
 0x514   : > { %v9362_v49 = vpop.eup %6755  ;;  %v3188_v45 = vsub.f32 %v3028_v5, %v3156_v54  ;;  %3893 = vst.msk [vmem:[#allocation3 + $0x160] sm:$0xff] %vm465_vm1, %v3156_v54  ;;  %v3157_v25 = vmax.f32 %v3029_v1, %v3089_v51 }
 0x515   : > { %10644 = vst [vmem:[#allocation72_spill] sm:$0xff] %v9362_v49  ;;  %4313 = vperm.xlu0 %6475, %v9362_v49  }
 0x516   : > { %v3232_v37 = vmul.f32 1.442695, %v3188_v45  ;;  %v3189_v62 = vsub.f32 %v3029_v1, %v3157_v25  ;;  %3894 = vst.msk [vmem:[#allocation3 + $0x168] sm:$0xff] %vm465_vm1, %v3157_v25 }
 0x517   : > { %3334 = vperm.xlu1 %6476, %v3156_v54  }
 0x518   : > { %6761 = vpow2.f32 %v3232_v37  ;;  %v3234_v56 = vmul.f32 1.442695, %v3189_v62 }
 0x519   : > { %v3092_v46 = vpop.xlane.xlu0 %3091  ;;  %3339 = vperm.xlu0 %6475, %v3157_v25   ;;  %v3032_v25 = vld [vmem:[#allocation3 + $0x180] sm:$0xff] }
 0x51a   : > { %v9367_v0 = vpop.eup %6757  ;;  %6763 = vpow2.f32 %v3234_v56  ;;  %v3158_v5 = vmax.f32 %v3030_v12, %v3092_v46  ;;  %v3033_v46 = vld [vmem:[#allocation3 + $0x188] sm:$0xff] }
 0x51b   : > { %10645 = vst [vmem:[#allocation67_spill] sm:$0xff] %v9367_v0  ;;  %4318 = vperm.xlu1 %6476, %v9367_v0   ;;  %v3095_v51 = vpop.xlane.xlu1 %3094 }
 0x51c   : > { %v9370_v41 = vpop.eup %6759  ;;  %v3190_v45 = vsub.f32 %v3030_v12, %v3158_v5  ;;  %3895 = vst.msk [vmem:[#allocation3 + $0x170] sm:$0xff] %vm465_vm1, %v3158_v5  ;;  %v3159_v1 = vmax.f32 %v3031_v58, %v3095_v51 }
 0x51d   : > { %10646 = vst [vmem:[#allocation74_spill] sm:$0xff] %v9370_v41  ;;  %4323 = vperm.xlu0 %6475, %v9370_v41  }
 0x51e   : > { %v3236_v54 = vmul.f32 1.442695, %v3190_v45  ;;  %v3191_v37 = vsub.f32 %v3031_v58, %v3159_v1  ;;  %3896 = vst.msk [vmem:[#allocation3 + $0x178] sm:$0xff] %vm465_vm1, %v3159_v1 }
 0x51f   : > { %3344 = vperm.xlu1 %6476, %v3158_v5  }
 0x520   : > { %6765 = vpow2.f32 %v3236_v54  ;;  %v3238_v62 = vmul.f32 1.442695, %v3191_v37 }
 0x521   : > { %v3098_v56 = vpop.xlane.xlu0 %3097  ;;  %3349 = vperm.xlu0 %6475, %v3159_v1   ;;  %v3034_v1 = vld [vmem:[#allocation3 + $0x190] sm:$0xff] }
 0x522   : > { %v9375_v0 = vpop.eup %6761  ;;  %6767 = vpow2.f32 %v3238_v62  ;;  %v3160_v12 = vmax.f32 %v3032_v25, %v3098_v56  ;;  %v3035_v56 = vld [vmem:[#allocation3 + $0x198] sm:$0xff] }
 0x523   : > { %10647 = vst [vmem:[#allocation69_spill] sm:$0xff] %v9375_v0  ;;  %4328 = vperm.xlu1 %6476, %v9375_v0   ;;  %v3101_v51 = vpop.xlane.xlu1 %3100 }
 0x524   : > { %v9378_v49 = vpop.eup %6763  ;;  %v3192_v45 = vsub.f32 %v3032_v25, %v3160_v12  ;;  %3897 = vst.msk [vmem:[#allocation3 + $0x180] sm:$0xff] %vm465_vm1, %v3160_v12  ;;  %v3161_v58 = vmax.f32 %v3033_v46, %v3101_v51 }
 0x525   : > { %10648 = vst [vmem:[#allocation76_spill] sm:$0xff] %v9378_v49  ;;  %4333 = vperm.xlu0 %6475, %v9378_v49  }
 0x526   : > { %v3240_v5 = vmul.f32 1.442695, %v3192_v45  ;;  %v3193_v54 = vsub.f32 %v3033_v46, %v3161_v58  ;;  %3898 = vst.msk [vmem:[#allocation3 + $0x188] sm:$0xff] %vm465_vm1, %v3161_v58 }
 0x527   : > { %3354 = vperm.xlu1 %6476, %v3160_v12  }
 0x528   : > { %6769 = vpow2.f32 %v3240_v5  ;;  %v3242_v37 = vmul.f32 1.442695, %v3193_v54 }
 0x529   : > { %v3104_v62 = vpop.xlane.xlu0 %3103  ;;  %3359 = vperm.xlu0 %6475, %v3161_v58   ;;  %v3036_v58 = vld [vmem:[#allocation3 + $0x1a0] sm:$0xff] }
 0x52a   : > { %v9383_v0 = vpop.eup %6765  ;;  %6771 = vpow2.f32 %v3242_v37  ;;  %v3162_v25 = vmax.f32 %v3034_v1, %v3104_v62  ;;  %v3037_v62 = vld [vmem:[#allocation3 + $0x1a8] sm:$0xff] }
 0x52b   : > { %10649 = vst [vmem:[#allocation71_spill] sm:$0xff] %v9383_v0  ;;  %4338 = vperm.xlu1 %6476, %v9383_v0   ;;  %v3107_v51 = vpop.xlane.xlu1 %3106 }
 0x52c   : > { %v9386_v41 = vpop.eup %6767  ;;  %v3194_v45 = vsub.f32 %v3034_v1, %v3162_v25  ;;  %3899 = vst.msk [vmem:[#allocation3 + $0x190] sm:$0xff] %vm465_vm1, %v3162_v25  ;;  %v3163_v46 = vmax.f32 %v3035_v56, %v3107_v51 }
 0x52d   : > { %10650 = vst [vmem:[#allocation78_spill] sm:$0xff] %v9386_v41  ;;  %4343 = vperm.xlu0 %6475, %v9386_v41  }
 0x52e   : > { %v3244_v12 = vmul.f32 1.442695, %v3194_v45  ;;  %v3195_v5 = vsub.f32 %v3035_v56, %v3163_v46  ;;  %3900 = vst.msk [vmem:[#allocation3 + $0x198] sm:$0xff] %vm465_vm1, %v3163_v46 }
 0x52f   : > { %3364 = vperm.xlu1 %6476, %v3162_v25  }
 0x530   : > { %6773 = vpow2.f32 %v3244_v12  ;;  %v3246_v54 = vmul.f32 1.442695, %v3195_v5 }
 0x531   : > { %v3110_v37 = vpop.xlane.xlu0 %3109  ;;  %3369 = vperm.xlu0 %6475, %v3163_v46   ;;  %v3038_v46 = vld [vmem:[#allocation3 + $0x1b0] sm:$0xff] }
 0x532   : > { %v9391_v0 = vpop.eup %6769  ;;  %6775 = vpow2.f32 %v3246_v54  ;;  %v3164_v1 = vmax.f32 %v3036_v58, %v3110_v37  ;;  %v3039_v37 = vld [vmem:[#allocation3 + $0x1b8] sm:$0xff] }
 0x533   : > { %10651 = vst [vmem:[#allocation73_spill] sm:$0xff] %v9391_v0  ;;  %4348 = vperm.xlu1 %6476, %v9391_v0   ;;  %v3113_v51 = vpop.xlane.xlu1 %3112 }
 0x534   : > { %v9394_v49 = vpop.eup %6771  ;;  %v3196_v45 = vsub.f32 %v3036_v58, %v3164_v1  ;;  %3901 = vst.msk [vmem:[#allocation3 + $0x1a0] sm:$0xff] %vm465_vm1, %v3164_v1  ;;  %v3165_v56 = vmax.f32 %v3037_v62, %v3113_v51 }
 0x535   : > { %10652 = vst [vmem:[#allocation80_spill] sm:$0xff] %v9394_v49  ;;  %4353 = vperm.xlu0 %6475, %v9394_v49  }
 0x536   : > { %v3248_v25 = vmul.f32 1.442695, %v3196_v45  ;;  %v3197_v12 = vsub.f32 %v3037_v62, %v3165_v56  ;;  %3902 = vst.msk [vmem:[#allocation3 + $0x1a8] sm:$0xff] %vm465_vm1, %v3165_v56 }
 0x537   : > { %3374 = vperm.xlu1 %6476, %v3164_v1  }
 0x538   : > { %6777 = vpow2.f32 %v3248_v25  ;;  %v3250_v5 = vmul.f32 1.442695, %v3197_v12 }
 0x539   : > { %v3116_v54 = vpop.xlane.xlu0 %3115  ;;  %3379 = vperm.xlu0 %6475, %v3165_v56   ;;  %v3040_v56 = vld [vmem:[#allocation3 + $0x1c0] sm:$0xff] }
 0x53a   : > { %v9399_v0 = vpop.eup %6773  ;;  %6779 = vpow2.f32 %v3250_v5  ;;  %v3166_v58 = vmax.f32 %v3038_v46, %v3116_v54  ;;  %v3041_v54 = vld [vmem:[#allocation3 + $0x1c8] sm:$0xff] }
 0x53b   : > { %10653 = vst [vmem:[#allocation75_spill] sm:$0xff] %v9399_v0  ;;  %4358 = vperm.xlu1 %6476, %v9399_v0   ;;  %v3119_v51 = vpop.xlane.xlu1 %3118 }
 0x53c   : > { %v9402_v41 = vpop.eup %6775  ;;  %v3198_v45 = vsub.f32 %v3038_v46, %v3166_v58  ;;  %3903 = vst.msk [vmem:[#allocation3 + $0x1b0] sm:$0xff] %vm465_vm1, %v3166_v58  ;;  %v3167_v62 = vmax.f32 %v3039_v37, %v3119_v51 }
 0x53d   : > { %10654 = vst [vmem:[#allocation82_spill] sm:$0xff] %v9402_v41  ;;  %4363 = vperm.xlu0 %6475, %v9402_v41  }
 0x53e   : > { %v3252_v1 = vmul.f32 1.442695, %v3198_v45  ;;  %v3199_v25 = vsub.f32 %v3039_v37, %v3167_v62  ;;  %3904 = vst.msk [vmem:[#allocation3 + $0x1b8] sm:$0xff] %vm465_vm1, %v3167_v62 }
 0x53f   : > { %3384 = vperm.xlu1 %6476, %v3166_v58  }
 0x540   : > { %6781 = vpow2.f32 %v3252_v1  ;;  %v3254_v12 = vmul.f32 1.442695, %v3199_v25 }
 0x541   : > { %v3122_v5 = vpop.xlane.xlu0 %3121  ;;  %3389 = vperm.xlu0 %6475, %v3167_v62   ;;  %v3042_v62 = vld [vmem:[#allocation3 + $0x1d0] sm:$0xff] }
 0x542   : > { %v9407_v0 = vpop.eup %6777  ;;  %6783 = vpow2.f32 %v3254_v12  ;;  %v3168_v46 = vmax.f32 %v3040_v56, %v3122_v5  ;;  %v3043_v5 = vld [vmem:[#allocation3 + $0x1d8] sm:$0xff] }
 0x543   : > { %10655 = vst [vmem:[#allocation77_spill] sm:$0xff] %v9407_v0  ;;  %4368 = vperm.xlu1 %6476, %v9407_v0   ;;  %v3125_v51 = vpop.xlane.xlu1 %3124 }
 0x544   : > { %v9410_v49 = vpop.eup %6779  ;;  %v3200_v45 = vsub.f32 %v3040_v56, %v3168_v46  ;;  %3905 = vst.msk [vmem:[#allocation3 + $0x1c0] sm:$0xff] %vm465_vm1, %v3168_v46  ;;  %v3169_v37 = vmax.f32 %v3041_v54, %v3125_v51 }
 0x545   : > { %10656 = vst [vmem:[#allocation84_spill] sm:$0xff] %v9410_v49  ;;  %4373 = vperm.xlu0 %6475, %v9410_v49   ;;  %v4659_v49 = vld [vmem:[#allocation4 + $0x28] sm:$0xff] }
 0x546   : > { %v3256_v58 = vmul.f32 1.442695, %v3200_v45  ;;  %v3201_v1 = vsub.f32 %v3041_v54, %v3169_v37  ;;  %3906 = vst.msk [vmem:[#allocation3 + $0x1c8] sm:$0xff] %vm465_vm1, %v3169_v37 }
 0x547   : > { %3394 = vperm.xlu1 %6476, %v3168_v46  }
 0x548   : > { %6785 = vpow2.f32 %v3256_v58  ;;  %v3258_v25 = vmul.f32 1.442695, %v3201_v1 }
 0x549   : > { %v3128_v12 = vpop.xlane.xlu0 %3127  ;;  %3399 = vperm.xlu0 %6475, %v3169_v37   ;;  %v9423_v37 = vld [vmem:[#allocation3 + $0x1e0] sm:$0xff] }
 0x54a   : > { %v9415_v0 = vpop.eup %6781  ;;  %6787 = vpow2.f32 %v3258_v25  ;;  %v3170_v56 = vmax.f32 %v3042_v62, %v3128_v12  ;;  %v9425_v12 = vld [vmem:[#allocation3 + $0x1e8] sm:$0xff] }
 0x54b   : > { %10657 = vst [vmem:[#allocation79_spill] sm:$0xff] %v9415_v0  ;;  %4378 = vperm.xlu1 %6476, %v9415_v0   ;;  %v3131_v51 = vpop.xlane.xlu1 %3130 }
 0x54c   : > { %v9418_v41 = vpop.eup %6783  ;;  %v3202_v45 = vsub.f32 %v3042_v62, %v3170_v56  ;;  %3907 = vst.msk [vmem:[#allocation3 + $0x1d0] sm:$0xff] %vm465_vm1, %v3170_v56  ;;  %v3171_v54 = vmax.f32 %v3043_v5, %v3131_v51 }
 0x54d   : > { %10658 = vst [vmem:[#allocation31_spill] sm:$0xff] %v9418_v41  ;;  %4383 = vperm.xlu0 %6475, %v9418_v41  }
 0x54e   : > { %v3260_v46 = vmul.f32 1.442695, %v3202_v45  ;;  %v3203_v58 = vsub.f32 %v3043_v5, %v3171_v54  ;;  %3908 = vst.msk [vmem:[#allocation3 + $0x1d8] sm:$0xff] %vm465_vm1, %v3171_v54  ;;  %v4656_v45 = vld [vmem:[#allocation4 + $0x10] sm:$0xff] }
 0x54f   : > { %3404 = vperm.xlu1 %6476, %v3170_v56  }
 0x550   : > { %6789 = vpow2.f32 %v3260_v46  ;;  %v3262_v1 = vmul.f32 1.442695, %v3203_v58  ;;  %v9444_v46 = vld [vmem:[#allocation3 + $0x1f0] sm:$0xff]  ;;  %v4658_v58 = vld [vmem:[#allocation4 + $0x20] sm:$0xff] }
 0x551   : > { %v3134_v25 = vpop.xlane.xlu0 %3133  ;;  %3409 = vperm.xlu0 %6475, %v3171_v54   ;;  %v4657_v54 = vld [vmem:[#allocation4 + $0x18] sm:$0xff] }
 0x552   : > { %v9427_v0 = vpop.eup %6785  ;;  %6791 = vpow2.f32 %v3262_v1  ;;  %v9430_v62 = vmax.f32 %v9423_v37, %v3134_v25  ;;  %v4660_v1 = vld [vmem:[#allocation4 + $0x30] sm:$0xff] }
 0x553   : > { %10659 = vst [vmem:[#allocation85_spill] sm:$0xff] %v9427_v0  ;;  %4388 = vperm.xlu1 %6476, %v9427_v0   ;;  %v3137_v5 = vpop.xlane.xlu1 %3136  ;;  %6793 = vrcp.f32 %v4656_v45  ;;  %v9447_v0 = vld [vmem:[#allocation3 + $0x1f8] sm:$0xff] }
 0x554   : > { %v9433_v51 = vpop.eup %6787  ;;  %3909 = vst.msk [vmem:[#allocation3 + $0x1e0] sm:$0xff] %vm465_vm1, %v9430_v62  ;;  %v9438_v56 = vmax.f32 %v9425_v12, %v3137_v5  ;;  %6795 = vrcp.f32 %v4657_v54  ;;  %v4661_v54 = vld [vmem:[#allocation4 + $0x38] sm:$0xff] }
 0x555   : > { %10660 = vst [vmem:[#allocation81_spill] sm:$0xff] %v9433_v51  ;;  %4393 = vperm.xlu0 %6475, %v9433_v51   ;;  %v4662_v51 = vld [vmem:[#allocation4 + $0x40] sm:$0xff]  ;;  %6797 = vrcp.f32 %v4658_v58 }
 0x556   : > { %3910 = vst.msk [vmem:[#allocation3 + $0x1e8] sm:$0xff] %vm465_vm1, %v9438_v56  ;;  %6799 = vrcp.f32 %v4660_v1  ;;  %v4666_v58 = vld [vmem:[#allocation4 + $0x60] sm:$0xff]  ;;  %v4668_v1 = vld [vmem:[#allocation4 + $0x70] sm:$0xff] }
 0x557   : > { %3414 = vperm.xlu1 %6476, %v9430_v62   ;;  %6801 = vrcp.f32 %v4662_v51  ;;  %v4670_v51 = vld [vmem:[#allocation4 + $0x80] sm:$0xff] }
 0x558   : > { %6803 = vrcp.f32 %v4659_v49 }
 0x559   : > { %v3140_v25 = vpop.xlane.xlu0 %3139  ;;  %3419 = vperm.xlu0 %6475, %v9438_v56   ;;  %6805 = vrcp.f32 %v4664_v63 }
 0x55a   : > { %v9449_v5 = vpop.eup %6789  ;;  %v9452_v41 = vmax.f32 %v9444_v46, %v3140_v25  ;;  %v4663_v25 = vld [vmem:[#allocation4 + $0x48] sm:$0xff]  ;;  %6807 = vrcp.f32 %v4661_v54 }
 0x55b   : > { %10661 = vst [vmem:[#allocation27_spill] sm:$0xff] %v9449_v5  ;;  %4398 = vperm.xlu1 %6476, %v9449_v5   ;;  %v3143_v36 = vpop.xlane.xlu1 %3142  ;;  %6809 = vrcp.f32 %v4666_v58  ;;  %v4665_v5 = vld [vmem:[#allocation4 + $0x58] sm:$0xff] }
 0x55c   : > { %v9455_v45 = vpop.eup %6791  ;;  %3911 = vst.msk [vmem:[#allocation3 + $0x1f0] sm:$0xff] %vm465_vm1, %v9452_v41  ;;  %v9460_v32 = vmax.f32 %v9447_v0, %v3143_v36  ;;  %6811 = vrcp.f32 %v4663_v25 }
 0x55d   : > { %10662 = vst [vmem:[#allocation91_spill] sm:$0xff] %v9455_v45  ;;  %4403 = vperm.xlu0 %6475, %v9455_v45   ;;  %v6794_v36 = vpop.eup %6793  ;;  %6813 = vrcp.f32 %v4668_v1 }
 0x55e   : > { %3912 = vst.msk [vmem:[#allocation3 + $0x1f8] sm:$0xff] %vm465_vm1, %v9460_v32  ;;  %v6796_v49 = vpop.eup %6795  ;;  %6815 = vrcp.f32 %v4665_v5 }
 0x55f   : > { %3424 = vperm.xlu1 %6476, %v9452_v41   ;;  %v6798_v15 = vpop.eup %6797  ;;  %6817 = vrcp.f32 %v4670_v51  ;;  %v4669_v51 = vld [vmem:[#allocation4 + $0x78] sm:$0xff] }
 0x560   : > { %v6800_v58 = vpop.eup %6799  ;;  %6819 = vrcp.f32 %v4667_v8 }
 0x561   : > { %3429 = vperm.xlu0 %6475, %v9460_v32   ;;  %v6802_v39 = vpop.eup %6801 }
 0x562   : > { %v6804_v5 = vpop.eup %6803 }
 0x563   : > { %v3275_v45 = vpop.permute.xlu0 %3274  ;;  %4794 = vperm.xlu1 %6476, %v6794_v36   ;;  %v6806_v57 = vpop.eup %6805 }
 0x564   : > { %v3432_v63 = vsub.f32 %v9127_v11, %v3275_v45  ;;  %v3433_v28 = vsub.f32 %v9129_v6, %v3275_v45  ;;  %v4672_v6 = vld [vmem:[#allocation4 + $0x90] sm:$0xff]  ;;  %v6808_v45 = vpop.eup %6807 }
 0x565   : > { %4799 = vperm.xlu0 %6475, %v6796_v49   ;;  %v3280_v54 = vpop.permute.xlu1 %3279  ;;  %v6810_v49 = vpop.eup %6809 }
 0x566   : > { %v3496_v53 = vmul.f32 1.442695, %v3432_v63  ;;  %v3498_v19 = vmul.f32 1.442695, %v3433_v28  ;;  %v3434_v25 = vsub.f32 %v9133_v17, %v3280_v54  ;;  %v3435_v1 = vsub.f32 %v9135_v7, %v3280_v54  ;;  %v6812_v28 = vpop.eup %6811  ;;  %v4674_v7 = vld [vmem:[#allocation4 + $0xa0] sm:$0xff] }
 0x567   : > { %4804 = vperm.xlu1 %6476, %v6798_v15   ;;  %v9473_v8 = vpop.eup %6813 }
 0x568   : > { %6821 = vpow2.f32 %v3496_v53  ;;  %v3500_v36 = vmul.f32 1.442695, %v3434_v25  ;;  %v3502_v11 = vmul.f32 1.442695, %v3435_v1 }
 0x569   : > { %6823 = vpow2.f32 %v3498_v19  ;;  %4809 = vperm.xlu0 %6475, %v6804_v5   ;;  %v6816_v19 = vpop.eup %6815 }
 0x56a   : > { %6825 = vpow2.f32 %v3500_v36  ;;  %v9477_v5 = vpop.eup %6817 }
 0x56b   : > { %6827 = vpow2.f32 %v3502_v11  ;;  %4814 = vperm.xlu1 %6476, %v6800_v58   ;;  %v3285_v17 = vpop.permute.xlu1 %3284  ;;  %v4671_v11 = vld [vmem:[#allocation4 + $0x88] sm:$0xff] }
 0x56c   : > { %6829 = vrcp.f32 %v4672_v6  ;;  %v3436_v15 = vsub.f32 %v9139_v61, %v3285_v17  ;;  %v3437_v53 = vsub.f32 %v9141_v59, %v3285_v17  ;;  %v6820_v59 = vpop.eup %6819 }
 0x56d   : > { %6831 = vrcp.f32 %v4669_v51  ;;  %v3290_v63 = vpop.permute.xlu0 %3289  ;;  %4819 = vperm.xlu0 %6475, %v6808_v45   ;;  %v4676_v45 = vld [vmem:[#allocation4 + $0xb0] sm:$0xff] }
 0x56e   : > { %v3504_v54 = vmul.f32 1.442695, %v3436_v15  ;;  %v3506_v25 = vmul.f32 1.442695, %v3437_v53  ;;  %v3438_v1 = vsub.f32 %v9145_v24, %v3290_v63  ;;  %v3439_v58 = vsub.f32 %v9147_v14, %v3290_v63  ;;  %v4673_v24 = vld [vmem:[#allocation4 + $0x98] sm:$0xff]  ;;  %v4675_v63 = vld [vmem:[#allocation4 + $0xa8] sm:$0xff] }
 0x56f   : > { %6833 = vrcp.f32 %v4674_v7  ;;  %4824 = vperm.xlu1 %6476, %v6802_v39   ;;  %v4678_v7 = vld [vmem:[#allocation4 + $0xc0] sm:$0xff] }
 0x570   : > { %6835 = vpow2.f32 %v3504_v54  ;;  %v3508_v61 = vmul.f32 1.442695, %v3438_v1  ;;  %v3510_v36 = vmul.f32 1.442695, %v3439_v58 }
 0x571   : > { %6837 = vpow2.f32 %v3506_v25  ;;  %4829 = vperm.xlu0 %6475, %v6812_v28  }
 0x572   : > { %v6822_v6 = vpop.eup %6821  ;;  %6839 = vpow2.f32 %v3508_v61  ;;  %v9479_v51 = vpop.permute.xlu1 %4268  ;;  %v4680_v61 = vld [vmem:[#allocation4 + $0xd0] sm:$0xff] }
 0x573   : > { %v6824_v17 = vpop.eup %6823  ;;  %6841 = vpow2.f32 %v3510_v36  ;;  %4834 = vperm.xlu1 %6476, %v6806_v57  }
 0x574   : > { %v6826_v14 = vpop.eup %6825  ;;  %6843 = vrcp.f32 %v4671_v11  ;;  %v9481_v39 = vpop.permute.xlu0 %4273  ;;  %v9483_v15 = vadd.f32 %v6824_v17, %v6822_v6 }
 0x575   : > { %10663 = vst [vmem:[#allocation83_spill] sm:$0xff] %v9481_v39  ;;  %v6828_v53 = vpop.eup %6827  ;;  %6845 = vrcp.f32 %v4676_v45  ;;  %4839 = vperm.xlu0 %6475, %v6816_v19   ;;  %v3720_v28 = vpack.c.bf16 %v6826_v14, %v6822_v6 }
 0x576   : > { %v9485_v54 = vpop.eup %6829  ;;  %6847 = vrcp.f32 %v4673_v24  ;;  %v3295_v25 = vpop.permute.xlu1 %3294  ;;  %v3721_v1 = vpack.c.bf16 %v6828_v53, %v6824_v17  ;;  %v9487_v58 = vadd.f32 %v6828_v53, %v6826_v14 }
 0x577   : > { %v6832_v57 = vpop.eup %6831  ;;  %6849 = vrcp.f32 %v4678_v7  ;;  %v3440_v36 = vsub.f32 %v9151_v60, %v3295_v25  ;;  %v3441_v11 = vsub.f32 %v9153_v16, %v3295_v25  ;;  %4844 = vperm.xlu1 %6476, %v6810_v49  }
 0x578   : > { %6851 = vrcp.f32 %v4675_v63  ;;  %4105 = vmatprep.mubr.bf16.mxu0 %v3721_v1  ;;  %v3300_v45 = vpop.permute.xlu0 %3299  ;;  %v4677_v63 = vld [vmem:[#allocation4 + $0xb8] sm:$0xff] }
 0x579   : > { %v9491_v19 = vpop.eup %6833  ;;  %v3512_v6 = vmul.f32 1.442695, %v3440_v36  ;;  %v3514_v39 = vmul.f32 1.442695, %v3441_v11  ;;  %v3442_v24 = vsub.f32 %v9157_v40, %v3300_v45  ;;  %v3443_v17 = vsub.f32 %v9159_v27, %v3300_v45  ;;  %4106 = vmatmul.mubr.bf16.vlgmr.msra.gmra.mrb[64].mxu0 %v3720_v28  ;;  %4849 = vperm.xlu0 %6475, %v6820_v59   ;;  %v4682_v28 = vld [vmem:[#allocation4 + $0xe0] sm:$0xff] }
 0x57a   : > { %v6836_v14 = vpop.eup %6835  ;;  %6853 = vrcp.f32 %v4680_v61  ;;  %v9495_v7 = vpop.permute.xlu1 %4278 }
 0x57b   : > { %v6838_v60 = vpop.eup %6837  ;;  %6855 = vpow2.f32 %v3512_v6  ;;  %v3516_v16 = vmul.f32 1.442695, %v3442_v24  ;;  %v3518_v49 = vmul.f32 1.442695, %v3443_v17  ;;  %4854 = vperm.xlu1 %6476, %v9473_v8   ;;  %v4679_v8 = vld [vmem:[#allocation4 + $0xc8] sm:$0xff] }
 0x57c   : > { %v6840_v53 = vpop.eup %6839  ;;  %6857 = vpow2.f32 %v3514_v39  ;;  %v9498_v25 = vpop.permute.xlu0 %4283  ;;  %v9500_v40 = vadd.f32 %v6838_v60, %v6836_v14 }
 0x57d   : > { %v6842_v27 = vpop.eup %6841  ;;  %6859 = vpow2.f32 %v3516_v16  ;;  %4859 = vperm.xlu0 %6475, %v6832_v57   ;;  %v3722_v59 = vpack.c.bf16 %v6840_v53, %v6836_v14 }
 0x57e   : > { %v6844_v1 = vpop.eup %6843  ;;  %6861 = vpow2.f32 %v3518_v49  ;;  %v3305_v61 = vpop.permute.xlu1 %3304  ;;  %v3723_v36 = vpack.c.bf16 %v6842_v27, %v6838_v60  ;;  %v9502_v11 = vadd.f32 %v6842_v27, %v6840_v53  ;;  %v4684_v27 = vld [vmem:[#allocation4 + $0xf0] sm:$0xff] }
 0x57f   : > { %v6846_v45 = vpop.eup %6845  ;;  %6863 = vrcp.f32 %v4677_v63  ;;  %v3444_v39 = vsub.f32 %v9163_v10, %v3305_v61  ;;  %v3445_v6 = vsub.f32 %v9165_v48, %v3305_v61  ;;  %4864 = vperm.xlu1 %6476, %v9477_v5   ;;  %v4681_v61 = vld [vmem:[#allocation4 + $0xd8] sm:$0xff] }
 0x580   : > { %v6848_v24 = vpop.eup %6847  ;;  %6865 = vrcp.f32 %v4682_v28  ;;  %4113 = vmatprep.mubr.bf16.mxu0 %v3723_v36  ;;  %v3310_v57 = vpop.permute.xlu0 %3309  ;;  %v4683_v36 = vld [vmem:[#allocation4 + $0xe8] sm:$0xff] }
 0x581   : > { %v9507_v17 = vpop.eup %6849  ;;  %v3520_v14 = vmul.f32 1.442695, %v3444_v39  ;;  %v3522_v16 = vmul.f32 1.442695, %v3445_v6  ;;  %v3446_v60 = vsub.f32 %v9169_v35, %v3310_v57  ;;  %v3447_v49 = vsub.f32 %v9171_v47, %v3310_v57  ;;  %4114 = vmatmul.mubr.bf16.gmra.mrb[68].mxu0 %v3722_v59  ;;  %4869 = vperm.xlu0 %6475, %v6844_v1  }
 0x582   : > { %v6852_v53 = vpop.eup %6851  ;;  %6867 = vrcp.f32 %v4679_v8  ;;  %v9511_v10 = vpop.permute.xlu1 %4288  ;;  %v3204_v57 = vsub.f32 %v9423_v37, %v9430_v62 }
 0x583   : > { %6869 = vpow2.f32 %v3520_v14  ;;  %v3524_v48 = vmul.f32 1.442695, %v3446_v60  ;;  %v3526_v5 = vmul.f32 1.442695, %v3447_v49  ;;  %4874 = vperm.xlu1 %6476, %v9485_v54  }
 0x584   : > { %v9514_v63 = vpop.eup %6853  ;;  %6871 = vpow2.f32 %v3522_v16  ;;  %v9516_v28 = vpop.permute.xlu0 %4293 }
 0x585   : > { %v6856_v35 = vpop.eup %6855  ;;  %6873 = vpow2.f32 %v3524_v48  ;;  %4879 = vperm.xlu0 %6475, %v6848_v24  }
 0x586   : > { %v6858_v47 = vpop.eup %6857  ;;  %6875 = vpow2.f32 %v3526_v5  ;;  %v3315_v59 = vpop.permute.xlu1 %3314 }
 0x587   : > { %v6860_v1 = vpop.eup %6859  ;;  %6877 = vrcp.f32 %v4684_v27  ;;  %v3448_v8 = vsub.f32 %v9175_v9, %v3315_v59  ;;  %v3449_v54 = vsub.f32 %v9177_v22, %v3315_v59  ;;  %4884 = vperm.xlu1 %6476, %v9491_v19   ;;  %v9521_v39 = vadd.f32 %v6858_v47, %v6856_v35 }
 0x588   : > { %v6862_v6 = vpop.eup %6861  ;;  %6879 = vrcp.f32 %v4681_v61  ;;  %v3320_v24 = vpop.permute.xlu0 %3319  ;;  %v3724_v14 = vpack.c.bf16 %v6860_v1, %v6856_v35  ;;  %v3205_v19 = vsub.f32 %v9425_v12, %v9438_v56  ;;  %v3264_v59 = vmul.f32 1.442695, %v3204_v57 }
 0x589   : > { %v6864_v16 = vpop.eup %6863  ;;  %v3528_v60 = vmul.f32 1.442695, %v3448_v8  ;;  %v3530_v49 = vmul.f32 1.442695, %v3449_v54  ;;  %v3450_v48 = vsub.f32 %v9181_v26, %v3320_v24  ;;  %v3451_v9 = vsub.f32 %v9183_v18, %v3320_v24  ;;  %4889 = vperm.xlu0 %6475, %v6852_v53   ;;  %v4685_v26 = vld [vmem:[#allocation4 + $0xf8] sm:$0xff] }
 0x58a   : > { %v9527_v22 = vpop.eup %6865  ;;  %6881 = vrcp.f32 %v4683_v36  ;;  %v3725_v5 = vpack.c.bf16 %v6862_v6, %v6858_v47  ;;  %v9531_v27 = vpop.permute.xlu1 %4298  ;;  %v9533_v37 = vadd.f32 %v6862_v6, %v6860_v1  ;;  %v3266_v56 = vmul.f32 1.442695, %v3205_v19 }
 0x58b   : > { %6883 = vpow2.f32 %v3528_v60  ;;  %v3532_v62 = vmul.f32 1.442695, %v3450_v48  ;;  %v3534_v35 = vmul.f32 1.442695, %v3451_v9  ;;  %4894 = vperm.xlu1 %6476, %v6846_v45   ;;  %v3206_v6 = vsub.f32 %v9444_v46, %v9452_v41 }
 0x58c   : > { %v6868_v61 = vpop.eup %6867  ;;  %6885 = vpow2.f32 %v3530_v49  ;;  %4121 = vmatprep.mubr.bf16.mxu0 %v3725_v5  ;;  %v9535_v18 = vpop.permute.xlu0 %4303 }
 0x58d   : > { %v6870_v53 = vpop.eup %6869  ;;  %6887 = vpow2.f32 %v3532_v62  ;;  %4122 = vmatmul.mubr.bf16.gmra.mrb[72].mxu0 %v3724_v14  ;;  %4899 = vperm.xlu0 %6475, %v6864_v16  }
 0x58e   : > { %v6872_v12 = vpop.eup %6871  ;;  %6889 = vpow2.f32 %v3534_v35  ;;  %v3325_v47 = vpop.permute.xlu1 %3324 }
 0x58f   : > { %v6874_v1 = vpop.eup %6873  ;;  %6891 = vrcp.f32 %v4685_v26  ;;  %v3452_v36 = vsub.f32 %v9187_v20, %v3325_v47  ;;  %v3453_v45 = vsub.f32 %v9189_v29, %v3325_v47  ;;  %4904 = vperm.xlu1 %6476, %v9507_v17   ;;  %v9540_v8 = vadd.f32 %v6872_v12, %v6870_v53 }
 0x590   : > { %v6876_v54 = vpop.eup %6875  ;;  %6893 = vpow2.f32 %v3264_v59  ;;  %v3330_v57 = vpop.permute.xlu0 %3329  ;;  %v3726_v24 = vpack.c.bf16 %v6874_v1, %v6870_v53  ;;  %v3207_v17 = vsub.f32 %v9447_v0, %v9460_v32 }
 0x591   : > { %v6878_v14 = vpop.eup %6877  ;;  %v3536_v16 = vmul.f32 1.442695, %v3452_v36  ;;  %v3538_v60 = vmul.f32 1.442695, %v3453_v45  ;;  %v3454_v49 = vsub.f32 %v9193_v30, %v3330_v57  ;;  %v3455_v20 = vsub.f32 %v9195_v33, %v3330_v57  ;;  %4909 = vperm.xlu0 %6475, %v6868_v61  }
 0x592   : > { %v6880_v29 = vpop.eup %6879  ;;  %6895 = vpow2.f32 %v3266_v56  ;;  %v3727_v48 = vpack.c.bf16 %v6876_v54, %v6872_v12  ;;  %v9548_v9 = vpop.permute.xlu1 %4308  ;;  %v9550_v19 = vadd.f32 %v6876_v54, %v6874_v1  ;;  %v3268_v30 = vmul.f32 1.442695, %v3206_v6 }
 0x593   : > { %6897 = vpow2.f32 %v3536_v16  ;;  %v3540_v41 = vmul.f32 1.442695, %v3454_v49  ;;  %v3542_v46 = vmul.f32 1.442695, %v3455_v20  ;;  %4914 = vperm.xlu1 %6476, %v9514_v63   ;;  %v3270_v0 = vmul.f32 1.442695, %v3207_v17 }
 0x594   : > { %v6882_v5 = vpop.eup %6881  ;;  %6899 = vpow2.f32 %v3538_v60  ;;  %4129 = vmatprep.mubr.bf16.mxu0 %v3727_v48  ;;  %v9553_v33 = vpop.permute.xlu0 %4313 }
 0x595   : > { %v6884_v62 = vpop.eup %6883  ;;  %6901 = vpow2.f32 %v3540_v41  ;;  %4130 = vmatmul.mubr.bf16.gmra.mrb[76].mxu0 %v3726_v24  ;;  %4919 = vperm.xlu0 %6475, %v6880_v29  }
 0x596   : > { %v6886_v32 = vpop.eup %6885  ;;  %6903 = vpow2.f32 %v3542_v46  ;;  %v3335_v35 = vpop.permute.xlu1 %3334 }
 0x597   : > { %v6888_v61 = vpop.eup %6887  ;;  %v3456_v26 = vsub.f32 %v9199_v21, %v3335_v35  ;;  %v3457_v59 = vsub.f32 %v9201_v2, %v3335_v35  ;;  %4924 = vperm.xlu1 %6476, %v9527_v22   ;;  %v9558_v63 = vadd.f32 %v6886_v32, %v6884_v62  ;;  %6905 = vpow2.f32 %v3268_v30 }
 0x598   : > { %v6890_v53 = vpop.eup %6889  ;;  %v3340_v12 = vpop.permute.xlu0 %3339  ;;  %v3728_v56 = vpack.c.bf16 %v6888_v61, %v6884_v62  ;;  %6907 = vpow2.f32 %v3270_v0 }
 0x599   : > { %v6892_v47 = vpop.eup %6891  ;;  %v3544_v1 = vmul.f32 1.442695, %v3456_v26  ;;  %v3546_v36 = vmul.f32 1.442695, %v3457_v59  ;;  %v3458_v45 = vsub.f32 %v9205_v23, %v3340_v12  ;;  %v3459_v54 = vsub.f32 %v9207_v31, %v3340_v12  ;;  %4929 = vperm.xlu0 %6475, %v6882_v5  }
 0x59a   : > { %v9562_v6 = vpop.eup %6893  ;;  %v3729_v21 = vpack.c.bf16 %v6890_v53, %v6886_v32  ;;  %v9564_v2 = vpop.permute.xlu1 %4318  ;;  %v9566_v22 = vadd.f32 %v6890_v53, %v6888_v61 }
 0x59b   : > { %6909 = vpow2.f32 %v3544_v1  ;;  %v3548_v57 = vmul.f32 1.442695, %v3458_v45  ;;  %v3550_v24 = vmul.f32 1.442695, %v3459_v54  ;;  %4934 = vperm.xlu1 %6476, %v6878_v14  }
 0x59c   : > { %v9568_v16 = vpop.eup %6895  ;;  %6911 = vpow2.f32 %v3546_v36  ;;  %4137 = vmatprep.mubr.bf16.mxu0 %v3729_v21  ;;  %v9570_v23 = vpop.permute.xlu0 %4323 }
 0x59d   : > { %v6898_v31 = vpop.eup %6897  ;;  %6913 = vpow2.f32 %v3548_v57  ;;  %4138 = vmatmul.mubr.bf16.gmra.mrb[80].mxu0 %v3728_v56  ;;  %4939 = vperm.xlu0 %6475, %v6892_v47  }
 0x59e   : > { %v6900_v60 = vpop.eup %6899  ;;  %6915 = vpow2.f32 %v3550_v24  ;;  %v3345_v49 = vpop.permute.xlu1 %3344 }
 0x59f   : > { %v6902_v20 = vpop.eup %6901  ;;  %v3460_v29 = vsub.f32 %v9211_v13, %v3345_v49  ;;  %v3461_v17 = vsub.f32 %v9213_v34, %v3345_v49  ;;  %4408 = vperm.xlu1 %6476, %v9562_v6   ;;  %v9575_v14 = vadd.f32 %v6900_v60, %v6898_v31 }
 0x5a0   : > { %v6904_v48 = vpop.eup %6903  ;;  %v3350_v41 = vpop.permute.xlu0 %3349  ;;  %v3730_v46 = vpack.c.bf16 %v6902_v20, %v6898_v31 }
 0x5a1   : > { %v3552_v5 = vmul.f32 1.442695, %v3460_v29  ;;  %v3554_v30 = vmul.f32 1.442695, %v3461_v17  ;;  %v3462_v62 = vsub.f32 %v9217_v55, %v3350_v41  ;;  %v3463_v32 = vsub.f32 %v9219_v4, %v3350_v41  ;;  %4413 = vperm.xlu0 %6475, %v9568_v16   ;;  %v9580_v0 = vpop.eup %6905 }
 0x5a2   : > { %v3731_v13 = vpack.c.bf16 %v6904_v48, %v6900_v60  ;;  %v9582_v35 = vpop.permute.xlu1 %4328  ;;  %v9584_v34 = vadd.f32 %v6904_v48, %v6902_v20  ;;  %v9587_v59 = vpop.eup %6907 }
 0x5a3   : > { %6917 = vpow2.f32 %v3552_v5  ;;  %v3556_v61 = vmul.f32 1.442695, %v3462_v62  ;;  %v3558_v26 = vmul.f32 1.442695, %v3463_v32  ;;  %4418 = vperm.xlu1 %6476, %v9580_v0  }
 0x5a4   : > { %6919 = vpow2.f32 %v3554_v30  ;;  %4145 = vmatprep.mubr.bf16.mxu0 %v3731_v13  ;;  %v9589_v55 = vpop.permute.xlu0 %4333 }
 0x5a5   : > { %v6910_v4 = vpop.eup %6909  ;;  %6921 = vpow2.f32 %v3556_v61  ;;  %4146 = vmatmul.mubr.bf16.gmra.mrb[84].mxu0 %v3730_v46  ;;  %4423 = vperm.xlu0 %6475, %v9587_v59  }
 0x5a6   : > { %v6912_v53 = vpop.eup %6911  ;;  %6923 = vpow2.f32 %v3558_v26  ;;  %v3355_v12 = vpop.permute.xlu1 %3354 }
 0x5a7   : > { %v6914_v56 = vpop.eup %6913  ;;  %v3464_v47 = vsub.f32 %v9223_v3, %v3355_v12  ;;  %v3465_v1 = vsub.f32 %v9225_v38, %v3355_v12  ;;  %v9594_v36 = vadd.f32 %v6912_v53, %v6910_v4 }
 0x5a8   : > { %v6916_v45 = vpop.eup %6915  ;;  %v3360_v54 = vpop.permute.xlu0 %3359  ;;  %v3732_v21 = vpack.c.bf16 %v6914_v56, %v6910_v4 }
 0x5a9   : > { %v3560_v57 = vmul.f32 1.442695, %v3464_v47  ;;  %v3562_v24 = vmul.f32 1.442695, %v3465_v1  ;;  %v3466_v31 = vsub.f32 %v9229_v42, %v3360_v54  ;;  %v3467_v60 = vsub.f32 %v9231_v43, %v3360_v54 }
 0x5aa   : > { %v3733_v49 = vpack.c.bf16 %v6916_v45, %v6912_v53  ;;  %v9598_v20 = vpop.permute.xlu1 %4338  ;;  %v9600_v29 = vadd.f32 %v6916_v45, %v6914_v56  ;;  %v10664_v53 = vld [vmem:[#allocation34_spill] sm:$0xff] }
 0x5ab   : > { %6925 = vpow2.f32 %v3560_v57  ;;  %v3564_v3 = vmul.f32 1.442695, %v3466_v31  ;;  %v3566_v17 = vmul.f32 1.442695, %v3467_v60  ;;  %v10668_v60 = vld [vmem:[#allocation40_spill] sm:$0xff] }
 0x5ac   : > { %6927 = vpow2.f32 %v3562_v24  ;;  %4153 = vmatprep.mubr.bf16.mxu0 %v3733_v49  ;;  %v9602_v38 = vpop.permute.xlu0 %4343  ;;  %v10667_v24 = vld [vmem:[#allocation39_spill] sm:$0xff] }
 0x5ad   : > { %v6918_v48 = vpop.eup %6917  ;;  %6929 = vpow2.f32 %v3564_v3  ;;  %4154 = vmatmul.mubr.bf16.gmra.mrb[88].mxu0 %v3732_v21 }
 0x5ae   : > { %v6920_v41 = vpop.eup %6919  ;;  %6931 = vpow2.f32 %v3566_v17  ;;  %v3365_v42 = vpop.permute.xlu1 %3364 }
 0x5af   : > { %v6922_v46 = vpop.eup %6921  ;;  %v3468_v43 = vsub.f32 %v9235_v44, %v3365_v42  ;;  %v3469_v5 = vsub.f32 %v9237_v52, %v3365_v42  ;;  %v9606_v30 = vadd.f32 %v6920_v41, %v6918_v48 }
 0x5b0   : > { %v6924_v62 = vpop.eup %6923  ;;  %v3370_v32 = vpop.permute.xlu0 %3369  ;;  %v3734_v13 = vpack.c.bf16 %v6922_v46, %v6918_v48 }
 0x5b1   : > { %v3568_v61 = vmul.f32 1.442695, %v3468_v43  ;;  %v3570_v26 = vmul.f32 1.442695, %v3469_v5  ;;  %v3470_v4 = vsub.f32 %v9241_v50, %v3370_v32  ;;  %v3471_v12 = vsub.f32 %v10664_v53, %v3370_v32  ;;  %v10669_v43 = vld [vmem:[#allocation88_spill] sm:$0xff] }
 0x5b2   : > { %v3735_v56 = vpack.c.bf16 %v6924_v62, %v6920_v41  ;;  %v9610_v47 = vpop.permute.xlu1 %4348  ;;  %v9612_v1 = vadd.f32 %v6924_v62, %v6922_v46  ;;  %v10670_v62 = vld [vmem:[#allocation89_spill] sm:$0xff] }
 0x5b3   : > { %10665 = vst [vmem:[#allocation30_spill] sm:$0xff] %v9610_v47  ;;  %6933 = vpow2.f32 %v3568_v61  ;;  %v3572_v44 = vmul.f32 1.442695, %v3470_v4  ;;  %v3574_v45 = vmul.f32 1.442695, %v3471_v12 }
 0x5b4   : > { %6935 = vpow2.f32 %v3570_v26  ;;  %4161 = vmatprep.mubr.bf16.mxu0 %v3735_v56  ;;  %v9614_v52 = vpop.permute.xlu0 %4353 }
 0x5b5   : > { %10666 = vst [vmem:[#allocation93_spill] sm:$0xff] %v9614_v52  ;;  %v6926_v54 = vpop.eup %6925  ;;  %6937 = vpow2.f32 %v3572_v44  ;;  %4162 = vmatmul.mubr.bf16.gmra.mrb[92].mxu0 %v3734_v13 }
 0x5b6   : > { %v6928_v21 = vpop.eup %6927  ;;  %6939 = vpow2.f32 %v3574_v45  ;;  %v3375_v50 = vpop.permute.xlu1 %3374 }
 0x5b7   : > { %v6930_v57 = vpop.eup %6929  ;;  %v3472_v31 = vsub.f32 %v10667_v24, %v3375_v50  ;;  %v3473_v49 = vsub.f32 %v10668_v60, %v3375_v50  ;;  %v9618_v3 = vadd.f32 %v6928_v21, %v6926_v54  ;;  %v10673_v50 = vld [vmem:[#allocation90_spill] sm:$0xff]  ;;  %v10674_v24 = vld [vmem:[#allocation37_spill] sm:$0xff] }
 0x5b8   : > { %v6932_v17 = vpop.eup %6931  ;;  %v3380_v48 = vpop.permute.xlu0 %3379  ;;  %v3736_v41 = vpack.c.bf16 %v6930_v57, %v6926_v54 }
 0x5b9   : > { %v3576_v42 = vmul.f32 1.442695, %v3472_v31  ;;  %v3578_v46 = vmul.f32 1.442695, %v3473_v49  ;;  %v3474_v5 = vsub.f32 %v10669_v43, %v3380_v48  ;;  %v3475_v32 = vsub.f32 %v10670_v62, %v3380_v48 }
 0x5ba   : > { %v3737_v13 = vpack.c.bf16 %v6932_v17, %v6928_v21  ;;  %v9622_v61 = vpop.permute.xlu1 %4358  ;;  %v9624_v26 = vadd.f32 %v6932_v17, %v6930_v57 }
 0x5bb   : > { %10671 = vst [vmem:[#allocation87_spill] sm:$0xff] %v9622_v61  ;;  %6941 = vpow2.f32 %v3576_v42  ;;  %v3580_v4 = vmul.f32 1.442695, %v3474_v5  ;;  %v3582_v53 = vmul.f32 1.442695, %v3475_v32  ;;  %v10676_v5 = vld [vmem:[#allocation43_spill] sm:$0xff] }
 0x5bc   : > { %6943 = vpow2.f32 %v3578_v46  ;;  %4169 = vmatprep.mubr.bf16.mxu0 %v3737_v13  ;;  %v9626_v12 = vpop.permute.xlu0 %4363  ;;  %v10675_v46 = vld [vmem:[#allocation38_spill] sm:$0xff] }
 0x5bd   : > { %10672 = vst [vmem:[#allocation28_spill] sm:$0xff] %v9626_v12  ;;  %v6934_v56 = vpop.eup %6933  ;;  %6945 = vpow2.f32 %v3580_v4  ;;  %4170 = vmatmul.mubr.bf16.gmra.mrb[96].mxu0 %v3736_v41 }
 0x5be   : > { %v6936_v44 = vpop.eup %6935  ;;  %6947 = vpow2.f32 %v3582_v53  ;;  %v3385_v45 = vpop.permute.xlu1 %3384 }
 0x5bf   : > { %v6938_v54 = vpop.eup %6937  ;;  %v3476_v21 = vsub.f32 %v10673_v50, %v3385_v45  ;;  %v3477_v31 = vsub.f32 %v10674_v24, %v3385_v45  ;;  %v9630_v57 = vadd.f32 %v6936_v44, %v6934_v56  ;;  %v10679_v24 = vld [vmem:[#allocation44_spill] sm:$0xff] }
 0x5c0   : > { %v6940_v60 = vpop.eup %6939  ;;  %v3390_v49 = vpop.permute.xlu0 %3389  ;;  %v3738_v17 = vpack.c.bf16 %v6938_v54, %v6934_v56 }
 0x5c1   : > { %v3584_v48 = vmul.f32 1.442695, %v3476_v21  ;;  %v3586_v42 = vmul.f32 1.442695, %v3477_v31  ;;  %v3478_v43 = vsub.f32 %v10675_v46, %v3390_v49  ;;  %v3479_v62 = vsub.f32 %v10676_v5, %v3390_v49 }
 0x5c2   : > { %v3739_v41 = vpack.c.bf16 %v6940_v60, %v6936_v44  ;;  %v9634_v32 = vpop.permute.xlu1 %4368  ;;  %v9636_v13 = vadd.f32 %v6940_v60, %v6938_v54  ;;  %v10680_v54 = vld [vmem:[#allocation41_spill] sm:$0xff] }
 0x5c3   : > { %10677 = vst [vmem:[#allocation95_spill] sm:$0xff] %v9634_v32  ;;  %6949 = vpow2.f32 %v3584_v48  ;;  %v3588_v4 = vmul.f32 1.442695, %v3478_v43  ;;  %v3590_v53 = vmul.f32 1.442695, %v3479_v62  ;;  %v10682_v62 = vld [vmem:[#allocation47_spill] sm:$0xff] }
 0x5c4   : > { %6951 = vpow2.f32 %v3586_v42  ;;  %4177 = vmatprep.mubr.bf16.mxu0 %v3739_v41  ;;  %v9638_v45 = vpop.permute.xlu0 %4373  ;;  %3628 = vadd.xlane.f32.xlu0 %v9487_v58  ;;  %v3767_v32 = vld [vmem:[#allocation4 + $0x170] sm:$0xff] }
 0x5c5   : > { %10678 = vst [vmem:[#allocation92_spill] sm:$0xff] %v9638_v45  ;;  %v6942_v56 = vpop.eup %6941  ;;  %6953 = vpow2.f32 %v3588_v4  ;;  %4178 = vmatmul.mubr.bf16.gmra.mrb[100].mxu0 %v3738_v17  ;;  %v10681_v17 = vld [vmem:[#allocation42_spill] sm:$0xff] }
 0x5c6   : > { %v6944_v50 = vpop.eup %6943  ;;  %6955 = vpow2.f32 %v3590_v53  ;;  %v3395_v21 = vpop.permute.xlu1 %3394 }
 0x5c7   : > { %v6946_v44 = vpop.eup %6945  ;;  %v3480_v31 = vsub.f32 %v10679_v24, %v3395_v21  ;;  %v3481_v60 = vsub.f32 %v10680_v54, %v3395_v21  ;;  %3625 = vadd.xlane.f32.xlu1 %v9483_v15  ;;  %v9644_v49 = vadd.f32 %v6944_v50, %v6942_v56 }
 0x5c8   : > { %v6948_v48 = vpop.eup %6947  ;;  %v3400_v42 = vpop.permute.xlu0 %3399  ;;  %3631 = vadd.xlane.f32.xlu0 %v9500_v40  ;;  %v3740_v58 = vpack.c.bf16 %v6946_v44, %v6942_v56 }
 0x5c9   : > { %v3592_v46 = vmul.f32 1.442695, %v3480_v31  ;;  %v3594_v43 = vmul.f32 1.442695, %v3481_v60  ;;  %v3482_v5 = vsub.f32 %v10681_v17, %v3400_v42  ;;  %v3483_v41 = vsub.f32 %v10682_v62, %v3400_v42 }
 0x5ca   : > { %v3741_v4 = vpack.c.bf16 %v6948_v48, %v6944_v50  ;;  %v9649_v53 = vpop.permute.xlu1 %4378  ;;  %v9651_v24 = vadd.f32 %v6948_v48, %v6946_v44  ;;  %v10685_v44 = vld [vmem:[#allocation48_spill] sm:$0xff]  ;;  %v10686_v48 = vld [vmem:[#allocation45_spill] sm:$0xff] }
 0x5cb   : > { %10683 = vst [vmem:[#allocation86_spill] sm:$0xff] %v9649_v53  ;;  %6957 = vpow2.f32 %v3592_v46  ;;  %v3596_v15 = vmul.f32 1.442695, %v3482_v5  ;;  %v3598_v21 = vmul.f32 1.442695, %v3483_v41  ;;  %3634 = vadd.xlane.f32.xlu1 %v9502_v11  ;;  %v10688_v41 = vld [vmem:[#allocation51_spill] sm:$0xff] }
 0x5cc   : > { %6959 = vpow2.f32 %v3594_v43  ;;  %4185 = vmatprep.mubr.bf16.mxu0 %v3741_v4  ;;  %v9654_v40 = vpop.permute.xlu0 %4383  ;;  %3637 = vadd.xlane.f32.xlu0 %v9521_v39 }
 0x5cd   : > { %10684 = vst [vmem:[#allocation32_spill] sm:$0xff] %v9654_v40  ;;  %v6950_v56 = vpop.eup %6949  ;;  %6961 = vpow2.f32 %v3596_v15  ;;  %4186 = vmatmul.mubr.bf16.gmra.mrb[104].mxu0 %v3740_v58  ;;  %v10687_v58 = vld [vmem:[#allocation46_spill] sm:$0xff] }
 0x5ce   : > { %v6952_v31 = vpop.eup %6951  ;;  %6963 = vpow2.f32 %v3598_v21  ;;  %v3405_v50 = vpop.permute.xlu1 %3404 }
 0x5cf   : > { %v6954_v54 = vpop.eup %6953  ;;  %v3484_v60 = vsub.f32 %v10685_v44, %v3405_v50  ;;  %v3485_v42 = vsub.f32 %v10686_v48, %v3405_v50  ;;  %3640 = vadd.xlane.f32.xlu1 %v9533_v37  ;;  %v9660_v11 = vadd.f32 %v6952_v31, %v6950_v56 }
 0x5d0   : > { %v6956_v46 = vpop.eup %6955  ;;  %v3410_v43 = vpop.permute.xlu0 %3409  ;;  %3643 = vadd.xlane.f32.xlu0 %v9540_v8  ;;  %v3742_v39 = vpack.c.bf16 %v6954_v54, %v6950_v56 }
 0x5d1   : > { %v3600_v17 = vmul.f32 1.442695, %v3484_v60  ;;  %v3602_v5 = vmul.f32 1.442695, %v3485_v42  ;;  %v3486_v62 = vsub.f32 %v10687_v58, %v3410_v43  ;;  %v3487_v4 = vsub.f32 %v10688_v41, %v3410_v43 }
 0x5d2   : > { %v3743_v15 = vpack.c.bf16 %v6956_v46, %v6952_v31  ;;  %v9665_v21 = vpop.permute.xlu1 %4388  ;;  %v9667_v44 = vadd.f32 %v6956_v46, %v6954_v54  ;;  %v10691_v54 = vld [vmem:[#allocation52_spill] sm:$0xff]  ;;  %v10692_v46 = vld [vmem:[#allocation49_spill] sm:$0xff] }
 0x5d3   : > { %10689 = vst [vmem:[#allocation94_spill] sm:$0xff] %v9665_v21  ;;  %6965 = vpow2.f32 %v3600_v17  ;;  %v3604_v37 = vmul.f32 1.442695, %v3486_v62  ;;  %v3606_v50 = vmul.f32 1.442695, %v3487_v4  ;;  %3646 = vadd.xlane.f32.xlu1 %v9550_v19  ;;  %v10694_v4 = vld [vmem:[#allocation55_spill] sm:$0xff] }
 0x5d4   : > { %6967 = vpow2.f32 %v3602_v5  ;;  %4193 = vmatprep.mubr.bf16.mxu0 %v3743_v15  ;;  %v9670_v8 = vpop.permute.xlu0 %4393  ;;  %3649 = vadd.xlane.f32.xlu0 %v9558_v63 }
 0x5d5   : > { %10690 = vst [vmem:[#allocation33_spill] sm:$0xff] %v9670_v8  ;;  %v6958_v56 = vpop.eup %6957  ;;  %6969 = vpow2.f32 %v3604_v37  ;;  %4194 = vmatmul.mubr.bf16.gmra.mrb[108].mxu0 %v3742_v39  ;;  %v10693_v39 = vld [vmem:[#allocation50_spill] sm:$0xff] }
 0x5d6   : > { %v6960_v60 = vpop.eup %6959  ;;  %6971 = vpow2.f32 %v3606_v50  ;;  %v3415_v31 = vpop.permute.xlu1 %3414 }
 0x5d7   : > { %v6962_v48 = vpop.eup %6961  ;;  %v3488_v42 = vsub.f32 %v10691_v54, %v3415_v31  ;;  %v3489_v43 = vsub.f32 %v10692_v46, %v3415_v31  ;;  %3652 = vadd.xlane.f32.xlu1 %v9566_v22  ;;  %v9676_v19 = vadd.f32 %v6960_v60, %v6958_v56 }
 0x5d8   : > { %v6964_v17 = vpop.eup %6963  ;;  %v3420_v5 = vpop.permute.xlu0 %3419  ;;  %3655 = vadd.xlane.f32.xlu0 %v9575_v14  ;;  %v3744_v63 = vpack.c.bf16 %v6962_v48, %v6958_v56 }
 0x5d9   : > { %v3608_v58 = vmul.f32 1.442695, %v3488_v42  ;;  %v3610_v62 = vmul.f32 1.442695, %v3489_v43  ;;  %v3490_v41 = vsub.f32 %v10693_v39, %v3420_v5  ;;  %v3491_v15 = vsub.f32 %v10694_v4, %v3420_v5  ;;  %v10699_v4 = vld [vmem:[#allocation54_spill] sm:$0xff] }
 0x5da   : > { %v3745_v37 = vpack.c.bf16 %v6964_v17, %v6960_v60  ;;  %v9681_v50 = vpop.permute.xlu1 %4398  ;;  %v9683_v54 = vadd.f32 %v6964_v17, %v6962_v48  ;;  %v10697_v48 = vld [vmem:[#allocation56_spill] sm:$0xff]  ;;  %v10698_v17 = vld [vmem:[#allocation53_spill] sm:$0xff] }
 0x5db   : > { %10695 = vst [vmem:[#allocation35_spill] sm:$0xff] %v9681_v50  ;;  %6973 = vpow2.f32 %v3608_v58  ;;  %v3612_v22 = vmul.f32 1.442695, %v3490_v41  ;;  %v3614_v31 = vmul.f32 1.442695, %v3491_v15  ;;  %3658 = vadd.xlane.f32.xlu1 %v9584_v34  ;;  %v10700_v15 = vld [vmem:[#allocation59_spill] sm:$0xff] }
 0x5dc   : > { %6975 = vpow2.f32 %v3610_v62  ;;  %4201 = vmatprep.mubr.bf16.mxu0 %v3745_v37  ;;  %v9686_v14 = vpop.permute.xlu0 %4403  ;;  %3661 = vadd.xlane.f32.xlu0 %v9594_v36 }
 0x5dd   : > { %10696 = vst [vmem:[#allocation96_spill] sm:$0xff] %v9686_v14  ;;  %v6966_v56 = vpop.eup %6965  ;;  %6977 = vpow2.f32 %v3612_v22  ;;  %4202 = vmatmul.mubr.bf16.gmra.mrb[112].mxu0 %v3744_v63 }
 0x5de   : > { %v6968_v42 = vpop.eup %6967  ;;  %6979 = vpow2.f32 %v3614_v31  ;;  %v3425_v60 = vpop.permute.xlu1 %3424 }
 0x5df   : > { %v6970_v46 = vpop.eup %6969  ;;  %v3492_v43 = vsub.f32 %v10697_v48, %v3425_v60  ;;  %v3493_v5 = vsub.f32 %v10698_v17, %v3425_v60  ;;  %3664 = vadd.xlane.f32.xlu1 %v9600_v29  ;;  %v3702_v34 = vadd.f32 %v6968_v42, %v6966_v56 }
 0x5e0   : > { %v6972_v58 = vpop.eup %6971  ;;  %v3430_v62 = vpop.permute.xlu0 %3429  ;;  %3667 = vadd.xlane.f32.xlu0 %v9606_v30  ;;  %v3746_v39 = vpack.c.bf16 %v6970_v46, %v6966_v56 }
 0x5e1   : > { %v3616_v36 = vmul.f32 1.442695, %v3492_v43  ;;  %v3618_v41 = vmul.f32 1.442695, %v3493_v5  ;;  %v3494_v63 = vsub.f32 %v10699_v4, %v3430_v62  ;;  %v3495_v37 = vsub.f32 %v10700_v15, %v3430_v62 }
 0x5e2   : > { %v3747_v22 = vpack.c.bf16 %v6972_v58, %v6968_v42  ;;  %v3705_v31 = vadd.f32 %v6972_v58, %v6970_v46  ;;  %v9704_v62 = vpop.permute.xlu1 %4794 }
 0x5e3   : > { %6981 = vpow2.f32 %v3616_v36  ;;  %v3620_v48 = vmul.f32 1.442695, %v3494_v63  ;;  %v3622_v14 = vmul.f32 1.442695, %v3495_v37  ;;  %3670 = vadd.xlane.f32.xlu1 %v9612_v1 }
 0x5e4   : > { %6983 = vpow2.f32 %v3618_v41  ;;  %4209 = vmatprep.mubr.bf16.mxu0 %v3747_v22  ;;  %3673 = vadd.xlane.f32.xlu0 %v9618_v3  ;;  %v9701_v3 = vpop.permute.xlu0 %4799 }
 0x5e5   : > { %v6974_v29 = vpop.eup %6973  ;;  %6985 = vpow2.f32 %v3620_v48  ;;  %4210 = vmatmul.mubr.bf16.gmra.mrb[116].mxu0 %v3746_v39 }
 0x5e6   : > { %v6976_v30 = vpop.eup %6975  ;;  %6987 = vpow2.f32 %v3622_v14 }
 0x5e7   : > { %v6978_v56 = vpop.eup %6977  ;;  %3676 = vadd.xlane.f32.xlu1 %v9624_v26  ;;  %v3708_v60 = vadd.f32 %v6976_v30, %v6974_v29 }
 0x5e8   : > { %v6980_v42 = vpop.eup %6979  ;;  %3679 = vadd.xlane.f32.xlu0 %v9630_v57  ;;  %v3748_v46 = vpack.c.bf16 %v6978_v56, %v6974_v29 }
 0x5e9   : > { %v3749_v43 = vpack.c.bf16 %v6980_v42, %v6976_v30  ;;  %v3711_v17 = vadd.f32 %v6980_v42, %v6978_v56 }
 0x5eb   : > { %4217 = vmatprep.mubr.bf16.mxu1 %v3749_v43  ;;  %3682 = vadd.xlane.f32.xlu1 %v9636_v13  ;;  %v9707_v13 = vpop.permute.xlu0 %4809 }
 0x5ec   : > { %4218 = vmatmul.mubr.bf16.vlgmr.msra.gmra.mrb[128].mxu1 %v3748_v46  ;;  %3685 = vadd.xlane.f32.xlu0 %v9644_v49  ;;  %v9711_v49 = vpop.permute.xlu1 %4804 }
 0x5ed   : > { %v6982_v1 = vpop.eup %6981 }
 0x5ee   : > { %v6984_v14 = vpop.eup %6983 }
 0x5ef   : > { %v6986_v5 = vpop.eup %6985  ;;  %3688 = vadd.xlane.f32.xlu1 %v9651_v24  ;;  %v3714_v26 = vadd.f32 %v6984_v14, %v6982_v1  ;;  %v9714_v24 = vpop.permute.xlu0 %4819 }
 0x5f0   : > { %v6988_v58 = vpop.eup %6987  ;;  %3691 = vadd.xlane.f32.xlu0 %v9660_v11  ;;  %v3750_v57 = vpack.c.bf16 %v6986_v5, %v6982_v1  ;;  %v9716_v11 = vpop.permute.xlu1 %4814 }
 0x5f1   : > { %v3751_v39 = vpack.c.bf16 %v6988_v58, %v6984_v14  ;;  %v3717_v36 = vadd.f32 %v6988_v58, %v6986_v5 }
 0x5f3   : > { %4225 = vmatprep.mubr.bf16.mxu1 %v3751_v39  ;;  %3694 = vadd.xlane.f32.xlu1 %v9667_v44  ;;  %v9718_v41 = vpop.permute.xlu0 %4829 }
 0x5f4   : > { %4226 = vmatmul.mubr.bf16.gmra.mrb[132].mxu1 %v3750_v57  ;;  %3697 = vadd.xlane.f32.xlu0 %v9676_v19  ;;  %v9720_v4 = vpop.permute.xlu1 %4824 }
 0x5f7   : > { %3700 = vadd.xlane.f32.xlu1 %v9683_v54  ;;  %v9722_v44 = vpop.permute.xlu0 %4839 }
 0x5f8   : > { %3703 = vadd.xlane.f32.xlu0 %v3702_v34  ;;  %v9724_v19 = vpop.permute.xlu1 %4834 }
 0x5fb   : > { %3706 = vadd.xlane.f32.xlu1 %v3705_v31  ;;  %v9726_v63 = vpop.permute.xlu0 %4849 }
 0x5fc   : > { %3709 = vadd.xlane.f32.xlu0 %v3708_v60  ;;  %v9728_v54 = vpop.permute.xlu1 %4844 }
 0x5fd   : > { %10701 = vst [vmem:[#allocation29_spill] sm:$0xff] %v9728_v54 }
 0x5ff   : > { %3712 = vadd.xlane.f32.xlu1 %v3711_v17  ;;  %v9730_v34 = vpop.permute.xlu0 %4859 }
 0x600   : > { %3715 = vadd.xlane.f32.xlu0 %v3714_v26  ;;  %10702 = vst [vmem:[#allocation36_spill] sm:$0xff] %v9730_v34  ;;  %v9732_v15 = vpop.permute.xlu1 %4854 }
 0x601   : > { %10703 = vst [vmem:[#allocation34_spill] sm:$0xff] %v9732_v15 }
 0x603   : > { %3718 = vadd.xlane.f32.xlu1 %v3717_v36  ;;  %v9734_v37 = vpop.permute.xlu0 %4869 }
 0x604   : > { %10704 = vst [vmem:[#allocation39_spill] sm:$0xff] %v9734_v37  ;;  %v9736_v22 = vpop.permute.xlu1 %4864  ;;  %v3759_v37 = vld [vmem:[#allocation4 + $0x130] sm:$0xff] }
 0x605   : > { %10705 = vst [vmem:[#allocation40_spill] sm:$0xff] %v9736_v22  ;;  %v3758_v22 = vld [vmem:[#allocation4 + $0x128] sm:$0xff] }
 0x607   : > { %v9738_v31 = vpop.permute.xlu0 %4879 }
 0x608   : > { %10706 = vst [vmem:[#allocation88_spill] sm:$0xff] %v9738_v31  ;;  %v9740_v48 = vpop.permute.xlu1 %4874  ;;  %v3756_v31 = vld [vmem:[#allocation4 + $0x118] sm:$0xff] }
 0x609   : > { %10707 = vst [vmem:[#allocation89_spill] sm:$0xff] %v9740_v48 }
 0x60b   : > { %v9742_v29 = vpop.permute.xlu0 %4889 }
 0x60c   : > { %10708 = vst [vmem:[#allocation90_spill] sm:$0xff] %v9742_v29  ;;  %v9744_v30 = vpop.permute.xlu1 %4884 }
 0x60d   : > { %10709 = vst [vmem:[#allocation37_spill] sm:$0xff] %v9744_v30 }
 0x60f   : > { %v9746_v56 = vpop.permute.xlu0 %4899 }
 0x610   : > { %10710 = vst [vmem:[#allocation38_spill] sm:$0xff] %v9746_v56  ;;  %v9748_v60 = vpop.permute.xlu1 %4894 }
 0x611   : > { %10711 = vst [vmem:[#allocation43_spill] sm:$0xff] %v9748_v60 }
 0x613   : > { %v9750_v42 = vpop.permute.xlu0 %4909 }
 0x614   : > { %10712 = vst [vmem:[#allocation44_spill] sm:$0xff] %v9750_v42  ;;  %v9752_v46 = vpop.permute.xlu1 %4904  ;;  %v3754_v42 = vld [vmem:[#allocation4 + $0x108] sm:$0xff] }
 0x615   : > { %10713 = vst [vmem:[#allocation41_spill] sm:$0xff] %v9752_v46 }
 0x617   : > { %v9754_v43 = vpop.permute.xlu0 %4919 }
 0x618   : > { %10714 = vst [vmem:[#allocation42_spill] sm:$0xff] %v9754_v43  ;;  %v9756_v17 = vpop.permute.xlu1 %4914 }
 0x619   : > { %10715 = vst [vmem:[#allocation47_spill] sm:$0xff] %v9756_v17 }
 0x61b   : > { %v9758_v1 = vpop.permute.xlu0 %4929 }
 0x61c   : > { %10716 = vst [vmem:[#allocation48_spill] sm:$0xff] %v9758_v1  ;;  %v9760_v14 = vpop.permute.xlu1 %4924 }
 0x61d   : > { %10717 = vst [vmem:[#allocation45_spill] sm:$0xff] %v9760_v14 }
 0x61f   : > { %v9762_v5 = vpop.permute.xlu0 %4939 }
 0x620   : > { %10718 = vst [vmem:[#allocation46_spill] sm:$0xff] %v9762_v5  ;;  %v9764_v26 = vpop.permute.xlu1 %4934  ;;  %v10724_v5 = vld [vmem:[#allocation63_spill] sm:$0xff] }
 0x621   : > { %10719 = vst [vmem:[#allocation51_spill] sm:$0xff] %v9764_v26  ;;  %v3786_v56 = vmul.f32 %v10724_v5, %v3754_v42  ;;  %v3753_v26 = vld [vmem:[#allocation4 + $0x100] sm:$0xff] }
 0x623   : > { %v9766_v58 = vpop.permute.xlu0 %4413 }
 0x624   : > { %10720 = vst [vmem:[#allocation52_spill] sm:$0xff] %v9766_v58  ;;  %v9768_v57 = vpop.permute.xlu1 %4408  ;;  %v3755_v58 = vld [vmem:[#allocation4 + $0x110] sm:$0xff] }
 0x625   : > { %10721 = vst [vmem:[#allocation49_spill] sm:$0xff] %v9768_v57  ;;  %v10725_v57 = vld [vmem:[#allocation58_spill] sm:$0xff] }
 0x626   : > { %v3785_v50 = vmul.f32 %v10725_v57, %v3753_v26 }
 0x627   : > { %v9770_v36 = vpop.permute.xlu0 %4423 }
 0x628   : > { %10722 = vst [vmem:[#allocation50_spill] sm:$0xff] %v9770_v36  ;;  %v9774_v1 = vpop.permute.xlu1 %4418 }
 0x629   : > { %10723 = vst [vmem:[#allocation55_spill] sm:$0xff] %v9774_v1 }
 0x64c   : > { %v6201_v39 = vpop.f32.mrb[64].mxu0 }
 0x64d   : > { %v6202_v46 = vpop.f32.mrb[65].mxu0 }
 0x64e   : > { %v9772_v43 = vadd.f32 %v6202_v46, %v6201_v39  ;;  %v6204_v17 = vpop.f32.mrb[66].mxu0  ;;  %v10726_v46 = vld [vmem:[#allocation64_spill] sm:$0xff] }
 0x64f   : > { %v6205_v60 = vpop.f32.mrb[67].mxu0  ;;  %v3787_v39 = vmul.f32 %v10726_v46, %v3755_v58  ;;  %v10728_v58 = vld [vmem:[#allocation62_spill] sm:$0xff] }
 0x650   : > { %v9776_v14 = vadd.f32 %v6205_v60, %v6204_v17  ;;  %v3757_v60 = vld [vmem:[#allocation4 + $0x120] sm:$0xff] }
 0x651   : > { %v3629_v30 = vpop.xlane.xlu0 %3628  ;;  %v3789_v46 = vmul.f32 %v10728_v58, %v3757_v60  ;;  %v3761_v60 = vld [vmem:[#allocation4 + $0x140] sm:$0xff] }
 0x652   : > { %v3818_v29 = vadd.f32 %v3786_v56, %v3629_v30  ;;  %v10727_v56 = vld [vmem:[#allocation61_spill] sm:$0xff] }
 0x653   : > { %v3788_v26 = vmul.f32 %v10727_v56, %v3756_v31 }
 0x654   : > { %3850 = vst.msk [vmem:[#allocation4 + $0x108] sm:$0xff] %vm465_vm1, %v3818_v29  ;;  %v6207_v36 = vpop.f32.mrb[68].mxu0  ;;  %v3626_v48 = vpop.xlane.xlu1 %3625 }
 0x655   : > { %v6208_v8 = vpop.f32.mrb[69].mxu0  ;;  %v3817_v21 = vadd.f32 %v3785_v50, %v3626_v48  ;;  %v3632_v1 = vpop.xlane.xlu0 %3631 }
 0x656   : > { %v9782_v17 = vadd.f32 %v6208_v8, %v6207_v36  ;;  %v6210_v42 = vpop.f32.mrb[70].mxu0  ;;  %v3819_v5 = vadd.f32 %v3787_v39, %v3632_v1  ;;  %v10729_v1 = vld [vmem:[#allocation66_spill] sm:$0xff]  ;;  %v10730_v39 = vld [vmem:[#allocation68_spill] sm:$0xff] }
 0x657   : > { %3849 = vst.msk [vmem:[#allocation4 + $0x100] sm:$0xff] %vm465_vm1, %v3817_v21  ;;  %v6211_v30 = vpop.f32.mrb[71].mxu0  ;;  %v3790_v21 = vmul.f32 %v10729_v1, %v3758_v22  ;;  %v3762_v1 = vld [vmem:[#allocation4 + $0x148] sm:$0xff] }
 0x658   : > { %3851 = vst.msk [vmem:[#allocation4 + $0x110] sm:$0xff] %vm465_vm1, %v3819_v5  ;;  %v9787_v29 = vadd.f32 %v6211_v30, %v6210_v42  ;;  %v3635_v57 = vpop.xlane.xlu1 %3634  ;;  %v3791_v42 = vmul.f32 %v10730_v39, %v3759_v37  ;;  %v3760_v5 = vld [vmem:[#allocation4 + $0x138] sm:$0xff] }
 0x659   : > { %v3820_v50 = vadd.f32 %v3788_v26, %v3635_v57  ;;  %v3638_v48 = vpop.xlane.xlu0 %3637 }
 0x65a   : > { %v3821_v8 = vadd.f32 %v3789_v46, %v3638_v48  ;;  %v10731_v46 = vld [vmem:[#allocation70_spill] sm:$0xff] }
 0x65b   : > { %v4975_v36 = vld [vmem:[#allocation4 + $0x108] sm:$0xff]  ;;  %3852 = vst.msk [vmem:[#allocation4 + $0x118] sm:$0xff] %vm465_vm1, %v3820_v50  ;;  %v3792_v50 = vmul.f32 %v10731_v46, %v3760_v5 }
 0x65c   : > { %6989 = vrcp.f32 %v4975_v36  ;;  %3853 = vst.msk [vmem:[#allocation4 + $0x120] sm:$0xff] %vm465_vm1, %v3821_v8  ;;  %v3641_v31 = vpop.xlane.xlu1 %3640  ;;  %v10732_v8 = vld [vmem:[#allocation65_spill] sm:$0xff] }
 0x65d   : > { %v3822_v30 = vadd.f32 %v3790_v21, %v3641_v31  ;;  %v3644_v56 = vpop.xlane.xlu0 %3643  ;;  %v3793_v36 = vmul.f32 %v10732_v8, %v3761_v60  ;;  %v3763_v31 = vld [vmem:[#allocation4 + $0x150] sm:$0xff] }
 0x65e   : > { %v4974_v58 = vld [vmem:[#allocation4 + $0x100] sm:$0xff]  ;;  %v3823_v26 = vadd.f32 %v3791_v42, %v3644_v56 }
 0x65f   : > { %6991 = vrcp.f32 %v4974_v58  ;;  %v4976_v57 = vld [vmem:[#allocation4 + $0x110] sm:$0xff]  ;;  %3854 = vst.msk [vmem:[#allocation4 + $0x128] sm:$0xff] %vm465_vm1, %v3822_v30 }
 0x660   : > { %3855 = vst.msk [vmem:[#allocation4 + $0x130] sm:$0xff] %vm465_vm1, %v3823_v26  ;;  %v6213_v22 = vpop.f32.mrb[72].mxu0  ;;  %v3647_v48 = vpop.xlane.xlu1 %3646  ;;  %6993 = vrcp.f32 %v4976_v57  ;;  %v10733_v26 = vld [vmem:[#allocation72_spill] sm:$0xff]  ;;  %v3764_v57 = vld [vmem:[#allocation4 + $0x158] sm:$0xff] }
 0x661   : > { %v6214_v37 = vpop.f32.mrb[73].mxu0  ;;  %v3824_v39 = vadd.f32 %v3792_v50, %v3647_v48  ;;  %v3650_v21 = vpop.xlane.xlu0 %3649  ;;  %v3794_v46 = vmul.f32 %v10733_v26, %v3762_v1  ;;  %v10734_v50 = vld [vmem:[#allocation67_spill] sm:$0xff]  ;;  %v10735_v1 = vld [vmem:[#allocation74_spill] sm:$0xff]  ;;  %v3766_v26 = vld [vmem:[#allocation4 + $0x168] sm:$0xff] }
 0x662   : > { %v4977_v40 = vld [vmem:[#allocation4 + $0x118] sm:$0xff]  ;;  %v9798_v42 = vadd.f32 %v6214_v37, %v6213_v22  ;;  %v6216_v56 = vpop.f32.mrb[74].mxu0  ;;  %v3825_v58 = vadd.f32 %v3793_v36, %v3650_v21  ;;  %v3795_v48 = vmul.f32 %v10734_v50, %v3763_v31  ;;  %v3765_v37 = vld [vmem:[#allocation4 + $0x160] sm:$0xff]  ;;  %v3796_v21 = vmul.f32 %v10735_v1, %v3764_v57  ;;  %v10736_v31 = vld [vmem:[#allocation69_spill] sm:$0xff] }
 0x663   : > { %6995 = vrcp.f32 %v4977_v40  ;;  %v4978_v30 = vld [vmem:[#allocation4 + $0x120] sm:$0xff]  ;;  %3856 = vst.msk [vmem:[#allocation4 + $0x138] sm:$0xff] %vm465_vm1, %v3824_v39  ;;  %v6217_v5 = vpop.f32.mrb[75].mxu0 }
 0x664   : > { %v9802_v53 = vadd.f32 %v6217_v5, %v6216_v56  ;;  %3857 = vst.msk [vmem:[#allocation4 + $0x140] sm:$0xff] %vm465_vm1, %v3825_v58  ;;  %v3653_v60 = vpop.xlane.xlu1 %3652  ;;  %6997 = vrcp.f32 %v4978_v30  ;;  %v3797_v5 = vmul.f32 %v10736_v31, %v3765_v37 }
 0x665   : > { %v3826_v8 = vadd.f32 %v3794_v46, %v3653_v60  ;;  %v3656_v22 = vpop.xlane.xlu0 %3655 }
 0x666   : > { %v6990_v45 = vpop.eup %6989  ;;  %v4979_v40 = vld [vmem:[#allocation4 + $0x128] sm:$0xff]  ;;  %v3827_v36 = vadd.f32 %v3795_v48, %v3656_v22 }
 0x667   : > { %6999 = vrcp.f32 %v4979_v40  ;;  %v4980_v39 = vld [vmem:[#allocation4 + $0x130] sm:$0xff]  ;;  %3858 = vst.msk [vmem:[#allocation4 + $0x148] sm:$0xff] %vm465_vm1, %v3826_v8  ;;  %5077 = vperm.xlu0 %6475, %v6990_v45  }
 0x668   : > { %3859 = vst.msk [vmem:[#allocation4 + $0x150] sm:$0xff] %vm465_vm1, %v3827_v36  ;;  %v6219_v56 = vpop.f32.mrb[76].mxu0  ;;  %v3659_v58 = vpop.xlane.xlu1 %3658  ;;  %7001 = vrcp.f32 %v4980_v39  ;;  %v10737_v36 = vld [vmem:[#allocation76_spill] sm:$0xff]  ;;  %v10738_v39 = vld [vmem:[#allocation71_spill] sm:$0xff] }
 0x669   : > { %v6992_v46 = vpop.eup %6991  ;;  %v6220_v60 = vpop.f32.mrb[77].mxu0  ;;  %v3828_v50 = vadd.f32 %v3796_v21, %v3659_v58  ;;  %v3798_v37 = vmul.f32 %v10737_v36, %v3766_v26  ;;  %v3799_v58 = vmul.f32 %v10738_v39, %v3767_v32  ;;  %v10740_v36 = vld [vmem:[#allocation73_spill] sm:$0xff] }
 0x66a   : > { %v3662_v30 = vpop.xlane.xlu0 %3661  ;;  %v4981_v48 = vld [vmem:[#allocation4 + $0x138] sm:$0xff]  ;;  %v9810_v22 = vadd.f32 %v6220_v60, %v6219_v56  ;;  %v6222_v8 = vpop.f32.mrb[78].mxu0  ;;  %5072 = vperm.xlu1 %6476, %v6992_v46   ;;  %v3769_v46 = vld [vmem:[#allocation4 + $0x180] sm:$0xff] }
 0x66b   : > { %v3829_v45 = vadd.f32 %v3797_v5, %v3662_v30  ;;  %7003 = vrcp.f32 %v4981_v48  ;;  %v4982_v57 = vld [vmem:[#allocation4 + $0x140] sm:$0xff]  ;;  %3860 = vst.msk [vmem:[#allocation4 + $0x158] sm:$0xff] %vm465_vm1, %v3828_v50  ;;  %v6223_v40 = vpop.f32.mrb[79].mxu0  ;;  %v6994_v1 = vpop.eup %6993  ;;  %v3768_v56 = vld [vmem:[#allocation4 + $0x178] sm:$0xff] }
 0x66c   : > { %v9814_v31 = vadd.f32 %v6223_v40, %v6222_v8  ;;  %v3665_v21 = vpop.xlane.xlu1 %3664  ;;  %7005 = vrcp.f32 %v4982_v57  ;;  %v10739_v50 = vld [vmem:[#allocation78_spill] sm:$0xff] }
 0x66d   : > { %3861 = vst.msk [vmem:[#allocation4 + $0x160] sm:$0xff] %vm465_vm1, %v3829_v45  ;;  %v6996_v60 = vpop.eup %6995  ;;  %v3830_v15 = vadd.f32 %v3798_v37, %v3665_v21  ;;  %v3800_v8 = vmul.f32 %v10739_v50, %v3768_v56  ;;  %v3801_v37 = vmul.f32 %v10740_v36, %v3769_v46  ;;  %v3770_v21 = vld [vmem:[#allocation4 + $0x188] sm:$0xff] }
 0x66e   : > { %v3668_v5 = vpop.xlane.xlu0 %3667  ;;  %v4983_v30 = vld [vmem:[#allocation4 + $0x148] sm:$0xff]  ;;  %5082 = vperm.xlu1 %6476, %v6994_v1   ;;  %5087 = vperm.xlu0 %6475, %v6996_v60   ;;  %v6998_v45 = vpop.eup %6997  ;;  %v3771_v1 = vld [vmem:[#allocation4 + $0x190] sm:$0xff] }
 0x66f   : > { %v3831_v48 = vadd.f32 %v3799_v58, %v3668_v5  ;;  %7007 = vrcp.f32 %v4983_v30  ;;  %v4984_v26 = vld [vmem:[#allocation4 + $0x150] sm:$0xff]  ;;  %3862 = vst.msk [vmem:[#allocation4 + $0x168] sm:$0xff] %vm465_vm1, %v3830_v15  ;;  %v10741_v46 = vld [vmem:[#allocation80_spill] sm:$0xff] }
 0x670   : > { %v6225_v32 = vpop.f32.mrb[80].mxu0  ;;  %v3671_v40 = vpop.xlane.xlu1 %3670  ;;  %7009 = vrcp.f32 %v4984_v26  ;;  %v3802_v50 = vmul.f32 %v10741_v46, %v3770_v21 }
 0x671   : > { %3863 = vst.msk [vmem:[#allocation4 + $0x170] sm:$0xff] %vm465_vm1, %v3831_v48  ;;  %v7000_v39 = vpop.eup %6999  ;;  %v6226_v57 = vpop.f32.mrb[81].mxu0  ;;  %v3832_v34 = vadd.f32 %v3800_v8, %v3671_v40  ;;  %v10742_v8 = vld [vmem:[#allocation75_spill] sm:$0xff]  ;;  %v3772_v40 = vld [vmem:[#allocation4 + $0x198] sm:$0xff] }
 0x672   : > { %v3674_v58 = vpop.xlane.xlu0 %3673  ;;  %v4985_v60 = vld [vmem:[#allocation4 + $0x158] sm:$0xff]  ;;  %v9822_v5 = vadd.f32 %v6226_v57, %v6225_v32  ;;  %v6228_v15 = vpop.f32.mrb[82].mxu0  ;;  %5092 = vperm.xlu1 %6476, %v6998_v45   ;;  %5097 = vperm.xlu0 %6475, %v7000_v39   ;;  %v3803_v32 = vmul.f32 %v10742_v8, %v3771_v1  ;;  %v3773_v39 = vld [vmem:[#allocation4 + $0x1a0] sm:$0xff] }
 0x673   : > { %v3833_v30 = vadd.f32 %v3801_v37, %v3674_v58  ;;  %7011 = vrcp.f32 %v4985_v60  ;;  %3864 = vst.msk [vmem:[#allocation4 + $0x178] sm:$0xff] %vm465_vm1, %v3832_v34  ;;  %v6229_v48 = vpop.f32.mrb[83].mxu0  ;;  %v7002_v36 = vpop.eup %7001  ;;  %v10743_v34 = vld [vmem:[#allocation82_spill] sm:$0xff] }
 0x674   : > { %v4986_v56 = vld [vmem:[#allocation4 + $0x160] sm:$0xff]  ;;  %v9826_v12 = vadd.f32 %v6229_v48, %v6228_v15  ;;  %v3677_v26 = vpop.xlane.xlu1 %3676  ;;  %v3804_v21 = vmul.f32 %v10743_v34, %v3772_v40  ;;  %v10744_v48 = vld [vmem:[#allocation77_spill] sm:$0xff] }
 0x675   : > { %3865 = vst.msk [vmem:[#allocation4 + $0x180] sm:$0xff] %vm465_vm1, %v3833_v30  ;;  %v7004_v57 = vpop.eup %7003  ;;  %v3834_v37 = vadd.f32 %v3802_v50, %v3677_v26  ;;  %7013 = vrcp.f32 %v4986_v56  ;;  %v3805_v46 = vmul.f32 %v10744_v48, %v3773_v39  ;;  %v3774_v50 = vld [vmem:[#allocation4 + $0x1a8] sm:$0xff] }
 0x676   : > { %v3680_v45 = vpop.xlane.xlu0 %3679  ;;  %v4987_v58 = vld [vmem:[#allocation4 + $0x168] sm:$0xff]  ;;  %5102 = vperm.xlu1 %6476, %v7002_v36   ;;  %5107 = vperm.xlu0 %6475, %v7004_v57   ;;  %v7006_v15 = vpop.eup %7005 }
 0x677   : > { %v3835_v60 = vadd.f32 %v3803_v32, %v3680_v45  ;;  %7015 = vrcp.f32 %v4987_v58  ;;  %3866 = vst.msk [vmem:[#allocation4 + $0x188] sm:$0xff] %vm465_vm1, %v3834_v37  ;;  %v3775_v32 = vld [vmem:[#allocation4 + $0x1b0] sm:$0xff]  ;;  %v10745_v58 = vld [vmem:[#allocation84_spill] sm:$0xff] }
 0x678   : > { %v6231_v30 = vpop.f32.mrb[84].mxu0  ;;  %v3683_v1 = vpop.xlane.xlu1 %3682  ;;  %v4988_v40 = vld [vmem:[#allocation4 + $0x170] sm:$0xff] }
 0x679   : > { %3867 = vst.msk [vmem:[#allocation4 + $0x190] sm:$0xff] %vm465_vm1, %v3835_v60  ;;  %v7008_v26 = vpop.eup %7007  ;;  %v6232_v8 = vpop.f32.mrb[85].mxu0  ;;  %v3836_v56 = vadd.f32 %v3804_v21, %v3683_v1  ;;  %v3806_v60 = vmul.f32 %v10745_v58, %v3774_v50  ;;  %v10746_v1 = vld [vmem:[#allocation79_spill] sm:$0xff]  ;;  %7017 = vrcp.f32 %v4988_v40 }
 0x67a   : > { %v3686_v61 = vpop.xlane.xlu0 %3685  ;;  %v9834_v36 = vadd.f32 %v6232_v8, %v6231_v30  ;;  %v6234_v57 = vpop.f32.mrb[86].mxu0  ;;  %5112 = vperm.xlu1 %6476, %v7006_v15   ;;  %5117 = vperm.xlu0 %6475, %v7008_v26   ;;  %v4989_v39 = vld [vmem:[#allocation4 + $0x178] sm:$0xff]  ;;  %v3807_v30 = vmul.f32 %v10746_v1, %v3775_v32  ;;  %v10747_v50 = vld [vmem:[#allocation31_spill] sm:$0xff]  ;;  %v10748_v32 = vld [vmem:[#allocation85_spill] sm:$0xff] }
 0x67b   : > { %v3837_v45 = vadd.f32 %v3805_v46, %v3686_v61  ;;  %3868 = vst.msk [vmem:[#allocation4 + $0x198] sm:$0xff] %vm465_vm1, %v3836_v56  ;;  %v6235_v37 = vpop.f32.mrb[87].mxu0  ;;  %v7010_v34 = vpop.eup %7009  ;;  %v3776_v8 = vld [vmem:[#allocation4 + $0x1b8] sm:$0xff]  ;;  %v3777_v46 = vld [vmem:[#allocation4 + $0x1c0] sm:$0xff]  ;;  %7019 = vrcp.f32 %v4989_v39  ;;  %v3778_v1 = vld [vmem:[#allocation4 + $0x1c8] sm:$0xff] }
 0x67c   : > { %v9838_v48 = vadd.f32 %v6235_v37, %v6234_v57  ;;  %v3689_v21 = vpop.xlane.xlu1 %3688  ;;  %v3808_v56 = vmul.f32 %v10747_v50, %v3776_v8  ;;  %v3809_v58 = vmul.f32 %v10748_v32, %v3777_v46  ;;  %v4990_v8 = vld [vmem:[#allocation4 + $0x180] sm:$0xff] }
 0x67d   : > { %3869 = vst.msk [vmem:[#allocation4 + $0x1a0] sm:$0xff] %vm465_vm1, %v3837_v45  ;;  %v7012_v52 = vpop.eup %7011  ;;  %v3838_v61 = vadd.f32 %v3806_v60, %v3689_v21  ;;  %7021 = vrcp.f32 %v4990_v8 }
 0x67e   : > { %v3692_v15 = vpop.xlane.xlu0 %3691  ;;  %5122 = vperm.xlu1 %6476, %v7010_v34   ;;  %5127 = vperm.xlu0 %6475, %v7012_v52   ;;  %v4991_v50 = vld [vmem:[#allocation4 + $0x188] sm:$0xff] }
 0x67f   : > { %v3839_v26 = vadd.f32 %v3807_v30, %v3692_v15  ;;  %3870 = vst.msk [vmem:[#allocation4 + $0x1a8] sm:$0xff] %vm465_vm1, %v3838_v61  ;;  %v7014_v57 = vpop.eup %7013  ;;  %v3779_v30 = vld [vmem:[#allocation4 + $0x1d0] sm:$0xff]  ;;  %7023 = vrcp.f32 %v4991_v50 }
 0x680   : > { %v6237_v45 = vpop.f32.mrb[88].mxu0  ;;  %v3695_v37 = vpop.xlane.xlu1 %3694  ;;  %v10749_v15 = vld [vmem:[#allocation81_spill] sm:$0xff] }
 0x681   : > { %3871 = vst.msk [vmem:[#allocation4 + $0x1b0] sm:$0xff] %vm465_vm1, %v3839_v26  ;;  %v7016_v60 = vpop.eup %7015  ;;  %v6238_v21 = vpop.f32.mrb[89].mxu0  ;;  %v3840_v47 = vadd.f32 %v3808_v56, %v3695_v37  ;;  %v3810_v26 = vmul.f32 %v10749_v15, %v3778_v1  ;;  %v10750_v37 = vld [vmem:[#allocation27_spill] sm:$0xff]  ;;  %v3783_v15 = vld [vmem:[#allocation4 + $0x1f0] sm:$0xff] }
 0x682   : > { %v3698_v40 = vpop.xlane.xlu0 %3697  ;;  %v9846_v34 = vadd.f32 %v6238_v21, %v6237_v45  ;;  %v6240_v52 = vpop.f32.mrb[90].mxu0  ;;  %5132 = vperm.xlu1 %6476, %v7014_v57   ;;  %5137 = vperm.xlu0 %6475, %v7016_v60   ;;  %v3811_v32 = vmul.f32 %v10750_v37, %v3779_v30  ;;  %v3780_v45 = vld [vmem:[#allocation4 + $0x1d8] sm:$0xff] }
 0x683   : > { %v3841_v39 = vadd.f32 %v3809_v58, %v3698_v40  ;;  %3872 = vst.msk [vmem:[#allocation4 + $0x1b8] sm:$0xff] %vm465_vm1, %v3840_v47  ;;  %v6241_v61 = vpop.f32.mrb[91].mxu0  ;;  %v3781_v58 = vld [vmem:[#allocation4 + $0x1e0] sm:$0xff]  ;;  %v7018_v60 = vpop.eup %7017 }
 0x684   : > { %v9850_v46 = vadd.f32 %v6241_v61, %v6240_v52  ;;  %v3701_v56 = vpop.xlane.xlu1 %3700  ;;  %v10751_v47 = vld [vmem:[#allocation91_spill] sm:$0xff]  ;;  %v3813_v52 = vmul.f32 %v9562_v6, %v3781_v58  ;;  %v3815_v58 = vmul.f32 %v9580_v0, %v3783_v15 }
 0x685   : > { %3873 = vst.msk [vmem:[#allocation4 + $0x1c0] sm:$0xff] %vm465_vm1, %v3841_v39  ;;  %v3842_v21 = vadd.f32 %v3810_v26, %v3701_v56  ;;  %v3812_v1 = vmul.f32 %v10751_v47, %v3780_v45  ;;  %v3782_v39 = vld [vmem:[#allocation4 + $0x1e8] sm:$0xff]  ;;  %v4992_v56 = vld [vmem:[#allocation4 + $0x190] sm:$0xff]  ;;  %v4993_v45 = vld [vmem:[#allocation4 + $0x198] sm:$0xff] }
 0x686   : > { %v3704_v54 = vpop.xlane.xlu0 %3703  ;;  %4490 = vrot.lane.b32.xlu1 %v9772_v43, %s7311_s26  ;;  %4492 = vrot.lane.b32.xlu0 %v9776_v14, %s7311_s26  ;;  %7025 = vrcp.f32 %v4992_v56 }
 0x687   : > { %v3843_v57 = vadd.f32 %v3811_v32, %v3704_v54  ;;  %3874 = vst.msk [vmem:[#allocation4 + $0x1c8] sm:$0xff] %vm465_vm1, %v3842_v21  ;;  %v7020_v54 = vpop.eup %7019  ;;  %v3814_v32 = vmul.f32 %v9568_v16, %v3782_v39  ;;  %7027 = vrcp.f32 %v4993_v45 }
 0x688   : > { %v6243_v40 = vpop.f32.mrb[92].mxu0  ;;  %v3707_v30 = vpop.xlane.xlu1 %3706  ;;  %v4996_v45 = vld [vmem:[#allocation4 + $0x1b0] sm:$0xff] }
 0x689   : > { %3875 = vst.msk [vmem:[#allocation4 + $0x1d0] sm:$0xff] %vm465_vm1, %v3843_v57  ;;  %v6244_v8 = vpop.f32.mrb[93].mxu0  ;;  %v3844_v61 = vadd.f32 %v3812_v1, %v3707_v30  ;;  %v3784_v57 = vld [vmem:[#allocation4 + $0x1f8] sm:$0xff] }
 0x68a   : > { %v3710_v43 = vpop.xlane.xlu0 %3709  ;;  %v9862_v26 = vadd.f32 %v6244_v8, %v6243_v40  ;;  %v6246_v14 = vpop.f32.mrb[94].mxu0  ;;  %5142 = vperm.xlu1 %6476, %v7018_v60   ;;  %5147 = vperm.xlu0 %6475, %v7020_v54   ;;  %v3816_v16 = vmul.f32 %v9587_v59, %v3784_v57 }
 0x68b   : > { %v3845_v50 = vadd.f32 %v3813_v52, %v3710_v43  ;;  %3876 = vst.msk [vmem:[#allocation4 + $0x1d8] sm:$0xff] %vm465_vm1, %v3844_v61  ;;  %v6247_v37 = vpop.f32.mrb[95].mxu0  ;;  %v7022_v40 = vpop.eup %7021  ;;  %v4995_v43 = vld [vmem:[#allocation4 + $0x1a8] sm:$0xff] }
 0x68c   : > { %v9866_v6 = vadd.f32 %v6247_v37, %v6246_v14  ;;  %v3713_v21 = vpop.xlane.xlu1 %3712  ;;  %v7024_v52 = vpop.eup %7023 }
 0x68d   : > { %3877 = vst.msk [vmem:[#allocation4 + $0x1e0] sm:$0xff] %vm465_vm1, %v3845_v50  ;;  %v3846_v47 = vadd.f32 %v3814_v32, %v3713_v21 }
 0x68e   : > { %v3716_v1 = vpop.xlane.xlu0 %3715  ;;  %4494 = vrot.lane.b32.xlu1 %v9782_v17, %s7311_s26  ;;  %4496 = vrot.lane.b32.xlu0 %v9787_v29, %s7311_s26  ;;  %v4994_v17 = vld [vmem:[#allocation4 + $0x1a0] sm:$0xff] }
 0x68f   : > { %v3847_v60 = vadd.f32 %v3815_v58, %v3716_v1  ;;  %3878 = vst.msk [vmem:[#allocation4 + $0x1e8] sm:$0xff] %vm465_vm1, %v3846_v47  ;;  %7029 = vrcp.f32 %v4994_v17  ;;  %v4997_v58 = vld [vmem:[#allocation4 + $0x1b8] sm:$0xff] }
 0x690   : > { %v6249_v0 = vpop.f32.mrb[96].mxu0  ;;  %v3719_v30 = vpop.xlane.xlu1 %3718  ;;  %7031 = vrcp.f32 %v4995_v43 }
 0x691   : > { %3879 = vst.msk [vmem:[#allocation4 + $0x1f0] sm:$0xff] %vm465_vm1, %v3847_v60  ;;  %v6250_v39 = vpop.f32.mrb[97].mxu0  ;;  %v3848_v54 = vadd.f32 %v3816_v16, %v3719_v30  ;;  %v7026_v59 = vpop.eup %7025  ;;  %7033 = vrcp.f32 %v4996_v45  ;;  %v4999_v30 = vld [vmem:[#allocation4 + $0x1c8] sm:$0xff] }
 0x692   : > { %v9877_v8 = vadd.f32 %v6250_v39, %v6249_v0  ;;  %v6252_v61 = vpop.f32.mrb[98].mxu0  ;;  %5152 = vperm.xlu1 %6476, %v7022_v40   ;;  %5157 = vperm.xlu0 %6475, %v7024_v52   ;;  %v7028_v50 = vpop.eup %7027  ;;  %7035 = vrcp.f32 %v4997_v58  ;;  %v4998_v40 = vld [vmem:[#allocation4 + $0x1c0] sm:$0xff] }
 0x693   : > { %3880 = vst.msk [vmem:[#allocation4 + $0x1f8] sm:$0xff] %vm465_vm1, %v3848_v54  ;;  %v6253_v29 = vpop.f32.mrb[99].mxu0  ;;  %7037 = vrcp.f32 %v4998_v40 }
 0x694   : > { %v9880_v15 = vadd.f32 %v6253_v29, %v6252_v61  ;;  %7039 = vrcp.f32 %v4999_v30  ;;  %v5000_v29 = vld [vmem:[#allocation4 + $0x1d0] sm:$0xff] }
 0x695   : > { %7041 = vrcp.f32 %v5000_v29 }
 0x696   : > { %4498 = vrot.lane.b32.xlu1 %v9798_v42, %s7311_s26  ;;  %4500 = vrot.lane.b32.xlu0 %v9802_v53, %s7311_s26 }
 0x698   : > { %v6255_v14 = vpop.f32.mrb[100].mxu0 }
 0x699   : > { %v6256_v56 = vpop.f32.mrb[101].mxu0  ;;  %v7030_v53 = vpop.eup %7029 }
 0x69a   : > { %v9886_v37 = vadd.f32 %v6256_v56, %v6255_v14  ;;  %v6258_v32 = vpop.f32.mrb[102].mxu0  ;;  %5162 = vperm.xlu1 %6476, %v7026_v59   ;;  %5167 = vperm.xlu0 %6475, %v7028_v50   ;;  %v7032_v47 = vpop.eup %7031  ;;  %v5001_v59 = vld [vmem:[#allocation4 + $0x1d8] sm:$0xff] }
 0x69b   : > { %v6259_v21 = vpop.f32.mrb[103].mxu0  ;;  %7043 = vrcp.f32 %v5001_v59 }
 0x69c   : > { %v9888_v57 = vadd.f32 %v6259_v21, %v6258_v32  ;;  %v5002_v21 = vld [vmem:[#allocation4 + $0x1e0] sm:$0xff] }
 0x69d   : > { %7045 = vrcp.f32 %v5002_v21 }
 0x69e   : > { %4502 = vrot.lane.b32.xlu1 %v9810_v22, %s7311_s26  ;;  %4504 = vrot.lane.b32.xlu0 %v9814_v31, %s7311_s26  ;;  %v7034_v22 = vpop.eup %7033 }
 0x69f   : > { %v7036_v39 = vpop.eup %7035 }
 0x6a0   : > { %v6261_v42 = vpop.f32.mrb[104].mxu0 }
 0x6a1   : > { %v6262_v1 = vpop.f32.mrb[105].mxu0 }
 0x6a2   : > { %v9894_v60 = vadd.f32 %v6262_v1, %v6261_v42  ;;  %v6264_v16 = vpop.f32.mrb[106].mxu0  ;;  %5172 = vperm.xlu1 %6476, %v7030_v53   ;;  %5177 = vperm.xlu0 %6475, %v7032_v47   ;;  %v5003_v53 = vld [vmem:[#allocation4 + $0x1e8] sm:$0xff] }
 0x6a3   : > { %v6265_v0 = vpop.f32.mrb[107].mxu0  ;;  %7047 = vrcp.f32 %v5003_v53 }
 0x6a4   : > { %v9896_v52 = vadd.f32 %v6265_v0, %v6264_v16 }
 0x6a6   : > { %4506 = vrot.lane.b32.xlu1 %v9822_v5, %s7311_s26  ;;  %4508 = vrot.lane.b32.xlu0 %v9826_v12, %s7311_s26  ;;  %v7038_v12 = vpop.eup %7037 }
 0x6a7   : > { %v7040_v50 = vpop.eup %7039 }
 0x6a8   : > { %v6267_v31 = vpop.f32.mrb[108].mxu0 }
 0x6a9   : > { %v6268_v54 = vpop.f32.mrb[109].mxu0 }
 0x6aa   : > { %v6269_v61 = vadd.f32 %v6268_v54, %v6267_v31  ;;  %v6270_v17 = vpop.f32.mrb[110].mxu0  ;;  %5182 = vperm.xlu1 %6476, %v7034_v22   ;;  %5187 = vperm.xlu0 %6475, %v7036_v39  }
 0x6ab   : > { %v6271_v43 = vpop.f32.mrb[111].mxu0 }
 0x6ac   : > { %v6272_v14 = vadd.f32 %v6271_v43, %v6270_v17 }
 0x6ae   : > { %4510 = vrot.lane.b32.xlu1 %v9834_v36, %s7311_s26  ;;  %4512 = vrot.lane.b32.xlu0 %v9838_v48, %s7311_s26  ;;  %v7042_v36 = vpop.eup %7041 }
 0x6af   : > { %v7044_v47 = vpop.eup %7043 }
 0x6b0   : > { %v6273_v5 = vpop.f32.mrb[112].mxu0  ;;  %v7046_v22 = vpop.eup %7045 }
 0x6b1   : > { %v6274_v56 = vpop.f32.mrb[113].mxu0  ;;  %v7048_v31 = vpop.eup %7047 }
 0x6b2   : > { %v6275_v32 = vadd.f32 %v6274_v56, %v6273_v5  ;;  %v6276_v45 = vpop.f32.mrb[114].mxu0  ;;  %5192 = vperm.xlu1 %6476, %v7038_v12   ;;  %5197 = vperm.xlu0 %6475, %v7040_v50  }
 0x6b3   : > { %v6277_v58 = vpop.f32.mrb[115].mxu0 }
 0x6b4   : > { %v6278_v42 = vadd.f32 %v6277_v58, %v6276_v45 }
 0x6b6   : > { %4514 = vrot.lane.b32.xlu1 %v9846_v34, %s7311_s26  ;;  %4516 = vrot.lane.b32.xlu0 %v9850_v46, %s7311_s26 }
 0x6b8   : > { %v6279_v48 = vpop.f32.mrb[116].mxu0 }
 0x6b9   : > { %v6280_v1 = vpop.f32.mrb[117].mxu0 }
 0x6ba   : > { %v6281_v16 = vadd.f32 %v6280_v1, %v6279_v48  ;;  %v6282_v40 = vpop.f32.mrb[118].mxu0  ;;  %5202 = vperm.xlu1 %6476, %v7042_v36   ;;  %5207 = vperm.xlu0 %6475, %v7044_v47   ;;  %v4234_v47 = vld [vmem:[#allocation5] sm:$0xff]  ;;  %v4235_v1 = vld [vmem:[#allocation5 + $0x8] sm:$0xff] }
 0x6bb   : > { %v6283_v0 = vpop.f32.mrb[119].mxu0 }
 0x6bc   : > { %v6284_v30 = vadd.f32 %v6283_v0, %v6282_v40  ;;  %v10752_v40 = vld [vmem:[#allocation83_spill] sm:$0xff] }
 0x6bd   : > { %v4427_v0 = vmul.f32 %v10752_v40, %v4235_v1 }
 0x6be   : > { %4518 = vrot.lane.b32.xlu1 %v9862_v26, %s7311_s26  ;;  %4520 = vrot.lane.b32.xlu0 %v9866_v6, %s7311_s26 }
 0x6bf   : > { %v6285_v34 = vpop.f32.mrb[128].mxu1 }
 0x6c0   : > { %v6286_v46 = vpop.f32.mrb[129].mxu1 }
 0x6c1   : > { %v6287_v39 = vadd.f32 %v6286_v46, %v6285_v34  ;;  %v6288_v54 = vpop.f32.mrb[130].mxu1 }
 0x6c2   : > { %v6289_v17 = vpop.f32.mrb[131].mxu1  ;;  %5212 = vperm.xlu1 %6476, %v7046_v22   ;;  %5217 = vperm.xlu0 %6475, %v7048_v31  }
 0x6c3   : > { %v6290_v29 = vadd.f32 %v6289_v17, %v6288_v54  ;;  %v4236_v54 = vld [vmem:[#allocation5 + $0x10] sm:$0xff]  ;;  %v4237_v17 = vld [vmem:[#allocation5 + $0x18] sm:$0xff] }
 0x6c6   : > { %4522 = vrot.lane.b32.xlu1 %v9877_v8, %s7311_s26  ;;  %4524 = vrot.lane.b32.xlu0 %v9880_v15, %s7311_s26  ;;  %v5004_v8 = vld [vmem:[#allocation4 + $0x1f0] sm:$0xff]  ;;  %v5005_v15 = vld [vmem:[#allocation4 + $0x1f8] sm:$0xff] }
 0x6c7   : > { %v6291_v26 = vpop.f32.mrb[132].mxu1  ;;  %7049 = vrcp.f32 %v5004_v8  ;;  %v10753_v8 = vld [vmem:[#allocation57_spill] sm:$0xff] }
 0x6c8   : > { %v6292_v43 = vpop.f32.mrb[133].mxu1  ;;  %7051 = vrcp.f32 %v5005_v15 }
 0x6c9   : > { %v6293_v59 = vadd.f32 %v6292_v43, %v6291_v26  ;;  %v6294_v6 = vpop.f32.mrb[134].mxu1 }
 0x6ca   : > { %v6295_v12 = vpop.f32.mrb[135].mxu1  ;;  %4526 = vrot.lane.b32.xlu1 %v9886_v37, %s7311_s26  ;;  %4528 = vrot.lane.b32.xlu0 %v9888_v57, %s7311_s26 }
 0x6cb   : > { %v6296_v5 = vadd.f32 %v6295_v12, %v6294_v6 }
 0x6ce   : > { %4530 = vrot.lane.b32.xlu1 %v9894_v60, %s7311_s26  ;;  %4532 = vrot.lane.b32.xlu0 %v9896_v52, %s7311_s26 }
 0x6d1   : > { %v7050_v37 = vpop.eup %7049 }
 0x6d2   : > { %4534 = vrot.lane.b32.xlu1 %v6269_v61, %s7311_s26  ;;  %4536 = vrot.lane.b32.xlu0 %v6272_v14, %s7311_s26  ;;  %v7052_v57 = vpop.eup %7051 }
 0x6d6   : > { %4538 = vrot.lane.b32.xlu1 %v6275_v32, %s7311_s26  ;;  %4540 = vrot.lane.b32.xlu0 %v6278_v42, %s7311_s26 }
 0x6da   : > { %4542 = vrot.lane.b32.xlu1 %v6281_v16, %s7311_s26  ;;  %4544 = vrot.lane.b32.xlu0 %v6284_v30, %s7311_s26  ;;  %v4426_v16 = vmul.f32 %v9479_v51, %v4234_v47  ;;  %v4429_v51 = vmul.f32 %v9498_v25, %v4237_v17 }
 0x6de   : > { %4546 = vrot.lane.b32.xlu1 %v6287_v39, %s7311_s26  ;;  %4548 = vrot.lane.b32.xlu0 %v6290_v29, %s7311_s26  ;;  %v4428_v29 = vmul.f32 %v9495_v7, %v4236_v54 }
 0x6e2   : > { %4550 = vrot.lane.b32.xlu1 %v6293_v59, %s7311_s26  ;;  %4552 = vrot.lane.b32.xlu0 %v6296_v5, %s7311_s26 }
 0x6e6   : > { %5222 = vperm.xlu1 %6476, %v7050_v37   ;;  %5227 = vperm.xlu0 %6475, %v7052_v57   ;;  %v5078_v60 = vpop.permute.xlu0 %5077  ;;  %v10754_v57 = vld [vmem:[#allocation60_spill] sm:$0xff] }
 0x6e9   : > { %v5073_v52 = vpop.permute.xlu1 %5072 }
 0x6ed   : > { %v5088_v61 = vpop.permute.xlu0 %5087  ;;  %v5083_v14 = vpop.permute.xlu1 %5082 }
 0x6f1   : > { %v9936_v50 = vpop.permute.xlu0 %5097  ;;  %v9938_v56 = vpop.permute.xlu1 %5092 }
 0x6f5   : > { %v9940_v32 = vpop.permute.xlu0 %5107  ;;  %v9942_v45 = vpop.permute.xlu1 %5102 }
 0x6f9   : > { %v9944_v21 = vpop.permute.xlu0 %5117  ;;  %v9946_v58 = vpop.permute.xlu1 %5112 }
 0x6fd   : > { %v9948_v53 = vpop.permute.xlu0 %5127  ;;  %v9950_v42 = vpop.permute.xlu1 %5122 }
 0x701   : > { %v9952_v36 = vpop.permute.xlu0 %5137  ;;  %v9954_v48 = vpop.permute.xlu1 %5132 }
 0x705   : > { %v4493_v30 = vpop.permute.xlu0 %4492  ;;  %v4491_v34 = vpop.permute.xlu1 %4490 }
 0x706   : > { %v4587_v22 = vadd.f32 %v4493_v30, %v4427_v0  ;;  %v4586_v46 = vadd.f32 %v4491_v34, %v4426_v16  ;;  %v4238_v0 = vld [vmem:[#allocation5 + $0x20] sm:$0xff]  ;;  %v4239_v30 = vld [vmem:[#allocation5 + $0x28] sm:$0xff] }
 0x708   : > { %4620 = vst.msk [vmem:[#allocation5 + $0x8] sm:$0xff] %vm4618_vm2, %v4587_v22  ;;  %4619 = vst.msk [vmem:[#allocation5] sm:$0xff] %vm4618_vm2, %v4586_v46  ;;  %v4431_v22 = vmul.f32 %v9516_v28, %v4239_v30 }
 0x709   : > { %v9960_v31 = vpop.permute.xlu0 %5147  ;;  %v9962_v39 = vpop.permute.xlu1 %5142 }
 0x70d   : > { %v4497_v26 = vpop.permute.xlu0 %4496  ;;  %v4495_v43 = vpop.permute.xlu1 %4494 }
 0x70e   : > { %v4589_v59 = vadd.f32 %v4497_v26, %v4429_v51  ;;  %v4588_v6 = vadd.f32 %v4495_v43, %v4428_v29 }
 0x70f   : > { %v4751_v12 = vld [vmem:[#allocation5 + $0x8] sm:$0xff]  ;;  %v4750_v5 = vld [vmem:[#allocation5] sm:$0xff] }
 0x710   : > { %v4943_v15 = vmul.f32 %v10753_v8, %v4751_v12  ;;  %v5231_v37 = vmul.f32 %v5078_v60, %v4751_v12  ;;  %v4942_v47 = vmul.f32 %v10754_v57, %v4750_v5  ;;  %v5230_v1 = vmul.f32 %v5073_v52, %v4750_v5  ;;  %4622 = vst.msk [vmem:[#allocation5 + $0x18] sm:$0xff] %vm4618_vm2, %v4589_v59  ;;  %v4240_v8 = vld [vmem:[#allocation5 + $0x30] sm:$0xff] }
 0x711   : > { %4621 = vst.msk [vmem:[#allocation5 + $0x10] sm:$0xff] %vm4618_vm2, %v4588_v6  ;;  %v9970_v7 = vpop.permute.xlu0 %5157  ;;  %v9972_v25 = vpop.permute.xlu1 %5152  ;;  %v4430_v60 = vmul.f32 %v9511_v10, %v4238_v0 }
 0x712   : > { %v5263_v16 = vsel %vm754_vm0, %v4943_v15, %v5231_v37  ;;  %v5262_v40 = vsel %vm754_vm0, %v4942_v47, %v5230_v1  ;;  %v4241_v15 = vld [vmem:[#allocation5 + $0x38] sm:$0xff] }
 0x713   : > { %v5870_v34 = vpack.c.bf16 %v5263_v16, %v5262_v40 }
 0x715   : > { %5871 = vst [vmem:[%s9980_s11] sm:$0xff] %v5870_v34   ;;  %v4501_v52 = vpop.permute.xlu0 %4500  ;;  %v4499_v46 = vpop.permute.xlu1 %4498 }
 0x716   : > { %v4591_v54 = vadd.f32 %v4501_v52, %v4431_v22  ;;  %v4590_v17 = vadd.f32 %v4499_v46, %v4430_v60  ;;  %v4242_v52 = vld [vmem:[#allocation5 + $0x40] sm:$0xff] }
 0x717   : > { %v4753_v29 = vld [vmem:[#allocation5 + $0x18] sm:$0xff] }
 0x718   : > { %v4752_v51 = vld [vmem:[#allocation5 + $0x10] sm:$0xff]  ;;  %v4945_v26 = vmul.f32 %v9701_v3, %v4753_v29  ;;  %v5233_v43 = vmul.f32 %v5088_v61, %v4753_v29  ;;  %4624 = vst.msk [vmem:[#allocation5 + $0x28] sm:$0xff] %vm4618_vm2, %v4591_v54  ;;  %4623 = vst.msk [vmem:[#allocation5 + $0x20] sm:$0xff] %vm4618_vm2, %v4590_v17  ;;  %v4432_v3 = vmul.f32 %v9531_v27, %v4240_v8 }
 0x719   : > { %v4944_v59 = vmul.f32 %v9704_v62, %v4752_v51  ;;  %v5232_v10 = vmul.f32 %v5083_v14, %v4752_v51  ;;  %v9987_v28 = vpop.permute.xlu0 %5167  ;;  %v9989_v6 = vpop.permute.xlu1 %5162  ;;  %v4433_v62 = vmul.f32 %v9535_v18, %v4241_v15  ;;  %v4244_v15 = vld [vmem:[#allocation5 + $0x50] sm:$0xff] }
 0x71a   : > { %v5265_v12 = vsel %vm754_vm0, %v4945_v26, %v5233_v43 }
 0x71b   : > { %v5264_v5 = vsel %vm754_vm0, %v4944_v59, %v5232_v10 }
 0x71c   : > { %v5875_v37 = vpack.c.bf16 %v5265_v12, %v5264_v5 }
 0x71d   : > { %v4505_v61 = vpop.permute.xlu0 %4504  ;;  %v4503_v14 = vpop.permute.xlu1 %4502 }
 0x71e   : > { %5962 = vst [vmem:[%s9980_s11 + $0x8] sm:$0xff] %v5875_v37   ;;  %v4593_v57 = vadd.f32 %v4505_v61, %v4433_v62  ;;  %v4592_v47 = vadd.f32 %v4503_v14, %v4432_v3 }
 0x71f   : > { %v4755_v1 = vld [vmem:[#allocation5 + $0x28] sm:$0xff]  ;;  %v4754_v16 = vld [vmem:[#allocation5 + $0x20] sm:$0xff] }
 0x720   : > { %v4947_v40 = vmul.f32 %v9707_v13, %v4755_v1  ;;  %v5235_v0 = vmul.f32 %v9936_v50, %v4755_v1  ;;  %v4946_v30 = vmul.f32 %v9711_v49, %v4754_v16  ;;  %v5234_v34 = vmul.f32 %v9938_v56, %v4754_v16  ;;  %4626 = vst.msk [vmem:[#allocation5 + $0x38] sm:$0xff] %vm4618_vm2, %v4593_v57  ;;  %v4243_v13 = vld [vmem:[#allocation5 + $0x48] sm:$0xff] }
 0x721   : > { %4625 = vst.msk [vmem:[#allocation5 + $0x30] sm:$0xff] %vm4618_vm2, %v4592_v47  ;;  %v10002_v27 = vpop.permute.xlu0 %5177  ;;  %v10004_v18 = vpop.permute.xlu1 %5172  ;;  %v4434_v50 = vmul.f32 %v9548_v9, %v4242_v52  ;;  %v4435_v49 = vmul.f32 %v9553_v33, %v4243_v13 }
 0x722   : > { %v5267_v60 = vsel %vm754_vm0, %v4947_v40, %v5235_v0  ;;  %v5266_v22 = vsel %vm754_vm0, %v4946_v30, %v5234_v34  ;;  %v4246_v34 = vld [vmem:[#allocation5 + $0x60] sm:$0xff] }
 0x723   : > { %v5880_v46 = vpack.c.bf16 %v5267_v60, %v5266_v22 }
 0x725   : > { %5963 = vst [vmem:[%s9980_s11 + $0x10] sm:$0xff] %v5880_v46   ;;  %v4509_v56 = vpop.permute.xlu0 %4508  ;;  %v4507_v54 = vpop.permute.xlu1 %4506 }
 0x726   : > { %v4595_v17 = vadd.f32 %v4509_v56, %v4435_v49  ;;  %v4594_v29 = vadd.f32 %v4507_v54, %v4434_v50 }
 0x727   : > { %v4757_v51 = vld [vmem:[#allocation5 + $0x38] sm:$0xff] }
 0x728   : > { %v4756_v26 = vld [vmem:[#allocation5 + $0x30] sm:$0xff]  ;;  %v4949_v43 = vmul.f32 %v9714_v24, %v4757_v51  ;;  %v5237_v59 = vmul.f32 %v9940_v32, %v4757_v51  ;;  %4628 = vst.msk [vmem:[#allocation5 + $0x48] sm:$0xff] %vm4618_vm2, %v4595_v17  ;;  %4627 = vst.msk [vmem:[#allocation5 + $0x40] sm:$0xff] %vm4618_vm2, %v4594_v29  ;;  %v4245_v24 = vld [vmem:[#allocation5 + $0x58] sm:$0xff]  ;;  %v4436_v32 = vmul.f32 %v9564_v2, %v4244_v15 }
 0x729   : > { %v4948_v10 = vmul.f32 %v9716_v11, %v4756_v26  ;;  %v5236_v12 = vmul.f32 %v9942_v45, %v4756_v26  ;;  %v10017_v9 = vpop.permute.xlu0 %5187  ;;  %v10019_v33 = vpop.permute.xlu1 %5182  ;;  %v4437_v11 = vmul.f32 %v9570_v23, %v4245_v24  ;;  %v4248_v26 = vld [vmem:[#allocation5 + $0x70] sm:$0xff] }
 0x72a   : > { %v5269_v5 = vsel %vm754_vm0, %v4949_v43, %v5237_v59 }
 0x72b   : > { %v5268_v8 = vsel %vm754_vm0, %v4948_v10, %v5236_v12 }
 0x72c   : > { %v5885_v37 = vpack.c.bf16 %v5269_v5, %v5268_v8 }
 0x72d   : > { %v4513_v45 = vpop.permute.xlu0 %4512  ;;  %v4511_v3 = vpop.permute.xlu1 %4510 }
 0x72e   : > { %5964 = vst [vmem:[%s9980_s11 + $0x18] sm:$0xff] %v5885_v37   ;;  %v4597_v62 = vadd.f32 %v4513_v45, %v4437_v11  ;;  %v4596_v61 = vadd.f32 %v4511_v3, %v4436_v32  ;;  %v10755_v37 = vld [vmem:[#allocation29_spill] sm:$0xff] }
 0x72f   : > { %v4759_v14 = vld [vmem:[#allocation5 + $0x48] sm:$0xff]  ;;  %v4758_v57 = vld [vmem:[#allocation5 + $0x40] sm:$0xff] }
 0x730   : > { %v4951_v47 = vmul.f32 %v9718_v41, %v4759_v14  ;;  %v5239_v1 = vmul.f32 %v9944_v21, %v4759_v14  ;;  %v4950_v16 = vmul.f32 %v9720_v4, %v4758_v57  ;;  %v5238_v40 = vmul.f32 %v9946_v58, %v4758_v57  ;;  %4630 = vst.msk [vmem:[#allocation5 + $0x58] sm:$0xff] %vm4618_vm2, %v4597_v62  ;;  %v4247_v41 = vld [vmem:[#allocation5 + $0x68] sm:$0xff]  ;;  %v4250_v62 = vld [vmem:[#allocation5 + $0x80] sm:$0xff]  ;;  %v10757_v57 = vld [vmem:[#allocation93_spill] sm:$0xff] }
 0x731   : > { %4629 = vst.msk [vmem:[#allocation5 + $0x50] sm:$0xff] %vm4618_vm2, %v4596_v61  ;;  %v10032_v2 = vpop.permute.xlu0 %5197  ;;  %v10034_v23 = vpop.permute.xlu1 %5192  ;;  %v4438_v21 = vmul.f32 %v9582_v35, %v4246_v34  ;;  %v4439_v4 = vmul.f32 %v9589_v55, %v4247_v41  ;;  %v10758_v34 = vld [vmem:[#allocation87_spill] sm:$0xff] }
 0x732   : > { %v5271_v0 = vsel %vm754_vm0, %v4951_v47, %v5239_v1  ;;  %v5270_v30 = vsel %vm754_vm0, %v4950_v16, %v5238_v40  ;;  %v4252_v16 = vld [vmem:[#allocation5 + $0x90] sm:$0xff]  ;;  %v4253_v40 = vld [vmem:[#allocation5 + $0x98] sm:$0xff] }
 0x733   : > { %v5890_v60 = vpack.c.bf16 %v5271_v0, %v5270_v30  ;;  %v4444_v41 = vmul.f32 %v10758_v34, %v4252_v16  ;;  %v4259_v16 = vld [vmem:[#allocation5 + $0xc8] sm:$0xff] }
 0x735   : > { %5965 = vst [vmem:[%s9980_s11 + $0x20] sm:$0xff] %v5890_v60   ;;  %v4517_v58 = vpop.permute.xlu0 %4516  ;;  %v4515_v22 = vpop.permute.xlu1 %4514  ;;  %v10759_v60 = vld [vmem:[#allocation28_spill] sm:$0xff] }
 0x736   : > { %v4599_v52 = vadd.f32 %v4517_v58, %v4439_v4  ;;  %v4598_v13 = vadd.f32 %v4515_v22, %v4438_v21  ;;  %v4445_v21 = vmul.f32 %v10759_v60, %v4253_v40  ;;  %v10760_v22 = vld [vmem:[#allocation36_spill] sm:$0xff]  ;;  %v10769_v60 = vld [vmem:[#allocation33_spill] sm:$0xff] }
 0x737   : > { %v4761_v46 = vld [vmem:[#allocation5 + $0x58] sm:$0xff] }
 0x738   : > { %v4760_v50 = vld [vmem:[#allocation5 + $0x50] sm:$0xff]  ;;  %v4953_v49 = vmul.f32 %v9722_v44, %v4761_v46  ;;  %v5241_v56 = vmul.f32 %v9948_v53, %v4761_v46  ;;  %4632 = vst.msk [vmem:[#allocation5 + $0x68] sm:$0xff] %vm4618_vm2, %v4599_v52  ;;  %4631 = vst.msk [vmem:[#allocation5 + $0x60] sm:$0xff] %vm4618_vm2, %v4598_v13  ;;  %v4249_v44 = vld [vmem:[#allocation5 + $0x78] sm:$0xff]  ;;  %v4440_v53 = vmul.f32 %v9598_v20, %v4248_v26 }
 0x739   : > { %v4952_v54 = vmul.f32 %v9724_v19, %v4760_v50  ;;  %v5240_v17 = vmul.f32 %v9950_v42, %v4760_v50  ;;  %v10047_v35 = vpop.permute.xlu0 %5207  ;;  %v10049_v55 = vpop.permute.xlu1 %5202  ;;  %v4441_v19 = vmul.f32 %v9602_v38, %v4249_v44  ;;  %v10761_v46 = vld [vmem:[#allocation34_spill] sm:$0xff]  ;;  %v4254_v44 = vld [vmem:[#allocation5 + $0xa0] sm:$0xff] }
 0x73a   : > { %v5273_v29 = vsel %vm754_vm0, %v4953_v49, %v5241_v56 }
 0x73b   : > { %v5272_v51 = vsel %vm754_vm0, %v4952_v54, %v5240_v17 }
 0x73c   : > { %v5895_v43 = vpack.c.bf16 %v5273_v29, %v5272_v51 }
 0x73d   : > { %v4521_v42 = vpop.permute.xlu0 %4520  ;;  %v4519_v59 = vpop.permute.xlu1 %4518 }
 0x73e   : > { %5966 = vst [vmem:[%s9980_s11 + $0x28] sm:$0xff] %v5895_v43   ;;  %v4601_v10 = vadd.f32 %v4521_v42, %v4441_v19  ;;  %v4600_v12 = vadd.f32 %v4519_v59, %v4440_v53  ;;  %v4255_v43 = vld [vmem:[#allocation5 + $0xa8] sm:$0xff]  ;;  %v10762_v53 = vld [vmem:[#allocation95_spill] sm:$0xff] }
 0x73f   : > { %v4763_v5 = vld [vmem:[#allocation5 + $0x68] sm:$0xff]  ;;  %v4762_v8 = vld [vmem:[#allocation5 + $0x60] sm:$0xff]  ;;  %v4446_v19 = vmul.f32 %v10762_v53, %v4254_v44 }
 0x740   : > { %v4955_v15 = vmul.f32 %v9726_v63, %v4763_v5  ;;  %v5243_v24 = vmul.f32 %v9952_v36, %v4763_v5  ;;  %v4954_v32 = vmul.f32 %v10755_v37, %v4762_v8  ;;  %v5242_v11 = vmul.f32 %v9954_v48, %v4762_v8  ;;  %4634 = vst.msk [vmem:[#allocation5 + $0x78] sm:$0xff] %vm4618_vm2, %v4601_v10  ;;  %v4251_v63 = vld [vmem:[#allocation5 + $0x88] sm:$0xff]  ;;  %v10756_v36 = vld [vmem:[#allocation30_spill] sm:$0xff] }
 0x741   : > { %4633 = vst.msk [vmem:[#allocation5 + $0x70] sm:$0xff] %vm4618_vm2, %v4600_v12  ;;  %v10062_v20 = vpop.permute.xlu0 %5217  ;;  %v10064_v38 = vpop.permute.xlu1 %5212  ;;  %v4442_v14 = vmul.f32 %v10756_v36, %v4250_v62  ;;  %v4443_v47 = vmul.f32 %v10757_v57, %v4251_v63  ;;  %v10763_v42 = vld [vmem:[#allocation92_spill] sm:$0xff]  ;;  %v4256_v12 = vld [vmem:[#allocation5 + $0xb0] sm:$0xff]  ;;  %v4257_v5 = vld [vmem:[#allocation5 + $0xb8] sm:$0xff] }
 0x742   : > { %v5275_v45 = vsel %vm754_vm0, %v4955_v15, %v5243_v24  ;;  %v5274_v3 = vsel %vm754_vm0, %v4954_v32, %v5242_v11  ;;  %v10764_v24 = vld [vmem:[#allocation86_spill] sm:$0xff]  ;;  %v10765_v32 = vld [vmem:[#allocation32_spill] sm:$0xff]  ;;  %v10766_v62 = vld [vmem:[#allocation39_spill] sm:$0xff] }
 0x743   : > { %v5900_v61 = vpack.c.bf16 %v5275_v45, %v5274_v3  ;;  %v4448_v37 = vmul.f32 %v10764_v24, %v4256_v12  ;;  %v4449_v11 = vmul.f32 %v10765_v32, %v4257_v5  ;;  %v10767_v36 = vld [vmem:[#allocation40_spill] sm:$0xff]  ;;  %v10775_v5 = vld [vmem:[#allocation37_spill] sm:$0xff]  ;;  %v4262_v32 = vld [vmem:[#allocation5 + $0xe0] sm:$0xff] }
 0x744   : > { %v10773_v53 = vld [vmem:[#allocation96_spill] sm:$0xff] }
 0x745   : > { %5967 = vst [vmem:[%s9980_s11 + $0x30] sm:$0xff] %v5900_v61   ;;  %v4525_v48 = vpop.permute.xlu0 %4524  ;;  %v4523_v1 = vpop.permute.xlu1 %4522 }
 0x746   : > { %v4603_v0 = vadd.f32 %v4525_v48, %v4443_v47  ;;  %v4602_v30 = vadd.f32 %v4523_v1, %v4442_v14  ;;  %v4258_v1 = vld [vmem:[#allocation5 + $0xc0] sm:$0xff] }
 0x747   : > { %v4765_v4 = vld [vmem:[#allocation5 + $0x78] sm:$0xff] }
 0x748   : > { %v4764_v58 = vld [vmem:[#allocation5 + $0x70] sm:$0xff]  ;;  %v4957_v52 = vmul.f32 %v10760_v22, %v4765_v4  ;;  %v5245_v13 = vmul.f32 %v9960_v31, %v4765_v4  ;;  %4636 = vst.msk [vmem:[#allocation5 + $0x88] sm:$0xff] %vm4618_vm2, %v4603_v0  ;;  %4635 = vst.msk [vmem:[#allocation5 + $0x80] sm:$0xff] %vm4618_vm2, %v4602_v30  ;;  %v10770_v22 = vld [vmem:[#allocation88_spill] sm:$0xff] }
 0x749   : > { %v4956_v50 = vmul.f32 %v10761_v46, %v4764_v58  ;;  %v5244_v49 = vmul.f32 %v9962_v39, %v4764_v58  ;;  %v4529_v56 = vpop.permute.xlu0 %4528  ;;  %v4527_v54 = vpop.permute.xlu1 %4526  ;;  %v4447_v39 = vmul.f32 %v10763_v42, %v4255_v43  ;;  %v10771_v46 = vld [vmem:[#allocation89_spill] sm:$0xff]  ;;  %v10772_v43 = vld [vmem:[#allocation35_spill] sm:$0xff] }
 0x74a   : > { %v5277_v17 = vsel %vm754_vm0, %v4957_v52, %v5245_v13  ;;  %v4605_v51 = vadd.f32 %v4529_v56, %v4445_v21  ;;  %v4604_v26 = vadd.f32 %v4527_v54, %v4444_v41  ;;  %v4451_v21 = vmul.f32 %v10769_v60, %v4259_v16  ;;  %v4265_v60 = vld [vmem:[#allocation5 + $0xf8] sm:$0xff] }
 0x74b   : > { %v5276_v29 = vsel %vm754_vm0, %v4956_v50, %v5244_v49 }
 0x74c   : > { %v5905_v31 = vpack.c.bf16 %v5277_v17, %v5276_v29  ;;  %4638 = vst.msk [vmem:[#allocation5 + $0x98] sm:$0xff] %vm4618_vm2, %v4605_v51  ;;  %4637 = vst.msk [vmem:[#allocation5 + $0x90] sm:$0xff] %vm4618_vm2, %v4604_v26  ;;  %v4260_v17 = vld [vmem:[#allocation5 + $0xd0] sm:$0xff]  ;;  %v4261_v29 = vld [vmem:[#allocation5 + $0xd8] sm:$0xff] }
 0x74d   : > { %v4533_v59 = vpop.permute.xlu0 %4532  ;;  %v4531_v10 = vpop.permute.xlu1 %4530 }
 0x74e   : > { %5968 = vst [vmem:[%s9980_s11 + $0x38] sm:$0xff] %v5905_v31   ;;  %v4607_v8 = vadd.f32 %v4533_v59, %v4447_v39  ;;  %v4606_v15 = vadd.f32 %v4531_v10, %v4446_v19  ;;  %v4452_v31 = vmul.f32 %v10772_v43, %v4260_v17  ;;  %v10774_v59 = vld [vmem:[#allocation90_spill] sm:$0xff]  ;;  %v10783_v17 = vld [vmem:[#allocation41_spill] sm:$0xff] }
 0x74f   : > { %v4767_v45 = vld [vmem:[#allocation5 + $0x88] sm:$0xff]  ;;  %v4766_v3 = vld [vmem:[#allocation5 + $0x80] sm:$0xff] }
 0x750   : > { %v4959_v63 = vmul.f32 %v10766_v62, %v4767_v45  ;;  %v5247_v61 = vmul.f32 %v9970_v7, %v4767_v45  ;;  %v4958_v14 = vmul.f32 %v10767_v36, %v4766_v3  ;;  %v5246_v57 = vmul.f32 %v9972_v25, %v4766_v3  ;;  %4640 = vst.msk [vmem:[#allocation5 + $0xa8] sm:$0xff] %vm4618_vm2, %v4607_v8  ;;  %v10768_v7 = vld [vmem:[#allocation94_spill] sm:$0xff]  ;;  %v10777_v36 = vld [vmem:[#allocation52_spill] sm:$0xff] }
 0x751   : > { %4639 = vst.msk [vmem:[#allocation5 + $0xa0] sm:$0xff] %vm4618_vm2, %v4606_v15  ;;  %v4537_v47 = vpop.permute.xlu0 %4536  ;;  %v4535_v48 = vpop.permute.xlu1 %4534  ;;  %v4450_v41 = vmul.f32 %v10768_v7, %v4258_v1 }
 0x752   : > { %v5279_v40 = vsel %vm754_vm0, %v4959_v63, %v5247_v61  ;;  %v5278_v0 = vsel %vm754_vm0, %v4958_v14, %v5246_v57  ;;  %v4609_v30 = vadd.f32 %v4537_v47, %v4449_v11  ;;  %v4608_v34 = vadd.f32 %v4535_v48, %v4448_v37  ;;  %v4263_v11 = vld [vmem:[#allocation5 + $0xe8] sm:$0xff]  ;;  %v10776_v63 = vld [vmem:[#allocation49_spill] sm:$0xff]  ;;  %v10778_v48 = vld [vmem:[#allocation38_spill] sm:$0xff] }
 0x753   : > { %v5910_v25 = vpack.c.bf16 %v5279_v40, %v5278_v0  ;;  %v4769_v4 = vld [vmem:[#allocation5 + $0x98] sm:$0xff]  ;;  %v4768_v58 = vld [vmem:[#allocation5 + $0x90] sm:$0xff]  ;;  %v4454_v61 = vmul.f32 %v10776_v63, %v4262_v32  ;;  %v10779_v40 = vld [vmem:[#allocation43_spill] sm:$0xff] }
 0x754   : > { %v4961_v52 = vmul.f32 %v10770_v22, %v4769_v4  ;;  %v5249_v13 = vmul.f32 %v9987_v28, %v4769_v4  ;;  %v4960_v50 = vmul.f32 %v10771_v46, %v4768_v58  ;;  %v5248_v49 = vmul.f32 %v9989_v6, %v4768_v58  ;;  %4642 = vst.msk [vmem:[#allocation5 + $0xb8] sm:$0xff] %vm4618_vm2, %v4609_v30  ;;  %v10780_v58 = vld [vmem:[#allocation55_spill] sm:$0xff] }
 0x755   : > { %4641 = vst.msk [vmem:[#allocation5 + $0xb0] sm:$0xff] %vm4618_vm2, %v4608_v34  ;;  %5969 = vst [vmem:[%s9980_s11 + $0x40] sm:$0xff] %v5910_v25   ;;  %v4541_v56 = vpop.permute.xlu0 %4540  ;;  %v4539_v54 = vpop.permute.xlu1 %4538  ;;  %v4453_v6 = vmul.f32 %v10773_v53, %v4261_v29 }
 0x756   : > { %v5281_v51 = vsel %vm754_vm0, %v4961_v52, %v5249_v13  ;;  %v5280_v26 = vsel %vm754_vm0, %v4960_v50, %v5248_v49  ;;  %v4611_v44 = vadd.f32 %v4541_v56, %v4451_v21  ;;  %v4610_v28 = vadd.f32 %v4539_v54, %v4450_v41  ;;  %v4264_v41 = vld [vmem:[#allocation5 + $0xf0] sm:$0xff]  ;;  %v10781_v52 = vld [vmem:[#allocation50_spill] sm:$0xff]  ;;  %v10782_v49 = vld [vmem:[#allocation44_spill] sm:$0xff] }
 0x757   : > { %v5915_v19 = vpack.c.bf16 %v5281_v51, %v5280_v26  ;;  %v4771_v42 = vld [vmem:[#allocation5 + $0xa8] sm:$0xff]  ;;  %v4456_v22 = vmul.f32 %v10780_v58, %v4264_v41 }
 0x758   : > { %v4770_v39 = vld [vmem:[#allocation5 + $0xa0] sm:$0xff]  ;;  %v4963_v10 = vmul.f32 %v10774_v59, %v4771_v42  ;;  %v5251_v12 = vmul.f32 %v10002_v27, %v4771_v42  ;;  %4644 = vst.msk [vmem:[#allocation5 + $0xc8] sm:$0xff] %vm4618_vm2, %v4611_v44  ;;  %4643 = vst.msk [vmem:[#allocation5 + $0xc0] sm:$0xff] %vm4618_vm2, %v4610_v28  ;;  %v10785_v42 = vld [vmem:[#allocation42_spill] sm:$0xff] }
 0x759   : > { %v4962_v8 = vmul.f32 %v10775_v5, %v4770_v39  ;;  %v5250_v15 = vmul.f32 %v10004_v18, %v4770_v39  ;;  %5970 = vst [vmem:[%s9980_s11 + $0x48] sm:$0xff] %v5915_v19   ;;  %v4545_v24 = vpop.permute.xlu0 %4544  ;;  %v4543_v37 = vpop.permute.xlu1 %4542  ;;  %v4455_v18 = vmul.f32 %v10777_v36, %v4263_v11  ;;  %v10786_v59 = vld [vmem:[#allocation47_spill] sm:$0xff] }
 0x75a   : > { %v5283_v45 = vsel %vm754_vm0, %v4963_v10, %v5251_v12  ;;  %v4613_v62 = vadd.f32 %v4545_v24, %v4453_v6  ;;  %v4612_v27 = vadd.f32 %v4543_v37, %v4452_v31  ;;  %v10788_v37 = vld [vmem:[#allocation48_spill] sm:$0xff] }
 0x75b   : > { %v5282_v3 = vsel %vm754_vm0, %v4962_v8, %v5250_v15  ;;  %v4773_v57 = vld [vmem:[#allocation5 + $0xb8] sm:$0xff] }
 0x75c   : > { %v5920_v14 = vpack.c.bf16 %v5283_v45, %v5282_v3  ;;  %v4772_v47 = vld [vmem:[#allocation5 + $0xb0] sm:$0xff]  ;;  %v4965_v1 = vmul.f32 %v10778_v48, %v4773_v57  ;;  %v5253_v16 = vmul.f32 %v10017_v9, %v4773_v57  ;;  %4646 = vst.msk [vmem:[#allocation5 + $0xd8] sm:$0xff] %vm4618_vm2, %v4613_v62  ;;  %4645 = vst.msk [vmem:[#allocation5 + $0xd0] sm:$0xff] %vm4618_vm2, %v4612_v27 }
 0x75d   : > { %v4964_v0 = vmul.f32 %v10779_v40, %v4772_v47  ;;  %v5252_v30 = vmul.f32 %v10019_v33, %v4772_v47  ;;  %v4549_v34 = vpop.permute.xlu0 %4548  ;;  %v4547_v7 = vpop.permute.xlu1 %4546  ;;  %v4457_v33 = vmul.f32 %v10781_v52, %v4265_v60  ;;  %v10789_v45 = vld [vmem:[#allocation45_spill] sm:$0xff]  ;;  %v10791_v47 = vld [vmem:[#allocation51_spill] sm:$0xff] }
 0x75e   : > { %5971 = vst [vmem:[%s9980_s11 + $0x50] sm:$0xff] %v5920_v14   ;;  %v5285_v21 = vsel %vm754_vm0, %v4965_v1, %v5253_v16  ;;  %v4615_v4 = vadd.f32 %v4549_v34, %v4455_v18  ;;  %v4614_v9 = vadd.f32 %v4547_v7, %v4454_v61 }
 0x75f   : > { %v5284_v25 = vsel %vm754_vm0, %v4964_v0, %v5252_v30  ;;  %v4775_v46 = vld [vmem:[#allocation5 + $0xc8] sm:$0xff]  ;;  %v4774_v50 = vld [vmem:[#allocation5 + $0xc0] sm:$0xff] }
 0x760   : > { %v5925_v13 = vpack.c.bf16 %v5285_v21, %v5284_v25  ;;  %v4967_v56 = vmul.f32 %v10782_v49, %v4775_v46  ;;  %v5255_v54 = vmul.f32 %v10032_v2, %v4775_v46  ;;  %v4966_v29 = vmul.f32 %v10783_v17, %v4774_v50  ;;  %4648 = vst.msk [vmem:[#allocation5 + $0xe8] sm:$0xff] %vm4618_vm2, %v4615_v4 }
 0x761   : > { %v5254_v51 = vmul.f32 %v10034_v23, %v4774_v50  ;;  %4647 = vst.msk [vmem:[#allocation5 + $0xe0] sm:$0xff] %vm4618_vm2, %v4614_v9  ;;  %v4553_v26 = vpop.permute.xlu0 %4552  ;;  %v4551_v44 = vpop.permute.xlu1 %4550 }
 0x762   : > { %5972 = vst [vmem:[%s9980_s11 + $0x58] sm:$0xff] %v5925_v13   ;;  %v5287_v28 = vsel %vm754_vm0, %v4967_v56, %v5255_v54  ;;  %v4617_v31 = vadd.f32 %v4553_v26, %v4457_v33  ;;  %v4616_v53 = vadd.f32 %v4551_v44, %v4456_v22 }
 0x763   : > { %v5286_v43 = vsel %vm754_vm0, %v4966_v29, %v5254_v51  ;;  %v4777_v6 = vld [vmem:[#allocation5 + $0xd8] sm:$0xff]  ;;  %v4776_v19 = vld [vmem:[#allocation5 + $0xd0] sm:$0xff] }
 0x764   : > { %v5930_v2 = vpack.c.bf16 %v5287_v28, %v5286_v43  ;;  %v4969_v23 = vmul.f32 %v10785_v42, %v4777_v6  ;;  %v5257_v39 = vmul.f32 %v10047_v35, %v4777_v6  ;;  %v4968_v10 = vmul.f32 %v10786_v59, %v4776_v19  ;;  %4650 = vst.msk [vmem:[#allocation5 + $0xf8] sm:$0xff] %vm4618_vm2, %v4617_v31 }
 0x765   : > { %v5256_v12 = vmul.f32 %v10049_v55, %v4776_v19  ;;  %4649 = vst.msk [vmem:[#allocation5 + $0xf0] sm:$0xff] %vm4618_vm2, %v4616_v53  ;;  %v5228_v36 = vpop.permute.xlu0 %5227  ;;  %v5223_v14 = vpop.permute.xlu1 %5222 }
 0x766   : > { %5973 = vst [vmem:[%s9980_s11 + $0x60] sm:$0xff] %v5930_v2   ;;  %v5289_v5 = vsel %vm754_vm0, %v4969_v23, %v5257_v39 }
 0x767   : > { %v5288_v8 = vsel %vm754_vm0, %v4968_v10, %v5256_v12  ;;  %v4779_v24 = vld [vmem:[#allocation5 + $0xe8] sm:$0xff] }
 0x768   : > { %v5935_v15 = vpack.c.bf16 %v5289_v5, %v5288_v8  ;;  %v4778_v35 = vld [vmem:[#allocation5 + $0xe0] sm:$0xff]  ;;  %v4971_v32 = vmul.f32 %v10788_v37, %v4779_v24  ;;  %v5259_v11 = vmul.f32 %v10062_v20, %v4779_v24  ;;  %v10790_v20 = vld [vmem:[#allocation46_spill] sm:$0xff] }
 0x769   : > { %v4970_v55 = vmul.f32 %v10789_v45, %v4778_v35  ;;  %v5258_v3 = vmul.f32 %v10064_v38, %v4778_v35 }
 0x76a   : > { %5974 = vst [vmem:[%s9980_s11 + $0x68] sm:$0xff] %v5935_v15   ;;  %v5291_v62 = vsel %vm754_vm0, %v4971_v32, %v5259_v11 }
 0x76b   : > { %v5290_v27 = vsel %vm754_vm0, %v4970_v55, %v5258_v3  ;;  %v4781_v61 = vld [vmem:[#allocation5 + $0xf8] sm:$0xff] }
 0x76c   : > { %v5940_v63 = vpack.c.bf16 %v5291_v62, %v5290_v27  ;;  %v4780_v18 = vld [vmem:[#allocation5 + $0xf0] sm:$0xff]  ;;  %v4973_v57 = vmul.f32 %v10790_v20, %v4781_v61  ;;  %v5261_v38 = vmul.f32 %v5228_v36, %v4781_v61 }
 0x76d   : > { %v4972_v48 = vmul.f32 %v10791_v47, %v4780_v18  ;;  %v5260_v1 = vmul.f32 %v5223_v14, %v4780_v18 }
 0x76e   : > { %5975 = vst [vmem:[%s9980_s11 + $0x70] sm:$0xff] %v5940_v63   ;;  %v5293_v16 = vsel %vm754_vm0, %v4973_v57, %v5261_v38 }
 0x76f   : > { %v5292_v40 = vsel %vm754_vm0, %v4972_v48, %v5260_v1 }
 0x770   : > { %v5945_v0 = vpack.c.bf16 %v5293_v16, %v5292_v40 }
 0x772   : > { %5976 = vst [vmem:[%s9980_s11 + $0x78] sm:$0xff] %v5945_v0  }
 0x773   : > { %7159 = shalt.err (!%p7156_p6)
}
 0x774   : > { %s7160_s23 = scalar_lea.hbm %s10167_s4, 2048  ;;  %s7164_s0 = scalar_lea.hbm %s10792_s29, 8192 }
 0x775   : > { %p7161_p4 = scmp.ne.s32.totalorder %s10167_s4, %s7160_s23  ;;  %p7165_p13 = scmp.lt.u32.totalorder %s10167_s4, %s10792_s29 }
 0x776   : > { %p7166_p0 = scmp.lt.u32.totalorder %s7164_s0, %s7160_s23  ;;  %p7168_p11 = scmp.lt.u32.totalorder %s7160_s23, %s10167_s4 }
 0x777   : > { %p7162_p2 = pnand %p7161_p4, %p10793_p5 }
 0x778   : > { %p7167_p10 = por %p7166_p0, %p7165_p13 }
 0x779   : > { %p7163_p9 = pneg %p7162_p2 }
 0x77a   : > { %p7169_p8 = por %p7168_p11, %p7167_p10 }
 0x77c   : > { %p7170_p1 = pnand %p7169_p8, %p7163_p9 }
 0x77e   : > { %7173 = shalt.err (!%p7170_p1)
}
 0x77f   : > { %s7313_s6 = smov 128   ;;  %s7314_s9 = smov 4  }
 0x780   : > { %6336 = dma.vmem_to_hbm [thread:$0]  (%p10793_p5), %s10169_s1, 2048, %s10167_s4, %s5455_s3, %s7311_s26, %s7313_s6, %s7314_s9  }
 0x781 PF: > { %p6353_p3 = scmp.ge.s32.totalorder %s7300_s25, 2  ;;  %s5487_s12 = sand.u32 1, %s7272_s18  }
 0x782   : > { %p10794_p12 = scmp.ne.s32.totalorder %s10427_s22, 0  ;;  %s5488_s16 = scalar_lea.sflag [#allocation8], %s5487_s12 }
 0x784   : > { %p6349_p7 = pnand %p6353_p3, %p10794_p12 }
 0x786   : > { %7243 = dma.done.wait (!%p6349_p7), %s5488_s16, 2048  }
 0x787   : > { %7245 = vsyncadd (!%p6349_p7), %s5488_s16, 4294965248  ;;  %s22_s25 = sadd.s32 1, %s7300_s25   ;;  %s10796_s15 = sld [smem:[#allocation17_spill]] }
 0x788   : > { %p10202_p6 = scmp.ge.s32.totalorder %s22_s25, 6   ;;  %s10797_s7 = sld [smem:[#allocation18_spill]] }
 0x789   : > { %s10798_s20 = sld [smem:[#allocation26_spill]]  ;;  %s10799_s21 = sld [smem:[#allocation21_spill]] }
 0x78a   : > { %s10800_s22 = sld [smem:[#allocation22_spill]]  ;;  %s10801_s23 = sld [smem:[#allocation23_spill]] }
 0x78b   : > { %s10802_s24 = sld [smem:[#allocation24_spill]]  ;;  %s10803_s12 = smov %s7252_s13 }
 0x78c   : > { %s10804_s13 = smov %s7256_s14  ;;  %s10805_s14 = smov %s7599_s5 }
 0x78d   : > { %s10806_s16 = smov %s7268_s17  ;;  %s10807_s17 = smov %s7444_s30 }
 0x78e   : > { %s10808_s18 = smov %s7276_s19  ;;  %s10809_s19 = smov %s10797_s7 }
 0x78f   :  { %21 = sbr.rel (!%p10202_p6) target bundleno = 16 (0x10), region = 111 }
 0x796   :  { %5493 = vsyncpa [#allocation7], 1 }
 0x797   :  { %5495 = vsyncpa [#allocation7 + $0x1], 1 }
 0x798   :  { %5496 = vsyncpa [#allocation10], 1 }
 0x799   :  { %5498 = vsyncpa [#allocation10 + $0x1], 1 }
 0x79a   :  { %5499 = vsyncpa [#allocation8], 1 }
 0x79b   :  { %5501 = vsyncpa [#allocation8 + $0x1], 1 }

</bundles_post_ra>
